<compile_context>
chip_gen: v7x
topology: tpu7x:2x2x1
jax: 0.10.0
libtpu: 0.0.40
codegen_flags: <defaults>
</compile_context>

<pallas_src>
import functools

import jax
import jax.numpy as jnp
from jax.experimental import pallas as pl
from jax.experimental.pallas import tpu as pltpu

WIN = 9                  # nas_ncc window (win = [9, 9, 9])
PAD = WIN // 2           # conv3d padding = 4
WIN_SIZE = float(WIN ** 3)
HYPER_1 = 10.0           # weight on ncc inside warp_loss
HYPER_2 = 15.0           # weight on grad inside warp_loss
HYPER_3 = 10.0           # weight on mse
_LANES = 128             # lane-dense scalar-accumulator width


def _band(n):
    # Band[j, i] = 1 iff |i - j| <= PAD  ==  1-D conv with ones(9), stride 1,
    # zero padding 4 (boundary zeros are implied by the band limits).
    r = jax.lax.broadcasted_iota(jnp.int32, (n, n), 0)
    c = jax.lax.broadcasted_iota(jnp.int32, (n, n), 1)
    return (jnp.abs(r - c) <= PAD).astype(jnp.float32)


def _make_ncc_mse_kernel(slab, d_valid):
    """Per-(batch, slab) NCC cc-sum and MSE-sum, accumulated over the slab axis."""

    def kernel(band_w_ref, band_h_ref, tgt_ref, wsrc_ref, inten_ref,
               cc_ref, mse_ref):
        si = pl.program_id(1)

        @pl.when(si == 0)
        def _init():
            cc_ref[...] = jnp.zeros_like(cc_ref)
            mse_ref[...] = jnp.zeros_like(mse_ref)

        I = tgt_ref[0, 0]              # (slab + 2*PAD, h, w), halo rows are zeros
        J = wsrc_ref[0, 0]
        _, h, w = I.shape

        # ---- D window sum first (on the raw channel data, halo comes from the
        #      overlapped input block -> no scratch buffer, no extra store) ----
        def dbox(x):
            s = x[0:slab]
            for j in range(1, WIN):    # 8 leading-dim shifted adds (free offsets)
                s = s + x[j:j + slab]
            return s                   # (slab, h, w)

        # Stack the five window-sum operands so the W/H band matmuls and the single
        # minor-dim swap run once per grid step instead of five times.
        S = jnp.concatenate(
            [dbox(I), dbox(J), dbox(I * I), dbox(J * J), dbox(I * J)],
            axis=0)                    # (5*slab, h, w)

        # ---- W and H window sums as banded all-ones matmuls on the MXU ----
        yw = jnp.dot(S.reshape(5 * slab * h, w), band_w_ref[...],
                     preferred_element_type=jnp.float32).reshape(5 * slab, h, w)
        yt = jnp.swapaxes(yw, 1, 2)    # one minor-dim swap per grid step (was 5x)
        z = jnp.dot(yt.reshape(5 * slab * w, h), band_h_ref[...],
                    preferred_element_type=jnp.float32).reshape(5, slab, w, h)

        i_sum, j_sum, i2_sum, j2_sum, ij_sum = z[0], z[1], z[2], z[3], z[4]

        inv_win = 1.0 / WIN_SIZE
        u_i = i_sum * inv_win
        u_j = j_sum * inv_win
        cross = ij_sum - u_j * i_sum - u_i * j_sum + u_i * u_j * WIN_SIZE
        i_var = i2_sum - 2.0 * u_i * i_sum + u_i * u_i * WIN_SIZE
        j_var = j2_sum - 2.0 * u_j * j_sum + u_j * u_j * WIN_SIZE
        cc = cross * cross / (i_var * j_var + 1e-5)   # exact division (reference parity)

        # Mask D rows that only exist because d was padded up to a slab multiple.
        if d_valid % slab != 0:
            rows = jax.lax.broadcasted_iota(jnp.int32, cc.shape, 0)
            cc = jnp.where((si * slab + rows) < d_valid, cc, 0.0)

        cc_ref[...] += jnp.sum(cc)

        # MSE(tgt, intensity) on this slab: interior rows of the halo'd tgt block
        # are exactly the slab rows, so tgt is read from HBM only once.
        diff = I[PAD:PAD + slab] - inten_ref[0]
        mse_ref[...] += jnp.sum(diff * diff)

    return kernel


def _ncc_mse_sums_pallas(tgt3, wsrc3, inten3, slab_d):
    """Per-batch (cc_sum, mse_sum) via a (batch, d_slab) grid."""
    b, d, h, w = tgt3.shape
    slab = min(slab_d, d)
    n_slabs = (d + slab - 1) // slab
    d_ceil = n_slabs * slab
    dz = slab + 2 * PAD

    def halo_slabs(vol):
        # Overlapped slab tensor: slab s holds rows [s*slab - PAD, s*slab + slab + PAD)
        # of the original volume, with zeros outside -> matches conv3d zero padding.
        pz = jnp.pad(vol, ((0, 0), (PAD, PAD + d_ceil - d), (0, 0), (0, 0)))
        return jnp.stack([pz[:, s * slab:s * slab + dz] for s in range(n_slabs)],
                         axis=1)                       # (b, n_slabs, dz, h, w)

    tgt_ov = halo_slabs(tgt3)
    wsrc_ov = halo_slabs(wsrc3)
    inten_p = jnp.pad(inten3, ((0, 0), (0, d_ceil - d), (0, 0), (0, 0)))

    band_w = _band(w)
    band_h = _band(h)

    vol_ov_spec = pl.BlockSpec((1, 1, dz, h, w), lambda bi, si: (bi, si, 0, 0, 0))
    inten_spec = pl.BlockSpec((1, slab, h, w), lambda bi, si: (bi, si, 0, 0))
    band_w_spec = pl.BlockSpec((w, w), lambda bi, si: (0, 0))   # resident across grid
    band_h_spec = pl.BlockSpec((h, h), lambda bi, si: (0, 0))
    out_spec = pl.BlockSpec((1, 1, _LANES), lambda bi, si: (bi, 0, 0))

    # VMEM budget derived from the slab size: double-buffered inputs + a generous
    # allowance for the stacked box-filter intermediates, clamped to sane bounds.
    f32b = 4
    step_bytes = f32b * h * w * (2 * (2 * dz + slab) + 7 * dz + 32 * slab) \
        + 2 * f32b * (h * h + w * w)
    vmem_limit = int(min(112 << 20, max(step_bytes + (4 << 20), 32 << 20)))

    kernel = _make_ncc_mse_kernel(slab, d)

    cc_sum, mse_sum = pl.pallas_call(
        kernel,
        out_shape=(jax.ShapeDtypeStruct((b, 1, _LANES), jnp.float32),
                   jax.ShapeDtypeStruct((b, 1, _LANES), jnp.float32)),
        grid=(b, n_slabs),
        in_specs=[band_w_spec, band_h_spec, vol_ov_spec, vol_ov_spec, inten_spec],
        out_specs=(out_spec, out_spec),
        compiler_params=pltpu.CompilerParams(
            dimension_semantics=("parallel", "arbitrary"),
            vmem_limit_bytes=vmem_limit),
    )(band_w, band_h, tgt_ov, wsrc_ov, inten_p)
    return cc_sum[:, 0, 0], mse_sum[:, 0, 0]


def _grad_kernel(flow_ref, g_ref):
    # gradient_loss(flow, penalty='l2'), per batch element.
    s = flow_ref[0]                                    # (c, d, h, w)
    c, d, h, w = s.shape
    dd = s[:, 1:, :, :] - s[:, :-1, :, :]
    dh = s[:, :, 1:, :] - s[:, :, :-1, :]
    dw = s[:, :, :, 1:] - s[:, :, :, :-1]
    g = (jnp.sum(dd * dd) / float(c * (d - 1) * h * w)
         + jnp.sum(dh * dh) / float(c * d * (h - 1) * w)
         + jnp.sum(dw * dw) / float(c * d * h * (w - 1))) / 3.0
    g_ref[...] = jnp.zeros_like(g_ref) + g


def _grad_loss_pallas(flow):
    b, c, d, h, w = flow.shape
    vmem_limit = int(min(112 << 20, max(4 * 4 * c * d * h * w + (4 << 20), 32 << 20)))
    g = pl.pallas_call(
        _grad_kernel,
        out_shape=jax.ShapeDtypeStruct((b, 1, _LANES), jnp.float32),
        grid=(b,),
        in_specs=[pl.BlockSpec((1, c, d, h, w), lambda bi: (bi, 0, 0, 0, 0))],
        out_specs=pl.BlockSpec((1, 1, _LANES), lambda bi: (bi, 0, 0)),
        compiler_params=pltpu.CompilerParams(
            dimension_semantics=("parallel",),
            vmem_limit_bytes=vmem_limit),
    )(flow)
    return g[:, 0, 0]


def loss_function_ncc_intensity_registration(intensity, warped_src, tgt, src, flow,
                                              *, slab_d=16):
    """Matches LossFunctionNccIntensity_Registration.forward (src is unused there)."""
    del src  # unused by the reference forward
    b, _, d, h, w = tgt.shape
    tgt3 = tgt.reshape(b, d, h, w)          # drop singleton channel (free reshape)
    wsrc3 = warped_src.reshape(b, d, h, w)
    inten3 = intensity.reshape(b, d, h, w)

    cc_sum, mse_sum = _ncc_mse_sums_pallas(tgt3, wsrc3, inten3, slab_d)
    g = _grad_loss_pallas(flow)

    n_vox = float(b * d * h * w)
    ncc = -jnp.sum(cc_sum) / n_vox                      # -mean(cc)
    grad = jnp.sum(g) / float(b)                        # gradient_loss(flow)
    mse = HYPER_3 * jnp.sum(mse_sum) / n_vox            # 10 * MSE(tgt, intensity)

    warp_loss = HYPER_1 * ncc + HYPER_2 * grad
    total_loss = warp_loss + mse
    return total_loss, warp_loss, ncc, grad, mse


if __name__ == "__main__":
    key = jax.random.PRNGKey(0)
    ks = jax.random.split(key, 5)
    B, D, H, W = 2, 16, 16, 16

    intensity = jax.random.uniform(ks[0], (B, 1, D, H, W), jnp.float32)
    warped_src = jax.random.uniform(ks[1], (B, 1, D, H, W), jnp.float32)
    tgt = jax.random.uniform(ks[2], (B, 1, D, H, W), jnp.float32)
    src = jax.random.uniform(ks[3], (B, 1, D, H, W), jnp.float32)
    flow = 0.5 * jax.random.normal(ks[4], (B, 3, D, H, W), jnp.float32)

    # slab_d=8 -> two D-slabs per batch element, exercising the slab-axis
    # init/accumulate path on the small demo volume.
    fwd = jax.jit(functools.partial(loss_function_ncc_intensity_registration, slab_d=8))
    out = fwd(intensity, warped_src, tgt, src, flow)
    out = jax.block_until_ready(out)
    total_loss, warp_loss, ncc, grad, mse = out
    print("KERNEL_OK")
</pallas_src>

<mosaic_0001>
module attributes {stable_mosaic.version = 11 : i64} {
  func.func @_grad_kernel(%arg0: i32, %arg1: memref<1x3x16x16x16xf32, #tpu.memory_space<vmem>>, %arg2: memref<1x1x128xf32, #tpu.memory_space<vmem>>) attributes {dimension_semantics = [#tpu.dimension_semantics<parallel>], iteration_bounds = array<i64: 2>, scalar_prefetch = 0 : i64, scratch_operands = 0 : i64, tpu.core_type = #tpu.core_type<tc>, window_params = [{transform_indices = @transform_0, window_bounds = array<i64: 1, 3, 16, 16, 16>}, {transform_indices = @transform_1, window_bounds = array<i64: 1, 1, 128>}]} {
    %c0 = arith.constant 0 : index
    %c0_0 = arith.constant 0 : index
    %c0_1 = arith.constant 0 : index
    %c0_2 = arith.constant 0 : index
    %c0_3 = arith.constant 0 : index
    %0 = vector.load %arg1[%c0, %c0_0, %c0_1, %c0_2, %c0_3] : memref<1x3x16x16x16xf32, #tpu.memory_space<vmem>>, vector<1x3x16x16x16xf32>
    %1 = vector.shape_cast %0 : vector<1x3x16x16x16xf32> to vector<3x16x16x16xf32>
    %2 = vector.extract_strided_slice %1 {offsets = [0, 1, 0, 0], sizes = [3, 15, 16, 16], strides = [1, 1, 1, 1]} : vector<3x16x16x16xf32> to vector<3x15x16x16xf32>
    %3 = vector.extract_strided_slice %1 {offsets = [0, 0, 0, 0], sizes = [3, 15, 16, 16], strides = [1, 1, 1, 1]} : vector<3x16x16x16xf32> to vector<3x15x16x16xf32>
    %4 = arith.subf %2, %3 : vector<3x15x16x16xf32>
    %5 = vector.extract_strided_slice %1 {offsets = [0, 0, 1, 0], sizes = [3, 16, 15, 16], strides = [1, 1, 1, 1]} : vector<3x16x16x16xf32> to vector<3x16x15x16xf32>
    %6 = vector.extract_strided_slice %1 {offsets = [0, 0, 0, 0], sizes = [3, 16, 15, 16], strides = [1, 1, 1, 1]} : vector<3x16x16x16xf32> to vector<3x16x15x16xf32>
    %7 = arith.subf %5, %6 : vector<3x16x15x16xf32>
    %8 = vector.extract_strided_slice %1 {offsets = [0, 0, 0, 1], sizes = [3, 16, 16, 15], strides = [1, 1, 1, 1]} : vector<3x16x16x16xf32> to vector<3x16x16x15xf32>
    %9 = vector.extract_strided_slice %1 {offsets = [0, 0, 0, 0], sizes = [3, 16, 16, 15], strides = [1, 1, 1, 1]} : vector<3x16x16x16xf32> to vector<3x16x16x15xf32>
    %10 = arith.subf %8, %9 : vector<3x16x16x15xf32>
    %11 = arith.mulf %4, %4 : vector<3x15x16x16xf32>
    %12 = vector.shape_cast %11 : vector<3x15x16x16xf32> to vector<1x3x15x16x16xf32>
    %cst = arith.constant dense<0.000000e+00> : vector<1xf32>
    %13 = vector.multi_reduction <add>, %12, %cst [1, 2, 3, 4] : vector<1x3x15x16x16xf32> to vector<1xf32>
    %14 = vector.shape_cast %13 : vector<1xf32> to vector<1x1x1x1x1xf32>
    %15 = vector.extract %14[0, 0, 0, 0, 0] : f32 from vector<1x1x1x1x1xf32>
    %cst_4 = arith.constant 1.152000e+04 : f32
    %16 = arith.divf %15, %cst_4 : f32
    %17 = arith.mulf %7, %7 : vector<3x16x15x16xf32>
    %18 = vector.shape_cast %17 : vector<3x16x15x16xf32> to vector<1x3x16x15x16xf32>
    %cst_5 = arith.constant dense<0.000000e+00> : vector<1xf32>
    %19 = vector.multi_reduction <add>, %18, %cst_5 [1, 2, 3, 4] : vector<1x3x16x15x16xf32> to vector<1xf32>
    %20 = vector.shape_cast %19 : vector<1xf32> to vector<1x1x1x1x1xf32>
    %21 = vector.extract %20[0, 0, 0, 0, 0] : f32 from vector<1x1x1x1x1xf32>
    %cst_6 = arith.constant 1.152000e+04 : f32
    %22 = arith.divf %21, %cst_6 : f32
    %23 = arith.addf %16, %22 : f32
    %24 = arith.mulf %10, %10 : vector<3x16x16x15xf32>
    %25 = vector.shape_cast %24 : vector<3x16x16x15xf32> to vector<1x3x16x16x15xf32>
    %cst_7 = arith.constant dense<0.000000e+00> : vector<1xf32>
    %26 = vector.multi_reduction <add>, %25, %cst_7 [1, 2, 3, 4] : vector<1x3x16x16x15xf32> to vector<1xf32>
    %27 = vector.shape_cast %26 : vector<1xf32> to vector<1x1x1x1x1xf32>
    %28 = vector.extract %27[0, 0, 0, 0, 0] : f32 from vector<1x1x1x1x1xf32>
    %cst_8 = arith.constant 1.152000e+04 : f32
    %29 = arith.divf %28, %cst_8 : f32
    %30 = arith.addf %23, %29 : f32
    %cst_9 = arith.constant 3.000000e+00 : f32
    %31 = arith.divf %30, %cst_9 : f32
    %cst_10 = arith.constant 0.000000e+00 : f32
    %32 = vector.broadcast %cst_10 : f32 to vector<1x1x128xf32>
    %33 = vector.broadcast %31 : f32 to vector<1x1x128xf32>
    %34 = arith.addf %32, %33 : vector<1x1x128xf32>
    %c0_11 = arith.constant 0 : index
    %c0_12 = arith.constant 0 : index
    %c0_13 = arith.constant 0 : index
    %35 = vector.load %arg2[%c0_11, %c0_12, %c0_13] : memref<1x1x128xf32, #tpu.memory_space<vmem>>, vector<1x1x128xf32>
    tpu.vector_store %arg2[%c0_11, %c0_12, %c0_13], %34 {strides = array<i32>} : memref<1x1x128xf32, #tpu.memory_space<vmem>>, vector<1x1x128xf32>,
    return
  }
  func.func @transform_0(%arg0: i32) -> (i32, i32, i32, i32, i32) {
    %c0_i32 = arith.constant 0 : i32
    %c0_i32_0 = arith.constant 0 : i32
    %c0_i32_1 = arith.constant 0 : i32
    %c0_i32_2 = arith.constant 0 : i32
    %c0_i32_3 = arith.constant 0 : i32
    return %arg0, %c0_i32, %c0_i32_0, %c0_i32_1, %c0_i32_2 : i32, i32, i32, i32, i32
  }
  func.func @transform_1(%arg0: i32) -> (i32, i32, i32) {
    %c0_i32 = arith.constant 0 : i32
    %c0_i32_0 = arith.constant 0 : i32
    %c0_i32_1 = arith.constant 0 : i32
    return %arg0, %c0_i32, %c0_i32_0 : i32, i32, i32
  }
}

module attributes {stable_mosaic.version = 11 : i64} {
  func.func @kernel(%arg0: i32, %arg1: i32, %arg2: memref<16x16xf32, #tpu.memory_space<vmem>>, %arg3: memref<16x16xf32, #tpu.memory_space<vmem>>, %arg4: memref<1x1x16x16x16xf32, #tpu.memory_space<vmem>>, %arg5: memref<1x1x16x16x16xf32, #tpu.memory_space<vmem>>, %arg6: memref<1x8x16x16xf32, #tpu.memory_space<vmem>>, %arg7: memref<1x1x128xf32, #tpu.memory_space<vmem>>, %arg8: memref<1x1x128xf32, #tpu.memory_space<vmem>>) attributes {dimension_semantics = [#tpu.dimension_semantics<parallel>, #tpu.dimension_semantics<arbitrary>], iteration_bounds = array<i64: 2, 2>, scalar_prefetch = 0 : i64, scratch_operands = 0 : i64, tpu.core_type = #tpu.core_type<tc>, window_params = [{pipeline_mode = #tpu.pipeline_mode<synchronous>, transform_indices = @transform_0, window_bounds = array<i64: 16, 16>}, {pipeline_mode = #tpu.pipeline_mode<synchronous>, transform_indices = @transform_1, window_bounds = array<i64: 16, 16>}, {transform_indices = @transform_2, window_bounds = array<i64: 1, 1, 16, 16, 16>}, {transform_indices = @transform_3, window_bounds = array<i64: 1, 1, 16, 16, 16>}, {transform_indices = @transform_4, window_bounds = array<i64: 1, 8, 16, 16>}, {transform_indices = @transform_5, window_bounds = array<i64: 1, 1, 128>}, {transform_indices = @transform_6, window_bounds = array<i64: 1, 1, 128>}]} {
    %c0_i32 = arith.constant 0 : i32
    %0 = arith.cmpi eq, %arg1, %c0_i32 : i32
    %1 = arith.extui %0 : i1 to i32
    %c0_i32_0 = arith.constant 0 : i32
    %2 = arith.cmpi ne, %1, %c0_i32_0 : i32
    scf.if %2 {
      %cst_41 = arith.constant 0.000000e+00 : f32
      %169 = vector.broadcast %cst_41 : f32 to vector<1x1x128xf32>
      %c0_42 = arith.constant 0 : index
      %c0_43 = arith.constant 0 : index
      %c0_44 = arith.constant 0 : index
      %170 = vector.load %arg7[%c0_42, %c0_43, %c0_44] : memref<1x1x128xf32, #tpu.memory_space<vmem>>, vector<1x1x128xf32>
      tpu.vector_store %arg7[%c0_42, %c0_43, %c0_44], %169 {strides = array<i32>} : memref<1x1x128xf32, #tpu.memory_space<vmem>>, vector<1x1x128xf32>,
      %cst_45 = arith.constant 0.000000e+00 : f32
      %171 = vector.broadcast %cst_45 : f32 to vector<1x1x128xf32>
      %c0_46 = arith.constant 0 : index
      %c0_47 = arith.constant 0 : index
      %c0_48 = arith.constant 0 : index
      %172 = vector.load %arg8[%c0_46, %c0_47, %c0_48] : memref<1x1x128xf32, #tpu.memory_space<vmem>>, vector<1x1x128xf32>
      tpu.vector_store %arg8[%c0_46, %c0_47, %c0_48], %171 {strides = array<i32>} : memref<1x1x128xf32, #tpu.memory_space<vmem>>, vector<1x1x128xf32>,
    } else {
    }
    %c0 = arith.constant 0 : index
    %c0_1 = arith.constant 0 : index
    %c0_2 = arith.constant 0 : index
    %c0_3 = arith.constant 0 : index
    %c0_4 = arith.constant 0 : index
    %3 = vector.load %arg4[%c0, %c0_1, %c0_2, %c0_3, %c0_4] : memref<1x1x16x16x16xf32, #tpu.memory_space<vmem>>, vector<1x1x16x16x16xf32>
    %4 = vector.shape_cast %3 : vector<1x1x16x16x16xf32> to vector<16x16x16xf32>
    %c0_5 = arith.constant 0 : index
    %c0_6 = arith.constant 0 : index
    %c0_7 = arith.constant 0 : index
    %c0_8 = arith.constant 0 : index
    %c0_9 = arith.constant 0 : index
    %5 = vector.load %arg5[%c0_5, %c0_6, %c0_7, %c0_8, %c0_9] : memref<1x1x16x16x16xf32, #tpu.memory_space<vmem>>, vector<1x1x16x16x16xf32>
    %6 = vector.shape_cast %5 : vector<1x1x16x16x16xf32> to vector<16x16x16xf32>
    %7 = vector.extract_strided_slice %4 {offsets = [0, 0, 0], sizes = [8, 16, 16], strides = [1, 1, 1]} : vector<16x16x16xf32> to vector<8x16x16xf32>
    %8 = vector.extract_strided_slice %4 {offsets = [1, 0, 0], sizes = [8, 16, 16], strides = [1, 1, 1]} : vector<16x16x16xf32> to vector<8x16x16xf32>
    %9 = arith.addf %7, %8 : vector<8x16x16xf32>
    %10 = vector.extract_strided_slice %4 {offsets = [2, 0, 0], sizes = [8, 16, 16], strides = [1, 1, 1]} : vector<16x16x16xf32> to vector<8x16x16xf32>
    %11 = arith.addf %9, %10 : vector<8x16x16xf32>
    %12 = vector.extract_strided_slice %4 {offsets = [3, 0, 0], sizes = [8, 16, 16], strides = [1, 1, 1]} : vector<16x16x16xf32> to vector<8x16x16xf32>
    %13 = arith.addf %11, %12 : vector<8x16x16xf32>
    %14 = vector.extract_strided_slice %4 {offsets = [4, 0, 0], sizes = [8, 16, 16], strides = [1, 1, 1]} : vector<16x16x16xf32> to vector<8x16x16xf32>
    %15 = arith.addf %13, %14 : vector<8x16x16xf32>
    %16 = vector.extract_strided_slice %4 {offsets = [5, 0, 0], sizes = [8, 16, 16], strides = [1, 1, 1]} : vector<16x16x16xf32> to vector<8x16x16xf32>
    %17 = arith.addf %15, %16 : vector<8x16x16xf32>
    %18 = vector.extract_strided_slice %4 {offsets = [6, 0, 0], sizes = [8, 16, 16], strides = [1, 1, 1]} : vector<16x16x16xf32> to vector<8x16x16xf32>
    %19 = arith.addf %17, %18 : vector<8x16x16xf32>
    %20 = vector.extract_strided_slice %4 {offsets = [7, 0, 0], sizes = [8, 16, 16], strides = [1, 1, 1]} : vector<16x16x16xf32> to vector<8x16x16xf32>
    %21 = arith.addf %19, %20 : vector<8x16x16xf32>
    %22 = vector.extract_strided_slice %4 {offsets = [8, 0, 0], sizes = [8, 16, 16], strides = [1, 1, 1]} : vector<16x16x16xf32> to vector<8x16x16xf32>
    %23 = arith.addf %21, %22 : vector<8x16x16xf32>
    %24 = vector.extract_strided_slice %6 {offsets = [0, 0, 0], sizes = [8, 16, 16], strides = [1, 1, 1]} : vector<16x16x16xf32> to vector<8x16x16xf32>
    %25 = vector.extract_strided_slice %6 {offsets = [1, 0, 0], sizes = [8, 16, 16], strides = [1, 1, 1]} : vector<16x16x16xf32> to vector<8x16x16xf32>
    %26 = arith.addf %24, %25 : vector<8x16x16xf32>
    %27 = vector.extract_strided_slice %6 {offsets = [2, 0, 0], sizes = [8, 16, 16], strides = [1, 1, 1]} : vector<16x16x16xf32> to vector<8x16x16xf32>
    %28 = arith.addf %26, %27 : vector<8x16x16xf32>
    %29 = vector.extract_strided_slice %6 {offsets = [3, 0, 0], sizes = [8, 16, 16], strides = [1, 1, 1]} : vector<16x16x16xf32> to vector<8x16x16xf32>
    %30 = arith.addf %28, %29 : vector<8x16x16xf32>
    %31 = vector.extract_strided_slice %6 {offsets = [4, 0, 0], sizes = [8, 16, 16], strides = [1, 1, 1]} : vector<16x16x16xf32> to vector<8x16x16xf32>
    %32 = arith.addf %30, %31 : vector<8x16x16xf32>
    %33 = vector.extract_strided_slice %6 {offsets = [5, 0, 0], sizes = [8, 16, 16], strides = [1, 1, 1]} : vector<16x16x16xf32> to vector<8x16x16xf32>
    %34 = arith.addf %32, %33 : vector<8x16x16xf32>
    %35 = vector.extract_strided_slice %6 {offsets = [6, 0, 0], sizes = [8, 16, 16], strides = [1, 1, 1]} : vector<16x16x16xf32> to vector<8x16x16xf32>
    %36 = arith.addf %34, %35 : vector<8x16x16xf32>
    %37 = vector.extract_strided_slice %6 {offsets = [7, 0, 0], sizes = [8, 16, 16], strides = [1, 1, 1]} : vector<16x16x16xf32> to vector<8x16x16xf32>
    %38 = arith.addf %36, %37 : vector<8x16x16xf32>
    %39 = vector.extract_strided_slice %6 {offsets = [8, 0, 0], sizes = [8, 16, 16], strides = [1, 1, 1]} : vector<16x16x16xf32> to vector<8x16x16xf32>
    %40 = arith.addf %38, %39 : vector<8x16x16xf32>
    %41 = arith.mulf %4, %4 : vector<16x16x16xf32>
    %42 = vector.extract_strided_slice %41 {offsets = [0, 0, 0], sizes = [8, 16, 16], strides = [1, 1, 1]} : vector<16x16x16xf32> to vector<8x16x16xf32>
    %43 = vector.extract_strided_slice %41 {offsets = [1, 0, 0], sizes = [8, 16, 16], strides = [1, 1, 1]} : vector<16x16x16xf32> to vector<8x16x16xf32>
    %44 = arith.addf %42, %43 : vector<8x16x16xf32>
    %45 = vector.extract_strided_slice %41 {offsets = [2, 0, 0], sizes = [8, 16, 16], strides = [1, 1, 1]} : vector<16x16x16xf32> to vector<8x16x16xf32>
    %46 = arith.addf %44, %45 : vector<8x16x16xf32>
    %47 = vector.extract_strided_slice %41 {offsets = [3, 0, 0], sizes = [8, 16, 16], strides = [1, 1, 1]} : vector<16x16x16xf32> to vector<8x16x16xf32>
    %48 = arith.addf %46, %47 : vector<8x16x16xf32>
    %49 = vector.extract_strided_slice %41 {offsets = [4, 0, 0], sizes = [8, 16, 16], strides = [1, 1, 1]} : vector<16x16x16xf32> to vector<8x16x16xf32>
    %50 = arith.addf %48, %49 : vector<8x16x16xf32>
    %51 = vector.extract_strided_slice %41 {offsets = [5, 0, 0], sizes = [8, 16, 16], strides = [1, 1, 1]} : vector<16x16x16xf32> to vector<8x16x16xf32>
    %52 = arith.addf %50, %51 : vector<8x16x16xf32>
    %53 = vector.extract_strided_slice %41 {offsets = [6, 0, 0], sizes = [8, 16, 16], strides = [1, 1, 1]} : vector<16x16x16xf32> to vector<8x16x16xf32>
    %54 = arith.addf %52, %53 : vector<8x16x16xf32>
    %55 = vector.extract_strided_slice %41 {offsets = [7, 0, 0], sizes = [8, 16, 16], strides = [1, 1, 1]} : vector<16x16x16xf32> to vector<8x16x16xf32>
    %56 = arith.addf %54, %55 : vector<8x16x16xf32>
    %57 = vector.extract_strided_slice %41 {offsets = [8, 0, 0], sizes = [8, 16, 16], strides = [1, 1, 1]} : vector<16x16x16xf32> to vector<8x16x16xf32>
    %58 = arith.addf %56, %57 : vector<8x16x16xf32>
    %59 = arith.mulf %6, %6 : vector<16x16x16xf32>
    %60 = vector.extract_strided_slice %59 {offsets = [0, 0, 0], sizes = [8, 16, 16], strides = [1, 1, 1]} : vector<16x16x16xf32> to vector<8x16x16xf32>
    %61 = vector.extract_strided_slice %59 {offsets = [1, 0, 0], sizes = [8, 16, 16], strides = [1, 1, 1]} : vector<16x16x16xf32> to vector<8x16x16xf32>
    %62 = arith.addf %60, %61 : vector<8x16x16xf32>
    %63 = vector.extract_strided_slice %59 {offsets = [2, 0, 0], sizes = [8, 16, 16], strides = [1, 1, 1]} : vector<16x16x16xf32> to vector<8x16x16xf32>
    %64 = arith.addf %62, %63 : vector<8x16x16xf32>
    %65 = vector.extract_strided_slice %59 {offsets = [3, 0, 0], sizes = [8, 16, 16], strides = [1, 1, 1]} : vector<16x16x16xf32> to vector<8x16x16xf32>
    %66 = arith.addf %64, %65 : vector<8x16x16xf32>
    %67 = vector.extract_strided_slice %59 {offsets = [4, 0, 0], sizes = [8, 16, 16], strides = [1, 1, 1]} : vector<16x16x16xf32> to vector<8x16x16xf32>
    %68 = arith.addf %66, %67 : vector<8x16x16xf32>
    %69 = vector.extract_strided_slice %59 {offsets = [5, 0, 0], sizes = [8, 16, 16], strides = [1, 1, 1]} : vector<16x16x16xf32> to vector<8x16x16xf32>
    %70 = arith.addf %68, %69 : vector<8x16x16xf32>
    %71 = vector.extract_strided_slice %59 {offsets = [6, 0, 0], sizes = [8, 16, 16], strides = [1, 1, 1]} : vector<16x16x16xf32> to vector<8x16x16xf32>
    %72 = arith.addf %70, %71 : vector<8x16x16xf32>
    %73 = vector.extract_strided_slice %59 {offsets = [7, 0, 0], sizes = [8, 16, 16], strides = [1, 1, 1]} : vector<16x16x16xf32> to vector<8x16x16xf32>
    %74 = arith.addf %72, %73 : vector<8x16x16xf32>
    %75 = vector.extract_strided_slice %59 {offsets = [8, 0, 0], sizes = [8, 16, 16], strides = [1, 1, 1]} : vector<16x16x16xf32> to vector<8x16x16xf32>
    %76 = arith.addf %74, %75 : vector<8x16x16xf32>
    %77 = arith.mulf %4, %6 : vector<16x16x16xf32>
    %78 = vector.extract_strided_slice %77 {offsets = [0, 0, 0], sizes = [8, 16, 16], strides = [1, 1, 1]} : vector<16x16x16xf32> to vector<8x16x16xf32>
    %79 = vector.extract_strided_slice %77 {offsets = [1, 0, 0], sizes = [8, 16, 16], strides = [1, 1, 1]} : vector<16x16x16xf32> to vector<8x16x16xf32>
    %80 = arith.addf %78, %79 : vector<8x16x16xf32>
    %81 = vector.extract_strided_slice %77 {offsets = [2, 0, 0], sizes = [8, 16, 16], strides = [1, 1, 1]} : vector<16x16x16xf32> to vector<8x16x16xf32>
    %82 = arith.addf %80, %81 : vector<8x16x16xf32>
    %83 = vector.extract_strided_slice %77 {offsets = [3, 0, 0], sizes = [8, 16, 16], strides = [1, 1, 1]} : vector<16x16x16xf32> to vector<8x16x16xf32>
    %84 = arith.addf %82, %83 : vector<8x16x16xf32>
    %85 = vector.extract_strided_slice %77 {offsets = [4, 0, 0], sizes = [8, 16, 16], strides = [1, 1, 1]} : vector<16x16x16xf32> to vector<8x16x16xf32>
    %86 = arith.addf %84, %85 : vector<8x16x16xf32>
    %87 = vector.extract_strided_slice %77 {offsets = [5, 0, 0], sizes = [8, 16, 16], strides = [1, 1, 1]} : vector<16x16x16xf32> to vector<8x16x16xf32>
    %88 = arith.addf %86, %87 : vector<8x16x16xf32>
    %89 = vector.extract_strided_slice %77 {offsets = [6, 0, 0], sizes = [8, 16, 16], strides = [1, 1, 1]} : vector<16x16x16xf32> to vector<8x16x16xf32>
    %90 = arith.addf %88, %89 : vector<8x16x16xf32>
    %91 = vector.extract_strided_slice %77 {offsets = [7, 0, 0], sizes = [8, 16, 16], strides = [1, 1, 1]} : vector<16x16x16xf32> to vector<8x16x16xf32>
    %92 = arith.addf %90, %91 : vector<8x16x16xf32>
    %93 = vector.extract_strided_slice %77 {offsets = [8, 0, 0], sizes = [8, 16, 16], strides = [1, 1, 1]} : vector<16x16x16xf32> to vector<8x16x16xf32>
    %94 = arith.addf %92, %93 : vector<8x16x16xf32>
    %95 = tpu.concatenate %23, %40, %58, %76, %94 in 0 : vector<8x16x16xf32>, vector<8x16x16xf32>, vector<8x16x16xf32>, vector<8x16x16xf32>, vector<8x16x16xf32> -> vector<40x16x16xf32>
    %96 = vector.shape_cast %95 : vector<40x16x16xf32> to vector<640x16xf32>
    %c0_10 = arith.constant 0 : index
    %c0_11 = arith.constant 0 : index
    %97 = vector.load %arg2[%c0_10, %c0_11] : memref<16x16xf32, #tpu.memory_space<vmem>>, vector<16x16xf32>
    %cst = arith.constant dense<0.000000e+00> : vector<640x16xf32>
    %98 = tpu.matmul %96, %97, %cst {dimension_numbers = #tpu.dot_dimension_numbers<[1], [0], [0], [1], [0, 0, 1, 1], [], []>} : vector<640x16xf32>, vector<16x16xf32>, vector<640x16xf32> -> vector<640x16xf32>
    %99 = vector.shape_cast %98 : vector<640x16xf32> to vector<40x16x16xf32>
    %100 = tpu.transpose %99, [0, 2, 1] : vector<40x16x16xf32> -> vector<40x16x16xf32>
    %101 = vector.shape_cast %100 : vector<40x16x16xf32> to vector<640x16xf32>
    %c0_12 = arith.constant 0 : index
    %c0_13 = arith.constant 0 : index
    %102 = vector.load %arg3[%c0_12, %c0_13] : memref<16x16xf32, #tpu.memory_space<vmem>>, vector<16x16xf32>
    %cst_14 = arith.constant dense<0.000000e+00> : vector<640x16xf32>
    %103 = tpu.matmul %101, %102, %cst_14 {dimension_numbers = #tpu.dot_dimension_numbers<[1], [0], [0], [1], [0, 0, 1, 1], [], []>} : vector<640x16xf32>, vector<16x16xf32>, vector<640x16xf32> -> vector<640x16xf32>
    %104 = vector.shape_cast %103 : vector<640x16xf32> to vector<5x8x16x16xf32>
    %105 = vector.extract_strided_slice %104 {offsets = [0, 0, 0, 0], sizes = [1, 8, 16, 16], strides = [1, 1, 1, 1]} : vector<5x8x16x16xf32> to vector<1x8x16x16xf32>
    %106 = vector.shape_cast %105 : vector<1x8x16x16xf32> to vector<8x16x16xf32>
    %107 = vector.extract_strided_slice %104 {offsets = [1, 0, 0, 0], sizes = [1, 8, 16, 16], strides = [1, 1, 1, 1]} : vector<5x8x16x16xf32> to vector<1x8x16x16xf32>
    %108 = vector.shape_cast %107 : vector<1x8x16x16xf32> to vector<8x16x16xf32>
    %109 = vector.extract_strided_slice %104 {offsets = [2, 0, 0, 0], sizes = [1, 8, 16, 16], strides = [1, 1, 1, 1]} : vector<5x8x16x16xf32> to vector<1x8x16x16xf32>
    %110 = vector.shape_cast %109 : vector<1x8x16x16xf32> to vector<8x16x16xf32>
    %111 = vector.extract_strided_slice %104 {offsets = [3, 0, 0, 0], sizes = [1, 8, 16, 16], strides = [1, 1, 1, 1]} : vector<5x8x16x16xf32> to vector<1x8x16x16xf32>
    %112 = vector.shape_cast %111 : vector<1x8x16x16xf32> to vector<8x16x16xf32>
    %113 = vector.extract_strided_slice %104 {offsets = [4, 0, 0, 0], sizes = [1, 8, 16, 16], strides = [1, 1, 1, 1]} : vector<5x8x16x16xf32> to vector<1x8x16x16xf32>
    %114 = vector.shape_cast %113 : vector<1x8x16x16xf32> to vector<8x16x16xf32>
    %cst_15 = arith.constant 0.00137174211 : f32
    %115 = vector.broadcast %cst_15 : f32 to vector<8x16x16xf32>
    %116 = arith.mulf %106, %115 : vector<8x16x16xf32>
    %cst_16 = arith.constant 0.00137174211 : f32
    %117 = vector.broadcast %cst_16 : f32 to vector<8x16x16xf32>
    %118 = arith.mulf %108, %117 : vector<8x16x16xf32>
    %119 = arith.mulf %118, %106 : vector<8x16x16xf32>
    %120 = arith.subf %114, %119 : vector<8x16x16xf32>
    %121 = arith.mulf %116, %108 : vector<8x16x16xf32>
    %122 = arith.subf %120, %121 : vector<8x16x16xf32>
    %123 = arith.mulf %116, %118 : vector<8x16x16xf32>
    %cst_17 = arith.constant 7.290000e+02 : f32
    %124 = vector.broadcast %cst_17 : f32 to vector<8x16x16xf32>
    %125 = arith.mulf %123, %124 : vector<8x16x16xf32>
    %126 = arith.addf %122, %125 : vector<8x16x16xf32>
    %cst_18 = arith.constant 2.000000e+00 : f32
    %127 = vector.broadcast %cst_18 : f32 to vector<8x16x16xf32>
    %128 = arith.mulf %127, %116 : vector<8x16x16xf32>
    %129 = arith.mulf %128, %106 : vector<8x16x16xf32>
    %130 = arith.subf %110, %129 : vector<8x16x16xf32>
    %131 = arith.mulf %116, %116 : vector<8x16x16xf32>
    %cst_19 = arith.constant 7.290000e+02 : f32
    %132 = vector.broadcast %cst_19 : f32 to vector<8x16x16xf32>
    %133 = arith.mulf %131, %132 : vector<8x16x16xf32>
    %134 = arith.addf %130, %133 : vector<8x16x16xf32>
    %cst_20 = arith.constant 2.000000e+00 : f32
    %135 = vector.broadcast %cst_20 : f32 to vector<8x16x16xf32>
    %136 = arith.mulf %135, %118 : vector<8x16x16xf32>
    %137 = arith.mulf %136, %108 : vector<8x16x16xf32>
    %138 = arith.subf %112, %137 : vector<8x16x16xf32>
    %139 = arith.mulf %118, %118 : vector<8x16x16xf32>
    %cst_21 = arith.constant 7.290000e+02 : f32
    %140 = vector.broadcast %cst_21 : f32 to vector<8x16x16xf32>
    %141 = arith.mulf %139, %140 : vector<8x16x16xf32>
    %142 = arith.addf %138, %141 : vector<8x16x16xf32>
    %143 = arith.mulf %126, %126 : vector<8x16x16xf32>
    %144 = arith.mulf %134, %142 : vector<8x16x16xf32>
    %cst_22 = arith.constant 9.99999974E-6 : f32
    %145 = vector.broadcast %cst_22 : f32 to vector<8x16x16xf32>
    %146 = arith.addf %144, %145 : vector<8x16x16xf32>
    %147 = arith.divf %143, %146 : vector<8x16x16xf32>
    %c0_23 = arith.constant 0 : index
    %c0_24 = arith.constant 0 : index
    %c0_25 = arith.constant 0 : index
    %148 = vector.load %arg7[%c0_23, %c0_24, %c0_25] : memref<1x1x128xf32, #tpu.memory_space<vmem>>, vector<1x1x128xf32>
    %149 = vector.shape_cast %147 : vector<8x16x16xf32> to vector<1x8x16x16xf32>
    %cst_26 = arith.constant dense<0.000000e+00> : vector<1xf32>
    %150 = vector.multi_reduction <add>, %149, %cst_26 [1, 2, 3] : vector<1x8x16x16xf32> to vector<1xf32>
    %151 = vector.shape_cast %150 : vector<1xf32> to vector<1x1x1x1xf32>
    %152 = vector.extract %151[0, 0, 0, 0] : f32 from vector<1x1x1x1xf32>
    %153 = vector.broadcast %152 : f32 to vector<1x1x128xf32>
    %154 = arith.addf %148, %153 : vector<1x1x128xf32>
    %c0_27 = arith.constant 0 : index
    %c0_28 = arith.constant 0 : index
    %c0_29 = arith.constant 0 : index
    %155 = vector.load %arg7[%c0_27, %c0_28, %c0_29] : memref<1x1x128xf32, #tpu.memory_space<vmem>>, vector<1x1x128xf32>
    tpu.vector_store %arg7[%c0_27, %c0_28, %c0_29], %154 {strides = array<i32>} : memref<1x1x128xf32, #tpu.memory_space<vmem>>, vector<1x1x128xf32>,
    %156 = vector.extract_strided_slice %4 {offsets = [4, 0, 0], sizes = [8, 16, 16], strides = [1, 1, 1]} : vector<16x16x16xf32> to vector<8x16x16xf32>
    %c0_30 = arith.constant 0 : index
    %c0_31 = arith.constant 0 : index
    %c0_32 = arith.constant 0 : index
    %c0_33 = arith.constant 0 : index
    %157 = vector.load %arg6[%c0_30, %c0_31, %c0_32, %c0_33] : memref<1x8x16x16xf32, #tpu.memory_space<vmem>>, vector<1x8x16x16xf32>
    %158 = vector.shape_cast %157 : vector<1x8x16x16xf32> to vector<8x16x16xf32>
    %159 = arith.subf %156, %158 : vector<8x16x16xf32>
    %c0_34 = arith.constant 0 : index
    %c0_35 = arith.constant 0 : index
    %c0_36 = arith.constant 0 : index
    %160 = vector.load %arg8[%c0_34, %c0_35, %c0_36] : memref<1x1x128xf32, #tpu.memory_space<vmem>>, vector<1x1x128xf32>
    %161 = arith.mulf %159, %159 : vector<8x16x16xf32>
    %162 = vector.shape_cast %161 : vector<8x16x16xf32> to vector<1x8x16x16xf32>
    %cst_37 = arith.constant dense<0.000000e+00> : vector<1xf32>
    %163 = vector.multi_reduction <add>, %162, %cst_37 [1, 2, 3] : vector<1x8x16x16xf32> to vector<1xf32>
    %164 = vector.shape_cast %163 : vector<1xf32> to vector<1x1x1x1xf32>
    %165 = vector.extract %164[0, 0, 0, 0] : f32 from vector<1x1x1x1xf32>
    %166 = vector.broadcast %165 : f32 to vector<1x1x128xf32>
    %167 = arith.addf %160, %166 : vector<1x1x128xf32>
    %c0_38 = arith.constant 0 : index
    %c0_39 = arith.constant 0 : index
    %c0_40 = arith.constant 0 : index
    %168 = vector.load %arg8[%c0_38, %c0_39, %c0_40] : memref<1x1x128xf32, #tpu.memory_space<vmem>>, vector<1x1x128xf32>
    tpu.vector_store %arg8[%c0_38, %c0_39, %c0_40], %167 {strides = array<i32>} : memref<1x1x128xf32, #tpu.memory_space<vmem>>, vector<1x1x128xf32>,
    return
  }
  func.func @transform_0(%arg0: i32, %arg1: i32) -> (i32, i32) {
    %c0_i32 = arith.constant 0 : i32
    %c0_i32_0 = arith.constant 0 : i32
    %c0_i32_1 = arith.constant 0 : i32
    return %c0_i32, %c0_i32_0 : i32, i32
  }
  func.func @transform_1(%arg0: i32, %arg1: i32) -> (i32, i32) {
    %c0_i32 = arith.constant 0 : i32
    %c0_i32_0 = arith.constant 0 : i32
    %c0_i32_1 = arith.constant 0 : i32
    return %c0_i32, %c0_i32_0 : i32, i32
  }
  func.func @transform_2(%arg0: i32, %arg1: i32) -> (i32, i32, i32, i32, i32) {
    %c0_i32 = arith.constant 0 : i32
    %c0_i32_0 = arith.constant 0 : i32
    %c0_i32_1 = arith.constant 0 : i32
    %c0_i32_2 = arith.constant 0 : i32
    return %arg0, %arg1, %c0_i32, %c0_i32_0, %c0_i32_1 : i32, i32, i32, i32, i32
  }
  func.func @transform_3(%arg0: i32, %arg1: i32) -> (i32, i32, i32, i32, i32) {
    %c0_i32 = arith.constant 0 : i32
    %c0_i32_0 = arith.constant 0 : i32
    %c0_i32_1 = arith.constant 0 : i32
    %c0_i32_2 = arith.constant 0 : i32
    return %arg0, %arg1, %c0_i32, %c0_i32_0, %c0_i32_1 : i32, i32, i32, i32, i32
  }
  func.func @transform_4(%arg0: i32, %arg1: i32) -> (i32, i32, i32, i32) {
    %c0_i32 = arith.constant 0 : i32
    %c0_i32_0 = arith.constant 0 : i32
    %c0_i32_1 = arith.constant 0 : i32
    return %arg0, %arg1, %c0_i32, %c0_i32_0 : i32, i32, i32, i32
  }
  func.func @transform_5(%arg0: i32, %arg1: i32) -> (i32, i32, i32) {
    %c0_i32 = arith.constant 0 : i32
    %c0_i32_0 = arith.constant 0 : i32
    %c0_i32_1 = arith.constant 0 : i32
    return %arg0, %c0_i32, %c0_i32_0 : i32, i32, i32
  }
  func.func @transform_6(%arg0: i32, %arg1: i32) -> (i32, i32, i32) {
    %c0_i32 = arith.constant 0 : i32
    %c0_i32_0 = arith.constant 0 : i32
    %c0_i32_1 = arith.constant 0 : i32
    return %arg0, %c0_i32, %c0_i32_0 : i32, i32, i32
  }
}

</mosaic_0001>

<bundles_post_ra>
// kernel: loss_function_ncc_intensity_registration.3
= control target key start
LH: loop header
LB: loop body
LE: loop exit
PB: predicated region body
PF: predicated region fallthrough
CT: control target
= control target key end

     0   :  { %s2896_s6 = smov 0   ;;  %s4885_s0 = inlined_call_operand.vmem [shape: f32[2,3,16,16,16], index: 0, kind: input, shape index: {}]   ;;  %s4886_s1 = inlined_call_operand.vmem [shape: f32[2,1,128], index: 1, kind: output, shape index: {}]  }
   0x1 LB: > { %s2774_s7 = sadd.s32 4294967295, %s2882_s6   ;;  %p2778_p0 = scmp.ge.s32.totalorder %s2882_s6, 1  ;;  %s2882_s6 = sphi %s2896_s6, %s11_s6  }
   0x2   : > { %p87_p1 = scmp.lt.s32.totalorder %s2882_s6, 3 }
   0x4   : > { %p88_p2 = pnand %p2778_p0, %p87_p1 }
   0x6   : > { %91 = sbr.rel (%p88_p2) target bundleno = 787 (0x313), region = 24 }
   0xd   : > { %p105_p3 = scmp.lt.s32.totalorder %s2774_s7, 1  ;;  %s2884_s12 = smov 1   ;;  %vm395_vm0 = vcmask 1040384   ;;  %vm1590_vm1 = vcmask 1046528   ;;  %vm1206_vm2 = vcmask 130048   ;;  %vm1832_vm3 = vcmask 129024  }
   0xe   : > { %s2885_s13 = smov 127   ;;  %vm2516_vm4 = vcmask 121856  }
   0xf   : > { %s5029_s7 = smov (!%p105_p3, %s2774_s7), 1 }
  0x10   : > { %s2782_s8 = smul.u32 768, %s5029_s7  ;;  %s112_s24 = scalar_lea.vmem %s4886_s1, %s5029_s7 }
  0x12   : > { %s2910_s11 = scalar_lea.vmem %s4885_s0, %s2782_s8 }
  0x13   : > { %v2913_v0 = vld [vmem:[%s2910_s11 + $0x10] sm:$0xff]  ;;  %v2916_v1 = vld [vmem:[%s2910_s11] sm:$0xff]  ;;  %v2923_v2 = vld [vmem:[%s2910_s11 + $0x18] sm:$0xff] }
  0x14   : > { %736 = vrot.lane.b32.xlu1 %v2913_v0, %s2884_s12  ;;  %732 = vrot.lane.b32.xlu0 %v2916_v1, %s2884_s12  ;;  %v2926_v3 = vld [vmem:[%s2910_s11 + $0x8] sm:$0xff]  ;;  %v2936_v5 = vld [vmem:[%s2910_s11 + $0x20] sm:$0xff]  ;;  %v396_v26 = vrot.slane %v2916_v1, 7  ;;  %v399_v30 = vrot.slane %v2913_v0, 7  ;;  %v400_v31 = vrot.slane %v2923_v2, 7 }
  0x15   : > { %v2933_v4 = vld [vmem:[%s2910_s11 + $0x28] sm:$0xff]  ;;  %v2943_v6 = vld [vmem:[%s2910_s11 + $0x38] sm:$0xff]  ;;  %v2946_v7 = vld [vmem:[%s2910_s11 + $0x30] sm:$0xff]  ;;  %v397_v27 = vrot.slane %v2926_v3, 7  ;;  %v402_v45 = vrot.slane %v2936_v5, 7 }
  0x16   : > { %v2953_v8 = vld [vmem:[%s2910_s11 + $0x48] sm:$0xff]  ;;  %v2956_v9 = vld [vmem:[%s2910_s11 + $0x40] sm:$0xff]  ;;  %v2963_v10 = vld [vmem:[%s2910_s11 + $0x58] sm:$0xff]  ;;  %v636_v35 = vsub.f32 %v2916_v1, %v396_v26  ;;  %v401_v37 = vsel %vm395_vm0, %v399_v30, %v400_v31  ;;  %v638_v40 = vsub.f32 %v2913_v0, %v399_v30  ;;  %v403_v44 = vrot.slane %v2933_v4, 7 }
  0x17   : > { %v2966_v11 = vld [vmem:[%s2910_s11 + $0x50] sm:$0xff]  ;;  %v2973_v12 = vld [vmem:[%s2910_s11 + $0x68] sm:$0xff]  ;;  %v2976_v13 = vld [vmem:[%s2910_s11 + $0x60] sm:$0xff]  ;;  %v398_v32 = vsel %vm395_vm0, %v396_v26, %v397_v27  ;;  %v639_v42 = vsub.f32 %v2923_v2, %v401_v37  ;;  %v640_v57 = vsub.f32 %v2936_v5, %v402_v45  ;;  %v406_v59 = vrot.slane %v2943_v6, 7 }
  0x18   : > { %738 = vrot.lane.b32.xlu1 %v2923_v2, %s2884_s12  ;;  %734 = vrot.lane.b32.xlu0 %v2926_v3, %s2884_s12  ;;  %v2983_v14 = vld [vmem:[%s2910_s11 + $0x78] sm:$0xff]  ;;  %v2986_v15 = vld [vmem:[%s2910_s11 + $0x70] sm:$0xff]  ;;  %v637_v36 = vsub.f32 %v2926_v3, %v398_v32  ;;  %v1398_v41 = vmul.f32 %v636_v35, %v636_v35  ;;  %v1400_v48 = vmul.f32 %v638_v40, %v638_v40  ;;  %v405_v60 = vrot.slane %v2946_v7, 7 }
  0x19   : > { %v2993_v16 = vld [vmem:[%s2910_s11 + $0x88] sm:$0xff]  ;;  %v2996_v17 = vld [vmem:[%s2910_s11 + $0x80] sm:$0xff]  ;;  %v3003_v18 = vld [vmem:[%s2910_s11 + $0x98] sm:$0xff]  ;;  %v1401_v50 = vmul.f32 %v639_v42, %v639_v42  ;;  %v404_v52 = vsel %vm395_vm0, %v402_v45, %v403_v44  ;;  %v1402_v27 = vmul.f32 %v640_v57, %v640_v57  ;;  %v408_v44 = vrot.slane %v2956_v9, 7 }
  0x1a   : > { %v3006_v19 = vld [vmem:[%s2910_s11 + $0x90] sm:$0xff]  ;;  %v3011_v20 = vld [vmem:[%s2910_s11 + $0xa8] sm:$0xff]  ;;  %v3016_v21 = vld [vmem:[%s2910_s11 + $0xa0] sm:$0xff]  ;;  %v1399_v43 = vmul.f32 %v637_v36, %v637_v36  ;;  %v1591_v49 = vrot.slane %v1398_v41, 1  ;;  %v1594_v54 = vrot.slane %v1400_v48, 1  ;;  %v641_v58 = vsub.f32 %v2933_v4, %v404_v52 }
  0x1b   : > { %v3021_v22 = vld [vmem:[%s2910_s11 + $0xb8] sm:$0xff]  ;;  %v3026_v23 = vld [vmem:[%s2910_s11 + $0xb0] sm:$0xff]  ;;  %v3031_v24 = vld [vmem:[%s2910_s11 + $0xc8] sm:$0xff]  ;;  %v1595_v55 = vrot.slane %v1401_v50, 1  ;;  %v407_v31 = vsel %vm395_vm0, %v405_v60, %v406_v59  ;;  %v1597_v37 = vrot.slane %v1402_v27, 1  ;;  %v642_v41 = vsub.f32 %v2946_v7, %v405_v60 }
  0x1c   : > { %742 = vrot.lane.b32.xlu1 %v2933_v4, %s2884_s12  ;;  %740 = vrot.lane.b32.xlu0 %v2936_v5, %s2884_s12  ;;  %v3036_v25 = vld [vmem:[%s2910_s11 + $0xc0] sm:$0xff]  ;;  %v3043_v28 = vld [vmem:[%s2910_s11 + $0xd8] sm:$0xff]  ;;  %v1592_v51 = vrot.slane %v1399_v43, 1  ;;  %v1403_v30 = vmul.f32 %v641_v58, %v641_v58  ;;  %v643_v42 = vsub.f32 %v2943_v6, %v407_v31  ;;  %v409_v43 = vrot.slane %v2953_v8, 7 }
  0x1d   : > { %v3048_v29 = vld [vmem:[%s2910_s11 + $0xd0] sm:$0xff]  ;;  %v3056_v33 = vld [vmem:[%s2910_s11 + $0xe8] sm:$0xff]  ;;  %v3061_v34 = vld [vmem:[%s2910_s11 + $0xe0] sm:$0xff]  ;;  %v1596_v26 = vsel %vm1590_vm1, %v1594_v54, %v1595_v55  ;;  %v1837_v50 = vsel %vm1832_vm3, %v1595_v55, 0.0  ;;  %v1404_v54 = vmul.f32 %v642_v41, %v642_v41  ;;  %v211_v55 = vsub.f32 %v2936_v5, %v2913_v0 }
  0x1e   : > { %v3069_v38 = vld [vmem:[%s2910_s11 + $0xf8] sm:$0xff]  ;;  %v3074_v39 = vld [vmem:[%s2910_s11 + $0xf0] sm:$0xff]  ;;  %v3083_v46 = vld [vmem:[%s2910_s11 + $0x108] sm:$0xff]  ;;  %v1593_v56 = vsel %vm1590_vm1, %v1591_v49, %v1592_v51  ;;  %v1833_v63 = vsel %vm1832_vm3, %v1592_v51, 0.0  ;;  %v1835_v36 = vsel %vm1206_vm2, %v1596_v26, 0.0  ;;  %v1598_v40 = vrot.slane %v1403_v30, 1 }
  0x1f   : > { %v3088_v47 = vld [vmem:[%s2910_s11 + $0x100] sm:$0xff]  ;;  %v3094_v53 = vld [vmem:[%s2910_s11 + $0x110] sm:$0xff]  ;;  %v3106_v61 = vld [vmem:[%s2910_s11 + $0x118] sm:$0xff]  ;;  %v1831_v62 = vsel %vm1206_vm2, %v1593_v56, 0.0  ;;  %v209_v49 = vsub.f32 %v2913_v0, %v2916_v1  ;;  %v210_v51 = vsub.f32 %v2923_v2, %v2926_v3  ;;  %v1405_v56 = vmul.f32 %v643_v42, %v643_v42 }
  0x20   : > { %746 = vrot.lane.b32.xlu1 %v2943_v6, %s2884_s12  ;;  %744 = vrot.lane.b32.xlu0 %v2946_v7, %s2884_s12  ;;  %4926 = vst [vmem:[#allocation2_spill] sm:$0xff] %v3106_v61  ;;  %v3115_v32 = vld [vmem:[%s2910_s11 + $0x120] sm:$0xff]  ;;  %v1834_v35 = vadd.f32 %v1833_v63, %v1831_v62  ;;  %v3125_v45 = vld [vmem:[%s2910_s11 + $0x128] sm:$0xff]  ;;  %v1599_v52 = vsel %vm1590_vm1, %v1597_v37, %v1598_v40  ;;  %v1600_v26 = vrot.slane %v1404_v54, 1 }
  0x21   : > { %4927 = vst [vmem:[#allocation3_spill] sm:$0xff] %v3115_v32  ;;  %4928 = vst [vmem:[#allocation4_spill] sm:$0xff] %v3125_v45  ;;  %v410_v57 = vsel %vm395_vm0, %v408_v44, %v409_v43  ;;  %v3137_v58 = vld [vmem:[%s2910_s11 + $0x130] sm:$0xff]  ;;  %v1116_v60 = vmul.f32 %v209_v49, %v209_v49  ;;  %v1117_v62 = vmul.f32 %v210_v51, %v210_v51  ;;  %v1839_v63 = vsel %vm1206_vm2, %v1599_v52, 0.0  ;;  %v3149_v37 = vld [vmem:[%s2910_s11 + $0x138] sm:$0xff] }
  0x22   : > { %v1836_v48 = vadd.f32 %v1835_v36, %v1834_v35  ;;  %4929 = vst [vmem:[#allocation5_spill] sm:$0xff] %v3137_v58  ;;  %v1601_v27 = vrot.slane %v1405_v56, 1  ;;  %v644_v30 = vsub.f32 %v2956_v9, %v408_v44  ;;  %v645_v31 = vsub.f32 %v2953_v8, %v410_v57  ;;  %4930 = vst [vmem:[#allocation6_spill] sm:$0xff] %v3149_v37  ;;  %v3161_v56 = vld [vmem:[%s2910_s11 + $0x140] sm:$0xff] }
  0x23   : > { %v412_v35 = vrot.slane %v2963_v10, 7  ;;  %v411_v36 = vrot.slane %v2966_v11, 7  ;;  %v212_v41 = vsub.f32 %v2933_v4, %v2923_v2  ;;  %v1207_v43 = vsel %vm1206_vm2, %v1116_v60, 0.0  ;;  %4931 = vst [vmem:[#allocation7_spill] sm:$0xff] %v3161_v56 }
  0x24   : > { %750 = vrot.lane.b32.xlu1 %v2953_v8, %s2884_s12  ;;  %748 = vrot.lane.b32.xlu0 %v2956_v9, %s2884_s12  ;;  %v1838_v59 = vadd.f32 %v1837_v50, %v1836_v48  ;;  %v1208_v44 = vsel %vm1206_vm2, %v1117_v62, 0.0  ;;  %v1118_v48 = vmul.f32 %v211_v55, %v211_v55  ;;  %v1841_v49 = vsel %vm1832_vm3, %v1598_v40, 0.0 }
  0x25   : > { %v1602_v50 = vsel %vm1590_vm1, %v1600_v26, %v1601_v27  ;;  %v1406_v51 = vmul.f32 %v644_v30, %v644_v30  ;;  %v1407_v52 = vmul.f32 %v645_v31, %v645_v31  ;;  %v413_v54 = vsel %vm395_vm0, %v411_v36, %v412_v35 }
  0x26   : > { %v1840_v42 = vadd.f32 %v1839_v63, %v1838_v59  ;;  %v1209_v57 = vadd.f32 %v1208_v44, %v1207_v43  ;;  %v1119_v60 = vmul.f32 %v212_v41, %v212_v41  ;;  %v1210_v62 = vsel %vm1206_vm2, %v1118_v48, 0.0 }
  0x27   : > { %v213_v40 = vsub.f32 %v2946_v7, %v2936_v5  ;;  %v1843_v55 = vsel %vm1206_vm2, %v1602_v50, 0.0  ;;  %v1603_v63 = vrot.slane %v1406_v51, 1  ;;  %v1604_v26 = vrot.slane %v1407_v52, 1 }
  0x28   : > { %754 = vrot.lane.b32.xlu1 %v2963_v10, %s2884_s12  ;;  %752 = vrot.lane.b32.xlu0 %v2966_v11, %s2884_s12  ;;  %v1842_v59 = vadd.f32 %v1841_v49, %v1840_v42  ;;  %v646_v30 = vsub.f32 %v2966_v11, %v411_v36  ;;  %v647_v31 = vsub.f32 %v2963_v10, %v413_v54  ;;  %v415_v35 = vrot.slane %v2973_v12, 7  ;;  %v3174_v42 = vld [vmem:[%s2910_s11 + $0x148] sm:$0xff] }
  0x29   : > { %v414_v41 = vrot.slane %v2976_v13, 7  ;;  %4932 = vst [vmem:[#allocation8_spill] sm:$0xff] %v3174_v42  ;;  %v1211_v43 = vadd.f32 %v1210_v62, %v1209_v57  ;;  %v1212_v48 = vsel %vm1206_vm2, %v1119_v60, 0.0  ;;  %v214_v49 = vsub.f32 %v2943_v6, %v2933_v4  ;;  %v3185_v57 = vld [vmem:[%s2910_s11 + $0x150] sm:$0xff] }
  0x2a   : > { %v1844_v44 = vadd.f32 %v1843_v55, %v1842_v59  ;;  %v1120_v36 = vmul.f32 %v213_v40, %v213_v40  ;;  %v1845_v50 = vsel %vm1832_vm3, %v1601_v27, 0.0  ;;  %v1605_v51 = vsel %vm1590_vm1, %v1603_v63, %v1604_v26  ;;  %4933 = vst [vmem:[#allocation9_spill] sm:$0xff] %v3185_v57 }
  0x2b   : > { %v1408_v52 = vmul.f32 %v646_v30, %v646_v30  ;;  %v1409_v54 = vmul.f32 %v647_v31, %v647_v31  ;;  %v1213_v59 = vadd.f32 %v1212_v48, %v1211_v43  ;;  %v1121_v62 = vmul.f32 %v214_v49, %v214_v49 }
  0x2c   : > { %758 = vrot.lane.b32.xlu1 %v2973_v12, %s2884_s12  ;;  %756 = vrot.lane.b32.xlu0 %v2976_v13, %s2884_s12  ;;  %v1846_v60 = vadd.f32 %v1845_v50, %v1844_v44  ;;  %v1214_v55 = vsel %vm1206_vm2, %v1120_v36, 0.0  ;;  %v215_v27 = vsub.f32 %v2956_v9, %v2946_v7  ;;  %v1847_v40 = vsel %vm1206_vm2, %v1605_v51, 0.0  ;;  %v3198_v44 = vld [vmem:[%s2910_s11 + $0x158] sm:$0xff] }
  0x2d   : > { %v1606_v63 = vrot.slane %v1408_v52, 1  ;;  %v1607_v30 = vrot.slane %v1409_v54, 1  ;;  %v648_v31 = vsub.f32 %v2976_v13, %v414_v41  ;;  %v417_v43 = vrot.slane %v2986_v15, 7  ;;  %4934 = vst [vmem:[#allocation10_spill] sm:$0xff] %v3198_v44 }
  0x2e   : > { %v1215_v48 = vadd.f32 %v1214_v55, %v1213_v59  ;;  %v1848_v49 = vadd.f32 %v1847_v40, %v1846_v60  ;;  %v1216_v36 = vsel %vm1206_vm2, %v1121_v62, 0.0  ;;  %v216_v50 = vsub.f32 %v2953_v8, %v2943_v6  ;;  %v3209_v59 = vld [vmem:[%s2910_s11 + $0x160] sm:$0xff] }
  0x2f   : > { %v1608_v51 = vsel %vm1590_vm1, %v1606_v63, %v1607_v30  ;;  %v1410_v52 = vmul.f32 %v648_v31, %v648_v31  ;;  %4935 = vst [vmem:[#allocation11_spill] sm:$0xff] %v3209_v59  ;;  %v650_v31 = vsub.f32 %v2986_v15, %v417_v43 }
  0x30   : > { %762 = vrot.lane.b32.xlu1 %v2983_v14, %s2884_s12  ;;  %760 = vrot.lane.b32.xlu0 %v2986_v15, %s2884_s12  ;;  %v1217_v60 = vadd.f32 %v1216_v36, %v1215_v48  ;;  %v1123_v55 = vmul.f32 %v216_v50, %v216_v50  ;;  %v420_v48 = vrot.slane %v2996_v17, 7 }
  0x31   : > { %v1609_v63 = vrot.slane %v1410_v52, 1  ;;  %v1412_v52 = vmul.f32 %v650_v31, %v650_v31 }
  0x33   : > { %v1612_v31 = vrot.slane %v1412_v52, 1 }
  0x34   : > { %766 = vrot.lane.b32.xlu1 %v2993_v16, %s2884_s12  ;;  %764 = vrot.lane.b32.xlu0 %v2996_v17, %s2884_s12 }
  0x38   : > { %770 = vrot.lane.b32.xlu1 %v3003_v18, %s2884_s12  ;;  %768 = vrot.lane.b32.xlu0 %v3006_v19, %s2884_s12 }
  0x3c   : > { %774 = vrot.lane.b32.xlu1 %v3011_v20, %s2884_s12  ;;  %772 = vrot.lane.b32.xlu0 %v3016_v21, %s2884_s12 }
  0x40   : > { %778 = vrot.lane.b32.xlu1 %v3021_v22, %s2884_s12  ;;  %776 = vrot.lane.b32.xlu0 %v3026_v23, %s2884_s12 }
  0x44   : > { %782 = vrot.lane.b32.xlu1 %v3031_v24, %s2884_s12  ;;  %780 = vrot.lane.b32.xlu0 %v3036_v25, %s2884_s12 }
  0x48   : > { %786 = vrot.lane.b32.xlu1 %v3043_v28, %s2884_s12  ;;  %784 = vrot.lane.b32.xlu0 %v3048_v29, %s2884_s12 }
  0x4c   : > { %790 = vrot.lane.b32.xlu1 %v3056_v33, %s2884_s12  ;;  %788 = vrot.lane.b32.xlu0 %v3061_v34, %s2884_s12 }
  0x50   : > { %794 = vrot.lane.b32.xlu1 %v3069_v38, %s2884_s12  ;;  %792 = vrot.lane.b32.xlu0 %v3074_v39, %s2884_s12 }
  0x54   : > { %798 = vrot.lane.b32.xlu1 %v3083_v46, %s2884_s12  ;;  %796 = vrot.lane.b32.xlu0 %v3088_v47, %s2884_s12 }
  0x58   : > { %800 = vrot.lane.b32.xlu1 %v3094_v53, %s2884_s12 }
  0x5c   : > { %802 = vrot.lane.b32.xlu1 %v3106_v61, %s2884_s12 }
  0x60   : > { %804 = vrot.lane.b32.xlu1 %v3115_v32, %s2884_s12 }
  0x64   : > { %806 = vrot.lane.b32.xlu1 %v3125_v45, %s2884_s12 }
  0x68   : > { %808 = vrot.lane.b32.xlu1 %v3137_v58, %s2884_s12 }
  0x6c   : > { %810 = vrot.lane.b32.xlu1 %v3149_v37, %s2884_s12 }
  0x70   : > { %812 = vrot.lane.b32.xlu1 %v3161_v56, %s2884_s12  ;;  %v416_v56 = vsel %vm395_vm0, %v414_v41, %v415_v35  ;;  %v418_v35 = vrot.slane %v2983_v14, 7  ;;  %v1122_v41 = vmul.f32 %v215_v27, %v215_v27  ;;  %v1851_v27 = vsel %vm1206_vm2, %v1608_v51, 0.0 }
  0x72   : > { %v1218_v40 = vsel %vm1206_vm2, %v1122_v41, 0.0  ;;  %v1220_v41 = vsel %vm1206_vm2, %v1123_v55, 0.0 }
  0x73   : > { %v1219_v36 = vadd.f32 %v1218_v40, %v1217_v60  ;;  %v3235_v60 = vld [vmem:[%s2910_s11 + $0x170] sm:$0xff] }
  0x74   : > { %814 = vrot.lane.b32.xlu1 %v3174_v42, %s2884_s12  ;;  %v649_v42 = vsub.f32 %v2973_v12, %v416_v56  ;;  %v1849_v56 = vsel %vm1832_vm3, %v1604_v26, 0.0  ;;  %v217_v26 = vsub.f32 %v2966_v11, %v2956_v9  ;;  %4937 = vst [vmem:[#allocation13_spill] sm:$0xff] %v3235_v60 }
  0x75   : > { %v1850_v62 = vadd.f32 %v1849_v56, %v1848_v49  ;;  %v3222_v49 = vld [vmem:[%s2910_s11 + $0x168] sm:$0xff]  ;;  %v218_v56 = vsub.f32 %v2963_v10, %v2953_v8 }
  0x76   : > { %v1411_v54 = vmul.f32 %v649_v42, %v649_v42  ;;  %4936 = vst [vmem:[#allocation12_spill] sm:$0xff] %v3222_v49 }
  0x77   : > { %v1852_v50 = vadd.f32 %v1851_v27, %v1850_v62  ;;  %v1221_v62 = vadd.f32 %v1220_v41, %v1219_v36  ;;  %v424_v36 = vrot.slane %v3003_v18, 7  ;;  %v3249_v41 = vld [vmem:[%s2910_s11 + $0x178] sm:$0xff] }
  0x78   : > { %816 = vrot.lane.b32.xlu1 %v3185_v57, %s2884_s12  ;;  %v419_v57 = vsel %vm395_vm0, %v417_v43, %v418_v35  ;;  %v1610_v42 = vrot.slane %v1411_v54, 1  ;;  %v421_v35 = vrot.slane %v2993_v16, 7  ;;  %v1124_v43 = vmul.f32 %v217_v26, %v217_v26 }
  0x79   : > { %v1125_v26 = vmul.f32 %v218_v56, %v218_v56  ;;  %v220_v56 = vsub.f32 %v2973_v12, %v2963_v10 }
  0x7a   : > { %v1611_v51 = vsel %vm1590_vm1, %v1609_v63, %v1610_v42  ;;  %v219_v63 = vsub.f32 %v2976_v13, %v2966_v11 }
  0x7c   : > { %818 = vrot.lane.b32.xlu1 %v3198_v44, %s2884_s12  ;;  %v651_v44 = vsub.f32 %v2983_v14, %v419_v57  ;;  %v1853_v57 = vsel %vm1832_vm3, %v1607_v30, 0.0  ;;  %v1222_v30 = vsel %vm1206_vm2, %v1124_v43, 0.0 }
  0x7d   : > { %v1854_v55 = vadd.f32 %v1853_v57, %v1852_v50  ;;  %v423_v50 = vrot.slane %v3006_v19, 7  ;;  %v1223_v43 = vadd.f32 %v1222_v30, %v1221_v62 }
  0x7e   : > { %v3229_v54 = vmul.f32 %v651_v44, %v651_v44  ;;  %v1855_v44 = vsel %vm1206_vm2, %v1611_v51, 0.0 }
  0x7f   : > { %v1856_v57 = vadd.f32 %v1855_v44, %v1854_v55  ;;  %v425_v62 = vsel %vm395_vm0, %v423_v50, %v424_v36  ;;  %v426_v36 = vrot.slane %v3016_v21, 7 }
  0x80   : > { %820 = vrot.lane.b32.xlu1 %v3209_v59, %s2884_s12  ;;  %v422_v59 = vsel %vm395_vm0, %v420_v48, %v421_v35  ;;  %v652_v35 = vsub.f32 %v2996_v17, %v420_v48 }
  0x81   : > { %v653_v37 = vsub.f32 %v2993_v16, %v422_v59  ;;  %v1224_v59 = vsel %vm1206_vm2, %v1125_v26, 0.0 }
  0x82   : > { %v1414_v32 = vmul.f32 %v652_v35, %v652_v35  ;;  %v427_v35 = vrot.slane %v3011_v20, 7 }
  0x83   : > { %v3258_v61 = vmul.f32 %v653_v37, %v653_v37  ;;  %v221_v37 = vsub.f32 %v2986_v15, %v2976_v13 }
  0x84   : > { %822 = vrot.lane.b32.xlu1 %v3222_v49, %s2884_s12  ;;  %v1613_v49 = vrot.slane %v3229_v54, 1  ;;  %v1126_v54 = vmul.f32 %v219_v63, %v219_v63 }
  0x86   : > { %v737_v40 = vpop.permute.xlu1 %736  ;;  %v733_v27 = vpop.permute.xlu0 %732  ;;  %v1614_v45 = vsel %vm1590_vm1, %v1612_v31, %v1613_v49  ;;  %v1615_v31 = vrot.slane %v1414_v32, 1 }
  0x87   : > { %v1020_v51 = vsub.f32 %v2916_v1, %v733_v27  ;;  %v1022_v1 = vsub.f32 %v2913_v0, %v737_v40  ;;  %v1225_v27 = vadd.f32 %v1224_v59, %v1223_v43  ;;  %v1859_v44 = vsel %vm1206_vm2, %v1614_v45, 0.0  ;;  %v3277_v43 = vld [vmem:[%s2910_s11 + $0x180] sm:$0xff] }
  0x88   : > { %824 = vrot.lane.b32.xlu1 %v3235_v60, %s2884_s12  ;;  %v1857_v60 = vsel %vm1832_vm3, %v1610_v42, 0.0  ;;  %v1127_v42 = vmul.f32 %v220_v56, %v220_v56  ;;  %v1616_v0 = vrot.slane %v3258_v61, 1  ;;  %v222_v61 = vsub.f32 %v2983_v14, %v2973_v12 }
  0x89   : > { %v1858_v26 = vadd.f32 %v1857_v60, %v1856_v57  ;;  %v2036_v30 = vmul.f32 %v1020_v51, %v1020_v51  ;;  %v655_v60 = vsub.f32 %v3003_v18, %v425_v62  ;;  %v2038_v56 = vmul.f32 %v1022_v1, %v1022_v1 }
  0x8a   : > { %v739_v52 = vpop.permute.xlu1 %738  ;;  %v735_v48 = vpop.permute.xlu0 %734  ;;  %v1228_v51 = vsel %vm1206_vm2, %v1127_v42, 0.0  ;;  %v1861_v59 = vsel %vm1832_vm3, %v1613_v49, 0.0  ;;  %v428_v1 = vsel %vm395_vm0, %v426_v36, %v427_v35 }
  0x8b   : > { %v1021_v58 = vsub.f32 %v2926_v3, %v735_v48  ;;  %v1226_v3 = vsel %vm1206_vm2, %v1126_v54, 0.0  ;;  %v1023_v45 = vsub.f32 %v2923_v2, %v739_v52  ;;  %v1128_v48 = vmul.f32 %v221_v37, %v221_v37 }
  0x8c   : > { %826 = vrot.lane.b32.xlu1 %v3249_v41, %s2884_s12  ;;  %v1227_v32 = vadd.f32 %v1226_v3, %v1225_v27  ;;  %v1617_v2 = vsel %vm1590_vm1, %v1615_v31, %v1616_v0  ;;  %v3288_v62 = vmul.f32 %v655_v60, %v655_v60  ;;  %v3294_v27 = vld [vmem:[%s2910_s11 + $0x188] sm:$0xff]  ;;  %v223_v3 = vsub.f32 %v2996_v17, %v2986_v15 }
  0x8d   : > { %v2037_v55 = vmul.f32 %v1021_v58, %v1021_v58  ;;  %v654_v58 = vsub.f32 %v3006_v19, %v423_v50  ;;  %v1860_v50 = vadd.f32 %v1859_v44, %v1858_v26  ;;  %v1129_v26 = vmul.f32 %v222_v61, %v222_v61 }
  0x8e   : > { %v743_v63 = vpop.permute.xlu1 %742  ;;  %v741_v40 = vpop.permute.xlu0 %740  ;;  %v1863_v37 = vsel %vm1206_vm2, %v1617_v2, 0.0  ;;  %v656_v60 = vsub.f32 %v3016_v21, %v426_v36  ;;  %v1865_v2 = vsel %vm1832_vm3, %v1616_v0, 0.0 }
  0x8f   : > { %2230 = vrot.lane.b32.xlu0 %v2037_v55, %s2885_s13  ;;  %v1024_v54 = vsub.f32 %v2936_v5, %v741_v40  ;;  %v1416_v52 = vmul.f32 %v654_v58, %v654_v58  ;;  %v2039_v55 = vmul.f32 %v1023_v45, %v1023_v45  ;;  %v1862_v49 = vadd.f32 %v1861_v59, %v1860_v50 }
  0x90   : > { %2228 = vrot.lane.b32.xlu1 %v2036_v30, %s2885_s13  ;;  %v1229_v30 = vadd.f32 %v1228_v51, %v1227_v32  ;;  %v1230_v5 = vsel %vm1206_vm2, %v1128_v48, 0.0  ;;  %v1619_v58 = vrot.slane %v3288_v62, 1  ;;  %v657_v40 = vsub.f32 %v3011_v20, %v428_v1  ;;  %v3312_v32 = vld [vmem:[%s2910_s11 + $0x190] sm:$0xff] }
  0x91   : > { %v2040_v44 = vmul.f32 %v1024_v54, %v1024_v54  ;;  %v1618_v31 = vrot.slane %v1416_v52, 1  ;;  %v429_v45 = vrot.slane %v3026_v23, 7  ;;  %v1025_v61 = vsub.f32 %v2933_v4, %v743_v63 }
  0x92   : > { %v3281_v57 = vpop.permute.xlu1 %746  ;;  %v745_v35 = vpop.permute.xlu0 %744  ;;  %v224_v50 = vsub.f32 %v2993_v16, %v2983_v14  ;;  %v1231_v51 = vadd.f32 %v1230_v5, %v1229_v30  ;;  %v1864_v36 = vadd.f32 %v1863_v37, %v1862_v49  ;;  %v1232_v59 = vsel %vm1206_vm2, %v1129_v26, 0.0  ;;  %v3329_v30 = vld [vmem:[%s2910_s11 + $0x198] sm:$0xff] }
  0x93   : > { %2232 = vrot.lane.b32.xlu0 %v2038_v56, %s2885_s13  ;;  %v430_v56 = vrot.slane %v3021_v22, 7  ;;  %v1130_v54 = vmul.f32 %v223_v3, %v223_v3  ;;  %v1026_v52 = vsub.f32 %v2946_v7, %v745_v35  ;;  %v1620_v4 = vsel %vm1590_vm1, %v1618_v31, %v1619_v58 }
  0x94   : > { %828 = vrot.lane.b32.xlu1 %v3277_v43, %s2884_s12  ;;  %v1418_v63 = vmul.f32 %v656_v60, %v656_v60  ;;  %v3323_v62 = vmul.f32 %v657_v40, %v657_v40  ;;  %v1131_v26 = vmul.f32 %v224_v50, %v224_v50  ;;  %v1233_v49 = vadd.f32 %v1232_v59, %v1231_v51 }
  0x95   : > { %v431_v1 = vsel %vm395_vm0, %v429_v45, %v430_v56  ;;  %v1866_v0 = vadd.f32 %v1865_v2, %v1864_v36  ;;  %v1234_v7 = vsel %vm1206_vm2, %v1130_v54, 0.0  ;;  %v225_v3 = vsub.f32 %v3006_v19, %v2996_v17  ;;  %v3348_v36 = vld [vmem:[%s2910_s11 + $0x1a0] sm:$0xff] }
  0x96   : > { %v3296_v42 = vpop.permute.xlu1 %750  ;;  %v1867_v37 = vsel %vm1206_vm2, %v1620_v4, 0.0  ;;  %v1621_v31 = vrot.slane %v1418_v63, 1  ;;  %v1622_v60 = vrot.slane %v3323_v62, 1  ;;  %v658_v40 = vsub.f32 %v3026_v23, %v429_v45  ;;  %v749_v56 = vpop.permute.xlu0 %748 }
  0x97   : > { %2234 = vrot.lane.b32.xlu0 %v2039_v55, %s2885_s13  ;;  %v2041_v55 = vmul.f32 %v1025_v61, %v1025_v61  ;;  %v659_v35 = vsub.f32 %v3021_v22, %v431_v1  ;;  %v433_v61 = vrot.slane %v3031_v24, 7  ;;  %v432_v50 = vrot.slane %v3036_v25, 7 }
  0x98   : > { %830 = vrot.lane.b32.xlu1 %v3294_v27, %s2884_s12  ;;  %v1027_v51 = vsub.f32 %v2943_v6, %v3281_v57  ;;  %v226_v59 = vsub.f32 %v3003_v18, %v2993_v16  ;;  %v1235_v45 = vadd.f32 %v1234_v7, %v1233_v49  ;;  %v1868_v54 = vadd.f32 %v1867_v37, %v1866_v0  ;;  %v3365_v0 = vld [vmem:[%s2910_s11 + $0x1a8] sm:$0xff] }
  0x99   : > { %v1132_v4 = vmul.f32 %v225_v3, %v225_v3  ;;  %v1869_v63 = vsel %vm1832_vm3, %v1619_v58, 0.0  ;;  %v1028_v62 = vsub.f32 %v2956_v9, %v749_v56  ;;  %v1623_v6 = vsel %vm1590_vm1, %v1621_v31, %v1622_v60 }
  0x9a   : > { %v3316_v48 = vpop.permute.xlu1 %754  ;;  %v1420_v57 = vmul.f32 %v658_v40, %v658_v40  ;;  %v3359_v1 = vmul.f32 %v659_v35, %v659_v35  ;;  %v2043_v49 = vmul.f32 %v1027_v51, %v1027_v51  ;;  %v1870_v58 = vadd.f32 %v1869_v63, %v1868_v54  ;;  %v753_v51 = vpop.permute.xlu0 %752 }
  0x9b   : > { %2236 = vrot.lane.b32.xlu0 %v2040_v44, %s2885_s13  ;;  %v2042_v44 = vmul.f32 %v1026_v52, %v1026_v52  ;;  %v1236_v52 = vsel %vm1206_vm2, %v1131_v26, 0.0  ;;  %v1133_v26 = vmul.f32 %v226_v59, %v226_v59  ;;  %v1238_v9 = vsel %vm1206_vm2, %v1132_v4, 0.0 }
  0x9c   : > { %832 = vrot.lane.b32.xlu1 %v3312_v32, %s2884_s12  ;;  %v1237_v7 = vadd.f32 %v1236_v52, %v1235_v45  ;;  %v227_v37 = vsub.f32 %v3016_v21, %v3006_v19  ;;  %v2044_v31 = vmul.f32 %v1028_v62, %v1028_v62  ;;  %v1624_v40 = vrot.slane %v1420_v57, 1  ;;  %v3384_v52 = vld [vmem:[%s2910_s11 + $0x1b0] sm:$0xff] }
  0x9d   : > { %v1625_v35 = vrot.slane %v3359_v1, 1  ;;  %v660_v56 = vsub.f32 %v3036_v25, %v432_v50  ;;  %v436_v59 = vrot.slane %v3043_v28, 7  ;;  %v435_v45 = vrot.slane %v3048_v29, 7 }
  0x9e   : > { %v3331_v5 = vpop.permute.xlu1 %758  ;;  %v1029_v54 = vsub.f32 %v2953_v8, %v3296_v42  ;;  %v228_v4 = vsub.f32 %v3011_v20, %v3003_v18  ;;  %v1134_v57 = vmul.f32 %v227_v37, %v227_v37  ;;  %v1873_v1 = vsel %vm1832_vm3, %v1622_v60, 0.0 }
  0x9f   : > { %2238 = vrot.lane.b32.xlu0 %v2041_v55, %s2885_s13  ;;  %v434_v55 = vsel %vm395_vm0, %v432_v50, %v433_v61  ;;  %v1239_v50 = vadd.f32 %v1238_v9, %v1237_v7  ;;  %v1626_v8 = vsel %vm1590_vm1, %v1624_v40, %v1625_v35  ;;  %v1422_v42 = vmul.f32 %v660_v56, %v660_v56 }
  0xa0   : > { %834 = vrot.lane.b32.xlu1 %v3329_v30, %s2884_s12  ;;  %v661_v61 = vsub.f32 %v3031_v24, %v434_v55  ;;  %v1030_v55 = vsub.f32 %v2966_v11, %v753_v51  ;;  %v437_v18 = vsel %vm395_vm0, %v435_v45, %v436_v59  ;;  %v2045_v7 = vmul.f32 %v1029_v54, %v1029_v54  ;;  %v757_v54 = vpop.permute.xlu0 %756 }
  0xa1   : > { %v1242_v11 = vsel %vm1206_vm2, %v1134_v57, 0.0  ;;  %v1627_v56 = vrot.slane %v1422_v42, 1  ;;  %v662_v51 = vsub.f32 %v3048_v29, %v435_v45  ;;  %v663_v59 = vsub.f32 %v3043_v28, %v437_v18 }
  0xa2   : > { %v3352_v2 = vpop.permute.xlu1 %762  ;;  %v2046_v40 = vmul.f32 %v1030_v55, %v1030_v55  ;;  %v1877_v42 = vsel %vm1832_vm3, %v1625_v35, 0.0 }
  0xa3   : > { %2240 = vrot.lane.b32.xlu0 %v2042_v44, %s2885_s13  ;;  %v1871_v44 = vsel %vm1206_vm2, %v1623_v6, 0.0  ;;  %v1240_v6 = vsel %vm1206_vm2, %v1133_v26, 0.0  ;;  %v1135_v26 = vmul.f32 %v228_v4, %v228_v4  ;;  %v439_v4 = vrot.slane %v3056_v33, 7 }
  0xa4   : > { %836 = vrot.lane.b32.xlu1 %v3348_v36, %s2884_s12  ;;  %v1872_v63 = vadd.f32 %v1871_v44, %v1870_v58  ;;  %v3401_v58 = vld [vmem:[%s2910_s11 + $0x1b8] sm:$0xff]  ;;  %v1241_v9 = vadd.f32 %v1240_v6, %v1239_v50  ;;  %v229_v44 = vsub.f32 %v3026_v23, %v3016_v21  ;;  %v438_v21 = vrot.slane %v3061_v34, 7 }
  0xa5   : > { %v1031_v50 = vsub.f32 %v2963_v10, %v3316_v48  ;;  %v230_v6 = vsub.f32 %v3021_v22, %v3011_v20  ;;  %v1244_v55 = vsel %vm1206_vm2, %v1135_v26, 0.0  ;;  %v1424_v48 = vmul.f32 %v662_v51, %v662_v51 }
  0xa6   : > { %v3367_v3 = vpop.permute.xlu1 %766  ;;  %v1874_v60 = vadd.f32 %v1873_v1, %v1872_v63  ;;  %v3420_v63 = vld [vmem:[%s2910_s11 + $0x1c0] sm:$0xff]  ;;  %v1243_v45 = vadd.f32 %v1242_v11, %v1241_v9  ;;  %v3431_v18 = vmul.f32 %v663_v59, %v663_v59  ;;  %v440_v20 = vsel %vm395_vm0, %v438_v21, %v439_v4  ;;  %v3437_v9 = vld [vmem:[%s2910_s11 + $0x1c8] sm:$0xff]  ;;  %v761_v4 = vpop.permute.xlu0 %760 }
  0xa7   : > { %2242 = vrot.lane.b32.xlu0 %v2043_v49, %s2885_s13  ;;  %v3395_v49 = vmul.f32 %v661_v61, %v661_v61  ;;  %v1137_v26 = vmul.f32 %v230_v6, %v230_v6  ;;  %v664_v59 = vsub.f32 %v3061_v34, %v438_v21  ;;  %v1033_v6 = vsub.f32 %v2973_v12, %v3331_v5 }
  0xa8   : > { %838 = vrot.lane.b32.xlu1 %v3365_v0, %s2884_s12  ;;  %v1631_v51 = vrot.slane %v3431_v18, 1 }
  0xa9   : > { %v1628_v61 = vrot.slane %v3395_v49, 1  ;;  %v1032_v49 = vsub.f32 %v2976_v13, %v757_v54  ;;  %v665_v54 = vsub.f32 %v3056_v33, %v440_v20  ;;  %v1426_v5 = vmul.f32 %v664_v59, %v664_v59 }
  0xaa   : > { %v3388_v62 = vpop.permute.xlu1 %770  ;;  %v2049_v20 = vmul.f32 %v1033_v6, %v1033_v6  ;;  %v1035_v6 = vsub.f32 %v2983_v14, %v3352_v2 }
  0xab   : > { %2244 = vrot.lane.b32.xlu0 %v2044_v31, %s2885_s13  ;;  %v1875_v31 = vsel %vm1206_vm2, %v1626_v8, 0.0  ;;  %v1136_v8 = vmul.f32 %v229_v44, %v229_v44  ;;  %v1629_v10 = vsel %vm1590_vm1, %v1627_v56, %v1628_v61  ;;  %v231_v44 = vsub.f32 %v3036_v25, %v3026_v23 }
  0xac   : > { %840 = vrot.lane.b32.xlu1 %v3384_v52, %s2884_s12  ;;  %v1876_v57 = vadd.f32 %v1875_v31, %v1874_v60  ;;  %v1245_v60 = vadd.f32 %v1244_v55, %v1243_v45  ;;  %v1879_v31 = vsel %vm1206_vm2, %v1629_v10, 0.0  ;;  %v1630_v56 = vrot.slane %v1424_v48, 1  ;;  %v3456_v45 = vld [vmem:[%s2910_s11 + $0x1d0] sm:$0xff] }
  0xad   : > { %v1246_v13 = vsel %vm1206_vm2, %v1136_v8, 0.0  ;;  %v441_v23 = vrot.slane %v3074_v39, 7  ;;  %v1881_v10 = vsel %vm1832_vm3, %v1628_v61, 0.0  ;;  %v1034_v48 = vsub.f32 %v2986_v15, %v761_v4  ;;  %v765_v4 = vpop.permute.xlu0 %764 }
  0xae   : > { %v3403_v37 = vpop.permute.xlu1 %774  ;;  %v1878_v35 = vadd.f32 %v1877_v42, %v1876_v57  ;;  %v232_v57 = vsub.f32 %v3031_v24, %v3021_v22  ;;  %v1247_v21 = vadd.f32 %v1246_v13, %v1245_v60  ;;  %v1248_v42 = vsel %vm1206_vm2, %v1137_v26, 0.0 }
  0xaf   : > { %2246 = vrot.lane.b32.xlu0 %v2045_v7, %s2885_s13  ;;  %v2047_v7 = vmul.f32 %v1031_v50, %v1031_v50  ;;  %v442_v50 = vrot.slane %v3069_v38, 7  ;;  %v1632_v12 = vsel %vm1590_vm1, %v1630_v56, %v1631_v51  ;;  %v3467_v18 = vmul.f32 %v665_v54, %v665_v54 }
  0xb0   : > { %842 = vrot.lane.b32.xlu1 %v3401_v58, %s2884_s12  ;;  %v1880_v55 = vadd.f32 %v1879_v31, %v1878_v35  ;;  %v1139_v26 = vmul.f32 %v232_v57, %v232_v57  ;;  %v1249_v60 = vadd.f32 %v1248_v42, %v1247_v21  ;;  %v233_v13 = vsub.f32 %v3048_v29, %v3036_v25  ;;  %v3492_v57 = vld [vmem:[%s2910_s11 + $0x1e0] sm:$0xff] }
  0xb1   : > { %v443_v22 = vsel %vm395_vm0, %v441_v23, %v442_v50  ;;  %v2050_v31 = vmul.f32 %v1034_v48, %v1034_v48  ;;  %v1634_v56 = vrot.slane %v3467_v18, 1  ;;  %v666_v59 = vsub.f32 %v3074_v39, %v441_v23  ;;  %4938 = vst [vmem:[#allocation14_spill] sm:$0xff] %v3492_v57 }
  0xb2   : > { %v3424_v1 = vpop.permute.xlu1 %778  ;;  %v1882_v61 = vadd.f32 %v1881_v10, %v1880_v55  ;;  %v667_v54 = vsub.f32 %v3069_v38, %v443_v22  ;;  %v445_v50 = vrot.slane %v3083_v46, 7  ;;  %v444_v25 = vrot.slane %v3088_v47, 7  ;;  %v3509_v22 = vld [vmem:[%s2910_s11 + $0x1e8] sm:$0xff] }
  0xb3   : > { %2248 = vrot.lane.b32.xlu0 %v2046_v40, %s2885_s13  ;;  %v2048_v40 = vmul.f32 %v1032_v49, %v1032_v49  ;;  %v1138_v49 = vmul.f32 %v231_v44, %v231_v44  ;;  %v1883_v44 = vsel %vm1206_vm2, %v1632_v12, 0.0  ;;  %v234_v21 = vsub.f32 %v3043_v28, %v3031_v24  ;;  %4939 = vst [vmem:[#allocation15_spill] sm:$0xff] %v3509_v22 }
  0xb4   : > { %844 = vrot.lane.b32.xlu1 %v3420_v63, %s2884_s12  ;;  %v1884_v55 = vadd.f32 %v1883_v44, %v1882_v61  ;;  %v1140_v10 = vmul.f32 %v233_v13, %v233_v13  ;;  %v1885_v48 = vsel %vm1832_vm3, %v1631_v51, 0.0  ;;  %v1036_v12 = vsub.f32 %v2996_v17, %v765_v4 }
  0xb5   : > { %v1250_v15 = vsel %vm1206_vm2, %v1138_v49, 0.0  ;;  %v1252_v49 = vsel %vm1206_vm2, %v1139_v26, 0.0  ;;  %v1428_v2 = vmul.f32 %v666_v59, %v666_v59  ;;  %v446_v24 = vsel %vm395_vm0, %v444_v25, %v445_v50  ;;  %v4940_v50 = vld [vmem:[#allocation2_spill] sm:$0xff] }
  0xb6   : > { %v3439_v11 = vpop.permute.xlu1 %782  ;;  %v1251_v23 = vadd.f32 %v1250_v15, %v1249_v60  ;;  %v2051_v18 = vmul.f32 %v1035_v6, %v1035_v6  ;;  %v1886_v51 = vadd.f32 %v1885_v48, %v1884_v55  ;;  %v1254_v17 = vsel %vm1206_vm2, %v1140_v10, 0.0 }
  0xb7   : > { %2250 = vrot.lane.b32.xlu0 %v2047_v7, %s2885_s13  ;;  %v3473_v7 = vld [vmem:[%s2910_s11 + $0x1d8] sm:$0xff]  ;;  %v235_v61 = vsub.f32 %v3061_v34, %v3048_v29  ;;  %v2052_v13 = vmul.f32 %v1036_v12, %v1036_v12  ;;  %v1636_v44 = vrot.slane %v1428_v2, 1  ;;  %v669_v59 = vsub.f32 %v3083_v46, %v446_v24 }
  0xb8   : > { %846 = vrot.lane.b32.xlu1 %v3437_v9, %s2884_s12  ;;  %v1253_v26 = vadd.f32 %v1252_v49, %v1251_v23  ;;  %v447_v4 = vrot.slane %v3094_v53, 7  ;;  %v448_v29 = vrot.slane %v4940_v50, 7  ;;  %v1037_v6 = vsub.f32 %v2993_v16, %v3367_v3 }
  0xb9   : > { %v236_v23 = vsub.f32 %v3056_v33, %v3043_v28  ;;  %v1142_v10 = vmul.f32 %v235_v61, %v235_v61  ;;  %v1889_v48 = vsel %vm1832_vm3, %v1634_v56, 0.0 }
  0xba   : > { %v3460_v8 = vpop.permute.xlu1 %786  ;;  %v449_v28 = vsel %vm395_vm0, %v447_v4, %v448_v29  ;;  %v2053_v2 = vmul.f32 %v1037_v6, %v1037_v6  ;;  %v670_v61 = vsub.f32 %v3094_v53, %v447_v4  ;;  %v2799_v29 = vld [vmem:[%s2910_s11 + $0x98] sm:$0xff]  ;;  %v238_v4 = vsub.f32 %v3069_v38, %v3056_v33 }
  0xbb   : > { %2252 = vrot.lane.b32.xlu0 %v2048_v40, %s2885_s13  ;;  %v1633_v40 = vrot.slane %v1426_v5, 1  ;;  %v3503_v5 = vmul.f32 %v667_v54, %v667_v54  ;;  %v769_v54 = vpop.permute.xlu0 %768  ;;  %v1143_v24 = vmul.f32 %v236_v23, %v236_v23  ;;  %v1039_v6 = vsub.f32 %v2799_v29, %v3388_v62  ;;  %v3564_v23 = vld [vmem:[%s2910_s11 + $0x200] sm:$0xff]  ;;  %v4947_v29 = vld [vmem:[#allocation5_spill] sm:$0xff] }
  0xbc   : > { %848 = vrot.lane.b32.xlu1 %v3456_v45, %s2884_s12  ;;  %v1038_v12 = vsub.f32 %v3006_v19, %v769_v54  ;;  %v1258_v19 = vsel %vm1206_vm2, %v1142_v10, 0.0  ;;  %v1432_v62 = vmul.f32 %v670_v61, %v670_v61 }
  0xbd   : > { %v1635_v14 = vsel %vm1590_vm1, %v1633_v40, %v1634_v56  ;;  %v668_v40 = vsub.f32 %v3088_v47, %v444_v25  ;;  %v1255_v25 = vadd.f32 %v1254_v17, %v1253_v26  ;;  %v237_v26 = vsub.f32 %v3074_v39, %v3061_v34  ;;  %v4944_v34 = vld [vmem:[#allocation4_spill] sm:$0xff] }
  0xbe   : > { %v3475_v35 = vpop.permute.xlu1 %790  ;;  %v1887_v15 = vsel %vm1206_vm2, %v1635_v14, 0.0  ;;  %v3539_v14 = vmul.f32 %v669_v59, %v669_v59  ;;  %v2054_v17 = vmul.f32 %v1038_v12, %v1038_v12  ;;  %v4943_v59 = vld [vmem:[#allocation3_spill] sm:$0xff]  ;;  %v451_v39 = vrot.slane %v4944_v34, 7 }
  0xbf   : > { %2254 = vrot.lane.b32.xlu0 %v2049_v20, %s2885_s13  ;;  %v1141_v20 = vmul.f32 %v234_v21, %v234_v21  ;;  %v3528_v21 = vld [vmem:[%s2910_s11 + $0x1f0] sm:$0xff]  ;;  %v1888_v55 = vadd.f32 %v1887_v15, %v1886_v51  ;;  %v1430_v3 = vmul.f32 %v668_v40, %v668_v40  ;;  %v671_v15 = vsub.f32 %v4940_v50, %v449_v28  ;;  %v773_v40 = vpop.permute.xlu0 %772 }
  0xc0   : > { %850 = vrot.lane.b32.xlu1 %v3473_v7, %s2884_s12  ;;  %4941 = vst [vmem:[#allocation2_spill] sm:$0xff] %v3528_v21  ;;  %v450_v54 = vrot.slane %v4943_v59, 7  ;;  %4945 = vst [vmem:[#allocation3_spill] sm:$0xff] %v3564_v23  ;;  %v1144_v10 = vmul.f32 %v237_v26, %v237_v26  ;;  %v2055_v38 = vmul.f32 %v1039_v6, %v1039_v6  ;;  %v1642_v61 = vrot.slane %v1432_v62, 1 }
  0xc1   : > { %v1256_v49 = vsel %vm1206_vm2, %v1141_v20, 0.0  ;;  %v1890_v56 = vadd.f32 %v1889_v48, %v1888_v55  ;;  %v1260_v48 = vsel %vm1206_vm2, %v1143_v24, 0.0  ;;  %v1145_v24 = vmul.f32 %v238_v4, %v238_v4  ;;  %v2801_v4 = vld [vmem:[%s2910_s11 + $0xa8] sm:$0xff] }
  0xc2   : > { %v3496_v42 = vpop.permute.xlu1 %794  ;;  %v452_v33 = vsel %vm395_vm0, %v450_v54, %v451_v39  ;;  %v239_v26 = vsub.f32 %v3094_v53, %v3088_v47  ;;  %v453_v6 = vrot.slane %v4947_v29, 7  ;;  %v4948_v47 = vld [vmem:[#allocation6_spill] sm:$0xff] }
  0xc3   : > { %2256 = vrot.lane.b32.xlu0 %v2050_v31, %s2885_s13  ;;  %v1637_v31 = vrot.slane %v3503_v5, 1  ;;  %v3545_v5 = vld [vmem:[%s2910_s11 + $0x1f8] sm:$0xff]  ;;  %v777_v39 = vpop.permute.xlu0 %776  ;;  %v454_v53 = vrot.slane %v4948_v47, 7 }
  0xc4   : > { %852 = vrot.lane.b32.xlu1 %v3492_v57, %s2884_s12  ;;  %4942 = vst [vmem:[#allocation16_spill] sm:$0xff] %v3545_v5 }
  0xc5   : > { %v1638_v16 = vsel %vm1590_vm1, %v1636_v44, %v1637_v31  ;;  %v1640_v44 = vrot.slane %v3539_v14, 1  ;;  %v1893_v12 = vsel %vm1832_vm3, %v1637_v31, 0.0  ;;  %v3574_v14 = vmul.f32 %v671_v15, %v671_v15 }
  0xc6   : > { %v3511_v60 = vpop.permute.xlu1 %798  ;;  %v1891_v51 = vsel %vm1206_vm2, %v1638_v16, 0.0  ;;  %v2800_v16 = vld [vmem:[%s2910_s11 + $0xa0] sm:$0xff] }
  0xc7   : > { %2258 = vrot.lane.b32.xlu0 %v2051_v18, %s2885_s13  ;;  %v1257_v18 = vadd.f32 %v1256_v49, %v1255_v25  ;;  %v1892_v55 = vadd.f32 %v1891_v51, %v1890_v56  ;;  %v1643_v15 = vrot.slane %v3574_v14, 1 }
  0xc8   : > { %854 = vrot.lane.b32.xlu1 %v3509_v22, %s2884_s12 }
  0xc9   : > { %v1259_v25 = vadd.f32 %v1258_v19, %v1257_v18  ;;  %v1894_v31 = vadd.f32 %v1893_v12, %v1892_v55  ;;  %v1262_v19 = vsel %vm1206_vm2, %v1144_v10, 0.0  ;;  %v3600_v55 = vld [vmem:[%s2910_s11 + $0x210] sm:$0xff]  ;;  %v3603_v10 = vld [vmem:[%s2910_s11 + $0x108] sm:$0xff]  ;;  %v1264_v12 = vsel %vm1206_vm2, %v1145_v24, 0.0  ;;  %v3620_v24 = vld [vmem:[%s2910_s11 + $0x218] sm:$0xff] }
  0xca   : > { %v3532_v46 = vpop.permute.xlu1 %800  ;;  %4949 = vst [vmem:[#allocation5_spill] sm:$0xff] %v3600_v55  ;;  %v1644_v14 = vsel %vm1590_vm1, %v1642_v61, %v1643_v15  ;;  %4950 = vst [vmem:[#allocation6_spill] sm:$0xff] %v3620_v24 }
  0xcb   : > { %2260 = vrot.lane.b32.xlu0 %v2052_v13, %s2885_s13  ;;  %v1639_v13 = vrot.slane %v1430_v3, 1  ;;  %v1040_v3 = vsub.f32 %v2800_v16, %v773_v40  ;;  %v1261_v18 = vadd.f32 %v1260_v48, %v1259_v25  ;;  %v673_v40 = vsub.f32 %v4944_v34, %v452_v33 }
  0xcc   : > { %856 = vrot.lane.b32.xlu1 %v3528_v21, %s2884_s12  ;;  %v1041_v25 = vsub.f32 %v2801_v4, %v3403_v37  ;;  %v1146_v16 = vmul.f32 %v239_v26, %v239_v26  ;;  %v2803_v37 = vld [vmem:[%s2910_s11 + $0xb0] sm:$0xff]  ;;  %v455_v33 = vsel %vm395_vm0, %v453_v6, %v454_v53  ;;  %v1899_v26 = vsel %vm1206_vm2, %v1644_v14, 0.0 }
  0xcd   : > { %v1641_v28 = vsel %vm1590_vm1, %v1639_v13, %v1640_v44  ;;  %v672_v13 = vsub.f32 %v4943_v59, %v450_v54  ;;  %v240_v59 = vsub.f32 %v4940_v50, %v3603_v10  ;;  %v1263_v54 = vadd.f32 %v1262_v19, %v1261_v18 }
  0xce   : > { %v3547_v20 = vpop.permute.xlu1 %802  ;;  %v1895_v51 = vsel %vm1206_vm2, %v1641_v28, 0.0  ;;  %v1042_v62 = vsub.f32 %v2803_v37, %v777_v39  ;;  %v3614_v50 = vmul.f32 %v673_v40, %v673_v40  ;;  %v674_v4 = vsub.f32 %v4947_v29, %v453_v6 }
  0xcf   : > { %2262 = vrot.lane.b32.xlu0 %v2053_v2, %s2885_s13  ;;  %v3581_v2 = vld [vmem:[%s2910_s11 + $0x208] sm:$0xff]  ;;  %v1896_v34 = vadd.f32 %v1895_v51, %v1894_v31  ;;  %v1434_v28 = vmul.f32 %v672_v13, %v672_v13  ;;  %v1265_v18 = vadd.f32 %v1264_v12, %v1263_v54  ;;  %v3626_v51 = vld [vmem:[%s2910_s11 + $0x110] sm:$0xff]  ;;  %v1266_v13 = vsel %vm1206_vm2, %v1146_v16, 0.0 }
  0xd0   : > { %858 = vrot.lane.b32.xlu1 %v3545_v5, %s2884_s12  ;;  %4946 = vst [vmem:[#allocation4_spill] sm:$0xff] %v3581_v2  ;;  %v2058_v40 = vmul.f32 %v1042_v62, %v1042_v62  ;;  %v1646_v53 = vrot.slane %v3614_v50, 1  ;;  %v4951_v54 = vld [vmem:[#allocation7_spill] sm:$0xff]  ;;  %v4952_v12 = vld [vmem:[#allocation8_spill] sm:$0xff]  ;;  %v3645_v62 = vld [vmem:[%s2910_s11 + $0x220] sm:$0xff] }
  0xd1   : > { %v1645_v39 = vrot.slane %v1434_v28, 1  ;;  %v457_v16 = vrot.slane %v4952_v12, 7  ;;  %4953 = vst [vmem:[#allocation7_spill] sm:$0xff] %v3645_v62  ;;  %v1267_v29 = vadd.f32 %v1266_v13, %v1265_v18  ;;  %v1901_v28 = vsel %vm1832_vm3, %v1643_v15, 0.0  ;;  %v3668_v13 = vld [vmem:[%s2910_s11 + $0x228] sm:$0xff] }
  0xd2   : > { %v3568_v49 = vpop.permute.xlu1 %804  ;;  %4954 = vst [vmem:[#allocation8_spill] sm:$0xff] %v3668_v13 }
  0xd3   : > { %2264 = vrot.lane.b32.xlu0 %v2054_v17, %s2885_s13  ;;  %v2056_v17 = vmul.f32 %v1040_v3, %v1040_v3  ;;  %v1897_v3 = vsel %vm1832_vm3, %v1640_v44, 0.0  ;;  %v1147_v44 = vmul.f32 %v240_v59, %v240_v59  ;;  %v781_v59 = vpop.permute.xlu0 %780  ;;  %v1647_v18 = vsel %vm1590_vm1, %v1645_v39, %v1646_v53 }
  0xd4   : > { %860 = vrot.lane.b32.xlu1 %v3564_v23, %s2884_s12  ;;  %v1898_v31 = vadd.f32 %v1897_v3, %v1896_v34  ;;  %v456_v34 = vrot.slane %v4951_v54, 7  ;;  %v2806_v3 = vld [vmem:[%s2910_s11 + $0xb8] sm:$0xff] }
  0xd5   : > { %v1043_v37 = vsub.f32 %v2806_v3, %v3424_v1  ;;  %v1268_v14 = vsel %vm1206_vm2, %v1147_v44, 0.0  ;;  %v2809_v3 = vld [vmem:[%s2910_s11 + $0xc0] sm:$0xff] }
  0xd6   : > { %v3583_v56 = vpop.permute.xlu1 %806  ;;  %v1900_v6 = vadd.f32 %v1899_v26, %v1898_v31  ;;  %v1044_v44 = vsub.f32 %v2809_v3, %v781_v59  ;;  %v1436_v31 = vmul.f32 %v674_v4, %v674_v4  ;;  %v458_v15 = vsel %vm395_vm0, %v456_v34, %v457_v16 }
  0xd7   : > { %2266 = vrot.lane.b32.xlu0 %v2055_v38, %s2885_s13  ;;  %v2057_v38 = vmul.f32 %v1041_v25, %v1041_v25  ;;  %v675_v25 = vsub.f32 %v4948_v47, %v455_v33  ;;  %v3652_v33 = vld [vmem:[%s2910_s11 + $0x118] sm:$0xff]  ;;  %v1903_v3 = vsel %vm1206_vm2, %v1647_v18, 0.0 }
  0xd8   : > { %862 = vrot.lane.b32.xlu1 %v3581_v2, %s2884_s12  ;;  %v1902_v59 = vadd.f32 %v1901_v28, %v1900_v6  ;;  %v2060_v16 = vmul.f32 %v1044_v44, %v1044_v44  ;;  %v676_v2 = vsub.f32 %v4951_v54, %v456_v34  ;;  %v4955_v6 = vld [vmem:[#allocation9_spill] sm:$0xff]  ;;  %v2811_v44 = vld [vmem:[%s2910_s11 + $0xc8] sm:$0xff] }
  0xd9   : > { %v3662_v26 = vmul.f32 %v675_v25, %v675_v25  ;;  %v459_v28 = vrot.slane %v4955_v6, 7  ;;  %v1045_v18 = vsub.f32 %v2811_v44, %v3439_v11  ;;  %v2813_v11 = vld [vmem:[%s2910_s11 + $0xd0] sm:$0xff] }
  0xda   : > { %v3607_v48 = vpop.permute.xlu1 %808  ;;  %v1904_v54 = vadd.f32 %v1903_v3, %v1902_v59 }
  0xdb   : > { %2268 = vrot.lane.b32.xlu0 %v2056_v17, %s2885_s13  ;;  %v3629_v17 = vld [vmem:[%s2910_s11 + $0x120] sm:$0xff] }
  0xdc   : > { %864 = vrot.lane.b32.xlu1 %v3600_v55, %s2884_s12  ;;  %v241_v61 = vsub.f32 %v3629_v17, %v3626_v51  ;;  %v1269_v55 = vadd.f32 %v1268_v14, %v1267_v29  ;;  %v677_v14 = vsub.f32 %v4952_v12, %v458_v15  ;;  %v785_v29 = vpop.permute.xlu0 %784  ;;  %v1905_v15 = vsel %vm1832_vm3, %v1646_v53, 0.0 }
  0xdd   : > { %v1046_v44 = vsub.f32 %v2813_v11, %v785_v29  ;;  %v1906_v23 = vadd.f32 %v1905_v15, %v1904_v54  ;;  %v3724_v54 = vld [vmem:[%s2910_s11 + $0x150] sm:$0xff] }
  0xde   : > { %v3622_v19 = vpop.permute.xlu1 %810  ;;  %v1148_v50 = vmul.f32 %v241_v61, %v241_v61  ;;  %v2059_v61 = vmul.f32 %v1043_v37, %v1043_v37  ;;  %v1648_v37 = vrot.slane %v1436_v31, 1  ;;  %v3690_v31 = vld [vmem:[%s2910_s11 + $0x230] sm:$0xff]  ;;  %v3704_v59 = vmul.f32 %v677_v14, %v677_v14  ;;  %v3717_v14 = vld [vmem:[%s2910_s11 + $0x140] sm:$0xff] }
  0xdf   : > { %2270 = vrot.lane.b32.xlu0 %v2057_v38, %s2885_s13  ;;  %v3655_v38 = vld [vmem:[%s2910_s11 + $0x128] sm:$0xff]  ;;  %4957 = vst [vmem:[#allocation9_spill] sm:$0xff] %v3690_v31 }
  0xe0   : > { %866 = vrot.lane.b32.xlu1 %v3620_v24, %s2884_s12  ;;  %v242_v1 = vsub.f32 %v3655_v38, %v3652_v33  ;;  %v3671_v24 = vld [vmem:[%s2910_s11 + $0x130] sm:$0xff]  ;;  %v1270_v4 = vsel %vm1206_vm2, %v1148_v50, 0.0  ;;  %v4956_v50 = vld [vmem:[#allocation10_spill] sm:$0xff] }
  0xe1   : > { %v245_v29 = vsub.f32 %v3717_v14, %v3671_v24 }
  0xe2   : > { %v3648_v47 = vpop.permute.xlu1 %812  ;;  %v1149_v25 = vmul.f32 %v242_v1, %v242_v1  ;;  %v460_v1 = vrot.slane %v4956_v50, 7 }
  0xe3   : > { %2272 = vrot.lane.b32.xlu0 %v2058_v40, %s2885_s13  ;;  %v243_v40 = vsub.f32 %v3671_v24, %v3629_v17 }
  0xe4   : > { %868 = vrot.lane.b32.xlu1 %v3645_v62, %s2884_s12  ;;  %v1649_v62 = vrot.slane %v3662_v26, 1  ;;  %v1272_v12 = vsel %vm1206_vm2, %v1149_v25, 0.0  ;;  %v461_v53 = vsel %vm395_vm0, %v459_v28, %v460_v1  ;;  %v3710_v25 = vld [vmem:[%s2910_s11 + $0x238] sm:$0xff]  ;;  %v2062_v1 = vmul.f32 %v1046_v44, %v1046_v44 }
  0xe5   : > { %v1150_v26 = vmul.f32 %v243_v40, %v243_v40  ;;  %v1438_v40 = vmul.f32 %v676_v2, %v676_v2  ;;  %4958 = vst [vmem:[#allocation10_spill] sm:$0xff] %v3710_v25  ;;  %v679_v15 = vsub.f32 %v4956_v50, %v461_v53 }
  0xe6   : > { %v3675_v39 = vpop.permute.xlu1 %814 }
  0xe7   : > { %2274 = vrot.lane.b32.xlu0 %v2059_v61, %s2885_s13  ;;  %v1271_v61 = vadd.f32 %v1270_v4, %v1269_v55  ;;  %v1650_v55 = vsel %vm1590_vm1, %v1648_v37, %v1649_v62  ;;  %v2061_v4 = vmul.f32 %v1045_v18, %v1045_v18  ;;  %v1274_v3 = vsel %vm1206_vm2, %v1150_v26, 0.0  ;;  %v789_v18 = vpop.permute.xlu0 %788 }
  0xe8   : > { %870 = vrot.lane.b32.xlu1 %v3668_v13, %s2884_s12  ;;  %v3697_v13 = vld [vmem:[%s2910_s11 + $0x138] sm:$0xff]  ;;  %v1907_v2 = vsel %vm1206_vm2, %v1650_v55, 0.0  ;;  %v1651_v26 = vrot.slane %v1438_v40, 1  ;;  %v4961_v55 = vld [vmem:[#allocation12_spill] sm:$0xff]  ;;  %v3735_v40 = vld [vmem:[%s2910_s11 + $0x240] sm:$0xff]  ;;  %v3749_v57 = vmul.f32 %v679_v15, %v679_v15 }
  0xe9   : > { %v244_v6 = vsub.f32 %v3697_v13, %v3655_v38  ;;  %v463_v44 = vrot.slane %v4961_v55, 7  ;;  %v1908_v53 = vadd.f32 %v1907_v2, %v1906_v23  ;;  %v1152_v55 = vmul.f32 %v245_v29, %v245_v29 }
  0xea   : > { %v3692_v34 = vpop.permute.xlu1 %816 }
  0xeb   : > { %2276 = vrot.lane.b32.xlu0 %v2060_v16, %s2885_s13  ;;  %v1273_v16 = vadd.f32 %v1272_v12, %v1271_v61  ;;  %v1151_v37 = vmul.f32 %v244_v6, %v244_v6  ;;  %v1652_v61 = vrot.slane %v3704_v59, 1  ;;  %v678_v12 = vsub.f32 %v3724_v54, %v459_v28  ;;  %v4960_v6 = vld [vmem:[#allocation11_spill] sm:$0xff] }
  0xec   : > { %872 = vrot.lane.b32.xlu1 %v3690_v31, %s2884_s12  ;;  %v462_v11 = vrot.slane %v4960_v6, 7  ;;  %v2816_v31 = vld [vmem:[%s2910_s11 + $0xd8] sm:$0xff]  ;;  %4962 = vst [vmem:[#allocation11_spill] sm:$0xff] %v3735_v40  ;;  %v3738_v59 = vld [vmem:[%s2910_s11 + $0x148] sm:$0xff]  ;;  %v1909_v6 = vsel %vm1832_vm3, %v1649_v62, 0.0  ;;  %v793_v62 = vpop.permute.xlu0 %792 }
  0xed   : > { %v246_v28 = vsub.f32 %v3738_v59, %v3697_v13  ;;  %v1275_v50 = vadd.f32 %v1274_v3, %v1273_v16  ;;  %v1440_v22 = vmul.f32 %v678_v12, %v678_v12  ;;  %v3755_v16 = vld [vmem:[%s2910_s11 + $0x248] sm:$0xff]  ;;  %v1910_v29 = vadd.f32 %v1909_v6, %v1908_v53 }
  0xee   : > { %v3713_v5 = vpop.permute.xlu1 %818  ;;  %v464_v23 = vsel %vm395_vm0, %v462_v11, %v463_v44  ;;  %4964 = vst [vmem:[#allocation18_spill] sm:$0xff] %v3755_v16  ;;  %v247_v12 = vsub.f32 %v3724_v54, %v3717_v14 }
  0xef   : > { %4959 = vst [vmem:[#allocation17_spill] sm:$0xff] %v3713_v5  ;;  %2278 = vrot.lane.b32.xlu0 %v2061_v4, %s2885_s13  ;;  %v1047_v4 = vsub.f32 %v2816_v31, %v3460_v8  ;;  %v2818_v8 = vld [vmem:[%s2910_s11 + $0xe0] sm:$0xff]  ;;  %v1653_v5 = vsel %vm1590_vm1, %v1651_v26, %v1652_v61  ;;  %v1654_v44 = vrot.slane %v1440_v22, 1 }
  0xf0   : > { %874 = vrot.lane.b32.xlu1 %v3710_v25, %s2884_s12  ;;  %v1276_v25 = vsel %vm1206_vm2, %v1151_v37, 0.0  ;;  %v1048_v31 = vsub.f32 %v2818_v8, %v789_v18  ;;  %v1153_v37 = vmul.f32 %v246_v28, %v246_v28  ;;  %v1278_v18 = vsel %vm1206_vm2, %v1152_v55, 0.0  ;;  %v3766_v28 = vld [vmem:[%s2910_s11 + $0x160] sm:$0xff]  ;;  %v2821_v8 = vld [vmem:[%s2910_s11 + $0xe8] sm:$0xff] }
  0xf1   : > { %v2063_v3 = vmul.f32 %v1047_v4, %v1047_v4  ;;  %v1277_v2 = vadd.f32 %v1276_v25, %v1275_v50  ;;  %v1911_v26 = vsel %vm1206_vm2, %v1653_v5, 0.0  ;;  %v1655_v4 = vrot.slane %v3749_v57, 1  ;;  %v3770_v50 = vld [vmem:[%s2910_s11 + $0x168] sm:$0xff]  ;;  %v4966_v5 = vld [vmem:[#allocation13_spill] sm:$0xff]  ;;  %v3780_v57 = vld [vmem:[%s2910_s11 + $0x250] sm:$0xff] }
  0xf2   : > { %v3742_v21 = vpop.permute.xlu1 %820  ;;  %v2064_v15 = vmul.f32 %v1048_v31, %v1048_v31  ;;  %v680_v25 = vsub.f32 %v3766_v28, %v462_v11  ;;  %v681_v53 = vsub.f32 %v3770_v50, %v464_v23  ;;  %v465_v6 = vrot.slane %v4966_v5, 7  ;;  %4967 = vst [vmem:[#allocation13_spill] sm:$0xff] %v3780_v57  ;;  %v3800_v5 = vld [vmem:[%s2910_s11 + $0x258] sm:$0xff] }
  0xf3   : > { %4963 = vst [vmem:[#allocation12_spill] sm:$0xff] %v3742_v21  ;;  %2280 = vrot.lane.b32.xlu0 %v2062_v1, %s2885_s13  ;;  %v466_v55 = vrot.slane %v3249_v41, 7  ;;  %v1049_v22 = vsub.f32 %v2821_v8, %v3475_v35  ;;  %v1279_v31 = vadd.f32 %v1278_v18, %v1277_v2  ;;  %v1280_v23 = vsel %vm1206_vm2, %v1153_v37, 0.0  ;;  %v797_v35 = vpop.permute.xlu0 %796  ;;  %4969 = vst [vmem:[#allocation21_spill] sm:$0xff] %v3800_v5 }
  0xf4   : > { %876 = vrot.lane.b32.xlu1 %v3735_v40, %s2884_s12  ;;  %v1913_v40 = vsel %vm1832_vm3, %v1652_v61, 0.0  ;;  %v1656_v2 = vsel %vm1590_vm1, %v1654_v44, %v1655_v4  ;;  %v1442_v18 = vmul.f32 %v680_v25, %v680_v25 }
  0xf5   : > { %v467_v61 = vsel %vm395_vm0, %v465_v6, %v466_v55  ;;  %v2065_v37 = vmul.f32 %v1049_v22, %v1049_v22  ;;  %v1281_v8 = vadd.f32 %v1280_v23, %v1279_v31  ;;  %v249_v55 = vsub.f32 %v3766_v28, %v3724_v54  ;;  %v3815_v31 = vld [vmem:[%s2910_s11 + $0x178] sm:$0xff] }
  0xf6   : > { %v3757_v1 = vpop.permute.xlu1 %822  ;;  %v1657_v22 = vrot.slane %v1442_v18, 1  ;;  %v469_v23 = vrot.slane %v3294_v27, 7 }
  0xf7   : > { %4965 = vst [vmem:[#allocation19_spill] sm:$0xff] %v3757_v1  ;;  %2282 = vrot.lane.b32.xlu0 %v2063_v3, %s2885_s13  ;;  %v1912_v3 = vadd.f32 %v1911_v26, %v1910_v29  ;;  %v3787_v1 = vld [vmem:[%s2910_s11 + $0x158] sm:$0xff]  ;;  %v3793_v29 = vmul.f32 %v681_v53, %v681_v53  ;;  %v2823_v26 = vld [vmem:[%s2910_s11 + $0xf0] sm:$0xff]  ;;  %v1915_v53 = vsel %vm1206_vm2, %v1656_v2, 0.0 }
  0xf8   : > { %878 = vrot.lane.b32.xlu1 %v3755_v16, %s2884_s12  ;;  %v1154_v16 = vmul.f32 %v247_v12, %v247_v12  ;;  %v248_v41 = vsub.f32 %v3787_v1, %v3738_v59  ;;  %v1050_v12 = vsub.f32 %v2823_v26, %v793_v62  ;;  %v3811_v26 = vld [vmem:[%s2910_s11 + $0x170] sm:$0xff]  ;;  %v250_v21 = vsub.f32 %v3770_v50, %v3787_v1 }
  0xf9   : > { %v1658_v62 = vrot.slane %v3793_v29, 1 }
  0xfa   : > { %v3782_v11 = vpop.permute.xlu1 %824  ;;  %v1282_v44 = vsel %vm1206_vm2, %v1154_v16, 0.0  ;;  %v1155_v25 = vmul.f32 %v248_v41, %v248_v41  ;;  %v683_v16 = vsub.f32 %v3815_v31, %v467_v61  ;;  %v2826_v41 = vld [vmem:[%s2910_s11 + $0xf8] sm:$0xff]  ;;  %v2066_v18 = vmul.f32 %v1050_v12, %v1050_v12 }
  0xfb   : > { %4968 = vst [vmem:[#allocation20_spill] sm:$0xff] %v3782_v11  ;;  %2284 = vrot.lane.b32.xlu0 %v2064_v15, %s2885_s13  ;;  %v1914_v15 = vadd.f32 %v1913_v40, %v1912_v3  ;;  %v682_v40 = vsub.f32 %v3811_v26, %v465_v6  ;;  %v468_v3 = vrot.slane %v3277_v43, 7  ;;  %v1051_v2 = vsub.f32 %v2826_v41, %v3496_v42 }
  0xfc   : > { %880 = vrot.lane.b32.xlu1 %v3780_v57, %s2884_s12  ;;  %v1283_v6 = vadd.f32 %v1282_v44, %v1281_v8  ;;  %v1284_v61 = vsel %vm1206_vm2, %v1155_v25, 0.0  ;;  %v1156_v43 = vmul.f32 %v249_v55, %v249_v55  ;;  %v1659_v42 = vsel %vm1590_vm1, %v1657_v22, %v1658_v62  ;;  %v2827_v44 = vld [vmem:[%s2910_s11 + $0x100] sm:$0xff] }
  0xfd   : > { %v1916_v57 = vadd.f32 %v1915_v53, %v1914_v15  ;;  %v1444_v12 = vmul.f32 %v682_v40, %v682_v40  ;;  %v3835_v41 = vmul.f32 %v683_v16, %v683_v16  ;;  %v470_v8 = vsel %vm395_vm0, %v468_v3, %v469_v23  ;;  %v190_v53 = vld [vmem:[%s2910_s11 + $0x268] sm:$0xff] }
  0xfe   : > { %v3802_v11 = vpop.permute.xlu1 %826  ;;  %v2067_v15 = vmul.f32 %v1051_v2, %v1051_v2  ;;  %v1052_v25 = vsub.f32 %v2827_v44, %v797_v35  ;;  %v1285_v55 = vadd.f32 %v1284_v61, %v1283_v6  ;;  %v1286_v22 = vsel %vm1206_vm2, %v1156_v43, 0.0 }
  0xff   : > { %4970 = vst [vmem:[#allocation22_spill] sm:$0xff] %v3802_v11  ;;  %2286 = vrot.lane.b32.xlu0 %v2065_v37, %s2885_s13  ;;  %v189_v37 = vld [vmem:[%s2910_s11 + $0x260] sm:$0xff]  ;;  %v1157_v40 = vmul.f32 %v250_v21, %v250_v21  ;;  %v1919_v16 = vsel %vm1206_vm2, %v1659_v42, 0.0  ;;  %v251_v23 = vsub.f32 %v3811_v26, %v3766_v28  ;;  %v1660_v2 = vrot.slane %v1444_v12, 1  ;;  %v191_v42 = vld [vmem:[%s2910_s11 + $0x270] sm:$0xff] }
 0x100   : > { %882 = vrot.lane.b32.xlu1 %v3800_v5, %s2884_s12  ;;  %v1917_v5 = vsel %vm1832_vm3, %v1655_v4, 0.0  ;;  %v1661_v35 = vrot.slane %v3835_v41, 1  ;;  %v471_v21 = vrot.slane %v3312_v32, 7  ;;  %v1053_v6 = vsub.f32 %v3603_v10, %v3511_v60 }
 0x101   : > { %v3824_v29 = vpop.permute.xlu0 %2230  ;;  %v2068_v61 = vmul.f32 %v1052_v25, %v1052_v25  ;;  %v1287_v12 = vadd.f32 %v1286_v22, %v1285_v55  ;;  %v252_v32 = vsub.f32 %v3815_v31, %v3770_v50  ;;  %v192_v55 = vld [vmem:[%s2910_s11 + $0x278] sm:$0xff] }
 0x102   : > { %4971 = vst [vmem:[#allocation23_spill] sm:$0xff] %v3824_v29  ;;  %v3827_v11 = vpop.permute.xlu1 %2228  ;;  %v1662_v60 = vsel %vm1590_vm1, %v1660_v2, %v1661_v35  ;;  %v2069_v25 = vmul.f32 %v1053_v6, %v1053_v6 }
 0x103   : > { %4972 = vst [vmem:[#allocation24_spill] sm:$0xff] %v3827_v11  ;;  %2288 = vrot.lane.b32.xlu0 %v2066_v18, %s2885_s13  ;;  %v1918_v11 = vadd.f32 %v1917_v5, %v1916_v57  ;;  %v3852_v18 = vld [vmem:[%s2910_s11 + $0x180] sm:$0xff]  ;;  %v685_v5 = vsub.f32 %v3294_v27, %v470_v8  ;;  %v1288_v27 = vsel %vm1206_vm2, %v1157_v40, 0.0  ;;  %v1158_v8 = vmul.f32 %v251_v23, %v251_v23 }
 0x104   : > { %884 = vrot.lane.b32.xlu1 %v189_v37, %s2884_s12  ;;  %v684_v57 = vsub.f32 %v3852_v18, %v468_v3  ;;  %v472_v37 = vrot.slane %v3329_v30, 7  ;;  %v1921_v3 = vsel %vm1832_vm3, %v1658_v62, 0.0  ;;  %v1054_v62 = vsub.f32 %v3626_v51, %v3532_v46  ;;  %v3890_v51 = vld [vmem:[%s2910_s11 + $0x190] sm:$0xff] }
 0x105   : > { %v3840_v4 = vpop.permute.xlu0 %2232  ;;  %v1920_v41 = vadd.f32 %v1919_v16, %v1918_v11  ;;  %v3872_v44 = vmul.f32 %v685_v5, %v685_v5  ;;  %v1289_v22 = vadd.f32 %v1288_v27, %v1287_v12  ;;  %v1290_v23 = vsel %vm1206_vm2, %v1158_v8, 0.0  ;;  %v193_v8 = vld [vmem:[%s2910_s11 + $0x280] sm:$0xff] }
 0x106   : > { %v3843_v29 = vpop.permute.xlu1 %828  ;;  %v1446_v10 = vmul.f32 %v684_v57, %v684_v57  ;;  %v473_v11 = vsel %vm395_vm0, %v471_v21, %v472_v37  ;;  %v1159_v2 = vmul.f32 %v252_v32, %v252_v32  ;;  %v1923_v57 = vsel %vm1206_vm2, %v1662_v60, 0.0 }
 0x107   : > { %2290 = vrot.lane.b32.xlu0 %v2067_v15, %s2885_s13  ;;  %v1922_v40 = vadd.f32 %v1921_v3, %v1920_v41  ;;  %v253_v5 = vsub.f32 %v3852_v18, %v3811_v26  ;;  %v1664_v46 = vrot.slane %v3872_v44, 1  ;;  %v686_v6 = vsub.f32 %v3890_v51, %v471_v21 }
 0x108   : > { %886 = vrot.lane.b32.xlu1 %v190_v53, %s2884_s12  ;;  %v1663_v37 = vrot.slane %v1446_v10, 1  ;;  %v475_v12 = vrot.slane %v3365_v0, 7  ;;  %v2070_v41 = vmul.f32 %v1054_v62, %v1054_v62  ;;  %v1055_v27 = vsub.f32 %v3652_v33, %v3547_v20 }
 0x109   : > { %v3861_v43 = vpop.permute.xlu0 %2234  ;;  %v1291_v32 = vadd.f32 %v1290_v23, %v1289_v22  ;;  %v1924_v60 = vadd.f32 %v1923_v57, %v1922_v40  ;;  %v1925_v21 = vsel %vm1832_vm3, %v1661_v35, 0.0  ;;  %v1160_v44 = vmul.f32 %v253_v5, %v253_v5  ;;  %v194_v40 = vld [vmem:[%s2910_s11 + $0x288] sm:$0xff] }
 0x10a   : > { %v3864_v15 = vpop.permute.xlu1 %830  ;;  %v1665_v20 = vsel %vm1590_vm1, %v1663_v37, %v1664_v46  ;;  %v1448_v33 = vmul.f32 %v686_v6, %v686_v6  ;;  %v1056_v35 = vsub.f32 %v3629_v17, %v3568_v49  ;;  %v3931_v17 = vld [vmem:[%s2910_s11 + $0x1a0] sm:$0xff] }
 0x10b   : > { %2292 = vrot.lane.b32.xlu0 %v2068_v61, %s2885_s13  ;;  %v687_v61 = vsub.f32 %v3329_v30, %v473_v11  ;;  %v1292_v30 = vsel %vm1206_vm2, %v1159_v2, 0.0  ;;  %v1926_v2 = vadd.f32 %v1925_v21, %v1924_v60  ;;  %v1294_v5 = vsel %vm1206_vm2, %v1160_v44, 0.0  ;;  %v195_v44 = vld [vmem:[%s2910_s11 + $0x290] sm:$0xff] }
 0x10c   : > { %888 = vrot.lane.b32.xlu1 %v191_v42, %s2884_s12  ;;  %v474_v42 = vrot.slane %v3348_v36, 7  ;;  %v3907_v36 = vld [vmem:[%s2910_s11 + $0x188] sm:$0xff]  ;;  %v1293_v23 = vadd.f32 %v1292_v30, %v1291_v32  ;;  %v1927_v6 = vsel %vm1206_vm2, %v1665_v20, 0.0  ;;  %v478_v32 = vrot.slane %v3401_v58, 7 }
 0x10d   : > { %v3878_v53 = vpop.permute.xlu0 %2236  ;;  %v254_v11 = vsub.f32 %v3907_v36, %v3815_v31  ;;  %v2072_v60 = vmul.f32 %v1056_v35, %v1056_v35  ;;  %v1057_v30 = vsub.f32 %v3655_v38, %v3583_v56  ;;  %v1928_v20 = vadd.f32 %v1927_v6, %v1926_v2  ;;  %v196_v2 = vld [vmem:[%s2910_s11 + $0x298] sm:$0xff] }
 0x10e   : > { %v3881_v16 = vpop.permute.xlu1 %832  ;;  %v476_v62 = vsel %vm395_vm0, %v474_v42, %v475_v12  ;;  %v1666_v12 = vrot.slane %v1448_v33, 1 }
 0x10f   : > { %2294 = vrot.lane.b32.xlu0 %v2069_v25, %s2885_s13  ;;  %v3913_v25 = vmul.f32 %v687_v61, %v687_v61  ;;  %v1161_v37 = vmul.f32 %v254_v11, %v254_v11  ;;  %v255_v61 = vsub.f32 %v3890_v51, %v3852_v18  ;;  %v1295_v11 = vadd.f32 %v1294_v5, %v1293_v23 }
 0x110   : > { %890 = vrot.lane.b32.xlu1 %v192_v55, %s2884_s12  ;;  %v2071_v55 = vmul.f32 %v1055_v27, %v1055_v27  ;;  %v689_v27 = vsub.f32 %v3365_v0, %v476_v62 }
 0x111   : > { %v3899_v3 = vpop.permute.xlu0 %2238  ;;  %v1667_v49 = vrot.slane %v3913_v25, 1  ;;  %v1296_v0 = vsel %vm1206_vm2, %v1161_v37, 0.0  ;;  %v1162_v25 = vmul.f32 %v255_v61, %v255_v61 }
 0x112   : > { %v3902_v10 = vpop.permute.xlu1 %834  ;;  %v1297_v5 = vadd.f32 %v1296_v0, %v1295_v11  ;;  %v481_v11 = vrot.slane %v3437_v9, 7  ;;  %v1059_v0 = vsub.f32 %v3697_v13, %v3622_v19 }
 0x113   : > { %2296 = vrot.lane.b32.xlu0 %v2070_v41, %s2885_s13  ;;  %v688_v41 = vsub.f32 %v3931_v17, %v474_v42  ;;  %v1929_v42 = vsel %vm1832_vm3, %v1664_v46, 0.0  ;;  %v1668_v56 = vsel %vm1590_vm1, %v1666_v12, %v1667_v49  ;;  %v1058_v46 = vsub.f32 %v3671_v24, %v3607_v48  ;;  %v3972_v24 = vld [vmem:[%s2910_s11 + $0x1b0] sm:$0xff] }
 0x114   : > { %892 = vrot.lane.b32.xlu1 %v193_v8, %s2884_s12  ;;  %v477_v8 = vrot.slane %v3384_v52, 7  ;;  %v3948_v52 = vld [vmem:[%s2910_s11 + $0x198] sm:$0xff]  ;;  %v1930_v37 = vadd.f32 %v1929_v42, %v1928_v20  ;;  %v1298_v61 = vsel %vm1206_vm2, %v1162_v25, 0.0  ;;  %v197_v25 = vld [vmem:[%s2910_s11 + $0x2a0] sm:$0xff] }
 0x115   : > { %v3919_v22 = vpop.permute.xlu0 %2240  ;;  %v256_v62 = vsub.f32 %v3948_v52, %v3907_v36  ;;  %v1450_v38 = vmul.f32 %v688_v41, %v688_v41  ;;  %v1931_v41 = vsel %vm1206_vm2, %v1668_v56, 0.0  ;;  %v2074_v20 = vmul.f32 %v1058_v46, %v1058_v46 }
 0x116   : > { %v3922_v57 = vpop.permute.xlu1 %836  ;;  %v479_v35 = vsel %vm395_vm0, %v477_v8, %v478_v32  ;;  %v1932_v56 = vadd.f32 %v1931_v41, %v1930_v37  ;;  %v198_v37 = vld [vmem:[%s2910_s11 + $0x2a8] sm:$0xff] }
 0x117   : > { %2298 = vrot.lane.b32.xlu0 %v2071_v55, %s2885_s13  ;;  %v3954_v55 = vmul.f32 %v689_v27, %v689_v27  ;;  %v1163_v12 = vmul.f32 %v256_v62, %v256_v62  ;;  %v257_v27 = vsub.f32 %v3931_v17, %v3890_v51  ;;  %v1669_v32 = vrot.slane %v1450_v38, 1 }
 0x118   : > { %894 = vrot.lane.b32.xlu1 %v194_v40, %s2884_s12  ;;  %v2073_v40 = vmul.f32 %v1057_v30, %v1057_v30  ;;  %v691_v30 = vsub.f32 %v3401_v58, %v479_v35  ;;  %v1299_v62 = vadd.f32 %v1298_v61, %v1297_v5 }
 0x119   : > { %v3940_v21 = vpop.permute.xlu0 %2242  ;;  %v1670_v48 = vrot.slane %v3954_v55, 1  ;;  %v1300_v58 = vsel %vm1206_vm2, %v1163_v12, 0.0  ;;  %v1164_v55 = vmul.f32 %v257_v27, %v257_v27 }
 0x11a   : > { %v3943_v33 = vpop.permute.xlu1 %838  ;;  %v1301_v61 = vadd.f32 %v1300_v58, %v1299_v62  ;;  %v484_v62 = vrot.slane %v3473_v7, 7  ;;  %v1061_v58 = vsub.f32 %v3738_v59, %v3675_v39 }
 0x11b   : > { %2300 = vrot.lane.b32.xlu0 %v2072_v60, %s2885_s13  ;;  %v690_v60 = vsub.f32 %v3972_v24, %v477_v8  ;;  %v1933_v8 = vsel %vm1832_vm3, %v1667_v49, 0.0  ;;  %v1671_v19 = vsel %vm1590_vm1, %v1669_v32, %v1670_v48  ;;  %v1060_v49 = vsub.f32 %v3717_v14, %v3648_v47  ;;  %v4013_v14 = vld [vmem:[%s2910_s11 + $0x1c0] sm:$0xff] }
 0x11c   : > { %896 = vrot.lane.b32.xlu1 %v195_v44, %s2884_s12  ;;  %v480_v44 = vrot.slane %v3420_v63, 7  ;;  %v3989_v63 = vld [vmem:[%s2910_s11 + $0x1a8] sm:$0xff]  ;;  %v1934_v12 = vadd.f32 %v1933_v8, %v1932_v56  ;;  %v1302_v27 = vsel %vm1206_vm2, %v1164_v55, 0.0  ;;  %v199_v55 = vld [vmem:[%s2910_s11 + $0x2b0] sm:$0xff] }
 0x11d   : > { %v3960_v23 = vpop.permute.xlu0 %2244  ;;  %v258_v35 = vsub.f32 %v3989_v63, %v3948_v52  ;;  %v1452_v13 = vmul.f32 %v690_v60, %v690_v60  ;;  %v1935_v60 = vsel %vm1206_vm2, %v1671_v19, 0.0  ;;  %v2076_v56 = vmul.f32 %v1060_v49, %v1060_v49 }
 0x11e   : > { %4973 = vst [vmem:[#allocation25_spill] sm:$0xff] %v3960_v23  ;;  %v3963_v6 = vpop.permute.xlu1 %840  ;;  %v482_v46 = vsel %vm395_vm0, %v480_v44, %v481_v11  ;;  %v1936_v19 = vadd.f32 %v1935_v60, %v1934_v12  ;;  %v200_v12 = vld [vmem:[%s2910_s11 + $0x2b8] sm:$0xff] }
 0x11f   : > { %2302 = vrot.lane.b32.xlu0 %v2073_v40, %s2885_s13  ;;  %v3995_v40 = vmul.f32 %v691_v30, %v691_v30  ;;  %v1165_v32 = vmul.f32 %v258_v35, %v258_v35  ;;  %v259_v30 = vsub.f32 %v3972_v24, %v3931_v17  ;;  %v1672_v11 = vrot.slane %v1452_v13, 1 }
 0x120   : > { %898 = vrot.lane.b32.xlu1 %v196_v2, %s2884_s12  ;;  %v2075_v2 = vmul.f32 %v1059_v0, %v1059_v0  ;;  %v693_v0 = vsub.f32 %v3437_v9, %v482_v46  ;;  %v1303_v35 = vadd.f32 %v1302_v27, %v1301_v61 }
 0x121   : > { %v3981_v42 = vpop.permute.xlu0 %2246  ;;  %v1673_v47 = vrot.slane %v3995_v40, 1  ;;  %v1304_v9 = vsel %vm1206_vm2, %v1165_v32, 0.0  ;;  %v1166_v40 = vmul.f32 %v259_v30, %v259_v30 }
 0x122   : > { %4974 = vst [vmem:[#allocation26_spill] sm:$0xff] %v3981_v42  ;;  %v3984_v38 = vpop.permute.xlu1 %842  ;;  %v1305_v27 = vadd.f32 %v1304_v9, %v1303_v35 }
 0x123   : > { %2304 = vrot.lane.b32.xlu0 %v2074_v20, %s2885_s13  ;;  %v692_v20 = vsub.f32 %v4013_v14, %v480_v44  ;;  %v1937_v44 = vsel %vm1832_vm3, %v1670_v48, 0.0  ;;  %v1674_v39 = vsel %vm1590_vm1, %v1672_v11, %v1673_v47  ;;  %v1062_v48 = vsub.f32 %v3724_v54, %v3692_v34  ;;  %v4054_v54 = vld [vmem:[%s2910_s11 + $0x1d0] sm:$0xff] }
 0x124   : > { %900 = vrot.lane.b32.xlu1 %v197_v25, %s2884_s12  ;;  %v483_v25 = vrot.slane %v3456_v45, 7  ;;  %v4030_v45 = vld [vmem:[%s2910_s11 + $0x1b8] sm:$0xff]  ;;  %v1938_v32 = vadd.f32 %v1937_v44, %v1936_v19  ;;  %v1306_v30 = vsel %vm1206_vm2, %v1166_v40, 0.0  ;;  %v4979_v19 = vld [vmem:[#allocation15_spill] sm:$0xff] }
 0x125   : > { %v4001_v5 = vpop.permute.xlu0 %2248  ;;  %v260_v46 = vsub.f32 %v4030_v45, %v3989_v63  ;;  %v1454_v59 = vmul.f32 %v692_v20, %v692_v20  ;;  %v1939_v20 = vsel %vm1206_vm2, %v1674_v39, 0.0  ;;  %v487_v9 = vrot.slane %v4979_v19, 7  ;;  %v4980_v40 = vld [vmem:[#allocation17_spill] sm:$0xff] }
 0x126   : > { %4975 = vst [vmem:[#allocation27_spill] sm:$0xff] %v4001_v5  ;;  %v4004_v41 = vpop.permute.xlu1 %844  ;;  %v485_v49 = vsel %vm395_vm0, %v483_v25, %v484_v62  ;;  %v2078_v44 = vmul.f32 %v1062_v48, %v1062_v48 }
 0x127   : > { %2306 = vrot.lane.b32.xlu0 %v2075_v2, %s2885_s13  ;;  %v4036_v2 = vmul.f32 %v693_v0, %v693_v0  ;;  %v1167_v11 = vmul.f32 %v260_v46, %v260_v46  ;;  %v261_v0 = vsub.f32 %v4013_v14, %v3972_v24  ;;  %v1675_v62 = vrot.slane %v1454_v59, 1  ;;  %v201_v59 = vld [vmem:[%s2910_s11 + $0x2c0] sm:$0xff] }
 0x128   : > { %902 = vrot.lane.b32.xlu1 %v198_v37, %s2884_s12  ;;  %v2077_v37 = vmul.f32 %v1061_v58, %v1061_v58  ;;  %v695_v58 = vsub.f32 %v3473_v7, %v485_v49  ;;  %v1063_v46 = vsub.f32 %v3787_v1, %v4980_v40 }
 0x129   : > { %v4022_v8 = vpop.permute.xlu0 %2250  ;;  %v1676_v34 = vrot.slane %v4036_v2, 1  ;;  %v1307_v2 = vadd.f32 %v1306_v30, %v1305_v27  ;;  %v1308_v7 = vsel %vm1206_vm2, %v1167_v11, 0.0  ;;  %v1168_v49 = vmul.f32 %v261_v0, %v261_v0  ;;  %v202_v0 = vld [vmem:[%s2910_s11 + $0x2c8] sm:$0xff] }
 0x12a   : > { %4976 = vst [vmem:[#allocation28_spill] sm:$0xff] %v4022_v8  ;;  %v4025_v13 = vpop.permute.xlu1 %846  ;;  %v4077_v27 = vmul.f32 %v695_v58, %v695_v58  ;;  %v2079_v30 = vmul.f32 %v1063_v46, %v1063_v46 }
 0x12b   : > { %2308 = vrot.lane.b32.xlu0 %v2076_v56, %s2885_s13  ;;  %v694_v56 = vsub.f32 %v4054_v54, %v483_v25  ;;  %v1941_v25 = vsel %vm1832_vm3, %v1673_v47, 0.0  ;;  %v1677_v1 = vsel %vm1590_vm1, %v1675_v62, %v1676_v34  ;;  %v4982_v47 = vld [vmem:[#allocation12_spill] sm:$0xff]  ;;  %v1309_v40 = vadd.f32 %v1308_v7, %v1307_v2  ;;  %v4984_v7 = vld [vmem:[#allocation2_spill] sm:$0xff] }
 0x12c   : > { %904 = vrot.lane.b32.xlu1 %v199_v55, %s2884_s12  ;;  %v4978_v55 = vld [vmem:[#allocation14_spill] sm:$0xff]  ;;  %v1064_v11 = vsub.f32 %v3766_v28, %v4982_v47  ;;  %v1310_v62 = vsel %vm1206_vm2, %v1168_v49, 0.0  ;;  %v1943_v58 = vsel %vm1206_vm2, %v1677_v1, 0.0  ;;  %v1679_v28 = vrot.slane %v4077_v27, 1  ;;  %v4985_v49 = vld [vmem:[#allocation16_spill] sm:$0xff]  ;;  %v4986_v47 = vld [vmem:[#allocation19_spill] sm:$0xff] }
 0x12d   : > { %v4042_v61 = vpop.permute.xlu0 %2252  ;;  %v486_v35 = vrot.slane %v4978_v55, 7  ;;  %v1456_v55 = vmul.f32 %v694_v56, %v694_v56  ;;  %v203_v27 = vld [vmem:[%s2910_s11 + $0x2d0] sm:$0xff] }
 0x12e   : > { %4977 = vst [vmem:[#allocation29_spill] sm:$0xff] %v4042_v61  ;;  %v4045_v60 = vpop.permute.xlu1 %848  ;;  %v2080_v1 = vmul.f32 %v1064_v11, %v1064_v11 }
 0x12f   : > { %2310 = vrot.lane.b32.xlu0 %v2077_v37, %s2885_s13  ;;  %v1940_v37 = vadd.f32 %v1939_v20, %v1938_v32  ;;  %v488_v32 = vsel %vm395_vm0, %v486_v35, %v487_v9  ;;  %v263_v9 = vsub.f32 %v4054_v54, %v4013_v14  ;;  %v1678_v46 = vrot.slane %v1456_v55, 1 }
 0x130   : > { %906 = vrot.lane.b32.xlu1 %v200_v12, %s2884_s12  ;;  %v4071_v12 = vld [vmem:[%s2910_s11 + $0x1c8] sm:$0xff] }
 0x131   : > { %v4063_v39 = vpop.permute.xlu0 %2254  ;;  %v262_v48 = vsub.f32 %v4071_v12, %v4030_v45 }
 0x132   : > { %4981 = vst [vmem:[#allocation14_spill] sm:$0xff] %v4063_v39  ;;  %v4066_v61 = vpop.permute.xlu1 %850  ;;  %v1942_v39 = vadd.f32 %v1941_v25, %v1940_v37  ;;  %v697_v37 = vsub.f32 %v4979_v19, %v488_v32  ;;  %v489_v25 = vrot.slane %v4984_v7, 7  ;;  %v1945_v19 = vsel %vm1832_vm3, %v1676_v34, 0.0  ;;  %v4988_v34 = vld [vmem:[#allocation20_spill] sm:$0xff] }
 0x133   : > { %2312 = vrot.lane.b32.xlu0 %v2078_v44, %s2885_s13  ;;  %v1169_v56 = vmul.f32 %v262_v48, %v262_v48  ;;  %v490_v48 = vrot.slane %v4985_v49, 7  ;;  %v1170_v32 = vmul.f32 %v263_v9, %v263_v9  ;;  %v204_v9 = vld [vmem:[%s2910_s11 + $0x2d8] sm:$0xff] }
 0x134   : > { %908 = vrot.lane.b32.xlu1 %v201_v59, %s2884_s12  ;;  %v4095_v59 = vld [vmem:[%s2910_s11 + $0x1e0] sm:$0xff]  ;;  %v1944_v8 = vadd.f32 %v1943_v58, %v1942_v39 }
 0x135   : > { %v4083_v20 = vpop.permute.xlu0 %2256  ;;  %v696_v2 = vsub.f32 %v4095_v59, %v486_v35  ;;  %v1312_v35 = vsel %vm1206_vm2, %v1169_v56, 0.0  ;;  %v491_v39 = vsel %vm395_vm0, %v489_v25, %v490_v48  ;;  %v1066_v56 = vsub.f32 %v3811_v26, %v4988_v34  ;;  %v4992_v34 = vld [vmem:[#allocation22_spill] sm:$0xff] }
 0x136   : > { %4983 = vst [vmem:[#allocation15_spill] sm:$0xff] %v4083_v20  ;;  %v4086_v44 = vpop.permute.xlu1 %852  ;;  %v1311_v20 = vadd.f32 %v1310_v62, %v1309_v40  ;;  %v4118_v40 = vmul.f32 %v697_v37, %v697_v37  ;;  %v265_v48 = vsub.f32 %v4095_v59, %v4054_v54 }
 0x137   : > { %2314 = vrot.lane.b32.xlu0 %v2079_v30, %s2885_s13  ;;  %v1065_v30 = vsub.f32 %v3770_v50, %v4986_v47  ;;  %v1680_v50 = vsel %vm1590_vm1, %v1678_v46, %v1679_v28  ;;  %v1458_v7 = vmul.f32 %v696_v2, %v696_v2  ;;  %v1314_v46 = vsel %vm1206_vm2, %v1170_v32, 0.0  ;;  %v4991_v32 = vld [vmem:[#allocation4_spill] sm:$0xff] }
 0x138   : > { %910 = vrot.lane.b32.xlu1 %v202_v0, %s2884_s12  ;;  %v4112_v0 = vld [vmem:[%s2910_s11 + $0x1d8] sm:$0xff]  ;;  %v1313_v47 = vadd.f32 %v1312_v35, %v1311_v20  ;;  %v1947_v37 = vsel %vm1206_vm2, %v1680_v50, 0.0  ;;  %v1682_v26 = vrot.slane %v4118_v40, 1  ;;  %v699_v20 = vsub.f32 %v4985_v49, %v491_v39  ;;  %v4990_v35 = vld [vmem:[#allocation3_spill] sm:$0xff]  ;;  %v205_v40 = vld [vmem:[%s2910_s11 + $0x2e0] sm:$0xff] }
 0x139   : > { %v4104_v55 = vpop.permute.xlu0 %2258  ;;  %v264_v11 = vsub.f32 %v4112_v0, %v4071_v12  ;;  %v2081_v62 = vmul.f32 %v1065_v30, %v1065_v30  ;;  %v1681_v30 = vrot.slane %v1458_v7, 1  ;;  %v2082_v50 = vmul.f32 %v1066_v56, %v1066_v56 }
 0x13a   : > { %4987 = vst [vmem:[#allocation17_spill] sm:$0xff] %v4104_v55  ;;  %v4107_v5 = vpop.permute.xlu1 %854  ;;  %v1946_v55 = vadd.f32 %v1945_v19, %v1944_v8  ;;  %v492_v19 = vrot.slane %v4990_v35, 7  ;;  %v1949_v49 = vsel %vm1832_vm3, %v1679_v28, 0.0  ;;  %v1172_v39 = vmul.f32 %v265_v48, %v265_v48 }
 0x13b   : > { %2316 = vrot.lane.b32.xlu0 %v2080_v1, %s2885_s13  ;;  %v1171_v2 = vmul.f32 %v264_v11, %v264_v11  ;;  %v493_v11 = vrot.slane %v4991_v32, 7  ;;  %v1068_v28 = vsub.f32 %v3852_v18, %v3843_v29 }
 0x13c   : > { %912 = vrot.lane.b32.xlu1 %v203_v27, %s2884_s12  ;;  %v4136_v27 = vld [vmem:[%s2910_s11 + $0x1f0] sm:$0xff]  ;;  %v1948_v42 = vadd.f32 %v1947_v37, %v1946_v55  ;;  %v206_v37 = vld [vmem:[%s2910_s11 + $0x2e8] sm:$0xff] }
 0x13d   : > { %v4124_v58 = vpop.permute.xlu0 %2260  ;;  %v698_v8 = vsub.f32 %v4136_v27, %v489_v25  ;;  %v1316_v25 = vsel %vm1206_vm2, %v1171_v2, 0.0  ;;  %v494_v55 = vsel %vm395_vm0, %v492_v19, %v493_v11 }
 0x13e   : > { %4989 = vst [vmem:[#allocation12_spill] sm:$0xff] %v4124_v58  ;;  %v4127_v1 = vpop.permute.xlu1 %856  ;;  %v1315_v58 = vadd.f32 %v1314_v46, %v1313_v47  ;;  %v4159_v47 = vmul.f32 %v699_v20, %v699_v20  ;;  %v1950_v32 = vadd.f32 %v1949_v49, %v1948_v42  ;;  %v267_v20 = vsub.f32 %v4136_v27, %v4095_v59  ;;  %v4998_v49 = vld [vmem:[#allocation6_spill] sm:$0xff] }
 0x13f   : > { %2318 = vrot.lane.b32.xlu0 %v2081_v62, %s2885_s13  ;;  %v1067_v62 = vsub.f32 %v3815_v31, %v4992_v34  ;;  %v1683_v31 = vsel %vm1590_vm1, %v1681_v30, %v1682_v26  ;;  %v1460_v35 = vmul.f32 %v698_v8, %v698_v8  ;;  %v1318_v30 = vsel %vm1206_vm2, %v1172_v39, 0.0  ;;  %v4177_v34 = vld [vmem:[%s2910_s11 + $0x200] sm:$0xff] }
 0x140   : > { %914 = vrot.lane.b32.xlu1 %v204_v9, %s2884_s12  ;;  %v4153_v9 = vld [vmem:[%s2910_s11 + $0x1e8] sm:$0xff]  ;;  %v1317_v48 = vadd.f32 %v1316_v25, %v1315_v58  ;;  %v1951_v11 = vsel %vm1206_vm2, %v1683_v31, 0.0  ;;  %v1685_v18 = vrot.slane %v4159_v47, 1  ;;  %4996 = vst [vmem:[#allocation20_spill] sm:$0xff] %v4177_v34  ;;  %v700_v42 = vsub.f32 %v4177_v34, %v492_v19 }
 0x141   : > { %v4145_v7 = vpop.permute.xlu0 %2262  ;;  %v266_v56 = vsub.f32 %v4153_v9, %v4112_v0  ;;  %v2083_v46 = vmul.f32 %v1067_v62, %v1067_v62  ;;  %v1684_v29 = vrot.slane %v1460_v35, 1  ;;  %v2844_v58 = vld [vmem:[%s2910_s11 + $0x208] sm:$0xff]  ;;  %v496_v39 = vrot.slane %v4998_v49, 7  ;;  %v207_v35 = vld [vmem:[%s2910_s11 + $0x2f0] sm:$0xff] }
 0x142   : > { %4993 = vst [vmem:[#allocation2_spill] sm:$0xff] %v4145_v7  ;;  %v4148_v23 = vpop.permute.xlu1 %858  ;;  %v701_v62 = vsub.f32 %v2844_v58, %v494_v55  ;;  %v1069_v31 = vsub.f32 %v3907_v36, %v3864_v15  ;;  %v1319_v47 = vadd.f32 %v1318_v30, %v1317_v48  ;;  %v1952_v55 = vadd.f32 %v1951_v11, %v1950_v32 }
 0x143   : > { %2320 = vrot.lane.b32.xlu0 %v2082_v50, %s2885_s13  ;;  %v1173_v8 = vmul.f32 %v266_v56, %v266_v56  ;;  %v2084_v56 = vmul.f32 %v1068_v28, %v1068_v28  ;;  %v1174_v7 = vmul.f32 %v267_v20, %v267_v20  ;;  %v1686_v15 = vsel %vm1590_vm1, %v1684_v29, %v1685_v18 }
 0x144   : > { %916 = vrot.lane.b32.xlu1 %v205_v40, %s2884_s12  ;;  %v4997_v40 = vld [vmem:[#allocation5_spill] sm:$0xff]  ;;  %v1462_v36 = vmul.f32 %v700_v42, %v700_v42  ;;  %v4198_v48 = vmul.f32 %v701_v62, %v701_v62  ;;  %v2085_v49 = vmul.f32 %v1069_v31, %v1069_v31  ;;  %v1070_v32 = vsub.f32 %v3890_v51, %v3881_v16 }
 0x145   : > { %v4165_v2 = vpop.permute.xlu0 %2264  ;;  %v495_v25 = vrot.slane %v4997_v40, 7  ;;  %v1953_v40 = vsel %vm1832_vm3, %v1682_v26, 0.0  ;;  %v1320_v28 = vsel %vm1206_vm2, %v1173_v8, 0.0  ;;  %v208_v8 = vld [vmem:[%s2910_s11 + $0x2f8] sm:$0xff]  ;;  %v1322_v42 = vsel %vm1206_vm2, %v1174_v7, 0.0 }
 0x146   : > { %4994 = vst [vmem:[#allocation16_spill] sm:$0xff] %v4165_v2  ;;  %v4168_v50 = vpop.permute.xlu1 %860  ;;  %v4190_v2 = vld [vmem:[%s2910_s11 + $0x1f8] sm:$0xff]  ;;  %v1321_v20 = vadd.f32 %v1320_v28, %v1319_v47  ;;  %v1955_v62 = vsel %vm1206_vm2, %v1686_v15, 0.0  ;;  %v1687_v16 = vrot.slane %v1462_v36, 1  ;;  %v1688_v51 = vrot.slane %v4198_v48, 1 }
 0x147   : > { %4995 = vst [vmem:[#allocation19_spill] sm:$0xff] %v4168_v50  ;;  %2322 = vrot.lane.b32.xlu0 %v2083_v46, %s2885_s13  ;;  %v268_v19 = vsub.f32 %v4190_v2, %v4153_v9  ;;  %v497_v30 = vsel %vm395_vm0, %v495_v25, %v496_v39  ;;  %v2847_v47 = vld [vmem:[%s2910_s11 + $0x218] sm:$0xff]  ;;  %v2086_v28 = vmul.f32 %v1070_v32, %v1070_v32 }
 0x148   : > { %918 = vrot.lane.b32.xlu1 %v206_v37, %s2884_s12  ;;  %v1071_v15 = vsub.f32 %v3948_v52, %v3902_v10  ;;  %v1689_v32 = vsel %vm1590_vm1, %v1687_v16, %v1688_v51 }
 0x149   : > { %v4186_v46 = vpop.permute.xlu0 %2266  ;;  %v1175_v11 = vmul.f32 %v268_v19, %v268_v19  ;;  %v703_v19 = vsub.f32 %v2847_v47, %v497_v30  ;;  %v1957_v30 = vsel %vm1832_vm3, %v1685_v18, 0.0  ;;  %v1072_v18 = vsub.f32 %v3931_v17, %v3922_v57 }
 0x14a   : > { %4999 = vst [vmem:[#allocation3_spill] sm:$0xff] %v4186_v46  ;;  %v863_v37 = vpop.permute.xlu1 %862 }
 0x14b   : > { %2324 = vrot.lane.b32.xlu0 %v2084_v56, %s2885_s13  ;;  %v1954_v56 = vadd.f32 %v1953_v40, %v1952_v55  ;;  %v1085_v29 = vsub.f32 %v2844_v58, %v863_v37  ;;  %v5002_v55 = vld [vmem:[#allocation7_spill] sm:$0xff]  ;;  %v5003_v37 = vld [vmem:[#allocation8_spill] sm:$0xff]  ;;  %v1324_v36 = vsel %vm1206_vm2, %v1175_v11, 0.0  ;;  %v4231_v10 = vmul.f32 %v703_v19, %v703_v19 }
 0x14c   : > { %920 = vrot.lane.b32.xlu1 %v207_v35, %s2884_s12  ;;  %v4212_v35 = vld [vmem:[%s2910_s11 + $0x210] sm:$0xff]  ;;  %v498_v7 = vrot.slane %v5002_v55, 7  ;;  %v499_v40 = vrot.slane %v5003_v37, 7  ;;  %v2849_v19 = vld [vmem:[%s2910_s11 + $0x228] sm:$0xff] }
 0x14d   : > { %v4204_v26 = vpop.permute.xlu0 %2268  ;;  %v269_v39 = vsub.f32 %v4212_v35, %v4177_v34  ;;  %v702_v31 = vsub.f32 %v4212_v35, %v495_v25  ;;  %v1956_v48 = vadd.f32 %v1955_v62, %v1954_v56  ;;  %v1959_v62 = vsel %vm1206_vm2, %v1689_v32, 0.0 }
 0x14e   : > { %5000 = vst [vmem:[#allocation4_spill] sm:$0xff] %v4204_v26  ;;  %v4207_v46 = vpop.permute.xlu1 %864  ;;  %v500_v52 = vsel %vm395_vm0, %v498_v7, %v499_v40  ;;  %v1691_v17 = vrot.slane %v4231_v10, 1  ;;  %v5004_v40 = vld [vmem:[#allocation9_spill] sm:$0xff]  ;;  %v272_v10 = vsub.f32 %v2849_v19, %v2847_v47 }
 0x14f   : > { %5001 = vst [vmem:[#allocation22_spill] sm:$0xff] %v4207_v46  ;;  %2326 = vrot.lane.b32.xlu0 %v2085_v49, %s2885_s13  ;;  %v1323_v49 = vadd.f32 %v1322_v42, %v1321_v20  ;;  %v2101_v46 = vmul.f32 %v1085_v29, %v1085_v29  ;;  %v1176_v34 = vmul.f32 %v269_v39, %v269_v39 }
 0x150   : > { %922 = vrot.lane.b32.xlu1 %v208_v8, %s2884_s12  ;;  %v270_v8 = vsub.f32 %v2847_v47, %v2844_v58  ;;  %v1464_v55 = vmul.f32 %v702_v31, %v702_v31  ;;  %v2087_v20 = vmul.f32 %v1071_v15, %v1071_v15  ;;  %v1958_v29 = vadd.f32 %v1957_v30, %v1956_v48 }
 0x151   : > { %v4225_v26 = vpop.permute.xlu0 %2270  ;;  %v1325_v56 = vadd.f32 %v1324_v36, %v1323_v49  ;;  %v1326_v39 = vsel %vm1206_vm2, %v1176_v34, 0.0  ;;  %v705_v37 = vsub.f32 %v2849_v19, %v500_v52  ;;  %v5005_v34 = vld [vmem:[#allocation10_spill] sm:$0xff]  ;;  %v2088_v49 = vmul.f32 %v1072_v18, %v1072_v18 }
 0x152   : > { %v867_v25 = vpop.permute.xlu1 %866  ;;  %v1177_v16 = vmul.f32 %v270_v8, %v270_v8  ;;  %v1690_v57 = vrot.slane %v1464_v55, 1  ;;  %v502_v15 = vrot.slane %v5005_v34, 7  ;;  %v1073_v36 = vsub.f32 %v3989_v63, %v3943_v33  ;;  %v2851_v34 = vld [vmem:[%s2910_s11 + $0x238] sm:$0xff] }
 0x153   : > { %v1087_v50 = vsub.f32 %v2847_v47, %v867_v25  ;;  %2328 = vrot.lane.b32.xlu0 %v2086_v28, %s2885_s13  ;;  %v501_v28 = vrot.slane %v5004_v40, 7  ;;  %v1961_v25 = vsel %vm1832_vm3, %v1688_v51, 0.0  ;;  %v1960_v30 = vadd.f32 %v1959_v62, %v1958_v29 }
 0x154   : > { %2358 = vrot.lane.b32.xlu1 %v2101_v46, %s2885_s13  ;;  %v4244_v46 = vld [vmem:[%s2910_s11 + $0x220] sm:$0xff]  ;;  %v1327_v8 = vadd.f32 %v1326_v39, %v1325_v56  ;;  %v2089_v63 = vmul.f32 %v1073_v36, %v1073_v36  ;;  %v1074_v51 = vsub.f32 %v3972_v24, %v3963_v6 }
 0x155   : > { %v2103_v11 = vmul.f32 %v1087_v50, %v1087_v50  ;;  %v4237_v58 = vpop.permute.xlu0 %2272  ;;  %v271_v31 = vsub.f32 %v4244_v46, %v4212_v35  ;;  %v704_v50 = vsub.f32 %v4244_v46, %v498_v7  ;;  %v1328_v7 = vsel %vm1206_vm2, %v1177_v16, 0.0 }
 0x156   : > { %v4239_v42 = vpop.permute.xlu1 %868  ;;  %v503_v33 = vsel %vm395_vm0, %v501_v28, %v502_v15  ;;  %v1962_v47 = vadd.f32 %v1961_v25, %v1960_v30  ;;  %v1329_v62 = vadd.f32 %v1328_v7, %v1327_v8  ;;  %v5007_v25 = vld [vmem:[#allocation18_spill] sm:$0xff]  ;;  %v2090_v8 = vmul.f32 %v1074_v51, %v1074_v51 }
 0x157   : > { %2330 = vrot.lane.b32.xlu0 %v2087_v20, %s2885_s13  ;;  %v1178_v55 = vmul.f32 %v271_v31, %v271_v31  ;;  %v1692_v20 = vsel %vm1590_vm1, %v1690_v57, %v1691_v17  ;;  %v1466_v18 = vmul.f32 %v704_v50, %v704_v50  ;;  %v1179_v57 = vmul.f32 %v272_v10, %v272_v10  ;;  %v4275_v50 = vld [vmem:[%s2910_s11 + $0x230] sm:$0xff] }
 0x158   : > { %2362 = vrot.lane.b32.xlu1 %v2103_v11, %s2885_s13  ;;  %v4263_v11 = vmul.f32 %v705_v37, %v705_v37  ;;  %v1963_v16 = vsel %vm1206_vm2, %v1692_v20, 0.0  ;;  %v273_v37 = vsub.f32 %v4275_v50, %v4244_v46  ;;  %v706_v40 = vsub.f32 %v4275_v50, %v501_v28 }
 0x159   : > { %v4257_v48 = vpop.permute.xlu0 %2274  ;;  %v1330_v31 = vsel %vm1206_vm2, %v1178_v55, 0.0  ;;  %v1693_v6 = vrot.slane %v1466_v18, 1  ;;  %v707_v15 = vsub.f32 %v2851_v34, %v503_v33  ;;  %v505_v30 = vrot.slane %v5007_v25, 7  ;;  %v2853_v25 = vld [vmem:[%s2910_s11 + $0x248] sm:$0xff] }
 0x15a   : > { %v871_v32 = vpop.permute.xlu1 %870  ;;  %v1694_v24 = vrot.slane %v4263_v11, 1  ;;  %v1965_v55 = vsel %vm1832_vm3, %v1691_v17, 0.0  ;;  %v1964_v10 = vadd.f32 %v1963_v16, %v1962_v47  ;;  %v1332_v18 = vsel %vm1206_vm2, %v1179_v57, 0.0 }
 0x15b   : > { %v1089_v52 = vsub.f32 %v2849_v19, %v871_v32  ;;  %2332 = vrot.lane.b32.xlu0 %v2088_v49, %s2885_s13  ;;  %v5006_v49 = vld [vmem:[#allocation11_spill] sm:$0xff]  ;;  %v1075_v32 = vsub.f32 %v4030_v45, %v3984_v38  ;;  %v1180_v28 = vmul.f32 %v273_v37, %v273_v37  ;;  %v274_v11 = vsub.f32 %v2851_v34, %v2849_v19 }
 0x15c   : > { %v504_v36 = vrot.slane %v5006_v49, 7  ;;  %v1468_v51 = vmul.f32 %v706_v40, %v706_v40  ;;  %v1076_v17 = vsub.f32 %v4013_v14, %v4004_v41  ;;  %v1966_v19 = vadd.f32 %v1965_v55, %v1964_v10  ;;  %v4306_v40 = vld [vmem:[%s2910_s11 + $0x240] sm:$0xff]  ;;  %v5009_v55 = vld [vmem:[#allocation21_spill] sm:$0xff] }
 0x15d   : > { %v2105_v56 = vmul.f32 %v1089_v52, %v1089_v52  ;;  %v4268_v29 = vpop.permute.xlu0 %2276  ;;  %v1331_v52 = vadd.f32 %v1330_v31, %v1329_v62  ;;  %v2091_v45 = vmul.f32 %v1075_v32, %v1075_v32  ;;  %v1334_v37 = vsel %vm1206_vm2, %v1180_v28, 0.0 }
 0x15e   : > { %v4270_v39 = vpop.permute.xlu1 %872  ;;  %v506_v38 = vsel %vm395_vm0, %v504_v36, %v505_v30  ;;  %v1696_v41 = vrot.slane %v1468_v51, 1  ;;  %v708_v49 = vsub.f32 %v4306_v40, %v504_v36  ;;  %v508_v10 = vrot.slane %v5009_v55, 7  ;;  %v4346_v55 = vld [vmem:[%s2910_s11 + $0x258] sm:$0xff] }
 0x15f   : > { %2334 = vrot.lane.b32.xlu0 %v2089_v63, %s2885_s13  ;;  %2366 = vrot.lane.b32.xlu1 %v2105_v56, %s2885_s13  ;;  %v1695_v63 = vsel %vm1590_vm1, %v1693_v6, %v1694_v24  ;;  %v4294_v56 = vmul.f32 %v707_v15, %v707_v15  ;;  %v1333_v16 = vadd.f32 %v1332_v18, %v1331_v52  ;;  %v1969_v28 = vsel %vm1832_vm3, %v1694_v24, 0.0 }
 0x160   : > { %v1967_v57 = vsel %vm1206_vm2, %v1695_v63, 0.0  ;;  %v1181_v6 = vmul.f32 %v274_v11, %v274_v11  ;;  %v275_v15 = vsub.f32 %v4306_v40, %v4275_v50  ;;  %v709_v30 = vsub.f32 %v2853_v25, %v506_v38 }
 0x161   : > { %v4288_v7 = vpop.permute.xlu0 %2278  ;;  %v1697_v14 = vrot.slane %v4294_v56, 1  ;;  %v2092_v52 = vmul.f32 %v1076_v17, %v1076_v17  ;;  %v1968_v11 = vadd.f32 %v1967_v57, %v1966_v19  ;;  %v276_v56 = vsub.f32 %v2853_v25, %v2851_v34 }
 0x162   : > { %v875_v20 = vpop.permute.xlu1 %874  ;;  %v1336_v51 = vsel %vm1206_vm2, %v1181_v6, 0.0  ;;  %v1182_v36 = vmul.f32 %v275_v15, %v275_v15  ;;  %v1470_v17 = vmul.f32 %v708_v49, %v708_v49  ;;  %v1078_v24 = vsub.f32 %v4054_v54, %v4045_v60  ;;  %v4337_v49 = vld [vmem:[%s2910_s11 + $0x250] sm:$0xff] }
 0x163   : > { %v1091_v33 = vsub.f32 %v2851_v34, %v875_v20  ;;  %2336 = vrot.lane.b32.xlu0 %v2090_v8, %s2885_s13  ;;  %v5008_v8 = vld [vmem:[#allocation13_spill] sm:$0xff]  ;;  %v1077_v20 = vsub.f32 %v4071_v12, %v4025_v13  ;;  %v1970_v34 = vadd.f32 %v1969_v28, %v1968_v11 }
 0x164   : > { %v507_v32 = vrot.slane %v5008_v8, 7  ;;  %v1338_v15 = vsel %vm1206_vm2, %v1182_v36, 0.0  ;;  %v1699_v60 = vrot.slane %v1470_v17, 1  ;;  %v1973_v36 = vsel %vm1832_vm3, %v1697_v14, 0.0 }
 0x165   : > { %v2107_v47 = vmul.f32 %v1091_v33, %v1091_v33  ;;  %v4299_v62 = vpop.permute.xlu0 %2280  ;;  %v1335_v33 = vadd.f32 %v1334_v37, %v1333_v16  ;;  %v2093_v12 = vmul.f32 %v1077_v20, %v1077_v20  ;;  %v1079_v20 = vsub.f32 %v4112_v0, %v4066_v61 }
 0x166   : > { %v4301_v31 = vpop.permute.xlu1 %876  ;;  %v509_v13 = vsel %vm395_vm0, %v507_v32, %v508_v10  ;;  %v710_v8 = vsub.f32 %v4337_v49, %v507_v32 }
 0x167   : > { %2338 = vrot.lane.b32.xlu0 %v2091_v45, %s2885_s13  ;;  %2370 = vrot.lane.b32.xlu1 %v2107_v47, %s2885_s13  ;;  %v1698_v45 = vsel %vm1590_vm1, %v1696_v41, %v1697_v14  ;;  %v4325_v47 = vmul.f32 %v709_v30, %v709_v30  ;;  %v1337_v57 = vadd.f32 %v1336_v51, %v1335_v33 }
 0x168   : > { %v1971_v6 = vsel %vm1206_vm2, %v1698_v45, 0.0  ;;  %v1183_v41 = vmul.f32 %v276_v56, %v276_v56  ;;  %v277_v30 = vsub.f32 %v4337_v49, %v4306_v40  ;;  %v711_v10 = vsub.f32 %v4346_v55, %v509_v13 }
 0x169   : > { %v4319_v18 = vpop.permute.xlu0 %2282  ;;  %v1700_v54 = vrot.slane %v4325_v47, 1  ;;  %v1972_v11 = vadd.f32 %v1971_v6, %v1970_v34  ;;  %v1339_v33 = vadd.f32 %v1338_v15, %v1337_v57  ;;  %v1472_v17 = vmul.f32 %v710_v8, %v710_v8  ;;  %v5010_v6 = vld [vmem:[#allocation23_spill] sm:$0xff] }
 0x16a   : > { %v879_v63 = vpop.permute.xlu1 %878  ;;  %v1340_v56 = vsel %vm1206_vm2, %v1183_v41, 0.0  ;;  %v1184_v32 = vmul.f32 %v277_v30, %v277_v30  ;;  %v4359_v61 = vmul.f32 %v711_v10, %v711_v10  ;;  %v2095_v0 = vmul.f32 %v1079_v20, %v1079_v20  ;;  %v5011_v41 = vld [vmem:[#allocation24_spill] sm:$0xff]  ;;  %v4381_v10 = vld [vmem:[%s2910_s11 + $0x268] sm:$0xff] }
 0x16b   : > { %v1093_v38 = vsub.f32 %v2853_v25, %v879_v63  ;;  %2340 = vrot.lane.b32.xlu0 %v2092_v52, %s2885_s13  ;;  %v2094_v52 = vmul.f32 %v1078_v24, %v1078_v24  ;;  %v278_v63 = vsub.f32 %v4346_v55, %v2853_v25  ;;  %v1701_v45 = vsel %vm1590_vm1, %v1699_v60, %v1700_v54  ;;  %v4377_v60 = vld [vmem:[%s2910_s11 + $0x260] sm:$0xff] }
 0x16c   : > { %v1080_v25 = vsub.f32 %v4095_v59, %v4086_v44  ;;  %v1974_v13 = vadd.f32 %v1973_v36, %v1972_v11  ;;  %v1975_v34 = vsel %vm1206_vm2, %v1701_v45, 0.0  ;;  %v1342_v57 = vsel %vm1206_vm2, %v1184_v32, 0.0 }
 0x16d   : > { %v2109_v19 = vmul.f32 %v1093_v38, %v1093_v38  ;;  %v4330_v16 = vpop.permute.xlu0 %2284  ;;  %v1185_v24 = vmul.f32 %v278_v63, %v278_v63  ;;  %v2518_v15 = vsel %vm2516_vm4, %v5010_v6, 0.0  ;;  %v2517_v30 = vsel %vm2516_vm4, %v5011_v41, 0.0 }
 0x16e   : > { %v4332_v37 = vpop.permute.xlu1 %880  ;;  %v1702_v44 = vrot.slane %v1472_v17, 1  ;;  %v1703_v59 = vrot.slane %v4359_v61, 1  ;;  %v510_v8 = vrot.slane %v4377_v60, 7  ;;  %v2096_v20 = vmul.f32 %v1080_v25, %v1080_v25 }
 0x16f   : > { %2342 = vrot.lane.b32.xlu0 %v2093_v12, %s2885_s13  ;;  %2374 = vrot.lane.b32.xlu1 %v2109_v19, %s2885_s13  ;;  %v1341_v12 = vadd.f32 %v1340_v56, %v1339_v33  ;;  %v1081_v11 = vsub.f32 %v4153_v9, %v4107_v5  ;;  %v1976_v63 = vadd.f32 %v1975_v34, %v1974_v13  ;;  %v1977_v32 = vsel %vm1832_vm3, %v1700_v54, 0.0 }
 0x170   : > { %v279_v36 = vsub.f32 %v4377_v60, %v4337_v49  ;;  %v2520_v45 = vsel %vm2516_vm4, %v3840_v4, 0.0  ;;  %v1344_v5 = vsel %vm1206_vm2, %v1185_v24, 0.0  ;;  %v1704_v9 = vsel %vm1590_vm1, %v1702_v44, %v1703_v59 }
 0x171   : > { %v4351_v28 = vpop.permute.xlu0 %2286  ;;  %v2097_v25 = vmul.f32 %v1081_v11, %v1081_v11  ;;  %v1082_v54 = vsub.f32 %v4136_v27, %v4127_v1  ;;  %v1978_v13 = vadd.f32 %v1977_v32, %v1976_v63  ;;  %v2524_v1 = vsel %vm2516_vm4, %v3878_v53, 0.0 }
 0x172   : > { %v883_v51 = vpop.permute.xlu1 %882  ;;  %v1186_v34 = vmul.f32 %v279_v36, %v279_v36  ;;  %v1979_v27 = vsel %vm1206_vm2, %v1704_v9, 0.0  ;;  %v1083_v11 = vsub.f32 %v4190_v2, %v4148_v23 }
 0x173   : > { %v1095_v38 = vsub.f32 %v4346_v55, %v883_v51  ;;  %2344 = vrot.lane.b32.xlu0 %v2094_v52, %s2885_s13  ;;  %v511_v52 = vrot.slane %v4381_v10, 7  ;;  %v2519_v51 = vadd.f32 %v2518_v15, %v2517_v30  ;;  %v280_v15 = vsub.f32 %v4381_v10, %v4346_v55 }
 0x174   : > { %v2098_v53 = vmul.f32 %v1082_v54, %v1082_v54  ;;  %v1346_v36 = vsel %vm1206_vm2, %v1186_v34, 0.0  ;;  %v5013_v54 = vld [vmem:[#allocation20_spill] sm:$0xff] }
 0x175   : > { %v2111_v47 = vmul.f32 %v1095_v38, %v1095_v38  ;;  %v4363_v14 = vpop.permute.xlu0 %2288  ;;  %v1343_v38 = vadd.f32 %v1342_v57, %v1341_v12  ;;  %v512_v61 = vsel %vm395_vm0, %v510_v8, %v511_v52  ;;  %v712_v12 = vsub.f32 %v4377_v60, %v510_v8  ;;  %v4420_v8 = vld [vmem:[%s2910_s11 + $0x278] sm:$0xff] }
 0x176   : > { %v4365_v19 = vpop.permute.xlu1 %884  ;;  %v2521_v24 = vadd.f32 %v2520_v45, %v2519_v51  ;;  %v713_v30 = vsub.f32 %v4381_v10, %v512_v61  ;;  %v514_v55 = vrot.slane %v4420_v8, 7  ;;  %v1981_v51 = vsel %vm1832_vm3, %v1703_v59, 0.0 }
 0x177   : > { %2346 = vrot.lane.b32.xlu0 %v2095_v0, %s2885_s13  ;;  %2378 = vrot.lane.b32.xlu1 %v2111_v47, %s2885_s13  ;;  %v2522_v0 = vsel %vm2516_vm4, %v3861_v43, 0.0  ;;  %v1345_v6 = vadd.f32 %v1344_v5, %v1343_v38  ;;  %v4410_v43 = vld [vmem:[%s2910_s11 + $0x270] sm:$0xff]  ;;  %v1980_v45 = vadd.f32 %v1979_v27, %v1978_v13  ;;  %v2528_v5 = vsel %vm2516_vm4, %v3919_v22, 0.0 }
 0x178   : > { %v513_v41 = vrot.slane %v4410_v43, 7  ;;  %v2523_v44 = vadd.f32 %v2522_v0, %v2521_v24  ;;  %v281_v52 = vsub.f32 %v4410_v43, %v4377_v60  ;;  %v4437_v9 = vmul.f32 %v713_v30, %v713_v30  ;;  %v5014_v30 = vld [vmem:[#allocation25_spill] sm:$0xff] }
 0x179   : > { %v4386_v33 = vpop.permute.xlu0 %2290  ;;  %v2530_v61 = vsel %vm2516_vm4, %v3940_v21, 0.0  ;;  %v2099_v0 = vmul.f32 %v1083_v11, %v1083_v11  ;;  %v282_v24 = vsub.f32 %v4420_v8, %v4381_v10  ;;  %v2532_v21 = vsel %vm2516_vm4, %v5014_v30, 0.0 }
 0x17a   : > { %v887_v56 = vpop.permute.xlu1 %886  ;;  %v2525_v32 = vadd.f32 %v2524_v1, %v2523_v44  ;;  %v714_v23 = vsub.f32 %v4410_v43, %v513_v41  ;;  %v515_v2 = vsel %vm395_vm0, %v513_v41, %v514_v55  ;;  %v1188_v34 = vmul.f32 %v281_v52, %v281_v52 }
 0x17b   : > { %v1097_v17 = vsub.f32 %v4381_v10, %v887_v56  ;;  %2348 = vrot.lane.b32.xlu0 %v2096_v20, %s2885_s13  ;;  %v2526_v20 = vsel %vm2516_vm4, %v3899_v3, 0.0  ;;  %v1474_v56 = vmul.f32 %v712_v12, %v712_v12  ;;  %v1347_v12 = vadd.f32 %v1346_v36, %v1345_v6  ;;  %v5016_v36 = vld [vmem:[#allocation22_spill] sm:$0xff] }
 0x17c   : > { %v2527_v59 = vadd.f32 %v2526_v20, %v2525_v32  ;;  %v1982_v44 = vadd.f32 %v1981_v51, %v1980_v45  ;;  %v1706_v6 = vrot.slane %v4437_v9, 1  ;;  %v715_v55 = vsub.f32 %v4420_v8, %v515_v2  ;;  %v5015_v20 = vld [vmem:[#allocation26_spill] sm:$0xff]  ;;  %v5017_v2 = vld [vmem:[#allocation27_spill] sm:$0xff] }
 0x17d   : > { %v2113_v47 = vmul.f32 %v1097_v17, %v1097_v17  ;;  %v4402_v4 = vpop.permute.xlu0 %2292  ;;  %v1187_v17 = vmul.f32 %v280_v15, %v280_v15  ;;  %v1705_v41 = vrot.slane %v1474_v56, 1  ;;  %v1476_v52 = vmul.f32 %v714_v23, %v714_v23 }
 0x17e   : > { %v4405_v57 = vpop.permute.xlu1 %888  ;;  %v2529_v15 = vadd.f32 %v2528_v5, %v2527_v59  ;;  %v1086_v56 = vsub.f32 %v4212_v35, %v5016_v36  ;;  %v1189_v51 = vmul.f32 %v282_v24, %v282_v24  ;;  %v2536_v59 = vsel %vm2516_vm4, %v5017_v2, 0.0  ;;  %v5019_v36 = vld [vmem:[#allocation29_spill] sm:$0xff] }
 0x17f   : > { %2350 = vrot.lane.b32.xlu0 %v2097_v25, %s2885_s13  ;;  %2382 = vrot.lane.b32.xlu1 %v2113_v47, %s2885_s13  ;;  %v5012_v25 = vld [vmem:[#allocation19_spill] sm:$0xff]  ;;  %v1348_v27 = vsel %vm1206_vm2, %v1187_v17, 0.0  ;;  %v1350_v17 = vsel %vm1206_vm2, %v1188_v34, 0.0  ;;  %v1088_v24 = vsub.f32 %v4244_v46, %v4239_v42  ;;  %v1708_v30 = vrot.slane %v1476_v52, 1 }
 0x180   : > { %v1084_v47 = vsub.f32 %v5013_v54, %v5012_v25  ;;  %v2531_v10 = vadd.f32 %v2530_v61, %v2529_v15  ;;  %v4474_v61 = vld [vmem:[%s2910_s11 + $0x288] sm:$0xff]  ;;  %v4479_v25 = vmul.f32 %v715_v55, %v715_v55  ;;  %v2102_v34 = vmul.f32 %v1086_v56, %v1086_v56 }
 0x181   : > { %v4429_v63 = vpop.permute.xlu0 %2294  ;;  %v517_v54 = vrot.slane %v4474_v61, 7  ;;  %v2540_v56 = vsel %vm2516_vm4, %v5019_v36, 0.0  ;;  %v284_v46 = vsub.f32 %v4474_v61, %v4420_v8  ;;  %v1985_v2 = vsel %vm1832_vm3, %v1706_v6, 0.0 }
 0x182   : > { %v891_v38 = vpop.permute.xlu1 %890  ;;  %v2100_v11 = vmul.f32 %v1084_v47, %v1084_v47  ;;  %v2533_v45 = vadd.f32 %v2532_v21, %v2531_v10  ;;  %v1352_v10 = vsel %vm1206_vm2, %v1189_v51, 0.0  ;;  %v1709_v42 = vrot.slane %v4479_v25, 1 }
 0x183   : > { %v1099_v3 = vsub.f32 %v4420_v8, %v891_v38  ;;  %2352 = vrot.lane.b32.xlu0 %v2098_v53, %s2885_s13  ;;  %v2534_v53 = vsel %vm2516_vm4, %v5015_v20, 0.0  ;;  %v1349_v38 = vadd.f32 %v1348_v27, %v1347_v12 }
 0x184   : > { %v2535_v47 = vadd.f32 %v2534_v53, %v2533_v45  ;;  %v2104_v45 = vmul.f32 %v1088_v24, %v1088_v24 }
 0x185   : > { %v2115_v13 = vmul.f32 %v1099_v3, %v1099_v3  ;;  %v4445_v22 = vpop.permute.xlu0 %2296  ;;  %v4466_v3 = vld [vmem:[%s2910_s11 + $0x280] sm:$0xff]  ;;  %v1351_v21 = vadd.f32 %v1350_v17, %v1349_v38 }
 0x186   : > { %v4449_v1 = vpop.permute.xlu1 %892  ;;  %v283_v9 = vsub.f32 %v4466_v3, %v4410_v43  ;;  %v516_v23 = vrot.slane %v4466_v3, 7  ;;  %v5020_v17 = vld [vmem:[#allocation14_spill] sm:$0xff] }
 0x187   : > { %2354 = vrot.lane.b32.xlu0 %v2099_v0, %s2885_s13  ;;  %2386 = vrot.lane.b32.xlu1 %v2115_v13, %s2885_s13  ;;  %v1707_v0 = vsel %vm1590_vm1, %v1705_v41, %v1706_v6  ;;  %v5018_v13 = vld [vmem:[#allocation28_spill] sm:$0xff]  ;;  %v2537_v41 = vadd.f32 %v2536_v59, %v2535_v47  ;;  %v2542_v51 = vsel %vm2516_vm4, %v5020_v17, 0.0  ;;  %v1191_v6 = vmul.f32 %v284_v46, %v284_v46 }
 0x188   : > { %v2538_v12 = vsel %vm2516_vm4, %v5018_v13, 0.0  ;;  %v1983_v20 = vsel %vm1206_vm2, %v1707_v0, 0.0  ;;  %v716_v53 = vsub.f32 %v4466_v3, %v516_v23  ;;  %v518_v52 = vsel %vm395_vm0, %v516_v23, %v517_v54  ;;  %v5021_v23 = vld [vmem:[#allocation15_spill] sm:$0xff]  ;;  %v4514_v13 = vld [vmem:[%s2910_s11 + $0x298] sm:$0xff] }
 0x189   : > { %v4462_v32 = vpop.permute.xlu0 %2298  ;;  %v2539_v38 = vadd.f32 %v2538_v12, %v2537_v41  ;;  %v1984_v59 = vadd.f32 %v1983_v20, %v1982_v44  ;;  %v717_v8 = vsub.f32 %v4474_v61, %v518_v52  ;;  %v2544_v54 = vsel %vm2516_vm4, %v5021_v23, 0.0 }
 0x18a   : > { %v895_v5 = vpop.permute.xlu1 %894  ;;  %v4508_v47 = vmul.f32 %v716_v53, %v716_v53  ;;  %v4527_v53 = vld [vmem:[%s2910_s11 + $0x290] sm:$0xff]  ;;  %v286_v23 = vsub.f32 %v4514_v13, %v4474_v61 }
 0x18b   : > { %v1101_v35 = vsub.f32 %v4474_v61, %v895_v5  ;;  %2356 = vrot.lane.b32.xlu0 %v2100_v11, %s2885_s13  ;;  %v1190_v11 = vmul.f32 %v283_v9, %v283_v9  ;;  %v1090_v5 = vsub.f32 %v4275_v50, %v4270_v39  ;;  %v2541_v0 = vadd.f32 %v2540_v56, %v2539_v38  ;;  %v5023_v38 = vld [vmem:[#allocation12_spill] sm:$0xff] }
 0x18c   : > { %v1710_v50 = vsel %vm1590_vm1, %v1708_v30, %v1709_v42  ;;  %v1986_v20 = vadd.f32 %v1985_v2, %v1984_v59  ;;  %v285_v30 = vsub.f32 %v4527_v53, %v4466_v3  ;;  %v1711_v56 = vrot.slane %v4508_v47, 1  ;;  %v5024_v2 = vld [vmem:[#allocation2_spill] sm:$0xff] }
 0x18d   : > { %v2117_v15 = vmul.f32 %v1101_v35, %v1101_v35  ;;  %v4486_v27 = vpop.permute.xlu0 %2300  ;;  %v1353_v35 = vadd.f32 %v1352_v10, %v1351_v21  ;;  %v1354_v44 = vsel %vm1206_vm2, %v1190_v11, 0.0  ;;  %v2543_v12 = vadd.f32 %v2542_v51, %v2541_v0 }
 0x18e   : > { %v4489_v55 = vpop.permute.xlu1 %896  ;;  %v1092_v21 = vsub.f32 %v4306_v40, %v4301_v31  ;;  %v4534_v52 = vmul.f32 %v717_v8, %v717_v8  ;;  %v2548_v31 = vsel %vm2516_vm4, %v5023_v38, 0.0  ;;  %v1987_v40 = vsel %vm1206_vm2, %v1710_v50, 0.0 }
 0x18f   : > { %2360 = vrot.lane.b32.xlu0 %v2102_v34, %s2885_s13  ;;  %2390 = vrot.lane.b32.xlu1 %v2117_v15, %s2885_s13  ;;  %v5022_v34 = vld [vmem:[#allocation17_spill] sm:$0xff]  ;;  %v2106_v15 = vmul.f32 %v1090_v5, %v1090_v5  ;;  %v2545_v36 = vadd.f32 %v2544_v54, %v2543_v12  ;;  %v1355_v46 = vadd.f32 %v1354_v44, %v1353_v35  ;;  %v519_v17 = vrot.slane %v4527_v53, 7 }
 0x190   : > { %v2546_v24 = vsel %vm2516_vm4, %v5022_v34, 0.0  ;;  %v520_v51 = vrot.slane %v4514_v13, 7  ;;  %v1356_v5 = vsel %vm1206_vm2, %v1191_v6, 0.0  ;;  %v2550_v59 = vsel %vm2516_vm4, %v5024_v2, 0.0  ;;  %v5025_v6 = vld [vmem:[#allocation16_spill] sm:$0xff]  ;;  %v4557_v34 = vld [vmem:[%s2910_s11 + $0x2a8] sm:$0xff] }
 0x191   : > { %v4505_v9 = vpop.permute.xlu0 %2302  ;;  %v2108_v35 = vmul.f32 %v1092_v21, %v1092_v21  ;;  %v1094_v0 = vsub.f32 %v4337_v49, %v4332_v37  ;;  %v1989_v47 = vsel %vm1832_vm3, %v1709_v42, 0.0  ;;  %v1192_v8 = vmul.f32 %v285_v30, %v285_v30 }
 0x192   : > { %v899_v25 = vpop.permute.xlu1 %898  ;;  %v1988_v50 = vadd.f32 %v1987_v40, %v1986_v20  ;;  %v1712_v44 = vrot.slane %v4534_v52, 1  ;;  %v2552_v12 = vsel %vm2516_vm4, %v5025_v6, 0.0  ;;  %v1357_v49 = vadd.f32 %v1356_v5, %v1355_v46 }
 0x193   : > { %v1103_v39 = vsub.f32 %v4514_v13, %v899_v25  ;;  %2364 = vrot.lane.b32.xlu0 %v2104_v45, %s2885_s13  ;;  %v2547_v45 = vadd.f32 %v2546_v24, %v2545_v36  ;;  %v718_v42 = vsub.f32 %v4527_v53, %v519_v17  ;;  %v521_v61 = vsel %vm395_vm0, %v519_v17, %v520_v51 }
 0x194   : > { %v1096_v20 = vsub.f32 %v4377_v60, %v4365_v19  ;;  %v1358_v52 = vsel %vm1206_vm2, %v1192_v8, 0.0  ;;  %v1193_v38 = vmul.f32 %v286_v23, %v286_v23  ;;  %v1990_v51 = vadd.f32 %v1989_v47, %v1988_v50  ;;  %v5027_v19 = vld [vmem:[#allocation4_spill] sm:$0xff] }
 0x195   : > { %v2119_v10 = vmul.f32 %v1103_v39, %v1103_v39  ;;  %v4524_v41 = vpop.permute.xlu0 %2304  ;;  %v2549_v54 = vadd.f32 %v2548_v31, %v2547_v45  ;;  %v4571_v31 = vld [vmem:[%s2910_s11 + $0x2a0] sm:$0xff]  ;;  %v1713_v45 = vsel %vm1590_vm1, %v1711_v56, %v1712_v44  ;;  %v719_v5 = vsub.f32 %v4514_v13, %v521_v61  ;;  %v4598_v61 = vld [vmem:[%s2910_s11 + $0x2b8] sm:$0xff] }
 0x196   : > { %v4531_v11 = vpop.permute.xlu1 %900  ;;  %v287_v46 = vsub.f32 %v4571_v31, %v4527_v53  ;;  %v2556_v60 = vsel %vm2516_vm4, %v5027_v19, 0.0  ;;  %v1480_v2 = vmul.f32 %v718_v42, %v718_v42  ;;  %v1359_v8 = vadd.f32 %v1358_v52, %v1357_v49 }
 0x197   : > { %2368 = vrot.lane.b32.xlu0 %v2106_v15, %s2885_s13  ;;  %2394 = vrot.lane.b32.xlu1 %v2119_v10, %s2885_s13  ;;  %v2551_v24 = vadd.f32 %v2550_v59, %v2549_v54  ;;  %v5026_v15 = vld [vmem:[#allocation3_spill] sm:$0xff]  ;;  %v2110_v10 = vmul.f32 %v1094_v0, %v1094_v0  ;;  %v522_v59 = vrot.slane %v4571_v31, 7  ;;  %v2558_v56 = vsel %vm2516_vm4, %v4225_v26, 0.0 }
 0x198   : > { %v2554_v21 = vsel %vm2516_vm4, %v5026_v15, 0.0  ;;  %v2112_v47 = vmul.f32 %v1096_v20, %v1096_v20  ;;  %v1098_v23 = vsub.f32 %v4410_v43, %v4405_v57  ;;  %v1360_v50 = vsel %vm1206_vm2, %v1193_v38, 0.0 }
 0x199   : > { %v4548_v25 = vpop.permute.xlu0 %2306  ;;  %v2553_v40 = vadd.f32 %v2552_v12, %v2551_v24  ;;  %v1194_v6 = vmul.f32 %v287_v46, %v287_v46  ;;  %v1481_v42 = vmul.f32 %v719_v5, %v719_v5  ;;  %v288_v49 = vsub.f32 %v4557_v34, %v4514_v13 }
 0x19a   : > { %v903_v39 = vpop.permute.xlu1 %902  ;;  %v2560_v26 = vsel %vm2516_vm4, %v4237_v58, 0.0  ;;  %v1993_v43 = vsel %vm1832_vm3, %v1712_v44, 0.0  ;;  %v1714_v24 = vrot.slane %v1480_v2, 1  ;;  %v2114_v20 = vmul.f32 %v1098_v23, %v1098_v23 }
 0x19b   : > { %v1105_v37 = vsub.f32 %v4557_v34, %v903_v39  ;;  %2372 = vrot.lane.b32.xlu0 %v2108_v35, %s2885_s13  ;;  %v523_v35 = vrot.slane %v4557_v34, 7  ;;  %v2555_v0 = vadd.f32 %v2554_v21, %v2553_v40  ;;  %v1991_v39 = vsel %vm1206_vm2, %v1713_v45, 0.0 }
 0x19c   : > { %v1100_v58 = vsub.f32 %v4466_v3, %v4449_v1  ;;  %v1992_v52 = vadd.f32 %v1991_v39, %v1990_v51  ;;  %v1361_v38 = vadd.f32 %v1360_v50, %v1359_v8  ;;  %v720_v46 = vsub.f32 %v4571_v31, %v522_v59  ;;  %v4620_v3 = vld [vmem:[%s2910_s11 + $0x2b0] sm:$0xff] }
 0x19d   : > { %v2121_v30 = vmul.f32 %v1105_v37, %v1105_v37  ;;  %v4567_v36 = vpop.permute.xlu0 %2308  ;;  %v2557_v12 = vadd.f32 %v2556_v60, %v2555_v0  ;;  %v524_v15 = vsel %vm395_vm0, %v522_v59, %v523_v35  ;;  %v1715_v45 = vrot.slane %v1481_v42, 1 }
 0x19e   : > { %v4575_v17 = vpop.permute.xlu1 %904  ;;  %v1362_v5 = vsel %vm1206_vm2, %v1194_v6, 0.0  ;;  %v1195_v19 = vmul.f32 %v288_v49, %v288_v49  ;;  %v721_v1 = vsub.f32 %v4557_v34, %v524_v15  ;;  %v525_v51 = vrot.slane %v4620_v3, 7 }
 0x19f   : > { %2376 = vrot.lane.b32.xlu0 %v2110_v10, %s2885_s13  ;;  %2398 = vrot.lane.b32.xlu1 %v2121_v30, %s2885_s13  ;;  %v2559_v21 = vadd.f32 %v2558_v56, %v2557_v12  ;;  %v2562_v10 = vsel %vm2516_vm4, %v4257_v48, 0.0  ;;  %v2564_v48 = vsel %vm2516_vm4, %v4268_v29, 0.0  ;;  %v526_v60 = vrot.slane %v4598_v61, 7 }
 0x1a0   : > { %v2566_v59 = vsel %vm2516_vm4, %v4288_v7, 0.0  ;;  %v2116_v35 = vmul.f32 %v1100_v58, %v1100_v58  ;;  %v1102_v29 = vsub.f32 %v4527_v53, %v4489_v55  ;;  %v1994_v8 = vadd.f32 %v1993_v43, %v1992_v52  ;;  %v4636_v7 = vld [vmem:[%s2910_s11 + $0x2c8] sm:$0xff] }
 0x1a1   : > { %v4589_v54 = vpop.permute.xlu0 %2310  ;;  %v2561_v44 = vadd.f32 %v2560_v26, %v2559_v21  ;;  %v1482_v56 = vmul.f32 %v720_v46, %v720_v46  ;;  %v1716_v50 = vsel %vm1590_vm1, %v1714_v24, %v1715_v45  ;;  %v1363_v6 = vadd.f32 %v1362_v5, %v1361_v38 }
 0x1a2   : > { %v907_v37 = vpop.permute.xlu1 %906  ;;  %v2568_v12 = vsel %vm2516_vm4, %v4299_v62, 0.0  ;;  %v1364_v55 = vsel %vm1206_vm2, %v1195_v19, 0.0  ;;  %v4641_v53 = vmul.f32 %v721_v1, %v721_v1  ;;  %v527_v42 = vsel %vm395_vm0, %v525_v51, %v526_v60 }
 0x1a3   : > { %v1107_v57 = vsub.f32 %v4598_v61, %v907_v37  ;;  %2380 = vrot.lane.b32.xlu0 %v2112_v47, %s2885_s13  ;;  %v2563_v2 = vadd.f32 %v2562_v10, %v2561_v44  ;;  %v289_v47 = vsub.f32 %v4620_v3, %v4571_v31  ;;  %v2570_v26 = vsel %vm2516_vm4, %v4319_v18, 0.0 }
 0x1a4   : > { %v1104_v62 = vsub.f32 %v4571_v31, %v4531_v11  ;;  %v1995_v15 = vsel %vm1206_vm2, %v1716_v50, 0.0  ;;  %v1997_v21 = vsel %vm1832_vm3, %v1715_v45, 0.0  ;;  %v722_v52 = vsub.f32 %v4620_v3, %v525_v51  ;;  %v4660_v31 = vld [vmem:[%s2910_s11 + $0x2c0] sm:$0xff] }
 0x1a5   : > { %v2123_v13 = vmul.f32 %v1107_v57, %v1107_v57  ;;  %v4608_v30 = vpop.permute.xlu0 %2312  ;;  %v2565_v23 = vadd.f32 %v2564_v48, %v2563_v2  ;;  %v2118_v57 = vmul.f32 %v1102_v29, %v1102_v29  ;;  %v1196_v10 = vmul.f32 %v289_v47, %v289_v47 }
 0x1a6   : > { %v4611_v40 = vpop.permute.xlu1 %908  ;;  %v723_v18 = vsub.f32 %v4598_v61, %v527_v42  ;;  %v2572_v38 = vsel %vm2516_vm4, %v4330_v16, 0.0  ;;  %v1718_v11 = vrot.slane %v4641_v53, 1  ;;  %v528_v46 = vrot.slane %v4660_v31, 7 }
 0x1a7   : > { %2384 = vrot.lane.b32.xlu0 %v2114_v20, %s2885_s13  ;;  %2402 = vrot.lane.b32.xlu1 %v2123_v13, %s2885_s13  ;;  %v2567_v49 = vadd.f32 %v2566_v59, %v2565_v23  ;;  %v1717_v13 = vrot.slane %v1482_v56, 1  ;;  %v529_v44 = vrot.slane %v4636_v7, 7  ;;  %v1365_v5 = vadd.f32 %v1364_v55, %v1363_v6 }
 0x1a8   : > { %v2574_v19 = vsel %vm2516_vm4, %v4351_v28, 0.0  ;;  %v2120_v48 = vmul.f32 %v1104_v62, %v1104_v62  ;;  %v1106_v16 = vsub.f32 %v4620_v3, %v4575_v17  ;;  %v1996_v51 = vadd.f32 %v1995_v15, %v1994_v8  ;;  %v4676_v28 = vld [vmem:[%s2910_s11 + $0x2d8] sm:$0xff]  ;;  %v4698_v15 = vld [vmem:[%s2910_s11 + $0x2d0] sm:$0xff] }
 0x1a9   : > { %v4628_v0 = vpop.permute.xlu0 %2314  ;;  %v2569_v20 = vadd.f32 %v2568_v12, %v2567_v49  ;;  %v1366_v60 = vsel %vm1206_vm2, %v1196_v10, 0.0  ;;  %v290_v2 = vsub.f32 %v4598_v61, %v4557_v34  ;;  %v1484_v29 = vmul.f32 %v722_v52, %v722_v52 }
 0x1aa   : > { %v911_v39 = vpop.permute.xlu1 %910  ;;  %v1485_v56 = vmul.f32 %v723_v18, %v723_v18  ;;  %v2576_v47 = vsel %vm2516_vm4, %v4363_v14, 0.0  ;;  %v1719_v17 = vsel %vm1590_vm1, %v1717_v13, %v1718_v11  ;;  %v530_v8 = vsel %vm395_vm0, %v528_v46, %v529_v44 }
 0x1ab   : > { %v1109_v37 = vsub.f32 %v4636_v7, %v911_v39  ;;  %2388 = vrot.lane.b32.xlu0 %v2116_v35, %s2885_s13  ;;  %v2571_v45 = vadd.f32 %v2570_v26, %v2569_v20  ;;  %v2578_v34 = vsel %vm2516_vm4, %v4386_v33, 0.0  ;;  %v2122_v50 = vmul.f32 %v1106_v16, %v1106_v16  ;;  %v4715_v16 = vld [vmem:[%s2910_s11 + $0x2e8] sm:$0xff] }
 0x1ac   : > { %v1108_v6 = vsub.f32 %v4660_v31, %v4611_v40  ;;  %v4688_v55 = vadd.f32 %v1366_v60, %v1365_v5  ;;  %v1197_v53 = vmul.f32 %v290_v2, %v290_v2  ;;  %v1999_v26 = vsel %vm1206_vm2, %v1719_v17, 0.0 }
 0x1ad   : > { %v2125_v43 = vmul.f32 %v1109_v37, %v1109_v37  ;;  %v4648_v24 = vpop.permute.xlu0 %2316  ;;  %v2573_v59 = vadd.f32 %v2572_v38, %v2571_v45  ;;  %v1998_v37 = vadd.f32 %v1997_v21, %v1996_v51  ;;  %v1721_v62 = vrot.slane %v1485_v56, 1 }
 0x1ae   : > { %v913_v58 = vpop.permute.xlu1 %912  ;;  %v2580_v33 = vsel %vm2516_vm4, %v4402_v4, 0.0  ;;  %v724_v40 = vsub.f32 %v4660_v31, %v528_v46  ;;  %v531_v21 = vrot.slane %v4698_v15, 7  ;;  %v532_v20 = vrot.slane %v4676_v28, 7 }
 0x1af   : > { %2392 = vrot.lane.b32.xlu0 %v2118_v57, %s2885_s13  ;;  %2406 = vrot.lane.b32.xlu1 %v2125_v43, %s2885_s13  ;;  %v2575_v39 = vadd.f32 %v2574_v19, %v2573_v59  ;;  %v1720_v57 = vrot.slane %v1484_v29, 1  ;;  %v725_v43 = vsub.f32 %v4636_v7, %v530_v8  ;;  %v2582_v13 = vsel %vm2516_vm4, %v4429_v63, 0.0  ;;  %v4724_v59 = vld [vmem:[%s2910_s11 + $0x2e0] sm:$0xff] }
 0x1b0   : > { %v2124_v4 = vmul.f32 %v1108_v6, %v1108_v6  ;;  %v1110_v52 = vsub.f32 %v4698_v15, %v913_v58  ;;  %v2000_v38 = vadd.f32 %v1999_v26, %v1998_v37  ;;  %v291_v46 = vsub.f32 %v4660_v31, %v4620_v3 }
 0x1b1   : > { %v4668_v1 = vpop.permute.xlu0 %2318  ;;  %v2577_v42 = vadd.f32 %v2576_v47, %v2575_v39  ;;  %v292_v44 = vsub.f32 %v4636_v7, %v4598_v61  ;;  %v2001_v19 = vsel %vm1832_vm3, %v1718_v11, 0.0  ;;  %v1722_v63 = vsel %vm1590_vm1, %v1720_v57, %v1721_v62  ;;  %v4744_v57 = vld [vmem:[%s2910_s11 + $0x2f0] sm:$0xff] }
 0x1b2   : > { %v915_v35 = vpop.permute.xlu1 %914  ;;  %v1486_v51 = vmul.f32 %v724_v40, %v724_v40  ;;  %v4719_v60 = vmul.f32 %v725_v43, %v725_v43  ;;  %v2584_v61 = vsel %vm2516_vm4, %v4445_v22, 0.0  ;;  %v2126_v2 = vmul.f32 %v1110_v52, %v1110_v52 }
 0x1b3   : > { %v1111_v23 = vsub.f32 %v4676_v28, %v915_v35  ;;  %2396 = vrot.lane.b32.xlu0 %v2120_v48, %s2885_s13  ;;  %v2579_v10 = vadd.f32 %v2578_v34, %v2577_v42  ;;  %v1368_v48 = vsel %vm1206_vm2, %v1197_v53, 0.0  ;;  %v533_v56 = vsel %vm395_vm0, %v531_v21, %v532_v20 }
 0x1b4   : > { %v2002_v47 = vadd.f32 %v2001_v19, %v2000_v38  ;;  %v1199_v17 = vmul.f32 %v292_v44, %v292_v44  ;;  %v2586_v8 = vsel %vm2516_vm4, %v4462_v32, 0.0  ;;  %v2005_v22 = vsel %vm1832_vm3, %v1721_v62, 0.0 }
 0x1b5   : > { %v2127_v14 = vmul.f32 %v1111_v23, %v1111_v23  ;;  %v4686_v12 = vpop.permute.xlu0 %2320  ;;  %v2581_v45 = vadd.f32 %v2580_v33, %v2579_v10  ;;  %v1198_v23 = vmul.f32 %v291_v46, %v291_v46  ;;  %v726_v34 = vsub.f32 %v4698_v15, %v531_v21 }
 0x1b6   : > { %v917_v49 = vpop.permute.xlu1 %916  ;;  %v2003_v6 = vsel %vm1206_vm2, %v1722_v63, 0.0  ;;  %v1724_v37 = vrot.slane %v4719_v60, 1  ;;  %v2588_v53 = vsel %vm2516_vm4, %v4486_v27, 0.0  ;;  %v727_v32 = vsub.f32 %v4676_v28, %v533_v56 }
 0x1b7   : > { %2400 = vrot.lane.b32.xlu0 %v2122_v50, %s2885_s13  ;;  %2410 = vrot.lane.b32.xlu1 %v2127_v14, %s2885_s13  ;;  %v2583_v3 = vadd.f32 %v2582_v13, %v2581_v45  ;;  %v1112_v11 = vsub.f32 %v4724_v59, %v917_v49  ;;  %v1723_v14 = vrot.slane %v1486_v51, 1  ;;  %v2590_v49 = vsel %vm2516_vm4, %v4505_v9, 0.0  ;;  %v4753_v13 = vld [vmem:[%s2910_s11 + $0x2f8] sm:$0xff] }
 0x1b8   : > { %v534_v43 = vrot.slane %v4724_v59, 7  ;;  %v535_v21 = vrot.slane %v4715_v16, 7  ;;  %v2004_v10 = vadd.f32 %v2003_v6, %v2002_v47  ;;  %v1369_v27 = vadd.f32 %v1368_v48, %v4688_v55 }
 0x1b9   : > { %v4705_v18 = vpop.permute.xlu0 %2322  ;;  %v2585_v50 = vadd.f32 %v2584_v61, %v2583_v3  ;;  %v2128_v26 = vmul.f32 %v1112_v11, %v1112_v11  ;;  %v1370_v52 = vsel %vm1206_vm2, %v1198_v23, 0.0  ;;  %v1488_v38 = vmul.f32 %v726_v34, %v726_v34 }
 0x1ba   : > { %v919_v5 = vpop.permute.xlu1 %918  ;;  %v1489_v46 = vmul.f32 %v727_v32, %v727_v32  ;;  %v1725_v44 = vsel %vm1590_vm1, %v1723_v14, %v1724_v37  ;;  %v2592_v55 = vsel %vm2516_vm4, %v4524_v41, 0.0  ;;  %v2594_v63 = vsel %vm2516_vm4, %v4548_v25, 0.0 }
 0x1bb   : > { %v1113_v58 = vsub.f32 %v4715_v16, %v919_v5  ;;  %2404 = vrot.lane.b32.xlu0 %v2124_v4, %s2885_s13  ;;  %v2587_v42 = vadd.f32 %v2586_v8, %v2585_v50  ;;  %v293_v4 = vsub.f32 %v4698_v15, %v4660_v31  ;;  %v2006_v31 = vadd.f32 %v2005_v22, %v2004_v10 }
 0x1bc   : > { %v1371_v51 = vadd.f32 %v1370_v52, %v1369_v27  ;;  %v2007_v60 = vsel %vm1206_vm2, %v1725_v44, 0.0  ;;  %v294_v41 = vsub.f32 %v4676_v28, %v4636_v7  ;;  %v1372_v61 = vsel %vm1206_vm2, %v1199_v17, 0.0 }
 0x1bd   : > { %v2129_v35 = vmul.f32 %v1113_v58, %v1113_v58  ;;  %v4727_v29 = vpop.permute.xlu0 %2324  ;;  %v2589_v20 = vadd.f32 %v2588_v53, %v2587_v42  ;;  %v536_v58 = vsel %vm395_vm0, %v534_v43, %v535_v21  ;;  %v1200_v3 = vmul.f32 %v293_v4, %v293_v4 }
 0x1be   : > { %v921_v39 = vpop.permute.xlu1 %920  ;;  %v537_v25 = vrot.slane %v4744_v57, 7  ;;  %v538_v56 = vrot.slane %v4753_v13, 7  ;;  %v728_v23 = vsub.f32 %v4724_v59, %v534_v43  ;;  %v729_v8 = vsub.f32 %v4715_v16, %v536_v58 }
 0x1bf   : > { %2408 = vrot.lane.b32.xlu0 %v2126_v2, %s2885_s13  ;;  %2414 = vrot.lane.b32.xlu1 %v2129_v35, %s2885_s13  ;;  %v1114_v62 = vsub.f32 %v4744_v57, %v921_v39  ;;  %v2591_v45 = vadd.f32 %v2590_v49, %v2589_v20  ;;  %v1726_v2 = vrot.slane %v1488_v38, 1  ;;  %v1727_v35 = vrot.slane %v1489_v46, 1 }
 0x1c0   : > { %v2596_v7 = vsel %vm2516_vm4, %v4567_v36, 0.0  ;;  %v2008_v22 = vadd.f32 %v2007_v60, %v2006_v31  ;;  %v1373_v34 = vadd.f32 %v1372_v61, %v1371_v51  ;;  %v2009_v17 = vsel %vm1832_vm3, %v1724_v37, 0.0 }
 0x1c1   : > { %v4747_v33 = vpop.permute.xlu0 %2326  ;;  %v2130_v5 = vmul.f32 %v1114_v62, %v1114_v62  ;;  %v2593_v11 = vadd.f32 %v2592_v55, %v2591_v45  ;;  %v295_v50 = vsub.f32 %v4724_v59, %v4698_v15  ;;  %v1201_v6 = vmul.f32 %v294_v41, %v294_v41 }
 0x1c2   : > { %v923_v40 = vpop.permute.xlu1 %922  ;;  %v1374_v14 = vsel %vm1206_vm2, %v1200_v3, 0.0  ;;  %v1728_v53 = vsel %vm1590_vm1, %v1726_v2, %v1727_v35  ;;  %v2598_v42 = vsel %vm2516_vm4, %v4589_v54, 0.0  ;;  %v1491_v36 = vmul.f32 %v729_v8, %v729_v8 }
 0x1c3   : > { %v1115_v9 = vsub.f32 %v4753_v13, %v923_v40  ;;  %2412 = vrot.lane.b32.xlu0 %v2128_v26, %s2885_s13  ;;  %v2595_v39 = vadd.f32 %v2594_v63, %v2593_v11  ;;  %v1490_v26 = vmul.f32 %v728_v23, %v728_v23  ;;  %v2600_v62 = vsel %vm2516_vm4, %v4608_v30, 0.0 }
 0x1c4   : > { %v539_v37 = vsel %vm395_vm0, %v537_v25, %v538_v56  ;;  %v2010_v40 = vadd.f32 %v2009_v17, %v2008_v22  ;;  %v1375_v15 = vadd.f32 %v1374_v14, %v1373_v34  ;;  %v2011_v43 = vsel %vm1206_vm2, %v1728_v53, 0.0 }
 0x1c5   : > { %v2131_v19 = vmul.f32 %v1115_v9, %v1115_v9  ;;  %v4763_v48 = vpop.permute.xlu0 %2328  ;;  %v2597_v32 = vadd.f32 %v2596_v7, %v2595_v39  ;;  %v296_v21 = vsub.f32 %v4715_v16, %v4676_v28  ;;  %v1202_v10 = vmul.f32 %v295_v50, %v295_v50 }
 0x1c6   : > { %v1376_v27 = vsel %vm1206_vm2, %v1201_v6, 0.0  ;;  %v730_v20 = vsub.f32 %v4744_v57, %v537_v25  ;;  %v731_v4 = vsub.f32 %v4753_v13, %v539_v37  ;;  %v1729_v52 = vrot.slane %v1490_v26, 1 }
 0x1c7   : > { %2416 = vrot.lane.b32.xlu0 %v2130_v5, %s2885_s13  ;;  %2418 = vrot.lane.b32.xlu1 %v2131_v19, %s2885_s13  ;;  %v2599_v54 = vadd.f32 %v2598_v42, %v2597_v32  ;;  %v1730_v30 = vrot.slane %v1491_v36, 1  ;;  %v2602_v46 = vsel %vm2516_vm4, %v4628_v0, 0.0  ;;  %v2012_v44 = vadd.f32 %v2011_v43, %v2010_v40 }
 0x1c8   : > { %v1377_v45 = vadd.f32 %v1376_v27, %v1375_v15  ;;  %v2013_v55 = vsel %vm1832_vm3, %v1727_v35, 0.0  ;;  %v297_v28 = vsub.f32 %v4744_v57, %v4724_v59  ;;  %v1203_v5 = vmul.f32 %v296_v21, %v296_v21 }
 0x1c9   : > { %v4776_v47 = vpop.permute.xlu0 %2330  ;;  %v2601_v38 = vadd.f32 %v2600_v62, %v2599_v54  ;;  %v1378_v19 = vsel %vm1206_vm2, %v1202_v10, 0.0  ;;  %v2604_v63 = vsel %vm2516_vm4, %v4648_v24, 0.0  ;;  %v1492_v58 = vmul.f32 %v730_v20, %v730_v20 }
 0x1ca   : > { %v1493_v60 = vmul.f32 %v731_v4, %v731_v4  ;;  %v1731_v41 = vsel %vm1590_vm1, %v1729_v52, %v1730_v30  ;;  %v2606_v0 = vsel %vm2516_vm4, %v4668_v1, 0.0  ;;  %v2014_v3 = vadd.f32 %v2013_v55, %v2012_v44 }
 0x1cb   : > { %v2603_v31 = vadd.f32 %v2602_v46, %v2601_v38  ;;  %v1379_v61 = vadd.f32 %v1378_v19, %v1377_v45  ;;  %v298_v59 = vsub.f32 %v4753_v13, %v4715_v16  ;;  %v1204_v57 = vmul.f32 %v297_v28, %v297_v28 }
 0x1cc   : > { %v1380_v11 = vsel %vm1206_vm2, %v1203_v5, 0.0  ;;  %v2608_v24 = vsel %vm2516_vm4, %v4686_v12, 0.0  ;;  %v2015_v35 = vsel %vm1206_vm2, %v1731_v41, 0.0  ;;  %v1732_v23 = vrot.slane %v1492_v58, 1 }
 0x1cd   : > { %v4789_v49 = vpop.permute.xlu0 %2332  ;;  %v2605_v2 = vadd.f32 %v2604_v63, %v2603_v31  ;;  %v1733_v8 = vrot.slane %v1493_v60, 1  ;;  %v2610_v1 = vsel %vm2516_vm4, %v4705_v18, 0.0  ;;  %v1381_v39 = vadd.f32 %v1380_v11, %v1379_v61 }
 0x1ce   : > { %v2016_v22 = vadd.f32 %v2015_v35, %v2014_v3  ;;  %v1205_v34 = vmul.f32 %v298_v59, %v298_v59  ;;  %v1382_v16 = vsel %vm1206_vm2, %v1204_v57, 0.0  ;;  %v2612_v13 = vsel %vm2516_vm4, %v4727_v29, 0.0  ;;  %v2359_v59 = vpop.permute.xlu1 %2358 }
 0x1cf   : > { %v2607_v25 = vadd.f32 %v2606_v0, %v2605_v2  ;;  %v2017_v12 = vsel %vm1832_vm3, %v1730_v30, 0.0  ;;  %v1734_v6 = vsel %vm1590_vm1, %v1732_v23, %v1733_v8  ;;  %v2614_v14 = vsel %vm2516_vm4, %v4747_v33, 0.0 }
 0x1d0   : > { %v1383_v53 = vadd.f32 %v1382_v16, %v1381_v39  ;;  %v2018_v32 = vadd.f32 %v2017_v12, %v2016_v22  ;;  %v1384_v42 = vsel %vm1206_vm2, %v1205_v34, 0.0  ;;  %v2616_v26 = vsel %vm2516_vm4, %v4763_v48, 0.0 }
 0x1d1   : > { %v2335_v9 = vpop.permute.xlu0 %2334  ;;  %v2609_v7 = vadd.f32 %v2608_v24, %v2607_v25  ;;  %v2019_v36 = vsel %vm1206_vm2, %v1734_v6, 0.0  ;;  %v2618_v37 = vsel %vm2516_vm4, %v4776_v47, 0.0  ;;  %v2620_v33 = vsel %vm2516_vm4, %v4789_v49, 0.0 }
 0x1d2   : > { %v1385_v40 = vadd.f32 %v1384_v42, %v1383_v53  ;;  %v2020_v43 = vadd.f32 %v2019_v36, %v2018_v32  ;;  %v2021_v21 = vsel %vm1832_vm3, %v1733_v8, 0.0  ;;  %v2622_v54 = vsel %vm2516_vm4, %v2335_v9, 0.0  ;;  %v2363_v23 = vpop.permute.xlu1 %2362 }
 0x1d3   : > { %v2611_v17 = vadd.f32 %v2610_v1, %v2609_v7  ;;  %v2650_v22 = vsel %vm2516_vm4, %v2363_v23, 0.0 }
 0x1d4   : > { %v2022_v20 = vadd.f32 %v2021_v21, %v2020_v43 }
 0x1d5   : > { %v2337_v51 = vpop.permute.xlu0 %2336  ;;  %v2613_v18 = vadd.f32 %v2612_v13, %v2611_v17 }
 0x1d6   : > { %v2624_v4 = vsel %vm2516_vm4, %v2337_v51, 0.0  ;;  %v2367_v34 = vpop.permute.xlu1 %2366 }
 0x1d7   : > { %v2615_v29 = vadd.f32 %v2614_v14, %v2613_v18 }
 0x1d9   : > { %v2339_v56 = vpop.permute.xlu0 %2338  ;;  %v2617_v15 = vadd.f32 %v2616_v26, %v2615_v29 }
 0x1da   : > { %v2626_v47 = vsel %vm2516_vm4, %v2339_v56, 0.0  ;;  %v2646_v56 = vsel %vm2516_vm4, %v2359_v59, 0.0  ;;  %v2371_v6 = vpop.permute.xlu1 %2370 }
 0x1db   : > { %v2619_v10 = vadd.f32 %v2618_v37, %v2617_v15  ;;  %v2658_v42 = vsel %vm2516_vm4, %v2371_v6, 0.0 }
 0x1dd   : > { %v2341_v50 = vpop.permute.xlu0 %2340  ;;  %v2621_v48 = vadd.f32 %v2620_v33, %v2619_v10 }
 0x1de   : > { %v2628_v46 = vsel %vm2516_vm4, %v2341_v50, 0.0  ;;  %v2654_v50 = vsel %vm2516_vm4, %v2367_v34, 0.0 }
 0x1df   : > { %v2623_v52 = vadd.f32 %v2622_v54, %v2621_v48 }
 0x1e1   : > { %v2343_v62 = vpop.permute.xlu0 %2342  ;;  %v2625_v38 = vadd.f32 %v2624_v4, %v2623_v52  ;;  %v2375_v26 = vpop.permute.xlu1 %2374 }
 0x1e2   : > { %v2630_v45 = vsel %vm2516_vm4, %v2343_v62, 0.0 }
 0x1e3   : > { %v2627_v49 = vadd.f32 %v2626_v47, %v2625_v38 }
 0x1e5   : > { %v2345_v27 = vpop.permute.xlu0 %2344  ;;  %v2629_v55 = vadd.f32 %v2628_v46, %v2627_v49 }
 0x1e6   : > { %1386 = vadd.xlane.f32.xlu0 %v1385_v40  ;;  %v2632_v9 = vsel %vm2516_vm4, %v2345_v27, 0.0  ;;  %v2662_v40 = vsel %vm2516_vm4, %v2375_v26, 0.0 }
 0x1e7   : > { %v2631_v28 = vadd.f32 %v2630_v45, %v2629_v55 }
 0x1e9   : > { %v2347_v30 = vpop.permute.xlu0 %2346  ;;  %v2633_v63 = vadd.f32 %v2632_v9, %v2631_v28  ;;  %v2379_v15 = vpop.permute.xlu1 %2378 }
 0x1ea   : > { %v2634_v19 = vsel %vm2516_vm4, %v2347_v30, 0.0  ;;  %v2666_v27 = vsel %vm2516_vm4, %v2379_v15, 0.0 }
 0x1eb   : > { %2023 = vadd.xlane.f32.xlu1 %v2022_v20  ;;  %v2635_v31 = vadd.f32 %v2634_v19, %v2633_v63 }
 0x1ed   : > { %v2349_v44 = vpop.permute.xlu0 %2348 }
 0x1ee   : > { %v2636_v58 = vsel %vm2516_vm4, %v2349_v44, 0.0 }
 0x1ef   : > { %v2637_v41 = vadd.f32 %v2636_v58, %v2635_v31 }
 0x1f1   : > { %v2351_v5 = vpop.permute.xlu0 %2350  ;;  %v2383_v54 = vpop.permute.xlu1 %2382 }
 0x1f2   : > { %v2638_v60 = vsel %vm2516_vm4, %v2351_v5, 0.0  ;;  %v2670_v30 = vsel %vm2516_vm4, %v2383_v54, 0.0 }
 0x1f3   : > { %v2639_v3 = vadd.f32 %v2638_v60, %v2637_v41 }
 0x1f5   : > { %v2353_v51 = vpop.permute.xlu0 %2352 }
 0x1f6   : > { %v2640_v0 = vsel %vm2516_vm4, %v2353_v51, 0.0 }
 0x1f7   : > { %v2641_v57 = vadd.f32 %v2640_v0, %v2639_v3 }
 0x1f9   : > { %v2355_v61 = vpop.permute.xlu0 %2354  ;;  %v2387_v47 = vpop.permute.xlu1 %2386 }
 0x1fa   : > { %v2642_v2 = vsel %vm2516_vm4, %v2355_v61, 0.0  ;;  %v2674_v45 = vsel %vm2516_vm4, %v2387_v47, 0.0 }
 0x1fb   : > { %v2643_v11 = vadd.f32 %v2642_v2, %v2641_v57 }
 0x1fd   : > { %v2357_v24 = vpop.permute.xlu0 %2356 }
 0x1fe   : > { %v2644_v35 = vsel %vm2516_vm4, %v2357_v24, 0.0 }
 0x1ff   : > { %v2645_v25 = vadd.f32 %v2644_v35, %v2643_v11 }
 0x201   : > { %v2647_v8 = vadd.f32 %v2646_v56, %v2645_v25  ;;  %v2361_v1 = vpop.permute.xlu0 %2360  ;;  %v2391_v55 = vpop.permute.xlu1 %2390 }
 0x202   : > { %v2648_v39 = vsel %vm2516_vm4, %v2361_v1, 0.0  ;;  %v2678_v63 = vsel %vm2516_vm4, %v2391_v55, 0.0 }
 0x203   : > { %v2649_v7 = vadd.f32 %v2648_v39, %v2647_v8 }
 0x205   : > { %v2651_v16 = vadd.f32 %v2650_v22, %v2649_v7  ;;  %v2365_v13 = vpop.permute.xlu0 %2364 }
 0x206   : > { %v2652_v12 = vsel %vm2516_vm4, %v2365_v13, 0.0 }
 0x207   : > { %v2653_v17 = vadd.f32 %v2652_v12, %v2651_v16 }
 0x209   : > { %v2655_v14 = vadd.f32 %v2654_v50, %v2653_v17  ;;  %v2369_v53 = vpop.permute.xlu0 %2368  ;;  %v2395_v58 = vpop.permute.xlu1 %2394 }
 0x20a   : > { %v2656_v18 = vsel %vm2516_vm4, %v2369_v53, 0.0  ;;  %v2682_v0 = vsel %vm2516_vm4, %v2395_v58, 0.0 }
 0x20b   : > { %v2657_v32 = vadd.f32 %v2656_v18, %v2655_v14 }
 0x20d   : > { %v2659_v36 = vadd.f32 %v2658_v42, %v2657_v32  ;;  %v2373_v29 = vpop.permute.xlu0 %2372 }
 0x20e   : > { %v2660_v62 = vsel %vm2516_vm4, %v2373_v29, 0.0 }
 0x20f   : > { %v2661_v37 = vadd.f32 %v2660_v62, %v2659_v36 }
 0x211   : > { %v2663_v43 = vadd.f32 %v2662_v40, %v2661_v37  ;;  %v2377_v33 = vpop.permute.xlu0 %2376  ;;  %v2399_v3 = vpop.permute.xlu1 %2398 }
 0x212   : > { %v2664_v21 = vsel %vm2516_vm4, %v2377_v33, 0.0  ;;  %v2686_v11 = vsel %vm2516_vm4, %v2399_v3, 0.0 }
 0x213   : > { %v2665_v10 = vadd.f32 %v2664_v21, %v2663_v43 }
 0x215   : > { %v2667_v48 = vadd.f32 %v2666_v27, %v2665_v10  ;;  %v2381_v20 = vpop.permute.xlu0 %2380 }
 0x216   : > { %v2668_v4 = vsel %vm2516_vm4, %v2381_v20, 0.0 }
 0x217   : > { %v2669_v52 = vadd.f32 %v2668_v4, %v2667_v48 }
 0x219   : > { %v2671_v38 = vadd.f32 %v2670_v30, %v2669_v52  ;;  %v2385_v46 = vpop.permute.xlu0 %2384  ;;  %v2403_v24 = vpop.permute.xlu1 %2402 }
 0x21a   : > { %v2672_v49 = vsel %vm2516_vm4, %v2385_v46, 0.0  ;;  %v2690_v8 = vsel %vm2516_vm4, %v2403_v24, 0.0 }
 0x21b   : > { %v2673_v44 = vadd.f32 %v2672_v49, %v2671_v38 }
 0x21d   : > { %v2675_v9 = vadd.f32 %v2674_v45, %v2673_v44  ;;  %v2389_v28 = vpop.permute.xlu0 %2388 }
 0x21e   : > { %v2676_v5 = vsel %vm2516_vm4, %v2389_v28, 0.0 }
 0x21f   : > { %v2677_v19 = vadd.f32 %v2676_v5, %v2675_v9 }
 0x221   : > { %v2679_v31 = vadd.f32 %v2678_v63, %v2677_v19  ;;  %v2393_v51 = vpop.permute.xlu0 %2392  ;;  %v2407_v1 = vpop.permute.xlu1 %2406 }
 0x222   : > { %v2680_v60 = vsel %vm2516_vm4, %v2393_v51, 0.0  ;;  %v2694_v16 = vsel %vm2516_vm4, %v2407_v1, 0.0 }
 0x223   : > { %v2681_v41 = vadd.f32 %v2680_v60, %v2679_v31 }
 0x225   : > { %v2683_v61 = vadd.f32 %v2682_v0, %v2681_v41  ;;  %v2397_v2 = vpop.permute.xlu0 %2396 }
 0x226   : > { %v2684_v59 = vsel %vm2516_vm4, %v2397_v2, 0.0 }
 0x227   : > { %v2685_v57 = vadd.f32 %v2684_v59, %v2683_v61 }
 0x229   : > { %v2687_v35 = vadd.f32 %v2686_v11, %v2685_v57  ;;  %v2401_v25 = vpop.permute.xlu0 %2400  ;;  %v2411_v13 = vpop.permute.xlu1 %2410 }
 0x22a   : > { %v2688_v56 = vsel %vm2516_vm4, %v2401_v25, 0.0  ;;  %v2698_v14 = vsel %vm2516_vm4, %v2411_v13, 0.0 }
 0x22b   : > { %v2689_v23 = vadd.f32 %v2688_v56, %v2687_v35 }
 0x22d   : > { %v2691_v39 = vadd.f32 %v2690_v8, %v2689_v23  ;;  %v2405_v7 = vpop.permute.xlu0 %2404 }
 0x22e   : > { %v2692_v22 = vsel %vm2516_vm4, %v2405_v7, 0.0 }
 0x22f   : > { %v2693_v34 = vadd.f32 %v2692_v22, %v2691_v39 }
 0x231   : > { %v2695_v12 = vadd.f32 %v2694_v16, %v2693_v34  ;;  %v2409_v17 = vpop.permute.xlu0 %2408  ;;  %v2415_v53 = vpop.permute.xlu1 %2414 }
 0x232   : > { %v2696_v50 = vsel %vm2516_vm4, %v2409_v17, 0.0  ;;  %v2702_v36 = vsel %vm2516_vm4, %v2415_v53, 0.0 }
 0x233   : > { %v2697_v6 = vadd.f32 %v2696_v50, %v2695_v12 }
 0x235   : > { %v2699_v18 = vadd.f32 %v2698_v14, %v2697_v6  ;;  %v2413_v32 = vpop.permute.xlu0 %2412 }
 0x236   : > { %v2700_v42 = vsel %vm2516_vm4, %v2413_v32, 0.0 }
 0x237   : > { %v2701_v26 = vadd.f32 %v2700_v42, %v2699_v18 }
 0x239   : > { %v2703_v29 = vadd.f32 %v2702_v36, %v2701_v26  ;;  %v2417_v62 = vpop.permute.xlu0 %2416  ;;  %v2419_v37 = vpop.permute.xlu1 %2418 }
 0x23a   : > { %v2704_v40 = vsel %vm2516_vm4, %v2417_v62, 0.0  ;;  %v2706_v15 = vsel %vm2516_vm4, %v2419_v37, 0.0 }
 0x23b   : > { %v2705_v43 = vadd.f32 %v2704_v40, %v2703_v29 }
 0x23d   : > { %v2707_v33 = vadd.f32 %v2706_v15, %v2705_v43 }
 0x23f   : > { %2708 = vadd.xlane.f32.xlu0 %v2707_v33 }
 0x273   : > { %v1387_v21 = vpop.xlane.xlu0 %1386 }
 0x274   : > { %v1388_v10 = vrot.slane %v1387_v21, 4 }
 0x276   : > { %v1389_v27 = vadd.f32 %v1388_v10, %v1387_v21 }
 0x278   : > { %v2024_v54 = vpop.xlane.xlu1 %2023  ;;  %v1390_v48 = vrot.slane %v1389_v27, 2 }
 0x279   : > { %v2025_v20 = vrot.slane %v2024_v54, 4 }
 0x27a   : > { %v1391_v4 = vadd.f32 %v1390_v48, %v1389_v27 }
 0x27b   : > { %v2026_v52 = vadd.f32 %v2025_v20, %v2024_v54 }
 0x27c   : > { %v1392_v30 = vrot.slane %v1391_v4, 1 }
 0x27d   : > { %v2027_v47 = vrot.slane %v2026_v52, 2 }
 0x27e   : > { %v1393_v38 = vadd.f32 %v1392_v30, %v1391_v4 }
 0x27f   : > { %v2028_v46 = vadd.f32 %v2027_v47, %v2026_v52 }
 0x280   : > { %2783 = vpush %v1393_v38 }
 0x281   : > { %v2029_v49 = vrot.slane %v2028_v46, 1 }
 0x283   : > { %v2030_v44 = vadd.f32 %v2029_v49, %v2028_v46 }
 0x285   : > { %2785 = vpush %v2030_v44 }
 0x2b1   : > { %s2784_s14 = spop %2783 }
 0x2b2   : > { %s1397_s16 = smul.f32 8.680556e-05, %s2784_s14 }
 0x2b6   : > { %s2786_s15 = spop %2785 }
 0x2b7   : > { %s2034_s17 = smul.f32 8.680556e-05, %s2786_s15 }
 0x2b9   : > { %s2035_s19 = sadd.f32 %s2034_s17, %s1397_s16 }
 0x2cc   : > { %v2709_v45 = vpop.xlane.xlu0 %2708 }
 0x2cd   : > { %v2710_v55 = vrot.slane %v2709_v45, 4 }
 0x2cf   : > { %v2711_v9 = vadd.f32 %v2710_v55, %v2709_v45 }
 0x2d1   : > { %v2712_v28 = vrot.slane %v2711_v9, 2 }
 0x2d3   : > { %v2713_v5 = vadd.f32 %v2712_v28, %v2711_v9 }
 0x2d5   : > { %v2714_v19 = vrot.slane %v2713_v5, 1 }
 0x2d7   : > { %v2715_v63 = vadd.f32 %v2714_v19, %v2713_v5 }
 0x2d9   : > { %2787 = vpush %v2715_v63 }
 0x30a   : > { %s2788_s18 = spop %2787 }
 0x30b   : > { %s2719_s20 = smul.f32 8.680556e-05, %s2788_s18 }
 0x30d   : > { %s2720_s21 = sadd.f32 %s2719_s20, %s2035_s19 }
 0x30f   : > { %s2723_s25 = smul.f32 0.33333334, %s2720_s21 }
 0x311   : > { %v2724_v58 = vstv %s2723_s25 }
 0x312   : > { %2726 = vst [vmem:[%s112_s24] sm:$0x1] %v2724_v58 }
 0x313 PF: > { %s11_s6 = sadd.s32 1, %s2882_s6  }
 0x314   : > { %p8_p4 = scmp.ge.s32.totalorder %s11_s6, 4  }
 0x316   :  { %10 = sbr.rel (!%p8_p4) target bundleno = 1 (0x1), region = 54 }

// kernel: loss_function_ncc_intensity_registration.2
= control target key start
LH: loop header
LB: loop body
LE: loop exit
PB: predicated region body
PF: predicated region fallthrough
CT: control target
= control target key end

     0   :  { %s5360_s21 = smov 0   ;;  %s5362_s22 = smov 0   ;;  %s7497_s0 = inlined_call_operand.vmem [shape: f32[16,16], index: 0, kind: input, shape index: {}, may-alias: {0,1}]   ;;  %s7498_s1 = inlined_call_operand.vmem [shape: f32[16,16], index: 1, kind: input, shape index: {}, may-alias: {0,1}]   ;;  %s7499_s2 = inlined_call_operand.vmem [shape: f32[2,2,16,16,16], index: 2, kind: input, shape index: {}]   ;;  %s7500_s3 = inlined_call_operand.vmem [shape: f32[2,2,16,16,16], index: 3, kind: input, shape index: {}]   ;;  %s7501_s4 = inlined_call_operand.vmem [shape: f32[2,16,16,16], index: 4, kind: input, shape index: {}]   ;;  %s7502_s5 = inlined_call_operand.vmem [shape: f32[2,1,128], index: 5, kind: output, shape index: {0}]   ;;  %s7503_s6 = inlined_call_operand.vmem [shape: f32[2,1,128], index: 6, kind: output, shape index: {1}]  }
   0x1   :  { %7545 = sst [smem:[#allocation68_spill]] %s7502_s5  ;;  %s5364_s23 = smov 0  }
   0x2   :  { %s5366_s24 = smov 0   ;;  %s5368_s25 = smov 0  }
   0x3 LB: > { %s26_s26 = sadd.s32 1, %s5314_s23  ;;  %s29_s27 = sadd.s32 1, %s5318_s24  ;;  %s5322_s25 = sphi %s5368_s25, %s17_s25   ;;  %s5318_s24 = sphi %s5366_s24, %s7714_s24   ;;  %s5314_s23 = sphi %s5364_s23, %s7713_s23   ;;  %s5310_s22 = sphi %s5362_s22, %s7712_s22   ;;  %s5306_s21 = sphi %s5360_s21, %s7711_s21  }
   0x4   : > { %p27_p0 = scmp.ge.s32.totalorder %s26_s26, 2  ;;  %p4547_p1 = scmp.ge.s32.totalorder %s5322_s25, 1 }
   0x5   : > { %p267_p2 = scmp.lt.s32.totalorder %s5322_s25, 5 }
   0x6   : > { %s7716_s26 = smov (%p27_p0, %s26_s26), 0  ;;  %s7718_s27 = smov (!%p27_p0, %s29_s27), %s5318_s24 }
   0x7   : > { %p268_p3 = pnand %p4547_p1, %p267_p2  ;;  %p31_p4 = scmp.ge.s32.totalorder %s7718_s27, 2 }
   0x9   : > { %s7720_s27 = smov (%p31_p4, %s7718_s27), 0  ;;  %271 = sbr.rel (%p268_p3) target bundleno = 1013 (0x3f5), region = 40 }
  0x10   : > { %p321_p5 = scmp.lt.s32.totalorder %s5310_s22, 1  ;;  %p323_p6 = scmp.lt.s32.totalorder %s5306_s21, 1 }
  0x11   : > { %s4554_s28 = sshll.u32 %s5306_s21, 3  ;;  %s7546_s5 = sld [smem:[#allocation68_spill]] }
  0x12   : > { %s7722_s22 = smov (!%p321_p5, %s5310_s22), 1  ;;  %p342_p7 = scmp.lt.s32.totalorder %s4554_s28, 15 }
  0x13   : > { %s324_s29 = scalar_select %p323_p6, %s5306_s21, 1 }
  0x14   : > { %s4549_s30 = sshll.u32 %s7722_s22, 6  ;;  %s4556_s8 = sshll.u32 %s7722_s22, 5 }
  0x15   : > { %s4548_s7 = sshll.u32 %s324_s29, 5  ;;  %s5403_s16 = scalar_lea.vmem %s7503_s6, %s7722_s22 }
  0x16   : > { %s327_s9 = sadd.s32 %s4549_s30, %s4548_s7  ;;  %s7724_s28 = smov (!%p342_p7, %s4554_s28), 15 }
  0x17   : > { %s5398_s12 = scalar_lea.vmem %s7546_s5, %s7722_s22  ;;  %s4550_s13 = sshll.u32 %s327_s9, 3 }
  0x18   : > { %s5408_s19 = scalar_lea.vmem %s7499_s2, %s4550_s13  ;;  %s5413_s30 = scalar_lea.vmem %s7500_s3, %s4550_s13 }
  0x19   : > { %s4555_s7 = sshll.u32 %s7724_s28, 1  ;;  %p4558_p8 = scmp.ne.s32.totalorder %s5306_s21, 0 }
  0x1a   : > { %s346_s10 = sadd.s32 %s4556_s8, %s4555_s7  ;;  %v5324_v0 = vmov (!%p4558_p8), 0.0  }
  0x1b   : > { %s4557_s11 = sshll.u32 %s346_s10, 3  ;;  %359 = sbr.rel (%p4558_p8) target bundleno = 34 (0x22), region = 44  ;;  %360 = vst [vmem:[%s5398_s12] sm:$0x1] (!%p4558_p8), %v5324_v0  ;;  %361 = vst [vmem:[%s5403_s16] sm:$0x1] (!%p4558_p8), %v5324_v0 }
  0x1c   : > { %s5418_s14 = scalar_lea.vmem %s7501_s4, %s4557_s11 }
  0x22 PF: > { %v1162_v1 = vld [vmem:[%s7497_s0] sm:$0xff]  ;;  %v1163_v2 = vld [vmem:[%s7497_s0 + $0x8] sm:$0xff]  ;;  %v5433_v5 = vld [vmem:[%s5408_s19 + $0x10] sm:$0xff]  ;;  %vm1164_vm0 = vcmask 130048  }
  0x23   : > { %v5430_v3 = vld [vmem:[%s5408_s19] sm:$0xff]  ;;  %v5133_v4 = vpack.c.bf16 %v1163_v2, %v1162_v1  ;;  %v5439_v7 = vld [vmem:[%s5408_s19 + $0x30] sm:$0xff]  ;;  %v5466_v18 = vld [vmem:[%s5408_s19 + $0x8] sm:$0xff] }
  0x24   : > { %v5436_v6 = vld [vmem:[%s5408_s19 + $0x20] sm:$0xff]  ;;  %v5445_v9 = vld [vmem:[%s5408_s19 + $0x50] sm:$0xff]  ;;  %v426_v10 = vadd.f32 %v5433_v5, %v5430_v3  ;;  %v5458_v14 = vmul.f32 %v5430_v3, %v5430_v3  ;;  %v5469_v19 = vld [vmem:[%s5408_s19 + $0x18] sm:$0xff] }
  0x25   : > { %v5442_v8 = vld [vmem:[%s5408_s19 + $0x40] sm:$0xff]  ;;  %v428_v11 = vadd.f32 %v5436_v6, %v5433_v5  ;;  %v430_v12 = vadd.f32 %v5439_v7, %v5436_v6  ;;  %5134 = vmatprep.subr.bf16.mxu0 %v5133_v4  ;;  %v5472_v20 = vld [vmem:[%s5408_s19 + $0x28] sm:$0xff]  ;;  %v5481_v24 = vld [vmem:[%s5408_s19 + $0x38] sm:$0xff]  ;;  %v427_v25 = vadd.f32 %v5469_v19, %v5466_v18 }
  0x26   : > { %v5454_v13 = vld [vmem:[%s5408_s19 + $0x60] sm:$0xff]  ;;  %v432_v15 = vadd.f32 %v5442_v8, %v5439_v7  ;;  %v434_v16 = vadd.f32 %v5445_v9, %v5442_v8  ;;  %5136 = vmatpush3.bf16.msra.mxu0 %v5133_v4  ;;  %v442_v17 = vadd.f32 %v426_v10, %v5436_v6  ;;  %v429_v26 = vadd.f32 %v5472_v20, %v5469_v19  ;;  %v5493_v30 = vld [vmem:[%s5408_s19 + $0x48] sm:$0xff]  ;;  %v5505_v38 = vld [vmem:[%s5408_s19 + $0x70] sm:$0xff] }
  0x27   : > { %v444_v21 = vadd.f32 %v428_v11, %v5439_v7  ;;  %v446_v22 = vadd.f32 %v430_v12, %v5442_v8  ;;  %v5478_v23 = vadd.f32 %v5454_v13, %v5445_v9  ;;  %v431_v33 = vadd.f32 %v5481_v24, %v5472_v20  ;;  %v5509_v40 = vld [vmem:[%s5408_s19 + $0x58] sm:$0xff]  ;;  %v5519_v48 = vld [vmem:[%s5408_s19 + $0x80] sm:$0xff]  ;;  %v5523_v50 = vld [vmem:[%s5408_s19 + $0x68] sm:$0xff] }
  0x28   : > { %v448_v27 = vadd.f32 %v432_v15, %v5445_v9  ;;  %v5489_v28 = vadd.f32 %v434_v16, %v5454_v13  ;;  %v458_v29 = vadd.f32 %v442_v17, %v5439_v7  ;;  %v443_v34 = vadd.f32 %v427_v25, %v5472_v20  ;;  %v5534_v59 = vld [vmem:[%s5408_s19 + $0x78] sm:$0xff]  ;;  %v5537_v60 = vld [vmem:[%s5408_s19 + $0x90] sm:$0xff]  ;;  %v5548_v11 = vld [vmem:[%s5408_s19 + $0x88] sm:$0xff] }
  0x29   : > { %v460_v31 = vadd.f32 %v444_v21, %v5442_v8  ;;  %v462_v32 = vadd.f32 %v446_v22, %v5445_v9  ;;  %v445_v35 = vadd.f32 %v429_v26, %v5481_v24  ;;  %v433_v37 = vadd.f32 %v5493_v30, %v5481_v24  ;;  %v5552_v15 = vld [vmem:[%s5408_s19 + $0xa0] sm:$0xff] }
  0x2a   : > { %v464_v36 = vadd.f32 %v448_v27, %v5454_v13  ;;  %v474_v39 = vadd.f32 %v458_v29, %v5442_v8  ;;  %v447_v43 = vadd.f32 %v431_v33, %v5493_v30  ;;  %v459_v44 = vadd.f32 %v443_v34, %v5481_v24  ;;  %v5567_v33 = vld [vmem:[%s5408_s19 + $0xb0] sm:$0xff] }
  0x2b   : > { %v476_v41 = vadd.f32 %v460_v31, %v5445_v9  ;;  %v478_v42 = vadd.f32 %v462_v32, %v5454_v13  ;;  %v461_v45 = vadd.f32 %v445_v35, %v5493_v30  ;;  %v449_v47 = vadd.f32 %v433_v37, %v5509_v40  ;;  %v5563_v31 = vld [vmem:[%s5408_s19 + $0x98] sm:$0xff] }
  0x2c   : > { %v480_v46 = vadd.f32 %v464_v36, %v5505_v38  ;;  %v490_v49 = vadd.f32 %v474_v39, %v5445_v9  ;;  %v463_v53 = vadd.f32 %v447_v43, %v5509_v40  ;;  %v475_v54 = vadd.f32 %v459_v44, %v5493_v30 }
  0x2d   : > { %v492_v51 = vadd.f32 %v476_v41, %v5454_v13  ;;  %v494_v52 = vadd.f32 %v478_v42, %v5505_v38  ;;  %v477_v55 = vadd.f32 %v461_v45, %v5509_v40  ;;  %v465_v57 = vadd.f32 %v449_v47, %v5523_v50  ;;  %v5579_v41 = vld [vmem:[%s5408_s19 + $0xa8] sm:$0xff] }
  0x2e   : > { %v496_v56 = vadd.f32 %v480_v46, %v5519_v48  ;;  %v506_v58 = vadd.f32 %v490_v49, %v5454_v13  ;;  %v479_v63 = vadd.f32 %v463_v53, %v5523_v50  ;;  %v491_v0 = vadd.f32 %v475_v54, %v5509_v40 }
  0x2f   : > { %v508_v61 = vadd.f32 %v492_v51, %v5505_v38  ;;  %v510_v62 = vadd.f32 %v494_v52, %v5519_v48  ;;  %v493_v1 = vadd.f32 %v477_v55, %v5523_v50  ;;  %v481_v4 = vadd.f32 %v465_v57, %v5534_v59 }
  0x30   : > { %v512_v2 = vadd.f32 %v496_v56, %v5537_v60  ;;  %v522_v10 = vadd.f32 %v506_v58, %v5505_v38  ;;  %v495_v17 = vadd.f32 %v479_v63, %v5534_v59  ;;  %v507_v21 = vadd.f32 %v491_v0, %v5523_v50 }
  0x31   : > { %v524_v12 = vadd.f32 %v508_v61, %v5519_v48  ;;  %v526_v16 = vadd.f32 %v510_v62, %v5537_v60  ;;  %v509_v22 = vadd.f32 %v493_v1, %v5534_v59  ;;  %v497_v26 = vadd.f32 %v481_v4, %v5548_v11 }
  0x32   : > { %v528_v25 = vadd.f32 %v512_v2, %v5552_v15  ;;  %v538_v27 = vadd.f32 %v522_v10, %v5519_v48  ;;  %v511_v32 = vadd.f32 %v495_v17, %v5548_v11  ;;  %v5571_v34 = vmul.f32 %v5433_v5, %v5433_v5  ;;  %v5621_v17 = vld [vmem:[%s5408_s19 + $0xb8] sm:$0xff] }
  0x33   : > { %v540_v29 = vadd.f32 %v524_v12, %v5537_v60  ;;  %v523_v35 = vadd.f32 %v507_v21, %v5534_v59  ;;  %v525_v36 = vadd.f32 %v509_v22, %v5548_v11  ;;  %v542_v37 = vadd.f32 %v526_v16, %v5552_v15 }
  0x34   : > { %v513_v39 = vadd.f32 %v497_v26, %v5563_v31  ;;  %4889 = vmatprep.mubr.msk.f32.mxu0 %vm1164_vm0, %v538_v27  ;;  %v527_v42 = vadd.f32 %v511_v32, %v5563_v31  ;;  %v466_v43 = vadd.f32 %v5489_v28, %v5505_v38  ;;  %v435_v5 = vadd.f32 %v5509_v40, %v5493_v30 }
  0x35   : > { %v452_v44 = vadd.f32 %v5478_v23, %v5505_v38  ;;  %v539_v45 = vadd.f32 %v523_v35, %v5548_v11  ;;  %v541_v46 = vadd.f32 %v525_v36, %v5563_v31  ;;  %v544_v47 = vadd.f32 %v528_v25, %v5567_v33  ;;  %v5633_v36 = vld [vmem:[%s5413_s30] sm:$0xff] }
  0x36   : > { %v437_v49 = vadd.f32 %v5523_v50, %v5509_v40  ;;  %v529_v51 = vadd.f32 %v513_v39, %v5579_v41  ;;  %v482_v52 = vadd.f32 %v466_v43, %v5519_v48  ;;  %v451_v28 = vadd.f32 %v435_v5, %v5523_v50  ;;  %v5636_v39 = vld [vmem:[%s5408_s19 + $0xc0] sm:$0xff] }
  0x37   : > { %v468_v53 = vadd.f32 %v452_v44, %v5519_v48  ;;  %4890 = vmatmul.mubr.msk.f32.vlgmr.msra.gmra.mrb[0].mxu0 %vm1164_vm0, %v539_v45  ;;  %v543_v23 = vadd.f32 %v527_v42, %v5579_v41  ;;  %v438_v55 = vadd.f32 %v5505_v38, %v5454_v13  ;;  %v439_v56 = vadd.f32 %v5534_v59, %v5523_v50  ;;  %v5643_v44 = vld [vmem:[%s5413_s30 + $0x10] sm:$0xff] }
  0x38   : > { %v453_v54 = vadd.f32 %v437_v49, %v5534_v59  ;;  %4892 = vmatprep.mubr.msk.f32.mxu0 %vm1164_vm0, %v540_v29  ;;  %v498_v57 = vadd.f32 %v482_v52, %v5537_v60  ;;  %v467_v58 = vadd.f32 %v451_v28, %v5534_v59  ;;  %v440_v62 = vadd.f32 %v5519_v48, %v5505_v38  ;;  %v5648_v49 = vld [vmem:[%s5408_s19 + $0xd0] sm:$0xff] }
  0x39   : > { %v484_v61 = vadd.f32 %v468_v53, %v5537_v60  ;;  %v454_v0 = vadd.f32 %v438_v55, %v5519_v48  ;;  %v455_v1 = vadd.f32 %v439_v56, %v5548_v11  ;;  %v441_v2 = vadd.f32 %v5548_v11, %v5534_v59  ;;  %v5658_v56 = vld [vmem:[%s5413_s30 + $0x20] sm:$0xff] }
  0x3a   : > { %v469_v63 = vadd.f32 %v453_v54, %v5548_v11  ;;  %v514_v4 = vadd.f32 %v498_v57, %v5552_v15  ;;  %v483_v10 = vadd.f32 %v467_v58, %v5548_v11  ;;  %v456_v16 = vadd.f32 %v440_v62, %v5537_v60  ;;  %7547 = vst [vmem:[#allocation2_spill] sm:$0xff] %v5658_v56  ;;  %v5661_v57 = vld [vmem:[%s5413_s30 + $0x8] sm:$0xff]  ;;  %v5664_v58 = vld [vmem:[%s5413_s30 + $0x18] sm:$0xff] }
  0x3b   : > { %v500_v12 = vadd.f32 %v484_v61, %v5552_v15  ;;  %4893 = vmatmul.mubr.msk.f32.gmra.mrb[2].mxu0 %vm1164_vm0, %v541_v46  ;;  %v470_v22 = vadd.f32 %v454_v0, %v5537_v60  ;;  %v471_v25 = vadd.f32 %v455_v1, %v5563_v31  ;;  %v457_v26 = vadd.f32 %v441_v2, %v5563_v31  ;;  %v5669_v61 = vld [vmem:[%s5408_s19 + $0xc8] sm:$0xff] }
  0x3c   : > { %v485_v21 = vadd.f32 %v469_v63, %v5563_v31  ;;  %4895 = vmatprep.mubr.msk.f32.mxu0 %vm1164_vm0, %v542_v37  ;;  %v530_v27 = vadd.f32 %v514_v4, %v5567_v33  ;;  %v499_v29 = vadd.f32 %v483_v10, %v5563_v31  ;;  %v472_v35 = vadd.f32 %v456_v16, %v5552_v15  ;;  %v5680_v10 = vld [vmem:[%s5413_s30 + $0x30] sm:$0xff] }
  0x3d   : > { %v516_v32 = vadd.f32 %v500_v12, %v5567_v33  ;;  %v486_v43 = vadd.f32 %v470_v22, %v5552_v15  ;;  %v487_v37 = vadd.f32 %v471_v25, %v5579_v41  ;;  %v473_v5 = vadd.f32 %v457_v26, %v5579_v41  ;;  %7548 = vst [vmem:[#allocation3_spill] sm:$0xff] %v5661_v57  ;;  %v5683_v12 = vld [vmem:[%s5413_s30 + $0x28] sm:$0xff]  ;;  %v5690_v22 = vld [vmem:[%s5408_s19 + $0xe0] sm:$0xff] }
  0x3e   : > { %v501_v42 = vadd.f32 %v485_v21, %v5579_v41  ;;  %v545_v45 = vadd.f32 %v529_v51, %v5621_v17  ;;  %v515_v46 = vadd.f32 %v499_v29, %v5579_v41  ;;  %v488_v28 = vadd.f32 %v472_v35, %v5567_v33  ;;  %7549 = vst [vmem:[#allocation4_spill] sm:$0xff] %v5664_v58  ;;  %v5687_v21 = vld [vmem:[%s5408_s19 + $0xd8] sm:$0xff]  ;;  %v5693_v25 = vld [vmem:[%s5408_s19 + $0xe8] sm:$0xff] }
  0x3f   : > { %v532_v52 = vadd.f32 %v516_v32, %v5636_v39  ;;  %4896 = vmatmul.mubr.msk.f32.gmra.mrb[4].mxu0 %vm1164_vm0, %v543_v23  ;;  %v502_v54 = vadd.f32 %v486_v43, %v5567_v33  ;;  %v503_v55 = vadd.f32 %v487_v37, %v5621_v17  ;;  %v489_v51 = vadd.f32 %v473_v5, %v5621_v17  ;;  %v5705_v37 = vld [vmem:[%s5413_s30 + $0x40] sm:$0xff]  ;;  %v5708_v5 = vld [vmem:[%s5413_s30 + $0x38] sm:$0xff] }
  0x40   : > { %v517_v53 = vadd.f32 %v501_v42, %v5621_v17  ;;  %4898 = vmatprep.mubr.msk.f32.mxu0 %vm1164_vm0, %v544_v47  ;;  %v546_v23 = vadd.f32 %v530_v27, %v5636_v39  ;;  %v531_v62 = vadd.f32 %v515_v46, %v5621_v17  ;;  %v504_v63 = vadd.f32 %v488_v28, %v5636_v39  ;;  %v5712_v46 = vld [vmem:[%s5408_s19 + $0xf0] sm:$0xff] }
  0x41   : > { %v554_v0 = vadd.f32 %v5643_v44, %v5633_v36  ;;  %v518_v2 = vadd.f32 %v502_v54, %v5636_v39  ;;  %v519_v4 = vadd.f32 %v503_v55, %v5669_v61  ;;  %v505_v47 = vadd.f32 %v489_v51, %v5669_v61  ;;  %7550 = vst [vmem:[#allocation5_spill] sm:$0xff] %v5680_v10 }
  0x42   : > { %v533_v1 = vadd.f32 %v517_v53, %v5669_v61  ;;  %7551 = vst [vmem:[#allocation6_spill] sm:$0xff] %v5683_v12  ;;  %v548_v16 = vadd.f32 %v532_v52, %v5648_v49  ;;  %v520_v26 = vadd.f32 %v504_v63, %v5648_v49  ;;  %v555_v29 = vadd.f32 %v5664_v58, %v5661_v57 }
  0x43   : > { %v570_v27 = vadd.f32 %v554_v0, %v5658_v56  ;;  %4899 = vmatmul.mubr.msk.f32.gmra.mrb[6].mxu0 %vm1164_vm0, %v545_v45  ;;  %v547_v32 = vadd.f32 %v531_v62, %v5669_v61  ;;  %v534_v35 = vadd.f32 %v518_v2, %v5648_v49  ;;  %v535_v42 = vadd.f32 %v519_v4, %v5687_v21  ;;  %v5726_v62 = vld [vmem:[%s5413_s30 + $0x48] sm:$0xff] }
  0x44   : > { %v521_v43 = vadd.f32 %v505_v47, %v5687_v21  ;;  %7552 = vst [vmem:[#allocation7_spill] sm:$0xff] %v5705_v37  ;;  %7553 = vst [vmem:[#allocation8_spill] sm:$0xff] %v5708_v5  ;;  %4901 = vmatprep.mubr.msk.f32.mxu0 %vm1164_vm0, %v546_v23  ;;  %v536_v45 = vadd.f32 %v520_v26, %v5690_v22  ;;  %v571_v28 = vadd.f32 %v555_v29, %v5683_v12  ;;  %v5723_v23 = vld [vmem:[%s5413_s30 + $0x50] sm:$0xff]  ;;  %v5737_v26 = vld [vmem:[%s5413_s30 + $0x60] sm:$0xff] }
  0x45   : > { %7554 = vst [vmem:[#allocation9_spill] sm:$0xff] %v5712_v46  ;;  %v586_v52 = vadd.f32 %v570_v27, %v5680_v10  ;;  %v556_v53 = vadd.f32 %v5658_v56, %v5643_v44  ;;  %v549_v54 = vadd.f32 %v533_v1, %v5687_v21  ;;  %v550_v55 = vadd.f32 %v534_v35, %v5690_v22  ;;  %v5740_v27 = vld [vmem:[%s5413_s30 + $0x58] sm:$0xff] }
  0x46   : > { %v551_v51 = vadd.f32 %v535_v42, %v5693_v25  ;;  %7555 = vst [vmem:[#allocation10_spill] sm:$0xff] %v5723_v23  ;;  %7556 = vst [vmem:[#allocation11_spill] sm:$0xff] %v5726_v62  ;;  %v557_v63 = vadd.f32 %v5683_v12, %v5664_v58  ;;  %v537_v0 = vadd.f32 %v521_v43, %v5693_v25 }
  0x47   : > { %v602_v2 = vadd.f32 %v586_v52, %v5705_v37  ;;  %v587_v4 = vadd.f32 %v571_v28, %v5708_v5  ;;  %v572_v1 = vadd.f32 %v556_v53, %v5680_v10  ;;  %4902 = vmatmul.mubr.msk.f32.gmra.mrb[8].mxu0 %vm1164_vm0, %v547_v32  ;;  %v552_v47 = vadd.f32 %v536_v45, %v5712_v46  ;;  %v5754_v28 = vld [vmem:[%s5413_s30 + $0x70] sm:$0xff]  ;;  %v5757_v53 = vld [vmem:[%s5413_s30 + $0x68] sm:$0xff] }
  0x48   : > { %7557 = vst [vmem:[#allocation12_spill] sm:$0xff] %v5740_v27  ;;  %v573_v29 = vadd.f32 %v557_v63, %v5708_v5  ;;  %v558_v35 = vadd.f32 %v5680_v10, %v5658_v56  ;;  %v559_v42 = vadd.f32 %v5708_v5, %v5683_v12  ;;  %4904 = vmatprep.mubr.msk.f32.mxu0 %vm1164_vm0, %v548_v16  ;;  %7558 = vst [vmem:[#allocation13_spill] sm:$0xff] %v5757_v53  ;;  %v5785_v56 = vld [vmem:[%s5413_s30 + $0x80] sm:$0xff]  ;;  %v5837_v46 = vld [vmem:[%s5413_s30 + $0xb0] sm:$0xff] }
  0x49   : > { %v618_v43 = vadd.f32 %v602_v2, %v5723_v23  ;;  %v603_v32 = vadd.f32 %v587_v4, %v5726_v62  ;;  %v588_v45 = vadd.f32 %v572_v1, %v5705_v37  ;;  %v560_v52 = vadd.f32 %v5705_v37, %v5680_v10  ;;  %v5770_v10 = vld [vmem:[%s5408_s19 + $0xf8] sm:$0xff] }
  0x4a   : > { %v589_v63 = vadd.f32 %v573_v29, %v5726_v62  ;;  %v574_v12 = vadd.f32 %v558_v35, %v5705_v37  ;;  %v575_v16 = vadd.f32 %v559_v42, %v5726_v62  ;;  %v561_v2 = vadd.f32 %v5726_v62, %v5708_v5  ;;  %7559 = vst [vmem:[#allocation14_spill] sm:$0xff] %v5770_v10  ;;  %v5773_v29 = vld [vmem:[%s5413_s30 + $0x78] sm:$0xff] }
  0x4b   : > { %v634_v4 = vadd.f32 %v618_v43, %v5737_v26  ;;  %v619_v1 = vadd.f32 %v603_v32, %v5740_v27  ;;  %v604_v58 = vadd.f32 %v588_v45, %v5723_v23  ;;  %v576_v57 = vadd.f32 %v560_v52, %v5723_v23  ;;  %4905 = vmatmul.mubr.msk.f32.gmra.mrb[10].mxu0 %vm1164_vm0, %v549_v54 }
  0x4c   : > { %v605_v35 = vadd.f32 %v589_v63, %v5740_v27  ;;  %v590_v42 = vadd.f32 %v574_v12, %v5723_v23  ;;  %v591_v5 = vadd.f32 %v575_v16, %v5740_v27  ;;  %v577_v43 = vadd.f32 %v561_v2, %v5740_v27  ;;  %4907 = vmatprep.mubr.msk.f32.mxu0 %vm1164_vm0, %v550_v55 }
  0x4d   : > { %v650_v32 = vadd.f32 %v634_v4, %v5754_v28  ;;  %v635_v45 = vadd.f32 %v619_v1, %v5757_v53  ;;  %v620_v54 = vadd.f32 %v604_v58, %v5737_v26  ;;  %v592_v52 = vadd.f32 %v576_v57, %v5737_v26  ;;  %v5797_v57 = vld [vmem:[%s5413_s30 + $0x88] sm:$0xff] }
  0x4e   : > { %v621_v63 = vadd.f32 %v605_v35, %v5757_v53  ;;  %v606_v12 = vadd.f32 %v590_v42, %v5737_v26  ;;  %v607_v16 = vadd.f32 %v591_v5, %v5757_v53  ;;  %v593_v2 = vadd.f32 %v577_v43, %v5757_v53  ;;  %7560 = vst [vmem:[#allocation15_spill] sm:$0xff] %v5797_v57 }
  0x4f   : > { %v553_v55 = vadd.f32 %v537_v0, %v5770_v10  ;;  %v651_v4 = vadd.f32 %v635_v45, %v5773_v29  ;;  %v636_v1 = vadd.f32 %v620_v54, %v5754_v28  ;;  %v608_v58 = vadd.f32 %v592_v52, %v5754_v28  ;;  %4908 = vmatmul.mubr.msk.f32.gmra.mrb[12].mxu0 %vm1164_vm0, %v551_v51  ;;  %v5806_v45 = vld [vmem:[%s5413_s30 + $0x90] sm:$0xff]  ;;  %v5821_v10 = vld [vmem:[%s5413_s30 + $0xa0] sm:$0xff] }
  0x50   : > { %v637_v35 = vadd.f32 %v621_v63, %v5773_v29  ;;  %v622_v5 = vadd.f32 %v606_v12, %v5754_v28  ;;  %v623_v42 = vadd.f32 %v607_v16, %v5773_v29  ;;  %v609_v0 = vadd.f32 %v593_v2, %v5773_v29  ;;  %4910 = vmatprep.mubr.msk.f32.mxu0 %vm1164_vm0, %v552_v47  ;;  %v5818_v2 = vld [vmem:[%s5413_s30 + $0x98] sm:$0xff] }
  0x51   : > { %v666_v43 = vadd.f32 %v650_v32, %v5785_v56  ;;  %v652_v51 = vadd.f32 %v636_v1, %v5785_v56  ;;  %v624_v54 = vadd.f32 %v608_v58, %v5785_v56  ;;  %v562_v52 = vadd.f32 %v5723_v23, %v5705_v37  ;;  %v5824_v1 = vld [vmem:[%s5413_s30 + $0xa8] sm:$0xff] }
  0x52   : > { %v653_v63 = vadd.f32 %v637_v35, %v5797_v57  ;;  %v638_v12 = vadd.f32 %v622_v5, %v5785_v56  ;;  %v639_v16 = vadd.f32 %v623_v42, %v5797_v57  ;;  %v625_v47 = vadd.f32 %v609_v0, %v5797_v57 }
  0x53   : > { %v667_v32 = vadd.f32 %v651_v4, %v5797_v57  ;;  %v640_v58 = vadd.f32 %v624_v54, %v5806_v45  ;;  %v578_v37 = vadd.f32 %v562_v52, %v5737_v26  ;;  %v563_v35 = vadd.f32 %v5740_v27, %v5726_v62  ;;  %4911 = vmatmul.mubr.msk.f32.gmra.mrb[14].mxu0 %vm1164_vm0, %v553_v55 }
  0x54   : > { %v668_v5 = vadd.f32 %v652_v51, %v5806_v45  ;;  %v654_v42 = vadd.f32 %v638_v12, %v5806_v45  ;;  %v655_v4 = vadd.f32 %v639_v16, %v5818_v2  ;;  %v641_v0 = vadd.f32 %v625_v47, %v5818_v2  ;;  %4913 = vmatprep.mubr.msk.f32.mxu0 %vm1164_vm0, %v666_v43 }
  0x55   : > { %v656_v54 = vadd.f32 %v640_v58, %v5821_v10  ;;  %v594_v52 = vadd.f32 %v578_v37, %v5754_v28  ;;  %v579_v62 = vadd.f32 %v563_v35, %v5757_v53  ;;  %v564_v55 = vadd.f32 %v5737_v26, %v5723_v23 }
  0x56   : > { %v669_v51 = vadd.f32 %v653_v63, %v5818_v2  ;;  %v670_v12 = vadd.f32 %v654_v42, %v5821_v10  ;;  %v671_v16 = vadd.f32 %v655_v4, %v5824_v1  ;;  %v565_v43 = vadd.f32 %v5757_v53, %v5740_v27  ;;  %v5877_v27 = vld [vmem:[%s5413_s30 + $0xb8] sm:$0xff] }
  0x57   : > { %v657_v47 = vadd.f32 %v641_v0, %v5824_v1  ;;  %v610_v58 = vadd.f32 %v594_v52, %v5785_v56  ;;  %v595_v37 = vadd.f32 %v579_v62, %v5773_v29  ;;  %v580_v35 = vadd.f32 %v564_v55, %v5754_v28  ;;  %4914 = vmatmul.mubr.msk.f32.gmra.mrb[16].mxu0 %vm1164_vm0, %v667_v32 }
  0x58   : > { %v672_v23 = vadd.f32 %v656_v54, %v5837_v46  ;;  %v581_v63 = vadd.f32 %v565_v43, %v5773_v29  ;;  %v566_v42 = vadd.f32 %v5754_v28, %v5737_v26  ;;  %v567_v4 = vadd.f32 %v5773_v29, %v5757_v53  ;;  %4916 = vmatprep.mubr.msk.f32.mxu0 %vm1164_vm0, %v668_v5 }
  0x59   : > { %v626_v0 = vadd.f32 %v610_v58, %v5806_v45  ;;  %v611_v62 = vadd.f32 %v595_v37, %v5797_v57  ;;  %v596_v52 = vadd.f32 %v580_v35, %v5785_v56  ;;  %v568_v32 = vadd.f32 %v5785_v56, %v5754_v28 }
  0x5a   : > { %v597_v54 = vadd.f32 %v581_v63, %v5797_v57  ;;  %v582_v55 = vadd.f32 %v566_v42, %v5785_v56  ;;  %v583_v43 = vadd.f32 %v567_v4, %v5797_v57  ;;  %v569_v53 = vadd.f32 %v5797_v57, %v5773_v29 }
  0x5b   : > { %v642_v5 = vadd.f32 %v626_v0, %v5821_v10  ;;  %v627_v58 = vadd.f32 %v611_v62, %v5818_v2  ;;  %v612_v37 = vadd.f32 %v596_v52, %v5806_v45  ;;  %v584_v35 = vadd.f32 %v568_v32, %v5806_v45  ;;  %4917 = vmatmul.mubr.msk.f32.gmra.mrb[18].mxu0 %vm1164_vm0, %v669_v51  ;;  %v5889_v32 = vld [vmem:[%s5413_s30 + $0xc0] sm:$0xff] }
  0x5c   : > { %v613_v63 = vadd.f32 %v597_v54, %v5818_v2  ;;  %v598_v42 = vadd.f32 %v582_v55, %v5806_v45  ;;  %v599_v4 = vadd.f32 %v583_v43, %v5818_v2  ;;  %v585_v57 = vadd.f32 %v569_v53, %v5818_v2  ;;  %4919 = vmatprep.mubr.msk.f32.mxu0 %vm1164_vm0, %v670_v12 }
  0x5d   : > { %v658_v0 = vadd.f32 %v642_v5, %v5837_v46  ;;  %v643_v62 = vadd.f32 %v627_v58, %v5824_v1  ;;  %v628_v52 = vadd.f32 %v612_v37, %v5821_v10  ;;  %v600_v51 = vadd.f32 %v584_v35, %v5821_v10  ;;  %v5901_v35 = vld [vmem:[%s5413_s30 + $0xc8] sm:$0xff] }
  0x5e   : > { %v629_v54 = vadd.f32 %v613_v63, %v5824_v1  ;;  %v614_v55 = vadd.f32 %v598_v42, %v5821_v10  ;;  %v615_v53 = vadd.f32 %v599_v4, %v5824_v1  ;;  %v601_v43 = vadd.f32 %v585_v57, %v5824_v1 }
  0x5f   : > { %v673_v12 = vadd.f32 %v657_v47, %v5877_v27  ;;  %v659_v5 = vadd.f32 %v643_v62, %v5877_v27  ;;  %v644_v58 = vadd.f32 %v628_v52, %v5837_v46  ;;  %v616_v37 = vadd.f32 %v600_v51, %v5837_v46  ;;  %4920 = vmatmul.mubr.msk.f32.gmra.mrb[20].mxu0 %vm1164_vm0, %v671_v16  ;;  %v5910_v62 = vld [vmem:[%s5413_s30 + $0xd0] sm:$0xff] }
  0x60   : > { %v645_v63 = vadd.f32 %v629_v54, %v5877_v27  ;;  %v630_v42 = vadd.f32 %v614_v55, %v5837_v46  ;;  %v631_v4 = vadd.f32 %v615_v53, %v5877_v27  ;;  %v617_v57 = vadd.f32 %v601_v43, %v5877_v27  ;;  %4922 = vmatprep.mubr.msk.f32.mxu0 %vm1164_vm0, %v672_v23  ;;  %v5917_v54 = vld [vmem:[%s5413_s30 + $0xd8] sm:$0xff] }
  0x61   : > { %v674_v47 = vadd.f32 %v658_v0, %v5889_v32  ;;  %v660_v52 = vadd.f32 %v644_v58, %v5889_v32  ;;  %v632_v16 = vadd.f32 %v616_v37, %v5889_v32  ;;  %v686_v51 = vmul.f32 %v5436_v6, %v5436_v6  ;;  %7561 = vst [vmem:[#allocation16_spill] sm:$0xff] %v5917_v54 }
  0x62   : > { %v661_v55 = vadd.f32 %v645_v63, %v5901_v35  ;;  %v646_v53 = vadd.f32 %v630_v42, %v5889_v32  ;;  %v647_v23 = vadd.f32 %v631_v4, %v5901_v35  ;;  %v633_v0 = vadd.f32 %v617_v57, %v5901_v35  ;;  %v5934_v42 = vld [vmem:[%s5413_s30 + $0xe0] sm:$0xff] }
  0x63   : > { %v5925_v43 = vmul.f32 %v5633_v36, %v5430_v3  ;;  %v675_v58 = vadd.f32 %v659_v5, %v5901_v35  ;;  %v648_v6 = vadd.f32 %v632_v16, %v5910_v62  ;;  %v688_v37 = vmul.f32 %v5439_v7, %v5439_v7  ;;  %4923 = vmatmul.mubr.msk.f32.gmra.mrb[22].mxu0 %vm1164_vm0, %v673_v12  ;;  %v5942_v16 = vld [vmem:[%s5413_s30 + $0xe8] sm:$0xff] }
  0x64   : > { %v676_v63 = vadd.f32 %v660_v52, %v5910_v62  ;;  %v662_v4 = vadd.f32 %v646_v53, %v5910_v62  ;;  %v663_v57 = vadd.f32 %v647_v23, %v5917_v54  ;;  %v649_v3 = vadd.f32 %v633_v0, %v5917_v54  ;;  %4925 = vmatprep.mubr.msk.f32.mxu0 %vm1164_vm0, %v674_v47  ;;  %v5957_v53 = vld [vmem:[%s5413_s30 + $0xf8] sm:$0xff] }
  0x65   : > { %7562 = vst [vmem:[#allocation17_spill] sm:$0xff] %v5925_v43  ;;  %v677_v5 = vadd.f32 %v661_v55, %v5917_v54  ;;  %v5945_v43 = vld [vmem:[%s5413_s30 + $0xf0] sm:$0xff]  ;;  %v664_v7 = vadd.f32 %v648_v6, %v5934_v42  ;;  %v5950_v12 = vmul.f32 %v5442_v8, %v5442_v8  ;;  %v5954_v52 = vmul.f32 %v5445_v9, %v5445_v9 }
  0x66   : > { %v665_v47 = vadd.f32 %v649_v3, %v5942_v16  ;;  %v5962_v55 = vmul.f32 %v5454_v13, %v5454_v13  ;;  %v5966_v23 = vmul.f32 %v5505_v38, %v5505_v38  ;;  %v714_v8 = vadd.f32 %v5571_v34, %v5458_v14 }
  0x67   : > { %v678_v0 = vadd.f32 %v662_v4, %v5934_v42  ;;  %v5973_v9 = vmul.f32 %v5519_v48, %v5519_v48  ;;  %v683_v6 = vmul.f32 %v5466_v18, %v5466_v18  ;;  %v685_v13 = vmul.f32 %v5469_v19, %v5469_v19  ;;  %4926 = vmatmul.mubr.msk.f32.gmra.mrb[24].mxu0 %vm1164_vm0, %v675_v58 }
  0x68   : > { %v679_v38 = vadd.f32 %v663_v57, %v5942_v16  ;;  %v680_v3 = vadd.f32 %v664_v7, %v5945_v43  ;;  %v730_v54 = vadd.f32 %v714_v8, %v686_v51  ;;  %v687_v14 = vmul.f32 %v5472_v20, %v5472_v20  ;;  %4928 = vmatprep.mubr.msk.f32.mxu0 %vm1164_vm0, %v676_v63 }
  0x69   : > { %v681_v48 = vadd.f32 %v665_v47, %v5957_v53  ;;  %v689_v18 = vmul.f32 %v5481_v24, %v5481_v24  ;;  %v5990_v19 = vmul.f32 %v5493_v30, %v5493_v30  ;;  %v5994_v58 = vmul.f32 %v5509_v40, %v5509_v40 }
  0x6a   : > { %v746_v4 = vadd.f32 %v730_v54, %v688_v37  ;;  %v5998_v57 = vmul.f32 %v5523_v50, %v5523_v50  ;;  %v715_v20 = vadd.f32 %v685_v13, %v683_v6  ;;  %v716_v63 = vadd.f32 %v686_v51, %v5571_v34 }
  0x6b   : > { %v6003_v7 = vmul.f32 %v5534_v59, %v5534_v59  ;;  %v6007_v24 = vmul.f32 %v5548_v11, %v5548_v11  ;;  %v717_v30 = vadd.f32 %v687_v14, %v685_v13  ;;  %v718_v47 = vadd.f32 %v688_v37, %v686_v51  ;;  %4929 = vmatmul.mubr.msk.f32.gmra.mrb[26].mxu0 %vm1164_vm0, %v677_v5 }
  0x6c   : > { %v762_v40 = vadd.f32 %v746_v4, %v5950_v12  ;;  %v731_v54 = vadd.f32 %v715_v20, %v687_v14  ;;  %v6013_v50 = vmul.f32 %v5537_v60, %v5537_v60  ;;  %v732_v34 = vadd.f32 %v716_v63, %v688_v37  ;;  %4931 = vmatprep.mubr.msk.f32.mxu0 %vm1164_vm0, %v678_v0 }
  0x6d   : > { %v6018_v59 = vmul.f32 %v5563_v31, %v5563_v31  ;;  %v733_v11 = vadd.f32 %v717_v30, %v689_v18  ;;  %v734_v8 = vadd.f32 %v718_v47, %v5950_v12  ;;  %v719_v51 = vadd.f32 %v689_v18, %v687_v14 }
  0x6e   : > { %v778_v5 = vadd.f32 %v762_v40, %v5954_v52  ;;  %v747_v6 = vadd.f32 %v731_v54, %v689_v18  ;;  %v748_v13 = vadd.f32 %v732_v34, %v5950_v12  ;;  %v720_v4 = vadd.f32 %v5950_v12, %v688_v37 }
  0x6f   : > { %v749_v60 = vadd.f32 %v733_v11, %v5990_v19  ;;  %v6027_v0 = vmul.f32 %v5552_v15, %v5552_v15  ;;  %v750_v31 = vadd.f32 %v734_v8, %v5954_v52  ;;  %v735_v20 = vadd.f32 %v719_v51, %v5990_v19  ;;  %4932 = vmatmul.mubr.msk.f32.gmra.mrb[28].mxu0 %vm1164_vm0, %v679_v38 }
  0x70   : > { %v794_v14 = vadd.f32 %v778_v5, %v5962_v55  ;;  %v763_v63 = vadd.f32 %v747_v6, %v5990_v19  ;;  %v764_v30 = vadd.f32 %v748_v13, %v5954_v52  ;;  %v736_v37 = vadd.f32 %v720_v4, %v5954_v52  ;;  %4934 = vmatprep.mubr.msk.f32.mxu0 %vm1164_vm0, %v680_v3 }
  0x71   : > { %v765_v47 = vadd.f32 %v749_v60, %v5994_v58  ;;  %v766_v15 = vadd.f32 %v750_v31, %v5962_v55  ;;  %v751_v40 = vadd.f32 %v735_v20, %v5994_v58  ;;  %v721_v54 = vadd.f32 %v5990_v19, %v689_v18 }
  0x72   : > { %v810_v38 = vadd.f32 %v794_v14, %v5966_v23  ;;  %v779_v34 = vadd.f32 %v763_v63, %v5994_v58  ;;  %v780_v11 = vadd.f32 %v764_v30, %v5962_v55  ;;  %v752_v8 = vadd.f32 %v736_v37, %v5962_v55 }
  0x73   : > { %v781_v51 = vadd.f32 %v765_v47, %v5998_v57  ;;  %v782_v3 = vadd.f32 %v766_v15, %v5966_v23  ;;  %v767_v5 = vadd.f32 %v751_v40, %v5998_v57  ;;  %v737_v6 = vadd.f32 %v721_v54, %v5994_v58  ;;  %4935 = vmatmul.mubr.msk.f32.gmra.mrb[30].mxu0 %vm1164_vm0, %v681_v48 }
  0x74   : > { %v826_v18 = vadd.f32 %v810_v38, %v5973_v9  ;;  %v795_v13 = vadd.f32 %v779_v34, %v5998_v57  ;;  %v796_v4 = vadd.f32 %v780_v11, %v5966_v23  ;;  %v768_v60 = vadd.f32 %v752_v8, %v5966_v23 }
  0x75   : > { %v797_v31 = vadd.f32 %v781_v51, %v6003_v7  ;;  %v798_v20 = vadd.f32 %v782_v3, %v5973_v9  ;;  %v783_v14 = vadd.f32 %v767_v5, %v6003_v7  ;;  %v753_v63 = vadd.f32 %v737_v6, %v5998_v57 }
  0x76   : > { %4937 = vmatprep.mubr.msk.f32.mxu0 %vm1164_vm0, %v826_v18  ;;  %v811_v48 = vadd.f32 %v795_v13, %v6003_v7  ;;  %v812_v30 = vadd.f32 %v796_v4, %v5973_v9  ;;  %v6063_v37 = vmul.f32 %v5579_v41, %v5579_v41  ;;  %v784_v47 = vadd.f32 %v768_v60, %v5973_v9 }
  0x77   : > { %v813_v15 = vadd.f32 %v797_v31, %v6007_v24  ;;  %v814_v40 = vadd.f32 %v798_v20, %v6013_v50  ;;  %v799_v54 = vadd.f32 %v783_v14, %v6007_v24  ;;  %v769_v38 = vadd.f32 %v753_v63, %v6003_v7 }
  0x78   : > { %v827_v34 = vadd.f32 %v811_v48, %v6007_v24  ;;  %v828_v11 = vadd.f32 %v812_v30, %v6013_v50  ;;  %v800_v8 = vadd.f32 %v784_v47, %v6013_v50  ;;  %v722_v41 = vadd.f32 %v5954_v52, %v5950_v12 }
  0x79   : > { %v815_v51 = vadd.f32 %v799_v54, %v6018_v59  ;;  %v6078_v3 = vmul.f32 %v5567_v33, %v5567_v33  ;;  %v6082_v5 = vmul.f32 %v5621_v17, %v5621_v17  ;;  %v785_v6 = vadd.f32 %v769_v38, %v6007_v24 }
  0x7a   : > { %4938 = vmatmul.mubr.msk.f32.gmra.mrb[32].mxu0 %vm1164_vm0, %v827_v34  ;;  %v829_v18 = vadd.f32 %v813_v15, %v6018_v59  ;;  %v816_v13 = vadd.f32 %v800_v8, %v6027_v0  ;;  %v738_v12 = vadd.f32 %v722_v41, %v5962_v55  ;;  %v723_v4 = vadd.f32 %v5994_v58, %v5990_v19 }
  0x7b   : > { %4940 = vmatprep.mubr.msk.f32.mxu0 %vm1164_vm0, %v828_v11  ;;  %v830_v33 = vadd.f32 %v814_v40, %v6027_v0  ;;  %v801_v17 = vadd.f32 %v785_v6, %v6018_v59  ;;  %v6096_v60 = vmul.f32 %v5636_v39, %v5636_v39  ;;  %v724_v31 = vadd.f32 %v5962_v55, %v5954_v52 }
  0x7c   : > { %v831_v20 = vadd.f32 %v815_v51, %v6063_v37  ;;  %v754_v14 = vadd.f32 %v738_v12, %v5966_v23  ;;  %v6104_v19 = vmul.f32 %v5669_v61, %v5669_v61  ;;  %v739_v63 = vadd.f32 %v723_v4, %v5998_v57 }
  0x7d   : > { %v832_v48 = vadd.f32 %v816_v13, %v6078_v3  ;;  %v6110_v30 = vmul.f32 %v5648_v49, %v5648_v49  ;;  %v740_v39 = vadd.f32 %v724_v31, %v5966_v23  ;;  %v725_v52 = vadd.f32 %v5998_v57, %v5994_v58 }
  0x7e   : > { %4941 = vmatmul.mubr.msk.f32.gmra.mrb[34].mxu0 %vm1164_vm0, %v829_v18  ;;  %v817_v47 = vadd.f32 %v801_v17, %v6063_v37  ;;  %v770_v61 = vadd.f32 %v754_v14, %v5973_v9  ;;  %v755_v15 = vadd.f32 %v739_v63, %v6003_v7  ;;  %v726_v40 = vadd.f32 %v5966_v23, %v5962_v55 }
  0x7f   : > { %4943 = vmatprep.mubr.msk.f32.mxu0 %vm1164_vm0, %v830_v33  ;;  %v756_v49 = vadd.f32 %v740_v39, %v5973_v9  ;;  %v6125_v54 = vmul.f32 %v5687_v21, %v5687_v21  ;;  %v741_v58 = vadd.f32 %v725_v52, %v6003_v7  ;;  %v727_v38 = vadd.f32 %v6003_v7, %v5998_v57 }
  0x80   : > { %v786_v34 = vadd.f32 %v770_v61, %v6013_v50  ;;  %v771_v11 = vadd.f32 %v755_v15, %v6007_v24  ;;  %v710_v55 = vmul.f32 %v5690_v22, %v5690_v22  ;;  %v742_v8 = vadd.f32 %v726_v40, %v5973_v9 }
  0x81   : > { %v772_v41 = vadd.f32 %v756_v49, %v6013_v50  ;;  %v757_v51 = vadd.f32 %v741_v58, %v6007_v24  ;;  %v743_v21 = vadd.f32 %v727_v38, %v6007_v24  ;;  %v728_v6 = vadd.f32 %v5973_v9, %v5966_v23 }
  0x82   : > { %4944 = vmatmul.mubr.msk.f32.gmra.mrb[36].mxu0 %vm1164_vm0, %v831_v20  ;;  %v833_v57 = vadd.f32 %v817_v47, %v6082_v5  ;;  %v802_v18 = vadd.f32 %v786_v34, %v6027_v0  ;;  %v787_v13 = vadd.f32 %v771_v11, %v6018_v59  ;;  %v758_v22 = vadd.f32 %v742_v8, %v6013_v50 }
  0x83   : > { %4946 = vmatprep.mubr.msk.f32.mxu0 %vm1164_vm0, %v832_v48  ;;  %v788_v12 = vadd.f32 %v772_v41, %v6027_v0  ;;  %v773_v4 = vadd.f32 %v757_v51, %v6018_v59  ;;  %v759_v33 = vadd.f32 %v743_v21, %v6018_v59  ;;  %v744_v23 = vadd.f32 %v728_v6, %v6013_v50  ;;  %v7563_v6 = vld [vmem:[#allocation9_spill] sm:$0xff] }
  0x84   : > { %v818_v9 = vadd.f32 %v802_v18, %v6078_v3  ;;  %v803_v17 = vadd.f32 %v787_v13, %v6063_v37  ;;  %v774_v31 = vadd.f32 %v758_v22, %v6027_v0  ;;  %v729_v20 = vadd.f32 %v6007_v24, %v6003_v7  ;;  %v7564_v13 = vld [vmem:[#allocation14_spill] sm:$0xff] }
  0x85   : > { %v804_v14 = vadd.f32 %v788_v12, %v6078_v3  ;;  %v789_v63 = vadd.f32 %v773_v4, %v6063_v37  ;;  %v775_v48 = vadd.f32 %v759_v33, %v6063_v37  ;;  %v760_v39 = vadd.f32 %v744_v23, %v6027_v0  ;;  %v7565_v22 = vld [vmem:[#allocation2_spill] sm:$0xff]  ;;  %v7566_v4 = vld [vmem:[#allocation5_spill] sm:$0xff]  ;;  %v7567_v23 = vld [vmem:[#allocation7_spill] sm:$0xff] }
  0x86   : > { %4947 = vmatmul.mubr.msk.f32.gmra.mrb[38].mxu0 %vm1164_vm0, %v833_v57  ;;  %v834_v50 = vadd.f32 %v818_v9, %v6096_v60  ;;  %v819_v52 = vadd.f32 %v803_v17, %v6082_v5  ;;  %v790_v47 = vadd.f32 %v774_v31, %v6078_v3  ;;  %v745_v61 = vadd.f32 %v729_v20, %v6018_v59  ;;  %v7568_v17 = vld [vmem:[#allocation10_spill] sm:$0xff] }
  0x87   : > { %v820_v7 = vadd.f32 %v804_v14, %v6096_v60  ;;  %v805_v24 = vadd.f32 %v789_v63, %v6082_v5  ;;  %v791_v15 = vadd.f32 %v775_v48, %v6082_v5  ;;  %v776_v40 = vadd.f32 %v760_v39, %v6078_v3  ;;  %v7569_v14 = vld [vmem:[#allocation3_spill] sm:$0xff]  ;;  %v7570_v39 = vld [vmem:[#allocation4_spill] sm:$0xff] }
  0x88   : > { %4949 = vmatprep.mubr.msk.f32.mxu0 %vm1164_vm0, %v834_v50  ;;  %v835_v0 = vadd.f32 %v819_v52, %v6104_v19  ;;  %v806_v49 = vadd.f32 %v790_v47, %v6096_v60  ;;  %v711_v58 = vmul.f32 %v5693_v25, %v5693_v25  ;;  %v761_v38 = vadd.f32 %v745_v61, %v6063_v37  ;;  %v7571_v52 = vld [vmem:[#allocation6_spill] sm:$0xff] }
  0x89   : > { %v836_v59 = vadd.f32 %v820_v7, %v6110_v30  ;;  %v821_v34 = vadd.f32 %v805_v24, %v6104_v19  ;;  %v807_v11 = vadd.f32 %v791_v15, %v6104_v19  ;;  %v792_v8 = vadd.f32 %v776_v40, %v6096_v60  ;;  %v7572_v15 = vld [vmem:[#allocation8_spill] sm:$0xff]  ;;  %v7573_v40 = vld [vmem:[#allocation11_spill] sm:$0xff] }
  0x8a   : > { %4950 = vmatmul.mubr.msk.f32.gmra.mrb[40].mxu0 %vm1164_vm0, %v835_v0  ;;  %v822_v3 = vadd.f32 %v806_v49, %v6110_v30  ;;  %v777_v41 = vadd.f32 %v761_v38, %v6082_v5  ;;  %v842_v51 = vmul.f32 %v5633_v36, %v5633_v36  ;;  %v844_v25 = vmul.f32 %v5643_v44, %v5643_v44  ;;  %v7574_v49 = vld [vmem:[#allocation12_spill] sm:$0xff] }
  0x8b   : > { %4952 = vmatprep.mubr.msk.f32.mxu0 %vm1164_vm0, %v836_v59  ;;  %v837_v37 = vadd.f32 %v821_v34, %v6125_v54  ;;  %v823_v21 = vadd.f32 %v807_v11, %v6125_v54  ;;  %v712_v60 = vmul.f32 %v7563_v6, %v7563_v6  ;;  %v808_v57 = vadd.f32 %v792_v8, %v6110_v30  ;;  %v7575_v11 = vld [vmem:[#allocation13_spill] sm:$0xff] }
  0x8c   : > { %v838_v18 = vadd.f32 %v822_v3, %v710_v55  ;;  %v713_v5 = vmul.f32 %v7564_v13, %v7564_v13  ;;  %v793_v36 = vadd.f32 %v777_v41, %v6104_v19  ;;  %v846_v44 = vmul.f32 %v7565_v22, %v7565_v22 }
  0x8d   : > { %v824_v12 = vadd.f32 %v808_v57, %v710_v55  ;;  %v848_v33 = vmul.f32 %v7566_v4, %v7566_v4  ;;  %v6200_v9 = vmul.f32 %v7567_v23, %v7567_v23  ;;  %v6204_v30 = vmul.f32 %v7568_v17, %v7568_v17 }
  0x8e   : > { %4953 = vmatmul.mubr.msk.f32.gmra.mrb[42].mxu0 %vm1164_vm0, %v837_v37  ;;  %v839_v31 = vadd.f32 %v823_v21, %v711_v58  ;;  %v809_v19 = vadd.f32 %v793_v36, %v6125_v54  ;;  %v874_v20 = vadd.f32 %v844_v25, %v842_v51  ;;  %v843_v55 = vmul.f32 %v7569_v14, %v7569_v14  ;;  %v7576_v51 = vld [vmem:[#allocation15_spill] sm:$0xff] }
  0x8f   : > { %4955 = vmatprep.mubr.msk.f32.mxu0 %vm1164_vm0, %v838_v18  ;;  %v840_v63 = vadd.f32 %v824_v12, %v712_v60  ;;  %v6213_v48 = vmul.f32 %v5737_v26, %v5737_v26  ;;  %v845_v50 = vmul.f32 %v7570_v39, %v7570_v39  ;;  %v847_v47 = vmul.f32 %v7571_v52, %v7571_v52 }
  0x90   : > { %v825_v61 = vadd.f32 %v809_v19, %v711_v58  ;;  %v6221_v54 = vmul.f32 %v5754_v28, %v5754_v28  ;;  %v6225_v7 = vmul.f32 %v5785_v56, %v5785_v56  ;;  %v890_v24 = vadd.f32 %v874_v20, %v846_v44 }
  0x91   : > { %v849_v26 = vmul.f32 %v7572_v15, %v7572_v15  ;;  %v6231_v0 = vmul.f32 %v7573_v40, %v7573_v40  ;;  %v6235_v38 = vmul.f32 %v7574_v49, %v7574_v49  ;;  %v875_v58 = vadd.f32 %v845_v50, %v843_v55 }
  0x92   : > { %4956 = vmatmul.mubr.msk.f32.gmra.mrb[44].mxu0 %vm1164_vm0, %v839_v31  ;;  %v841_v59 = vadd.f32 %v825_v61, %v713_v5  ;;  %v906_v34 = vadd.f32 %v890_v24, %v848_v33  ;;  %v6240_v8 = vmul.f32 %v7575_v11, %v7575_v11  ;;  %v876_v3 = vadd.f32 %v846_v44, %v844_v25 }
  0x93   : > { %4958 = vmatprep.mubr.msk.f32.mxu0 %vm1164_vm0, %v840_v63  ;;  %v6245_v41 = vmul.f32 %v5773_v29, %v5773_v29  ;;  %v6249_v37 = vmul.f32 %v7576_v51, %v7576_v51  ;;  %v891_v21 = vadd.f32 %v875_v58, %v847_v47  ;;  %v877_v6 = vadd.f32 %v847_v47, %v845_v50 }
  0x94   : > { %v922_v60 = vadd.f32 %v906_v34, %v6200_v9  ;;  %v6254_v57 = vmul.f32 %v5806_v45, %v5806_v45  ;;  %v892_v18 = vadd.f32 %v876_v3, %v848_v33  ;;  %v878_v25 = vadd.f32 %v848_v33, %v846_v44 }
  0x95   : > { %v907_v13 = vadd.f32 %v891_v21, %v849_v26  ;;  %v6258_v5 = vmul.f32 %v5818_v2, %v5818_v2  ;;  %v893_v36 = vadd.f32 %v877_v6, %v849_v26  ;;  %v879_v22 = vadd.f32 %v849_v26, %v847_v47 }
  0x96   : > { %4959 = vmatmul.mubr.msk.f32.gmra.mrb[46].mxu0 %vm1164_vm0, %v841_v59  ;;  %v938_v12 = vadd.f32 %v922_v60, %v6204_v30  ;;  %v908_v4 = vadd.f32 %v892_v18, %v6200_v9  ;;  %v894_v23 = vadd.f32 %v878_v25, %v6200_v9  ;;  %v880_v17 = vadd.f32 %v6200_v9, %v848_v33 }
  0x97   : > { %v923_v31 = vadd.f32 %v907_v13, %v6231_v0  ;;  %v909_v44 = vadd.f32 %v893_v36, %v6231_v0  ;;  %v6269_v19 = vmul.f32 %v5821_v10, %v5821_v10  ;;  %v895_v20 = vadd.f32 %v879_v22, %v6231_v0 }
  0x98   : > { %v954_v14 = vadd.f32 %v938_v12, %v6213_v48  ;;  %v924_v55 = vadd.f32 %v908_v4, %v6204_v30  ;;  %v910_v63 = vadd.f32 %v894_v23, %v6204_v30  ;;  %v896_v39 = vadd.f32 %v880_v17, %v6204_v30 }
  0x99   : > { %v939_v33 = vadd.f32 %v923_v31, %v6235_v38  ;;  %v925_v50 = vadd.f32 %v909_v44, %v6235_v38  ;;  %v911_v52 = vadd.f32 %v895_v20, %v6235_v38  ;;  %v881_v47 = vadd.f32 %v6231_v0, %v849_v26 }
  0x9a   : > { %v970_v61 = vadd.f32 %v954_v14, %v6221_v54  ;;  %v940_v24 = vadd.f32 %v924_v55, %v6213_v48  ;;  %v926_v15 = vadd.f32 %v910_v63, %v6213_v48  ;;  %v912_v40 = vadd.f32 %v896_v39, %v6213_v48 }
  0x9b   : > { %v955_v49 = vadd.f32 %v939_v33, %v6240_v8  ;;  %v941_v58 = vadd.f32 %v925_v50, %v6240_v8  ;;  %v927_v59 = vadd.f32 %v911_v52, %v6240_v8  ;;  %v897_v34 = vadd.f32 %v881_v47, %v6235_v38 }
  0x9c   : > { %v986_v11 = vadd.f32 %v970_v61, %v6225_v7  ;;  %v956_v26 = vadd.f32 %v940_v24, %v6221_v54  ;;  %v942_v3 = vadd.f32 %v926_v15, %v6221_v54  ;;  %v928_v21 = vadd.f32 %v912_v40, %v6221_v54 }
  0x9d   : > { %v971_v6 = vadd.f32 %v955_v49, %v6245_v41  ;;  %v957_v60 = vadd.f32 %v941_v58, %v6245_v41  ;;  %v943_v18 = vadd.f32 %v927_v59, %v6245_v41  ;;  %v913_v25 = vadd.f32 %v897_v34, %v6240_v8 }
  0x9e   : > { %4961 = vmatprep.mubr.msk.f32.mxu0 %vm1164_vm0, %v986_v11  ;;  %v972_v13 = vadd.f32 %v956_v26, %v6225_v7  ;;  %v958_v36 = vadd.f32 %v942_v3, %v6225_v7  ;;  %v6301_v22 = vmul.f32 %v5824_v1, %v5824_v1  ;;  %v944_v12 = vadd.f32 %v928_v21, %v6225_v7 }
  0x9f   : > { %v987_v4 = vadd.f32 %v971_v6, %v6249_v37  ;;  %v973_v23 = vadd.f32 %v957_v60, %v6249_v37  ;;  %v959_v17 = vadd.f32 %v943_v18, %v6249_v37  ;;  %v929_v31 = vadd.f32 %v913_v25, %v6245_v41  ;;  %v7577_v18 = vld [vmem:[#allocation16_spill] sm:$0xff] }
  0xa0   : > { %v988_v44 = vadd.f32 %v972_v13, %v6254_v57  ;;  %v974_v20 = vadd.f32 %v958_v36, %v6254_v57  ;;  %v960_v14 = vadd.f32 %v944_v12, %v6254_v57  ;;  %v882_v1 = vadd.f32 %v6204_v30, %v6200_v9 }
  0xa1   : > { %4962 = vmatmul.mubr.msk.f32.gmra.mrb[48].mxu0 %vm1164_vm0, %v987_v4  ;;  %v989_v55 = vadd.f32 %v973_v23, %v6258_v5  ;;  %v975_v63 = vadd.f32 %v959_v17, %v6258_v5  ;;  %v6318_v39 = vmul.f32 %v5837_v46, %v5837_v46  ;;  %v945_v33 = vadd.f32 %v929_v31, %v6249_v37 }
  0xa2   : > { %4964 = vmatprep.mubr.msk.f32.mxu0 %vm1164_vm0, %v988_v44  ;;  %v990_v50 = vadd.f32 %v974_v20, %v6269_v19  ;;  %v976_v52 = vadd.f32 %v960_v14, %v6269_v19  ;;  %v898_v9 = vadd.f32 %v882_v1, %v6213_v48  ;;  %v883_v47 = vadd.f32 %v6235_v38, %v6231_v0 }
  0xa3   : > { %v6329_v61 = vmul.f32 %v5877_v27, %v5877_v27  ;;  %v961_v46 = vadd.f32 %v945_v33, %v6258_v5  ;;  %v6334_v24 = vmul.f32 %v5889_v32, %v5889_v32  ;;  %v884_v15 = vadd.f32 %v6213_v48, %v6204_v30 }
  0xa4   : > { %v991_v40 = vadd.f32 %v975_v63, %v6301_v22  ;;  %v914_v49 = vadd.f32 %v898_v9, %v6221_v54  ;;  %v6342_v0 = vmul.f32 %v5901_v35, %v5901_v35  ;;  %v899_v58 = vadd.f32 %v883_v47, %v6240_v8 }
  0xa5   : > { %4965 = vmatmul.mubr.msk.f32.gmra.mrb[50].mxu0 %vm1164_vm0, %v989_v55  ;;  %v977_v59 = vadd.f32 %v961_v46, %v6301_v22  ;;  %v6349_v34 = vmul.f32 %v5910_v62, %v5910_v62  ;;  %v900_v30 = vadd.f32 %v884_v15, %v6221_v54  ;;  %v885_v11 = vadd.f32 %v6240_v8, %v6235_v38 }
  0xa6   : > { %4967 = vmatprep.mubr.msk.f32.mxu0 %vm1164_vm0, %v990_v50  ;;  %v992_v26 = vadd.f32 %v976_v52, %v6318_v39  ;;  %v930_v3 = vadd.f32 %v914_v49, %v6225_v7  ;;  %v915_v21 = vadd.f32 %v899_v58, %v6245_v41  ;;  %v886_v6 = vadd.f32 %v6221_v54, %v6213_v48 }
  0xa7   : > { %v916_v60 = vadd.f32 %v900_v30, %v6225_v7  ;;  %v6363_v25 = vmul.f32 %v7577_v18, %v7577_v18  ;;  %v901_v13 = vadd.f32 %v885_v11, %v6245_v41  ;;  %v887_v38 = vadd.f32 %v6245_v41, %v6240_v8 }
  0xa8   : > { %v993_v36 = vadd.f32 %v977_v59, %v6329_v61  ;;  %v946_v12 = vadd.f32 %v930_v3, %v6254_v57  ;;  %v931_v4 = vadd.f32 %v915_v21, %v6249_v37  ;;  %v902_v23 = vadd.f32 %v886_v6, %v6225_v7 }
  0xa9   : > { %4968 = vmatmul.mubr.msk.f32.gmra.mrb[52].mxu0 %vm1164_vm0, %v991_v40  ;;  %v932_v48 = vadd.f32 %v916_v60, %v6254_v57  ;;  %v917_v17 = vadd.f32 %v901_v13, %v6249_v37  ;;  %v903_v31 = vadd.f32 %v887_v38, %v6249_v37  ;;  %v888_v44 = vadd.f32 %v6225_v7, %v6221_v54  ;;  %v5219_v38 = vld [vmem:[%s5408_s19 + $0x10] sm:$0xff] }
  0xaa   : > { %4970 = vmatprep.mubr.msk.f32.mxu0 %vm1164_vm0, %v992_v26  ;;  %v962_v8 = vadd.f32 %v946_v12, %v6269_v19  ;;  %v947_v20 = vadd.f32 %v931_v4, %v6258_v5  ;;  %v870_v14 = vmul.f32 %v5934_v42, %v5934_v42  ;;  %v918_v1 = vadd.f32 %v902_v23, %v6254_v57 }
  0xab   : > { %v948_v55 = vadd.f32 %v932_v48, %v6269_v19  ;;  %v933_v63 = vadd.f32 %v917_v17, %v6258_v5  ;;  %v919_v33 = vadd.f32 %v903_v31, %v6258_v5  ;;  %v904_v50 = vadd.f32 %v888_v44, %v6254_v57  ;;  %v5221_v17 = vld [vmem:[%s5408_s19 + $0x20] sm:$0xff] }
  0xac   : > { %v978_v54 = vadd.f32 %v962_v8, %v6318_v39  ;;  %v963_v7 = vadd.f32 %v947_v20, %v6301_v22  ;;  %v934_v52 = vadd.f32 %v918_v1, %v6269_v19  ;;  %v889_v9 = vadd.f32 %v6249_v37, %v6245_v41  ;;  %v5222_v31 = vld [vmem:[%s5413_s30 + $0x20] sm:$0xff]  ;;  %v5223_v8 = vld [vmem:[%s5408_s19 + $0x30] sm:$0xff] }
  0xad   : > { %4971 = vmatmul.mubr.msk.f32.gmra.mrb[54].mxu0 %vm1164_vm0, %v993_v36  ;;  %v964_v47 = vadd.f32 %v948_v55, %v6318_v39  ;;  %v949_v46 = vadd.f32 %v933_v63, %v6301_v22  ;;  %v935_v15 = vadd.f32 %v919_v33, %v6301_v22  ;;  %v920_v40 = vadd.f32 %v904_v50, %v6269_v19  ;;  %v5220_v36 = vld [vmem:[%s5413_s30 + $0x10] sm:$0xff]  ;;  %v5225_v63 = vld [vmem:[%s5408_s19 + $0x40] sm:$0xff] }
  0xae   : > { %v994_v57 = vadd.f32 %v978_v54, %v6334_v24  ;;  %v979_v49 = vadd.f32 %v963_v7, %v6329_v61  ;;  %v950_v58 = vadd.f32 %v934_v52, %v6318_v39  ;;  %v905_v59 = vadd.f32 %v889_v9, %v6258_v5  ;;  %v5224_v20 = vld [vmem:[%s5413_s30 + $0x30] sm:$0xff]  ;;  %v5226_v33 = vld [vmem:[%s5413_s30 + $0x40] sm:$0xff]  ;;  %v7578_v52 = vld [vmem:[#allocation17_spill] sm:$0xff] }
  0xaf   : > { %v980_v41 = vadd.f32 %v964_v47, %v6334_v24  ;;  %v965_v37 = vadd.f32 %v949_v46, %v6329_v61  ;;  %v951_v30 = vadd.f32 %v935_v15, %v6329_v61  ;;  %v936_v11 = vadd.f32 %v920_v40, %v6318_v39  ;;  %v5228_v50 = vld [vmem:[%s5413_s30 + $0x50] sm:$0xff]  ;;  %v5229_v9 = vld [vmem:[%s5408_s19 + $0x8] sm:$0xff]  ;;  %v5231_v15 = vld [vmem:[%s5408_s19 + $0x18] sm:$0xff] }
  0xb0   : > { %4973 = vmatprep.mubr.msk.f32.mxu0 %vm1164_vm0, %v994_v57  ;;  %v995_v19 = vadd.f32 %v979_v49, %v6342_v0  ;;  %v966_v26 = vadd.f32 %v950_v58, %v6334_v24  ;;  %v871_v3 = vmul.f32 %v5942_v16, %v5942_v16  ;;  %v921_v5 = vadd.f32 %v905_v59, %v6301_v22  ;;  %v5230_v47 = vld [vmem:[%s5413_s30 + $0x8] sm:$0xff]  ;;  %v5232_v40 = vld [vmem:[%s5413_s30 + $0x18] sm:$0xff]  ;;  %v5233_v58 = vld [vmem:[%s5408_s19 + $0x60] sm:$0xff] }
  0xb1   : > { %v996_v21 = vadd.f32 %v980_v41, %v6349_v34  ;;  %v981_v6 = vadd.f32 %v965_v37, %v6342_v0  ;;  %v967_v60 = vadd.f32 %v951_v30, %v6342_v0  ;;  %v952_v39 = vadd.f32 %v936_v11, %v6334_v24  ;;  %v5235_v41 = vld [vmem:[%s5408_s19 + $0x70] sm:$0xff]  ;;  %v5236_v30 = vld [vmem:[%s5408_s19 + $0x28] sm:$0xff] }
  0xb2   : > { %4974 = vmatmul.mubr.msk.f32.gmra.mrb[56].mxu0 %vm1164_vm0, %v995_v19  ;;  %v982_v13 = vadd.f32 %v966_v26, %v6349_v34  ;;  %v872_v16 = vmul.f32 %v5945_v43, %v5945_v43  ;;  %v937_v22 = vadd.f32 %v921_v5, %v6329_v61  ;;  %v6423_v12 = vmul.f32 %v5220_v36, %v5219_v38  ;;  %v5237_v11 = vld [vmem:[%s5413_s30 + $0x28] sm:$0xff]  ;;  %v5238_v5 = vld [vmem:[%s5408_s19 + $0x80] sm:$0xff]  ;;  %v5243_v38 = vld [vmem:[%s5408_s19 + $0x58] sm:$0xff] }
  0xb3   : > { %4976 = vmatprep.mubr.msk.f32.mxu0 %vm1164_vm0, %v996_v21  ;;  %v997_v24 = vadd.f32 %v981_v6, %v6363_v25  ;;  %v983_v4 = vadd.f32 %v967_v60, %v6363_v25  ;;  %v968_v23 = vadd.f32 %v952_v39, %v6349_v34  ;;  %v873_v43 = vmul.f32 %v5957_v53, %v5957_v53  ;;  %v5239_v60 = vld [vmem:[%s5408_s19 + $0x38] sm:$0xff] }
  0xb4   : > { %v998_v61 = vadd.f32 %v982_v13, %v870_v14  ;;  %v953_v48 = vadd.f32 %v937_v22, %v6342_v0  ;;  %v1006_v44 = vmul.f32 %v5222_v31, %v5221_v17  ;;  %v6436_v1 = vmul.f32 %v5224_v20, %v5223_v8  ;;  %v5227_v0 = vld [vmem:[%s5408_s19 + $0x50] sm:$0xff]  ;;  %v5240_v39 = vld [vmem:[%s5413_s30 + $0x38] sm:$0xff]  ;;  %v5242_v22 = vld [vmem:[%s5413_s30 + $0x48] sm:$0xff] }
  0xb5   : > { %v999_v55 = vadd.f32 %v983_v4, %v871_v3  ;;  %v984_v34 = vadd.f32 %v968_v23, %v870_v14  ;;  %v6440_v53 = vmul.f32 %v5226_v33, %v5225_v63  ;;  %v6444_v54 = vmul.f32 %v5228_v50, %v5227_v0  ;;  %v5244_v36 = vld [vmem:[%s5413_s30 + $0x58] sm:$0xff]  ;;  %v5245_v4 = vld [vmem:[%s5408_s19 + $0x68] sm:$0xff]  ;;  %v5249_v0 = vld [vmem:[%s5408_s19 + $0x90] sm:$0xff] }
  0xb6   : > { %4977 = vmatmul.mubr.msk.f32.gmra.mrb[58].mxu0 %vm1164_vm0, %v997_v24  ;;  %v969_v7 = vadd.f32 %v953_v48, %v6363_v25  ;;  %v1034_v14 = vadd.f32 %v6423_v12, %v7578_v52  ;;  %v1003_v46 = vmul.f32 %v5230_v47, %v5229_v9  ;;  %v1005_v57 = vmul.f32 %v5232_v40, %v5231_v15  ;;  %v5234_v25 = vld [vmem:[%s5413_s30 + $0x60] sm:$0xff]  ;;  %v5247_v17 = vld [vmem:[%s5408_s19 + $0x78] sm:$0xff]  ;;  %v5248_v20 = vld [vmem:[%s5408_s19 + $0x88] sm:$0xff] }
  0xb7   : > { %4979 = vmatprep.mubr.msk.f32.mxu0 %vm1164_vm0, %v998_v61  ;;  %v1000_v49 = vadd.f32 %v984_v34, %v872_v16  ;;  %v6457_v59 = vmul.f32 %v5234_v25, %v5233_v58  ;;  %v6461_v37 = vmul.f32 %v5235_v41, %v5754_v28  ;;  %v1007_v19 = vmul.f32 %v5237_v11, %v5236_v30  ;;  %v5241_v16 = vld [vmem:[%s5408_s19 + $0x48] sm:$0xff]  ;;  %v5250_v52 = vld [vmem:[%s5408_s19 + $0x98] sm:$0xff] }
  0xb8   : > { %v985_v26 = vadd.f32 %v969_v7, %v871_v3  ;;  %v6467_v21 = vmul.f32 %v5238_v5, %v5785_v56  ;;  %v1050_v6 = vadd.f32 %v1034_v14, %v1006_v44  ;;  %v1009_v13 = vmul.f32 %v5240_v39, %v5239_v60  ;;  %v5246_v3 = vld [vmem:[%s5413_s30 + $0x68] sm:$0xff] }
  0xb9   : > { %v6473_v28 = vmul.f32 %v5242_v22, %v5241_v16  ;;  %v6477_v24 = vmul.f32 %v5244_v36, %v5243_v38  ;;  %v6481_v23 = vmul.f32 %v5246_v3, %v5245_v4  ;;  %v1035_v56 = vadd.f32 %v1005_v57, %v1003_v46 }
  0xba   : > { %4980 = vmatmul.mubr.msk.f32.gmra.mrb[60].mxu0 %vm1164_vm0, %v999_v55  ;;  %v1001_v61 = vadd.f32 %v985_v26, %v873_v43  ;;  %v1066_v48 = vadd.f32 %v1050_v6, %v6436_v1  ;;  %v6487_v31 = vmul.f32 %v5247_v17, %v5773_v29  ;;  %v1036_v8 = vadd.f32 %v1006_v44, %v6423_v12 }
  0xbb   : > { %4982 = vmatprep.mubr.msk.f32.mxu0 %vm1164_vm0, %v1000_v49  ;;  %v6493_v34 = vmul.f32 %v5248_v20, %v7576_v51  ;;  %v1051_v63 = vadd.f32 %v1035_v56, %v1007_v19  ;;  %v1037_v33 = vadd.f32 %v1007_v19, %v1005_v57  ;;  %v1038_v55 = vadd.f32 %v6436_v1, %v1006_v44  ;;  %v5252_v20 = vld [vmem:[%s5408_s19 + $0xa8] sm:$0xff] }
  0xbc   : > { %v1082_v43 = vadd.f32 %v1066_v48, %v6440_v53  ;;  %v6499_v50 = vmul.f32 %v5249_v0, %v5806_v45  ;;  %v1052_v29 = vadd.f32 %v1036_v8, %v6436_v1  ;;  %v1039_v12 = vadd.f32 %v1009_v13, %v1007_v19 }
  0xbd   : > { %v1067_v7 = vadd.f32 %v1051_v63, %v1009_v13  ;;  %v6504_v14 = vmul.f32 %v5250_v52, %v5818_v2  ;;  %v1053_v51 = vadd.f32 %v1037_v33, %v1009_v13  ;;  %v1054_v9 = vadd.f32 %v1038_v55, %v6440_v53  ;;  %v5251_v2 = vld [vmem:[%s5408_s19 + $0xa0] sm:$0xff]  ;;  %v5253_v63 = vld [vmem:[%s5413_s30 + $0xa8] sm:$0xff] }
  0xbe   : > { %4983 = vmatmul.mubr.msk.f32.gmra.mrb[62].mxu0 %vm1164_vm0, %v1001_v61  ;;  %v1098_v44 = vadd.f32 %v1082_v43, %v6444_v54  ;;  %v1068_v47 = vadd.f32 %v1052_v29, %v6440_v53  ;;  %v1055_v45 = vadd.f32 %v1039_v12, %v6473_v28  ;;  %v1040_v46 = vadd.f32 %v6440_v53, %v6436_v1 }
  0xbf   : > { %v1083_v15 = vadd.f32 %v1067_v7, %v6473_v28  ;;  %v1069_v40 = vadd.f32 %v1053_v51, %v6473_v28  ;;  %v6517_v57 = vmul.f32 %v5251_v2, %v5821_v10  ;;  %v1070_v49 = vadd.f32 %v1054_v9, %v6444_v54 }
  0xc0   : > { %v1114_v58 = vadd.f32 %v1098_v44, %v6457_v59  ;;  %v1084_v25 = vadd.f32 %v1068_v47, %v6444_v54  ;;  %v1071_v41 = vadd.f32 %v1055_v45, %v6477_v24  ;;  %v1056_v30 = vadd.f32 %v1040_v46, %v6444_v54  ;;  %v5254_v45 = vld [vmem:[%s5408_s19 + $0xb0] sm:$0xff] }
  0xc1   : > { %v1099_v1 = vadd.f32 %v1083_v15, %v6477_v24  ;;  %v1085_v11 = vadd.f32 %v1069_v40, %v6477_v24  ;;  %v1086_v19 = vadd.f32 %v1070_v49, %v6457_v59  ;;  %v1041_v26 = vadd.f32 %v6473_v28, %v1009_v13  ;;  %v5255_v46 = vld [vmem:[%s5413_s30 + $0xb0] sm:$0xff]  ;;  %v5256_v40 = vld [vmem:[%s5408_s19 + $0xb8] sm:$0xff] }
  0xc2   : > { %v1130_v10 = vadd.f32 %v1114_v58, %v6461_v37  ;;  %v1100_v5 = vadd.f32 %v1084_v25, %v6457_v59  ;;  %v1087_v6 = vadd.f32 %v1071_v41, %v6481_v23  ;;  %v1072_v60 = vadd.f32 %v1056_v30, %v6457_v59 }
  0xc3   : > { %v1115_v39 = vadd.f32 %v1099_v1, %v6481_v23  ;;  %v1101_v16 = vadd.f32 %v1085_v11, %v6481_v23  ;;  %v1102_v22 = vadd.f32 %v1086_v19, %v6461_v37  ;;  %v1057_v38 = vadd.f32 %v1041_v26, %v6477_v24  ;;  %v5257_v1 = vld [vmem:[%s5408_s19 + $0xc0] sm:$0xff]  ;;  %v5258_v11 = vld [vmem:[%s5408_s19 + $0xc8] sm:$0xff] }
  0xc4   : > { %v1146_v13 = vadd.f32 %v1130_v10, %v6467_v21  ;;  %v1116_v36 = vadd.f32 %v1100_v5, %v6461_v37  ;;  %v1103_v4 = vadd.f32 %v1087_v6, %v6487_v31  ;;  %v1088_v3 = vadd.f32 %v1072_v60, %v6461_v37  ;;  %v5259_v60 = vld [vmem:[%s5408_s19 + $0xd0] sm:$0xff] }
  0xc5   : > { %v1131_v56 = vadd.f32 %v1115_v39, %v6487_v31  ;;  %v1117_v61 = vadd.f32 %v1101_v16, %v6487_v31  ;;  %v1118_v48 = vadd.f32 %v1102_v22, %v6467_v21  ;;  %v1073_v17 = vadd.f32 %v1057_v38, %v6481_v23 }
  0xc6   : > { %4985 = vmatprep.mubr.msk.f32.mxu0 %vm1164_vm0, %v1146_v13  ;;  %v1132_v8 = vadd.f32 %v1116_v36, %v6467_v21  ;;  %v6548_v33 = vmul.f32 %v5253_v63, %v5252_v20  ;;  %v1119_v55 = vadd.f32 %v1103_v4, %v6493_v34  ;;  %v1104_v43 = vadd.f32 %v1088_v3, %v6467_v21  ;;  %v5260_v36 = vld [vmem:[%s5408_s19 + $0xd8] sm:$0xff] }
  0xc7   : > { %v1147_v0 = vadd.f32 %v1131_v56, %v6493_v34  ;;  %v1133_v29 = vadd.f32 %v1117_v61, %v6493_v34  ;;  %v1134_v12 = vadd.f32 %v1118_v48, %v6499_v50  ;;  %v1089_v7 = vadd.f32 %v1073_v17, %v6487_v31 }
  0xc8   : > { %v1148_v52 = vadd.f32 %v1132_v8, %v6499_v50  ;;  %v1135_v51 = vadd.f32 %v1119_v55, %v6504_v14  ;;  %v1120_v9 = vadd.f32 %v1104_v43, %v6499_v50  ;;  %v1042_v44 = vadd.f32 %v6444_v54, %v6440_v53  ;;  %v5261_v43 = vld [vmem:[%s5408_s19 + $0xe0] sm:$0xff] }
  0xc9   : > { %4986 = vmatmul.mubr.msk.f32.gmra.mrb[64].mxu0 %vm1164_vm0, %v1147_v0  ;;  %v1149_v47 = vadd.f32 %v1133_v29, %v6504_v14  ;;  %v6565_v15 = vmul.f32 %v5255_v46, %v5254_v45  ;;  %v6569_v2 = vmul.f32 %v5256_v40, %v5877_v27  ;;  %v1105_v49 = vadd.f32 %v1089_v7, %v6493_v34 }
  0xca   : > { %4988 = vmatprep.mubr.msk.f32.mxu0 %vm1164_vm0, %v1148_v52  ;;  %v1150_v58 = vadd.f32 %v1134_v12, %v6517_v57  ;;  %v1136_v53 = vadd.f32 %v1120_v9, %v6517_v57  ;;  %v1058_v25 = vadd.f32 %v1042_v44, %v6457_v59  ;;  %v1043_v41 = vadd.f32 %v6477_v24, %v6473_v28 }
  0xcb   : > { %v1121_v30 = vadd.f32 %v1105_v49, %v6504_v14  ;;  %v6581_v27 = vmul.f32 %v5257_v1, %v5889_v32  ;;  %v6585_v19 = vmul.f32 %v5258_v11, %v5901_v35  ;;  %v1044_v26 = vadd.f32 %v6457_v59, %v6444_v54 }
  0xcc   : > { %v1151_v10 = vadd.f32 %v1135_v51, %v6548_v33  ;;  %v1074_v5 = vadd.f32 %v1058_v25, %v6461_v37  ;;  %v1059_v28 = vadd.f32 %v1043_v41, %v6481_v23  ;;  %v1045_v6 = vadd.f32 %v6481_v23, %v6477_v24 }
  0xcd   : > { %4989 = vmatmul.mubr.msk.f32.gmra.mrb[66].mxu0 %vm1164_vm0, %v1149_v47  ;;  %v1137_v32 = vadd.f32 %v1121_v30, %v6548_v33  ;;  %v6598_v35 = vmul.f32 %v5259_v60, %v5910_v62  ;;  %v1060_v54 = vadd.f32 %v1044_v26, %v6461_v37  ;;  %v1046_v39 = vadd.f32 %v6461_v37, %v6457_v59  ;;  %v5262_v26 = vld [vmem:[%s5408_s19 + $0xe8] sm:$0xff]  ;;  %v5265_v60 = vld [vmem:[%s5413_s30 + $0xf0] sm:$0xff] }
  0xce   : > { %4991 = vmatprep.mubr.msk.f32.mxu0 %vm1164_vm0, %v1150_v58  ;;  %v1152_v16 = vadd.f32 %v1136_v53, %v6565_v15  ;;  %v1090_v22 = vadd.f32 %v1074_v5, %v6467_v21  ;;  %v1075_v24 = vadd.f32 %v1059_v28, %v6487_v31  ;;  %v1061_v38 = vadd.f32 %v1045_v6, %v6487_v31 }
  0xcf   : > { %v1076_v13 = vadd.f32 %v1060_v54, %v6467_v21  ;;  %v6611_v62 = vmul.f32 %v5260_v36, %v7577_v18  ;;  %v1062_v4 = vadd.f32 %v1046_v39, %v6467_v21  ;;  %v1047_v59 = vadd.f32 %v6487_v31, %v6481_v23 }
  0xd0   : > { %v1153_v3 = vadd.f32 %v1137_v32, %v6569_v2  ;;  %v1106_v56 = vadd.f32 %v1090_v22, %v6499_v50  ;;  %v1091_v61 = vadd.f32 %v1075_v24, %v6493_v34  ;;  %v1077_v48 = vadd.f32 %v1061_v38, %v6493_v34  ;;  %v5264_v32 = vld [vmem:[%s5408_s19 + $0xf0] sm:$0xff]  ;;  %v5266_v24 = vld [vmem:[%s5408_s19 + $0xf8] sm:$0xff] }
  0xd1   : > { %4992 = vmatmul.mubr.msk.f32.gmra.mrb[68].mxu0 %vm1164_vm0, %v1151_v10  ;;  %v1092_v17 = vadd.f32 %v1076_v13, %v6499_v50  ;;  %v1078_v18 = vadd.f32 %v1062_v4, %v6499_v50  ;;  %v1063_v8 = vadd.f32 %v1047_v59, %v6493_v34  ;;  %v1048_v20 = vadd.f32 %v6467_v21, %v6461_v37  ;;  %v5263_v10 = vld [vmem:[%s5413_s30 + $0xe8] sm:$0xff]  ;;  %v5267_v38 = vld [vmem:[%s5413_s30 + $0xf8] sm:$0xff] }
  0xd2   : > { %4994 = vmatprep.mubr.msk.f32.mxu0 %vm1164_vm0, %v1152_v16  ;;  %v1122_v23 = vadd.f32 %v1106_v56, %v6517_v57  ;;  %v1107_v63 = vadd.f32 %v1091_v61, %v6504_v14  ;;  %v1093_v55 = vadd.f32 %v1077_v48, %v6504_v14  ;;  %v1030_v0 = vmul.f32 %v5261_v43, %v5934_v42 }
  0xd3   : > { %v1108_v29 = vadd.f32 %v1092_v17, %v6517_v57  ;;  %v1094_v12 = vadd.f32 %v1078_v18, %v6517_v57  ;;  %v1079_v7 = vadd.f32 %v1063_v8, %v6504_v14  ;;  %v1064_v52 = vadd.f32 %v1048_v20, %v6499_v50  ;;  %v3150_v20 = vld [vmem:[%s7498_s1] sm:$0xff] }
  0xd4   : > { %v1138_v37 = vadd.f32 %v1122_v23, %v6565_v15  ;;  %v1123_v21 = vadd.f32 %v1107_v63, %v6548_v33  ;;  %v1109_v51 = vadd.f32 %v1093_v55, %v6548_v33  ;;  %v1049_v9 = vadd.f32 %v6493_v34, %v6487_v31  ;;  %v3151_v23 = vld [vmem:[%s7498_s1 + $0x8] sm:$0xff] }
  0xd5   : > { %4995 = vmatmul.mubr.msk.f32.gmra.mrb[70].mxu0 %vm1164_vm0, %v1153_v3  ;;  %v1124_v42 = vadd.f32 %v1108_v29, %v6565_v15  ;;  %v1110_v44 = vadd.f32 %v1094_v12, %v6565_v15  ;;  %v1095_v47 = vadd.f32 %v1079_v7, %v6548_v33  ;;  %v1080_v45 = vadd.f32 %v1064_v52, %v6517_v57 }
  0xd6   : > { %v1154_v50 = vadd.f32 %v1138_v37, %v6581_v27  ;;  %v1139_v46 = vadd.f32 %v1123_v21, %v6569_v2  ;;  %v1125_v40 = vadd.f32 %v1109_v51, %v6569_v2  ;;  %v1065_v49 = vadd.f32 %v1049_v9, %v6504_v14 }
  0xd7   : > { %v1140_v31 = vadd.f32 %v1124_v42, %v6581_v27  ;;  %v1126_v34 = vadd.f32 %v1110_v44, %v6581_v27  ;;  %v1111_v58 = vadd.f32 %v1095_v47, %v6569_v2  ;;  %v1096_v53 = vadd.f32 %v1080_v45, %v6565_v15 }
  0xd8   : > { %4997 = vmatprep.mubr.msk.f32.mxu0 %vm1164_vm0, %v1154_v50  ;;  %v1155_v57 = vadd.f32 %v1139_v46, %v6585_v19  ;;  %v1141_v25 = vadd.f32 %v1125_v40, %v6585_v19  ;;  %v1081_v41 = vadd.f32 %v1065_v49, %v6548_v33  ;;  %v1031_v5 = vmul.f32 %v5263_v10, %v5262_v26 }
  0xd9   : > { %v1156_v14 = vadd.f32 %v1140_v31, %v6598_v35  ;;  %v1142_v30 = vadd.f32 %v1126_v34, %v6598_v35  ;;  %v1127_v1 = vadd.f32 %v1111_v58, %v6585_v19  ;;  %v1112_v11 = vadd.f32 %v1096_v53, %v6581_v27 }
  0xda   : > { %4998 = vmatmul.mubr.msk.f32.gmra.mrb[72].mxu0 %vm1164_vm0, %v1155_v57  ;;  %v1157_v15 = vadd.f32 %v1141_v25, %v6611_v62  ;;  %v1097_v28 = vadd.f32 %v1081_v41, %v6569_v2  ;;  %v1032_v54 = vmul.f32 %v5265_v60, %v5264_v32  ;;  %v1033_v13 = vmul.f32 %v5267_v38, %v5266_v24 }
  0xdb   : > { %5000 = vmatprep.mubr.msk.f32.mxu0 %vm1164_vm0, %v1156_v14  ;;  %v1158_v33 = vadd.f32 %v1142_v30, %v1030_v0  ;;  %v1143_v6 = vadd.f32 %v1127_v1, %v6611_v62  ;;  %v1128_v27 = vadd.f32 %v1112_v11, %v6598_v35  ;;  %v5137_v63 = vpack.c.bf16 %v3151_v23, %v3150_v20 }
  0xdc   : > { %v1113_v39 = vadd.f32 %v1097_v28, %v6585_v19 }
  0xdd   : > { %v1144_v16 = vadd.f32 %v1128_v27, %v1030_v0  ;;  %v1159_v22 = vadd.f32 %v1143_v6, %v1031_v5  ;;  %5138 = vmatprep.subr.bf16.mxu1 %v5137_v63 }
  0xde   : > { %5001 = vmatmul.mubr.msk.f32.gmra.mrb[74].mxu0 %vm1164_vm0, %v1157_v15  ;;  %v1129_v2 = vadd.f32 %v1113_v39, %v6611_v62  ;;  %5140 = vmatpush3.bf16.msra.mxu1 %v5137_v63 }
  0xdf   : > { %5003 = vmatprep.mubr.msk.f32.mxu0 %vm1164_vm0, %v1158_v33  ;;  %v1160_v36 = vadd.f32 %v1144_v16, %v1032_v54 }
  0xe0   : > { %v1145_v4 = vadd.f32 %v1129_v2, %v1031_v5 }
  0xe2   : > { %5004 = vmatmul.mubr.msk.f32.gmra.mrb[76].mxu0 %vm1164_vm0, %v1159_v22  ;;  %v1161_v59 = vadd.f32 %v1145_v4, %v1033_v13 }
  0xe3   : > { %5006 = vmatprep.mubr.msk.f32.mxu0 %vm1164_vm0, %v1160_v36 }
  0xe6   : > { %5007 = vmatmul.mubr.msk.f32.gmra.mrb[78].mxu0 %vm1164_vm0, %v1161_v59 }
 0x10a   : > { %v4891_v19 = vpop.f32.mrb[0].mxu0 }
 0x10b   : > { %v1471_v35 = vpop.f32.mrb[1].mxu0 }
 0x10c   : > { %1870 = vxpose.xlu0.b32.start [1/2] (short) (narrow) %v1471_v35, 16 }
 0x10e   : > { %v4894_v3 = vpop.f32.mrb[2].mxu0 }
 0x10f   : > { %v1481_v56 = vpop.f32.mrb[3].mxu0 }
 0x110   : > { %1871 = vxpose.xlu0.b32.end [2/2] (short) (narrow) %v4891_v19, 16  ;;  %1902 = vxpose.xlu1.b32.start [1/2] (short) (narrow) %v1481_v56, 16 }
 0x112   : > { %v4897_v61 = vpop.f32.mrb[4].mxu0 }
 0x113   : > { %v1491_v62 = vpop.f32.mrb[5].mxu0 }
 0x114   : > { %1903 = vxpose.xlu1.b32.end [2/2] (short) (narrow) %v4894_v3, 16  ;;  %1934 = vxpose.xlu0.b32.start [1/2] (short) (narrow) %v1491_v62, 16 }
 0x116   : > { %v4900_v48 = vpop.f32.mrb[6].mxu0 }
 0x117   : > { %v1501_v17 = vpop.f32.mrb[7].mxu0 }
 0x118   : > { %1935 = vxpose.xlu0.b32.end [2/2] (short) (narrow) %v4897_v61, 16  ;;  %1966 = vxpose.xlu1.b32.start [1/2] (short) (narrow) %v1501_v17, 16 }
 0x11a   : > { %v4903_v18 = vpop.f32.mrb[8].mxu0 }
 0x11b   : > { %v1511_v8 = vpop.f32.mrb[9].mxu0 }
 0x11c   : > { %1967 = vxpose.xlu1.b32.end [2/2] (short) (narrow) %v4900_v48, 16  ;;  %1998 = vxpose.xlu0.b32.start [1/2] (short) (narrow) %v1511_v8, 16 }
 0x11e   : > { %v4906_v55 = vpop.f32.mrb[10].mxu0 }
 0x11f   : > { %v1521_v43 = vpop.f32.mrb[11].mxu0 }
 0x120   : > { %1999 = vxpose.xlu0.b32.end [2/2] (short) (narrow) %v4903_v18, 16  ;;  %2030 = vxpose.xlu1.b32.start [1/2] (short) (narrow) %v1521_v43, 16 }
 0x122   : > { %v4909_v0 = vpop.f32.mrb[12].mxu0 }
 0x123   : > { %v1531_v29 = vpop.f32.mrb[13].mxu0 }
 0x124   : > { %2031 = vxpose.xlu1.b32.end [2/2] (short) (narrow) %v4906_v55, 16  ;;  %2062 = vxpose.xlu0.b32.start [1/2] (short) (narrow) %v1531_v29, 16 }
 0x126   : > { %v4912_v12 = vpop.f32.mrb[14].mxu0 }
 0x127   : > { %v1541_v7 = vpop.f32.mrb[15].mxu0 }
 0x128   : > { %2063 = vxpose.xlu0.b32.end [2/2] (short) (narrow) %v4909_v0, 16  ;;  %2094 = vxpose.xlu1.b32.start [1/2] (short) (narrow) %v1541_v7, 16 }
 0x12a   : > { %v4915_v52 = vpop.f32.mrb[16].mxu0 }
 0x12b   : > { %v1551_v37 = vpop.f32.mrb[17].mxu0 }
 0x12c   : > { %2095 = vxpose.xlu1.b32.end [2/2] (short) (narrow) %v4912_v12, 16  ;;  %2126 = vxpose.xlu0.b32.start [1/2] (short) (narrow) %v1551_v37, 16 }
 0x12e   : > { %v4918_v21 = vpop.f32.mrb[18].mxu0 }
 0x12f   : > { %v1561_v51 = vpop.f32.mrb[19].mxu0 }
 0x130   : > { %2127 = vxpose.xlu0.b32.end [2/2] (short) (narrow) %v4915_v52, 16  ;;  %2158 = vxpose.xlu1.b32.start [1/2] (short) (narrow) %v1561_v51, 16 }
 0x132   : > { %v4921_v9 = vpop.f32.mrb[20].mxu0 }
 0x133   : > { %v1571_v42 = vpop.f32.mrb[21].mxu0 }
 0x134   : > { %2159 = vxpose.xlu1.b32.end [2/2] (short) (narrow) %v4918_v21, 16  ;;  %2190 = vxpose.xlu0.b32.start [1/2] (short) (narrow) %v1571_v42, 16 }
 0x136   : > { %v4924_v44 = vpop.f32.mrb[22].mxu0 }
 0x137   : > { %v1581_v47 = vpop.f32.mrb[23].mxu0 }
 0x138   : > { %2191 = vxpose.xlu0.b32.end [2/2] (short) (narrow) %v4921_v9, 16  ;;  %2222 = vxpose.xlu1.b32.start [1/2] (short) (narrow) %v1581_v47, 16 }
 0x13a   : > { %v4927_v45 = vpop.f32.mrb[24].mxu0 }
 0x13b   : > { %v1591_v50 = vpop.f32.mrb[25].mxu0 }
 0x13c   : > { %2223 = vxpose.xlu1.b32.end [2/2] (short) (narrow) %v4924_v44, 16  ;;  %2254 = vxpose.xlu0.b32.start [1/2] (short) (narrow) %v1591_v50, 16 }
 0x13e   : > { %v4930_v46 = vpop.f32.mrb[26].mxu0 }
 0x13f   : > { %v1601_v40 = vpop.f32.mrb[27].mxu0 }
 0x140   : > { %2255 = vxpose.xlu0.b32.end [2/2] (short) (narrow) %v4927_v45, 16  ;;  %2286 = vxpose.xlu1.b32.start [1/2] (short) (narrow) %v1601_v40, 16 }
 0x142   : > { %v4933_v49 = vpop.f32.mrb[28].mxu0 }
 0x143   : > { %v1611_v31 = vpop.f32.mrb[29].mxu0 }
 0x144   : > { %2287 = vxpose.xlu1.b32.end [2/2] (short) (narrow) %v4930_v46, 16  ;;  %2318 = vxpose.xlu0.b32.start [1/2] (short) (narrow) %v1611_v31, 16 }
 0x146   : > { %v4936_v34 = vpop.f32.mrb[30].mxu0 }
 0x147   : > { %v1621_v58 = vpop.f32.mrb[31].mxu0 }
 0x148   : > { %2319 = vxpose.xlu0.b32.end [2/2] (short) (narrow) %v4933_v49, 16  ;;  %2350 = vxpose.xlu1.b32.start [1/2] (short) (narrow) %v1621_v58, 16 }
 0x14c   : > { %2351 = vxpose.xlu1.b32.end [2/2] (short) (narrow) %v4936_v34, 16 }
 0x14d   : > { %v4939_v53 = vpop.f32.mrb[32].mxu0 }
 0x14e   : > { %v1631_v57 = vpop.f32.mrb[33].mxu0 }
 0x14f   : > { %2382 = vxpose.xlu0.b32.start [1/2] (short) (narrow) %v1631_v57, 16 }
 0x151   : > { %v4942_v25 = vpop.f32.mrb[34].mxu0 }
 0x152   : > { %v1641_v41 = vpop.f32.mrb[35].mxu0 }
 0x153   : > { %2383 = vxpose.xlu0.b32.end [2/2] (short) (narrow) %v4939_v53, 16  ;;  %2414 = vxpose.xlu1.b32.start [1/2] (short) (narrow) %v1641_v41, 16 }
 0x155   : > { %v4945_v14 = vpop.f32.mrb[36].mxu0 }
 0x156   : > { %v1651_v30 = vpop.f32.mrb[37].mxu0 }
 0x157   : > { %2415 = vxpose.xlu1.b32.end [2/2] (short) (narrow) %v4942_v25, 16  ;;  %2446 = vxpose.xlu0.b32.start [1/2] (short) (narrow) %v1651_v30, 16 }
 0x159   : > { %v4948_v1 = vpop.f32.mrb[38].mxu0 }
 0x15a   : > { %v1661_v11 = vpop.f32.mrb[39].mxu0 }
 0x15b   : > { %2447 = vxpose.xlu0.b32.end [2/2] (short) (narrow) %v4945_v14, 16  ;;  %2478 = vxpose.xlu1.b32.start [1/2] (short) (narrow) %v1661_v11, 16 }
 0x15d   : > { %v4951_v15 = vpop.f32.mrb[40].mxu0 }
 0x15e   : > { %v1671_v26 = vpop.f32.mrb[41].mxu0 }
 0x15f   : > { %2479 = vxpose.xlu1.b32.end [2/2] (short) (narrow) %v4948_v1, 16  ;;  %2510 = vxpose.xlu0.b32.start [1/2] (short) (narrow) %v1671_v26, 16 }
 0x161   : > { %v4954_v10 = vpop.f32.mrb[42].mxu0 }
 0x162   : > { %v1681_v5 = vpop.f32.mrb[43].mxu0 }
 0x163   : > { %2511 = vxpose.xlu0.b32.end [2/2] (short) (narrow) %v4951_v15, 16  ;;  %2542 = vxpose.xlu1.b32.start [1/2] (short) (narrow) %v1681_v5, 16 }
 0x165   : > { %v4957_v28 = vpop.f32.mrb[44].mxu0 }
 0x166   : > { %v1691_v33 = vpop.f32.mrb[45].mxu0 }
 0x167   : > { %2543 = vxpose.xlu1.b32.end [2/2] (short) (narrow) %v4954_v10, 16  ;;  %2574 = vxpose.xlu0.b32.start [1/2] (short) (narrow) %v1691_v33, 16 }
 0x169   : > { %v4960_v6 = vpop.f32.mrb[46].mxu0 }
 0x16a   : > { %v1701_v32 = vpop.f32.mrb[47].mxu0 }
 0x16b   : > { %2575 = vxpose.xlu0.b32.end [2/2] (short) (narrow) %v4957_v28, 16  ;;  %2606 = vxpose.xlu1.b32.start [1/2] (short) (narrow) %v1701_v32, 16 }
 0x16f   : > { %2607 = vxpose.xlu1.b32.end [2/2] (short) (narrow) %v4960_v6, 16 }
 0x174   : > { %v4963_v60 = vpop.f32.mrb[48].mxu0 }
 0x175   : > { %v1711_v54 = vpop.f32.mrb[49].mxu0 }
 0x176   : > { %2638 = vxpose.xlu0.b32.start [1/2] (short) (narrow) %v1711_v54, 16 }
 0x178   : > { %v4966_v27 = vpop.f32.mrb[50].mxu0 }
 0x179   : > { %v1721_v39 = vpop.f32.mrb[51].mxu0 }
 0x17a   : > { %2639 = vxpose.xlu0.b32.end [2/2] (short) (narrow) %v4963_v60, 16  ;;  %2670 = vxpose.xlu1.b32.start [1/2] (short) (narrow) %v1721_v39, 16 }
 0x17c   : > { %v4969_v16 = vpop.f32.mrb[52].mxu0 }
 0x17d   : > { %v1731_v22 = vpop.f32.mrb[53].mxu0 }
 0x17e   : > { %2671 = vxpose.xlu1.b32.end [2/2] (short) (narrow) %v4966_v27, 16  ;;  %2702 = vxpose.xlu0.b32.start [1/2] (short) (narrow) %v1731_v22, 16 }
 0x180   : > { %v4972_v24 = vpop.f32.mrb[54].mxu0 }
 0x181   : > { %v1741_v38 = vpop.f32.mrb[55].mxu0 }
 0x182   : > { %2703 = vxpose.xlu0.b32.end [2/2] (short) (narrow) %v4969_v16, 16  ;;  %2734 = vxpose.xlu1.b32.start [1/2] (short) (narrow) %v1741_v38, 16 }
 0x185   : > { %v4975_v13 = vpop.f32.mrb[56].mxu0 }
 0x186   : > { %v1751_v2 = vpop.f32.mrb[57].mxu0  ;;  %2735 = vxpose.xlu1.b32.end [2/2] (short) (narrow) %v4972_v24, 16 }
 0x187   : > { %2766 = vxpose.xlu0.b32.start [1/2] (short) (narrow) %v1751_v2, 16 }
 0x189   : > { %v4978_v36 = vpop.f32.mrb[58].mxu0 }
 0x18a   : > { %v1761_v4 = vpop.f32.mrb[59].mxu0 }
 0x18b   : > { %2767 = vxpose.xlu0.b32.end [2/2] (short) (narrow) %v4975_v13, 16  ;;  %2798 = vxpose.xlu1.b32.start [1/2] (short) (narrow) %v1761_v4, 16 }
 0x18c   : > { %v1886_v19 = vpop.trf.xlu0 }
 0x18d   : > { %v4981_v59 = vpop.f32.mrb[60].mxu0  ;;  %5013 = vmatprep.mubr.msk.f32.mxu1 %vm1164_vm0, %v1886_v19 }
 0x18e   : > { %v1771_v35 = vpop.f32.mrb[61].mxu0 }
 0x18f   : > { %2799 = vxpose.xlu1.b32.end [2/2] (short) (narrow) %v4978_v36, 16  ;;  %2830 = vxpose.xlu0.b32.start [1/2] (short) (narrow) %v1771_v35, 16 }
 0x190   : > { %v1887_v56 = vpop.trf.xlu0  ;;  %v1918_v62 = vpop.trf.xlu1 }
 0x191   : > { %v4984_v3 = vpop.f32.mrb[62].mxu0  ;;  %5014 = vmatmul.mubr.msk.f32.vlgmr.msra.gmra.mrb[0].mxu1 %vm1164_vm0, %v1887_v56 }
 0x192   : > { %v1781_v61 = vpop.f32.mrb[63].mxu0  ;;  %5016 = vmatprep.mubr.msk.f32.mxu1 %vm1164_vm0, %v1918_v62 }
 0x193   : > { %2831 = vxpose.xlu0.b32.end [2/2] (short) (narrow) %v4981_v59, 16  ;;  %2862 = vxpose.xlu1.b32.start [1/2] (short) (narrow) %v1781_v61, 16 }
 0x194   : > { %v1950_v48 = vpop.trf.xlu0  ;;  %v1919_v17 = vpop.trf.xlu1 }
 0x195   : > { %5017 = vmatmul.mubr.msk.f32.gmra.mrb[2].mxu1 %vm1164_vm0, %v1919_v17 }
 0x196   : > { %5019 = vmatprep.mubr.msk.f32.mxu1 %vm1164_vm0, %v1950_v48 }
 0x197   : > { %2863 = vxpose.xlu1.b32.end [2/2] (short) (narrow) %v4984_v3, 16 }
 0x198   : > { %v1951_v18 = vpop.trf.xlu0  ;;  %v1982_v8 = vpop.trf.xlu1 }
 0x199   : > { %5020 = vmatmul.mubr.msk.f32.gmra.mrb[4].mxu1 %vm1164_vm0, %v1951_v18 }
 0x19a   : > { %5022 = vmatprep.mubr.msk.f32.mxu1 %vm1164_vm0, %v1982_v8 }
 0x19c   : > { %v4987_v20 = vpop.f32.mrb[64].mxu0  ;;  %v2014_v63 = vpop.trf.xlu0 }
 0x19d   : > { %v1791_v23 = vpop.f32.mrb[65].mxu0  ;;  %v1983_v55 = vpop.trf.xlu1 }
 0x19e   : > { %2894 = vxpose.xlu0.b32.start [1/2] (short) (narrow) %v1791_v23, 16  ;;  %5023 = vmatmul.mubr.msk.f32.gmra.mrb[6].mxu1 %vm1164_vm0, %v1983_v55 }
 0x19f   : > { %5025 = vmatprep.mubr.msk.f32.mxu1 %vm1164_vm0, %v2014_v63 }
 0x1a0   : > { %v4990_v43 = vpop.f32.mrb[66].mxu0  ;;  %v2015_v29 = vpop.trf.xlu0 }
 0x1a1   : > { %v1801_v0 = vpop.f32.mrb[67].mxu0  ;;  %v2046_v12 = vpop.trf.xlu1 }
 0x1a2   : > { %2895 = vxpose.xlu0.b32.end [2/2] (short) (narrow) %v4987_v20, 16  ;;  %2926 = vxpose.xlu1.b32.start [1/2] (short) (narrow) %v1801_v0, 16 }
 0x1a3   : > { %5026 = vmatmul.mubr.msk.f32.gmra.mrb[8].mxu1 %vm1164_vm0, %v2015_v29 }
 0x1a4   : > { %v4993_v7 = vpop.f32.mrb[68].mxu0  ;;  %5028 = vmatprep.mubr.msk.f32.mxu1 %vm1164_vm0, %v2046_v12  ;;  %v2078_v37 = vpop.trf.xlu0 }
 0x1a5   : > { %v1811_v52 = vpop.f32.mrb[69].mxu0  ;;  %v2047_v21 = vpop.trf.xlu1 }
 0x1a6   : > { %2927 = vxpose.xlu1.b32.end [2/2] (short) (narrow) %v4990_v43, 16  ;;  %2958 = vxpose.xlu0.b32.start [1/2] (short) (narrow) %v1811_v52, 16 }
 0x1a7   : > { %5029 = vmatmul.mubr.msk.f32.gmra.mrb[10].mxu1 %vm1164_vm0, %v2047_v21 }
 0x1a8   : > { %v4996_v51 = vpop.f32.mrb[70].mxu0  ;;  %5031 = vmatprep.mubr.msk.f32.mxu1 %vm1164_vm0, %v2078_v37  ;;  %v2079_v42 = vpop.trf.xlu0 }
 0x1a9   : > { %v1821_v9 = vpop.f32.mrb[71].mxu0  ;;  %v2110_v44 = vpop.trf.xlu1 }
 0x1aa   : > { %2959 = vxpose.xlu0.b32.end [2/2] (short) (narrow) %v4993_v7, 16  ;;  %2990 = vxpose.xlu1.b32.start [1/2] (short) (narrow) %v1821_v9, 16 }
 0x1ab   : > { %5032 = vmatmul.mubr.msk.f32.gmra.mrb[12].mxu1 %vm1164_vm0, %v2079_v42 }
 0x1ac   : > { %5034 = vmatprep.mubr.msk.f32.mxu1 %vm1164_vm0, %v2110_v44  ;;  %v2142_v45 = vpop.trf.xlu0 }
 0x1ad   : > { %v4999_v47 = vpop.f32.mrb[72].mxu0  ;;  %v2111_v46 = vpop.trf.xlu1 }
 0x1ae   : > { %v1831_v50 = vpop.f32.mrb[73].mxu0  ;;  %2991 = vxpose.xlu1.b32.end [2/2] (short) (narrow) %v4996_v51, 16 }
 0x1af   : > { %3022 = vxpose.xlu0.b32.start [1/2] (short) (narrow) %v1831_v50, 16  ;;  %5035 = vmatmul.mubr.msk.f32.gmra.mrb[14].mxu1 %vm1164_vm0, %v2111_v46 }
 0x1b0   : > { %5037 = vmatprep.mubr.msk.f32.mxu1 %vm1164_vm0, %v2142_v45  ;;  %v2143_v49 = vpop.trf.xlu0 }
 0x1b1   : > { %v5002_v40 = vpop.f32.mrb[74].mxu0  ;;  %v2174_v34 = vpop.trf.xlu1 }
 0x1b2   : > { %v1841_v31 = vpop.f32.mrb[75].mxu0 }
 0x1b3   : > { %3023 = vxpose.xlu0.b32.end [2/2] (short) (narrow) %v4999_v47, 16  ;;  %3054 = vxpose.xlu1.b32.start [1/2] (short) (narrow) %v1841_v31, 16 }
 0x1b4   : > { %5038 = vmatmul.mubr.msk.f32.gmra.mrb[16].mxu1 %vm1164_vm0, %v2143_v49  ;;  %v2206_v53 = vpop.trf.xlu0 }
 0x1b5   : > { %v5005_v58 = vpop.f32.mrb[76].mxu0  ;;  %5040 = vmatprep.mubr.msk.f32.mxu1 %vm1164_vm0, %v2174_v34  ;;  %v2175_v25 = vpop.trf.xlu1 }
 0x1b6   : > { %v1851_v57 = vpop.f32.mrb[77].mxu0 }
 0x1b7   : > { %3055 = vxpose.xlu1.b32.end [2/2] (short) (narrow) %v5002_v40, 16  ;;  %3086 = vxpose.xlu0.b32.start [1/2] (short) (narrow) %v1851_v57, 16 }
 0x1b8   : > { %5041 = vmatmul.mubr.msk.f32.gmra.mrb[18].mxu1 %vm1164_vm0, %v2175_v25  ;;  %v2207_v14 = vpop.trf.xlu0 }
 0x1b9   : > { %v5008_v41 = vpop.f32.mrb[78].mxu0  ;;  %5043 = vmatprep.mubr.msk.f32.mxu1 %vm1164_vm0, %v2206_v53  ;;  %v2238_v1 = vpop.trf.xlu1 }
 0x1ba   : > { %v1861_v30 = vpop.f32.mrb[79].mxu0 }
 0x1bb   : > { %3087 = vxpose.xlu0.b32.end [2/2] (short) (narrow) %v5005_v58, 16  ;;  %3118 = vxpose.xlu1.b32.start [1/2] (short) (narrow) %v1861_v30, 16 }
 0x1bc   : > { %5044 = vmatmul.mubr.msk.f32.gmra.mrb[20].mxu1 %vm1164_vm0, %v2207_v14  ;;  %v2270_v11 = vpop.trf.xlu0 }
 0x1bd   : > { %5046 = vmatprep.mubr.msk.f32.mxu1 %vm1164_vm0, %v2238_v1  ;;  %v2239_v15 = vpop.trf.xlu1 }
 0x1bf   : > { %3119 = vxpose.xlu1.b32.end [2/2] (short) (narrow) %v5008_v41, 16 }
 0x1c0   : > { %5047 = vmatmul.mubr.msk.f32.gmra.mrb[22].mxu1 %vm1164_vm0, %v2239_v15  ;;  %v2271_v26 = vpop.trf.xlu0 }
 0x1c1   : > { %5049 = vmatprep.mubr.msk.f32.mxu1 %vm1164_vm0, %v2270_v11  ;;  %v2302_v10 = vpop.trf.xlu1 }
 0x1c4   : > { %5050 = vmatmul.mubr.msk.f32.gmra.mrb[24].mxu1 %vm1164_vm0, %v2271_v26  ;;  %v2334_v5 = vpop.trf.xlu0 }
 0x1c5   : > { %5052 = vmatprep.mubr.msk.f32.mxu1 %vm1164_vm0, %v2302_v10  ;;  %v2303_v28 = vpop.trf.xlu1 }
 0x1c8   : > { %5053 = vmatmul.mubr.msk.f32.gmra.mrb[26].mxu1 %vm1164_vm0, %v2303_v28  ;;  %v2335_v33 = vpop.trf.xlu0 }
 0x1c9   : > { %5055 = vmatprep.mubr.msk.f32.mxu1 %vm1164_vm0, %v2334_v5  ;;  %v2366_v6 = vpop.trf.xlu1 }
 0x1cc   : > { %5056 = vmatmul.mubr.msk.f32.gmra.mrb[28].mxu1 %vm1164_vm0, %v2335_v33 }
 0x1cd   : > { %5058 = vmatprep.mubr.msk.f32.mxu1 %vm1164_vm0, %v2366_v6  ;;  %v2367_v32 = vpop.trf.xlu1 }
 0x1cf   : > { %v2398_v60 = vpop.trf.xlu0 }
 0x1d0   : > { %5059 = vmatmul.mubr.msk.f32.gmra.mrb[30].mxu1 %vm1164_vm0, %v2367_v32 }
 0x1d1   : > { %5061 = vmatprep.mubr.msk.f32.mxu1 %vm1164_vm0, %v2398_v60 }
 0x1d3   : > { %v2399_v54 = vpop.trf.xlu0  ;;  %v2430_v27 = vpop.trf.xlu1 }
 0x1d4   : > { %5062 = vmatmul.mubr.msk.f32.gmra.mrb[32].mxu1 %vm1164_vm0, %v2399_v54 }
 0x1d5   : > { %5064 = vmatprep.mubr.msk.f32.mxu1 %vm1164_vm0, %v2430_v27 }
 0x1d7   : > { %v2431_v39 = vpop.trf.xlu1  ;;  %v2462_v16 = vpop.trf.xlu0 }
 0x1d8   : > { %5065 = vmatmul.mubr.msk.f32.gmra.mrb[34].mxu1 %vm1164_vm0, %v2431_v39 }
 0x1d9   : > { %5067 = vmatprep.mubr.msk.f32.mxu1 %vm1164_vm0, %v2462_v16 }
 0x1db   : > { %v2463_v22 = vpop.trf.xlu0  ;;  %v2494_v24 = vpop.trf.xlu1 }
 0x1dc   : > { %5068 = vmatmul.mubr.msk.f32.gmra.mrb[36].mxu1 %vm1164_vm0, %v2463_v22 }
 0x1dd   : > { %5070 = vmatprep.mubr.msk.f32.mxu1 %vm1164_vm0, %v2494_v24 }
 0x1df   : > { %v2495_v38 = vpop.trf.xlu1  ;;  %v2526_v13 = vpop.trf.xlu0 }
 0x1e0   : > { %5071 = vmatmul.mubr.msk.f32.gmra.mrb[38].mxu1 %vm1164_vm0, %v2495_v38 }
 0x1e1   : > { %5073 = vmatprep.mubr.msk.f32.mxu1 %vm1164_vm0, %v2526_v13 }
 0x1e3   : > { %v2527_v2 = vpop.trf.xlu0  ;;  %v2558_v36 = vpop.trf.xlu1 }
 0x1e4   : > { %5074 = vmatmul.mubr.msk.f32.gmra.mrb[40].mxu1 %vm1164_vm0, %v2527_v2 }
 0x1e5   : > { %5076 = vmatprep.mubr.msk.f32.mxu1 %vm1164_vm0, %v2558_v36 }
 0x1e7   : > { %v2559_v4 = vpop.trf.xlu1  ;;  %v2590_v59 = vpop.trf.xlu0 }
 0x1e8   : > { %5077 = vmatmul.mubr.msk.f32.gmra.mrb[42].mxu1 %vm1164_vm0, %v2559_v4 }
 0x1e9   : > { %5079 = vmatprep.mubr.msk.f32.mxu1 %vm1164_vm0, %v2590_v59 }
 0x1eb   : > { %v2591_v19 = vpop.trf.xlu0  ;;  %v2622_v35 = vpop.trf.xlu1 }
 0x1ec   : > { %5080 = vmatmul.mubr.msk.f32.gmra.mrb[44].mxu1 %vm1164_vm0, %v2591_v19 }
 0x1ed   : > { %5082 = vmatprep.mubr.msk.f32.mxu1 %vm1164_vm0, %v2622_v35 }
 0x1ef   : > { %v2623_v3 = vpop.trf.xlu1 }
 0x1f0   : > { %5083 = vmatmul.mubr.msk.f32.gmra.mrb[46].mxu1 %vm1164_vm0, %v2623_v3 }
 0x1f6   : > { %v2654_v56 = vpop.trf.xlu0 }
 0x1f7   : > { %5085 = vmatprep.mubr.msk.f32.mxu1 %vm1164_vm0, %v2654_v56 }
 0x1fa   : > { %v2655_v61 = vpop.trf.xlu0  ;;  %v2686_v62 = vpop.trf.xlu1 }
 0x1fb   : > { %5086 = vmatmul.mubr.msk.f32.gmra.mrb[48].mxu1 %vm1164_vm0, %v2655_v61 }
 0x1fc   : > { %5088 = vmatprep.mubr.msk.f32.mxu1 %vm1164_vm0, %v2686_v62 }
 0x1fe   : > { %v2687_v48 = vpop.trf.xlu1  ;;  %v2718_v17 = vpop.trf.xlu0 }
 0x1ff   : > { %5089 = vmatmul.mubr.msk.f32.gmra.mrb[50].mxu1 %vm1164_vm0, %v2687_v48 }
 0x200   : > { %5091 = vmatprep.mubr.msk.f32.mxu1 %vm1164_vm0, %v2718_v17 }
 0x202   : > { %v2719_v18 = vpop.trf.xlu0  ;;  %v2750_v8 = vpop.trf.xlu1 }
 0x203   : > { %5092 = vmatmul.mubr.msk.f32.gmra.mrb[52].mxu1 %vm1164_vm0, %v2719_v18 }
 0x204   : > { %5094 = vmatprep.mubr.msk.f32.mxu1 %vm1164_vm0, %v2750_v8 }
 0x206   : > { %v2751_v20 = vpop.trf.xlu1 }
 0x207   : > { %v2782_v23 = vpop.trf.xlu0  ;;  %5095 = vmatmul.mubr.msk.f32.gmra.mrb[54].mxu1 %vm1164_vm0, %v2751_v20 }
 0x208   : > { %5097 = vmatprep.mubr.msk.f32.mxu1 %vm1164_vm0, %v2782_v23 }
 0x20b   : > { %v2783_v63 = vpop.trf.xlu0  ;;  %v2814_v55 = vpop.trf.xlu1 }
 0x20c   : > { %5098 = vmatmul.mubr.msk.f32.gmra.mrb[56].mxu1 %vm1164_vm0, %v2783_v63 }
 0x20d   : > { %5100 = vmatprep.mubr.msk.f32.mxu1 %vm1164_vm0, %v2814_v55 }
 0x20f   : > { %v2815_v43 = vpop.trf.xlu1  ;;  %v2846_v0 = vpop.trf.xlu0 }
 0x210   : > { %5101 = vmatmul.mubr.msk.f32.gmra.mrb[58].mxu1 %vm1164_vm0, %v2815_v43 }
 0x211   : > { %5103 = vmatprep.mubr.msk.f32.mxu1 %vm1164_vm0, %v2846_v0 }
 0x213   : > { %v2847_v29 = vpop.trf.xlu0  ;;  %v2878_v12 = vpop.trf.xlu1 }
 0x214   : > { %5104 = vmatmul.mubr.msk.f32.gmra.mrb[60].mxu1 %vm1164_vm0, %v2847_v29 }
 0x215   : > { %5106 = vmatprep.mubr.msk.f32.mxu1 %vm1164_vm0, %v2878_v12 }
 0x217   : > { %v2879_v7 = vpop.trf.xlu1 }
 0x218   : > { %5107 = vmatmul.mubr.msk.f32.gmra.mrb[62].mxu1 %vm1164_vm0, %v2879_v7 }
 0x21e   : > { %v2910_v52 = vpop.trf.xlu0 }
 0x21f   : > { %5109 = vmatprep.mubr.msk.f32.mxu1 %vm1164_vm0, %v2910_v52 }
 0x222   : > { %v2911_v37 = vpop.trf.xlu0  ;;  %v2942_v21 = vpop.trf.xlu1 }
 0x223   : > { %5110 = vmatmul.mubr.msk.f32.gmra.mrb[64].mxu1 %vm1164_vm0, %v2911_v37 }
 0x224   : > { %5112 = vmatprep.mubr.msk.f32.mxu1 %vm1164_vm0, %v2942_v21 }
 0x226   : > { %v2943_v51 = vpop.trf.xlu1  ;;  %v2974_v9 = vpop.trf.xlu0 }
 0x227   : > { %5113 = vmatmul.mubr.msk.f32.gmra.mrb[66].mxu1 %vm1164_vm0, %v2943_v51 }
 0x228   : > { %5115 = vmatprep.mubr.msk.f32.mxu1 %vm1164_vm0, %v2974_v9 }
 0x22a   : > { %v2975_v42 = vpop.trf.xlu0  ;;  %v3006_v44 = vpop.trf.xlu1 }
 0x22b   : > { %5116 = vmatmul.mubr.msk.f32.gmra.mrb[68].mxu1 %vm1164_vm0, %v2975_v42 }
 0x22c   : > { %5118 = vmatprep.mubr.msk.f32.mxu1 %vm1164_vm0, %v3006_v44 }
 0x22e   : > { %v3007_v47 = vpop.trf.xlu1 }
 0x22f   : > { %v3038_v45 = vpop.trf.xlu0  ;;  %5119 = vmatmul.mubr.msk.f32.gmra.mrb[70].mxu1 %vm1164_vm0, %v3007_v47 }
 0x230   : > { %5121 = vmatprep.mubr.msk.f32.mxu1 %vm1164_vm0, %v3038_v45 }
 0x233   : > { %v3039_v50 = vpop.trf.xlu0  ;;  %v3070_v46 = vpop.trf.xlu1 }
 0x234   : > { %5122 = vmatmul.mubr.msk.f32.gmra.mrb[72].mxu1 %vm1164_vm0, %v3039_v50 }
 0x235   : > { %5124 = vmatprep.mubr.msk.f32.mxu1 %vm1164_vm0, %v3070_v46 }
 0x237   : > { %v3071_v40 = vpop.trf.xlu1  ;;  %v3102_v49 = vpop.trf.xlu0 }
 0x238   : > { %5125 = vmatmul.mubr.msk.f32.gmra.mrb[74].mxu1 %vm1164_vm0, %v3071_v40 }
 0x239   : > { %5127 = vmatprep.mubr.msk.f32.mxu1 %vm1164_vm0, %v3102_v49 }
 0x23b   : > { %v3103_v31 = vpop.trf.xlu0  ;;  %v3134_v34 = vpop.trf.xlu1 }
 0x23c   : > { %5128 = vmatmul.mubr.msk.f32.gmra.mrb[76].mxu1 %vm1164_vm0, %v3103_v31 }
 0x23d   : > { %5130 = vmatprep.mubr.msk.f32.mxu1 %vm1164_vm0, %v3134_v34 }
 0x23f   : > { %v3135_v58 = vpop.trf.xlu1 }
 0x240   : > { %5131 = vmatmul.mubr.msk.f32.gmra.mrb[78].mxu1 %vm1164_vm0, %v3135_v58 }
 0x264   : > { %v5015_v53 = vpop.f32.mrb[0].mxu1 }
 0x265   : > { %v6767_v57 = vpop.f32.mrb[1].mxu1  ;;  %v3858_v60 = vmul.f32 0.0013717421, %v5015_v53 }
 0x266   : > { %v3857_v54 = vmul.f32 0.0013717421, %v6767_v57 }
 0x267   : > { %v4002_v29 = vmul.f32 2.0, %v3858_v60  ;;  %v4050_v7 = vmul.f32 %v3858_v60, %v3858_v60 }
 0x268   : > { %v6769_v25 = vpop.f32.mrb[2].mxu1  ;;  %v4001_v52 = vmul.f32 2.0, %v3857_v54  ;;  %v4049_v50 = vmul.f32 %v3857_v54, %v3857_v54 }
 0x269   : > { %v6771_v41 = vpop.f32.mrb[3].mxu1  ;;  %v3860_v13 = vmul.f32 0.0013717421, %v6769_v25  ;;  %v6896_v49 = vmul.f32 %v5015_v53, %v4002_v29 }
 0x26a   : > { %v3859_v4 = vmul.f32 0.0013717421, %v6771_v41 }
 0x26b   : > { %v4004_v46 = vmul.f32 2.0, %v3860_v13  ;;  %v4052_v31 = vmul.f32 %v3860_v13, %v3860_v13 }
 0x26c   : > { %v6773_v14 = vpop.f32.mrb[4].mxu1  ;;  %v4003_v34 = vmul.f32 2.0, %v3859_v4 }
 0x26d   : > { %v6775_v30 = vpop.f32.mrb[5].mxu1  ;;  %v3862_v48 = vmul.f32 0.0013717421, %v6773_v14 }
 0x26e   : > { %v3861_v18 = vmul.f32 0.0013717421, %v6775_v30 }
 0x271   : > { %v6777_v1 = vpop.f32.mrb[6].mxu1 }
 0x272   : > { %v6779_v11 = vpop.f32.mrb[7].mxu1  ;;  %v3864_v12 = vmul.f32 0.0013717421, %v6777_v1 }
 0x273   : > { %v6873_v21 = vmul.f32 0.0013717421, %v6779_v11 }
 0x276   : > { %v6781_v15 = vpop.f32.mrb[8].mxu1 }
 0x277   : > { %v6783_v26 = vpop.f32.mrb[9].mxu1  ;;  %v3866_v58 = vmul.f32 0.0013717421, %v6781_v15 }
 0x27a   : > { %v6785_v10 = vpop.f32.mrb[10].mxu1 }
 0x27b   : > { %v6787_v5 = vpop.f32.mrb[11].mxu1 }
 0x27e   : > { %v6789_v28 = vpop.f32.mrb[12].mxu1 }
 0x27f   : > { %v6791_v33 = vpop.f32.mrb[13].mxu1 }
 0x282   : > { %v6793_v6 = vpop.f32.mrb[14].mxu1 }
 0x283   : > { %v6795_v32 = vpop.f32.mrb[15].mxu1 }
 0x287   : > { %v6798_v27 = vpop.f32.mrb[16].mxu1 }
 0x288   : > { %v6801_v39 = vmul.f32 0.0013717421, %v6798_v27  ;;  %v6804_v16 = vmul.f32 %v6798_v27, %v3858_v60  ;;  %v6806_v22 = vpop.f32.mrb[17].mxu1 }
 0x289   : > { %v6809_v24 = vmul.f32 0.0013717421, %v6806_v22  ;;  %v6812_v38 = vmul.f32 %v3857_v54, %v6806_v22 }
 0x28a   : > { %7579 = vst [vmem:[#allocation9_spill] sm:$0xff] %v6804_v16  ;;  %v6816_v2 = vmul.f32 %v5015_v53, %v6801_v39  ;;  %v6819_v36 = vmul.f32 %v6801_v39, %v3858_v60  ;;  %v6899_v60 = vmul.f32 729.0, %v4050_v7  ;;  %v4008_v16 = vmul.f32 2.0, %v3864_v12 }
 0x28b   : > { %7580 = vst [vmem:[#allocation14_spill] sm:$0xff] %v6812_v38  ;;  %v6822_v59 = vpop.f32.mrb[18].mxu1  ;;  %v6826_v19 = vmul.f32 %v6809_v24, %v6767_v57  ;;  %v6829_v35 = vmul.f32 %v6809_v24, %v3857_v54  ;;  %v6908_v54 = vmul.f32 0.0013717421, %v6783_v26 }
 0x28c   : > { %7581 = vst [vmem:[#allocation2_spill] sm:$0xff] %v6816_v2  ;;  %7582 = vst [vmem:[#allocation5_spill] sm:$0xff] %v6819_v36  ;;  %v6832_v3 = vmul.f32 0.0013717421, %v6822_v59  ;;  %v6835_v56 = vmul.f32 %v6822_v59, %v3860_v13  ;;  %v6837_v61 = vpop.f32.mrb[19].mxu1  ;;  %v7016_v2 = vmul.f32 %v6777_v1, %v4008_v16 }
 0x28d   : > { %7583 = vst [vmem:[#allocation7_spill] sm:$0xff] %v6826_v19  ;;  %7584 = vst [vmem:[#allocation10_spill] sm:$0xff] %v6829_v35  ;;  %v6840_v62 = vmul.f32 %v3859_v4, %v6837_v61  ;;  %v6844_v17 = vmul.f32 0.0013717421, %v6837_v61  ;;  %v4056_v19 = vmul.f32 %v3864_v12, %v3864_v12 }
 0x28e   : > { %7585 = vst [vmem:[#allocation3_spill] sm:$0xff] %v6835_v56  ;;  %v6851_v20 = vmul.f32 %v6769_v25, %v6832_v3  ;;  %v6854_v23 = vmul.f32 %v6832_v3, %v3860_v13  ;;  %v6936_v56 = vmul.f32 729.0, %v4052_v31 }
 0x28f   : > { %7586 = vst [vmem:[#allocation4_spill] sm:$0xff] %v6840_v62  ;;  %v6847_v8 = vpop.f32.mrb[20].mxu1  ;;  %v6870_v37 = vmul.f32 %v6844_v17, %v6771_v41  ;;  %v6881_v42 = vmul.f32 %v6844_v17, %v3859_v4 }
 0x290   : > { %7587 = vst [vmem:[#allocation6_spill] sm:$0xff] %v6847_v8  ;;  %7588 = vst [vmem:[#allocation8_spill] sm:$0xff] %v6851_v20  ;;  %v6857_v63 = vmul.f32 0.0013717421, %v6847_v8  ;;  %v6860_v55 = vmul.f32 %v6847_v8, %v3862_v48  ;;  %v6862_v43 = vpop.f32.mrb[21].mxu1  ;;  %v4054_v20 = vmul.f32 %v3862_v48, %v3862_v48 }
 0x291   : > { %7589 = vst [vmem:[#allocation11_spill] sm:$0xff] %v6854_v23  ;;  %7591 = vst [vmem:[#allocation13_spill] sm:$0xff] %v6862_v43  ;;  %v6865_v0 = vmul.f32 %v3861_v18, %v6862_v43  ;;  %v6876_v51 = vmul.f32 0.0013717421, %v6862_v43 }
 0x292   : > { %7590 = vst [vmem:[#allocation12_spill] sm:$0xff] %v6860_v55  ;;  %7593 = vst [vmem:[#allocation16_spill] sm:$0xff] %v6870_v37  ;;  %v6885_v44 = vmul.f32 %v6773_v14, %v6857_v63  ;;  %v4006_v37 = vmul.f32 2.0, %v3862_v48 }
 0x293   : > { %7592 = vst [vmem:[#allocation15_spill] sm:$0xff] %v6865_v0  ;;  %7594 = vst [vmem:[#allocation17_spill] sm:$0xff] %v6876_v51  ;;  %v6878_v9 = vpop.f32.mrb[22].mxu1  ;;  %v6902_v0 = vmul.f32 %v4001_v52, %v6767_v57  ;;  %v6917_v13 = vmul.f32 %v6876_v51, %v6775_v30  ;;  %v6920_v29 = vmul.f32 %v6876_v51, %v3861_v18  ;;  %v6927_v52 = vmul.f32 729.0, %v4049_v50  ;;  %v5272_v51 = vld [vmem:[%s5408_s19 + $0x60] sm:$0xff] }
 0x294   : > { %7595 = vst [vmem:[#allocation18_spill] sm:$0xff] %v6878_v9  ;;  %7596 = vst [vmem:[#allocation19_spill] sm:$0xff] %v6881_v42  ;;  %v6888_v47 = vmul.f32 %v6878_v9, %v3864_v12  ;;  %v6890_v45 = vpop.f32.mrb[23].mxu1  ;;  %v6911_v55 = vmul.f32 0.0013717421, %v6878_v9 }
 0x295   : > { %7597 = vst [vmem:[#allocation20_spill] sm:$0xff] %v6885_v44  ;;  %7599 = vst [vmem:[#allocation22_spill] sm:$0xff] %v6890_v45  ;;  %v6894_v40 = vmul.f32 %v6873_v21, %v6890_v45  ;;  %v4051_v44 = vmul.f32 %v3859_v4, %v3859_v4  ;;  %v6945_v50 = vmul.f32 0.0013717421, %v6890_v45  ;;  %v6948_v4 = vmul.f32 0.0013717421, %v6787_v5 }
 0x296   : > { %7598 = vst [vmem:[#allocation21_spill] sm:$0xff] %v6888_v47  ;;  %v6905_v47 = vmul.f32 %v6857_v63, %v3862_v48  ;;  %7602 = vst [vmem:[#allocation25_spill] sm:$0xff] %v6911_v55  ;;  %v6979_v42 = vmul.f32 0.0013717421, %v6789_v28 }
 0x297   : > { %7600 = vst [vmem:[#allocation23_spill] sm:$0xff] %v6894_v40  ;;  %v6913_v53 = vpop.f32.mrb[24].mxu1  ;;  %7604 = vst [vmem:[#allocation27_spill] sm:$0xff] %v6917_v13  ;;  %v6930_v40 = vmul.f32 %v6769_v25, %v4004_v46  ;;  %v6939_v13 = vmul.f32 %v4003_v34, %v6771_v41  ;;  %v4005_v25 = vmul.f32 2.0, %v3861_v18  ;;  %v6957_v41 = vmul.f32 %v6777_v1, %v6911_v55 }
 0x298   : > { %7601 = vst [vmem:[#allocation24_spill] sm:$0xff] %v6905_v47  ;;  %7603 = vst [vmem:[#allocation26_spill] sm:$0xff] %v6913_v53  ;;  %v6923_v57 = vmul.f32 %v6913_v53, %v3866_v58  ;;  %v6925_v7 = vpop.f32.mrb[25].mxu1  ;;  %v6951_v46 = vmul.f32 0.0013717421, %v6913_v53  ;;  %v6960_v34 = vmul.f32 %v6911_v55, %v3864_v12  ;;  %v6968_v38 = vmul.f32 729.0, %v4051_v44 }
 0x299   : > { %7605 = vst [vmem:[#allocation28_spill] sm:$0xff] %v6920_v29  ;;  %7607 = vst [vmem:[#allocation30_spill] sm:$0xff] %v6925_v7  ;;  %v6934_v62 = vmul.f32 %v6908_v54, %v6925_v7  ;;  %v4053_v29 = vmul.f32 %v3861_v18, %v3861_v18  ;;  %v6984_v44 = vmul.f32 %v4005_v25, %v6775_v30  ;;  %v5268_v53 = vld [vmem:[%s5408_s19 + $0x40] sm:$0xff] }
 0x29a   : > { %7606 = vst [vmem:[#allocation29_spill] sm:$0xff] %v6923_v57  ;;  %v6942_v57 = vmul.f32 0.0013717421, %v6785_v10  ;;  %7609 = vst [vmem:[#allocation32_spill] sm:$0xff] %v6945_v50  ;;  %v6988_v18 = vmul.f32 %v6945_v50, %v6779_v11  ;;  %v7004_v30 = vmul.f32 %v6781_v15, %v6951_v46  ;;  %v4058_v1 = vmul.f32 %v3866_v58, %v3866_v58 }
 0x29b   : > { %7608 = vst [vmem:[#allocation31_spill] sm:$0xff] %v6934_v62  ;;  %7610 = vst [vmem:[#allocation33_spill] sm:$0xff] %v6951_v46  ;;  %v6953_v31 = vpop.f32.mrb[26].mxu1  ;;  %v7013_v23 = vmul.f32 729.0, %v4053_v29  ;;  %v7031_v29 = vmul.f32 0.0013717421, %v6793_v6  ;;  %v7034_v16 = vmul.f32 %v6951_v46, %v3866_v58 }
 0x29c   : > { %7611 = vst [vmem:[#allocation34_spill] sm:$0xff] %v6953_v31  ;;  %7612 = vst [vmem:[#allocation35_spill] sm:$0xff] %v6957_v41  ;;  %v6964_v62 = vmul.f32 %v6953_v31, %v6942_v57  ;;  %v6966_v48 = vpop.f32.mrb[27].mxu1  ;;  %v6975_v41 = vmul.f32 %v6773_v14, %v4006_v37  ;;  %v6994_v14 = vmul.f32 0.0013717421, %v6925_v7  ;;  %v4317_v37 = vld [vmem:[%s5418_s14] sm:$0xff] }
 0x29d   : > { %7613 = vst [vmem:[#allocation36_spill] sm:$0xff] %v6960_v34  ;;  %7615 = vst [vmem:[#allocation38_spill] sm:$0xff] %v6966_v48  ;;  %v6972_v47 = vmul.f32 %v6948_v4, %v6966_v48  ;;  %v4007_v34 = vmul.f32 2.0, %v6873_v21  ;;  %v4318_v7 = vld [vmem:[%s5418_s14 + $0x8] sm:$0xff]  ;;  %v4333_v45 = vsub.f32 %v5268_v53, %v4317_v37  ;;  %v7055_v53 = vmul.f32 0.0013717421, %v6966_v48 }
 0x29e   : > { %7614 = vst [vmem:[#allocation37_spill] sm:$0xff] %v6964_v62  ;;  %v6981_v62 = vmul.f32 729.0, %v4054_v20  ;;  %7617 = vst [vmem:[#allocation40_spill] sm:$0xff] %v6988_v18  ;;  %v7000_v20 = vmul.f32 %v6945_v50, %v6873_v21  ;;  %v5269_v46 = vld [vmem:[%s5408_s19 + $0x48] sm:$0xff]  ;;  %v7073_v48 = vmul.f32 %v6908_v54, %v6908_v54  ;;  %v5270_v50 = vld [vmem:[%s5408_s19 + $0x50] sm:$0xff] }
 0x29f   : > { %7616 = vst [vmem:[#allocation39_spill] sm:$0xff] %v6972_v47  ;;  %v6991_v47 = vmul.f32 0.0013717421, %v6791_v33  ;;  %7618 = vst [vmem:[#allocation41_spill] sm:$0xff] %v6994_v14  ;;  %v6996_v12 = vpop.f32.mrb[28].mxu1  ;;  %v7027_v36 = vmul.f32 %v4007_v34, %v6779_v11  ;;  %v4334_v9 = vsub.f32 %v5269_v46, %v4318_v7  ;;  %v7083_v7 = vmul.f32 729.0, %v4058_v1 }
 0x2a0   : > { %7619 = vst [vmem:[#allocation42_spill] sm:$0xff] %v6996_v12  ;;  %7620 = vst [vmem:[#allocation43_spill] sm:$0xff] %v7000_v20  ;;  %v7009_v25 = vmul.f32 %v6996_v12, %v6979_v42  ;;  %v7011_v18 = vpop.f32.mrb[29].mxu1  ;;  %v4055_v20 = vmul.f32 %v6873_v21, %v6873_v21  ;;  %v4319_v21 = vld [vmem:[%s5418_s14 + $0x10] sm:$0xff]  ;;  %v7042_v11 = vmul.f32 0.0013717421, %v6953_v31 }
 0x2a1   : > { %7621 = vst [vmem:[#allocation44_spill] sm:$0xff] %v7004_v30  ;;  %7623 = vst [vmem:[#allocation46_spill] sm:$0xff] %v7011_v18  ;;  %v7022_v35 = vmul.f32 %v6991_v47, %v7011_v18  ;;  %v7024_v30 = vmul.f32 729.0, %v4056_v19  ;;  %v7039_v19 = vmul.f32 0.0013717421, %v6795_v32  ;;  %v4321_v46 = vld [vmem:[%s5418_s14 + $0x20] sm:$0xff] }
 0x2a2   : > { %7622 = vst [vmem:[#allocation45_spill] sm:$0xff] %v7009_v25  ;;  %v4010_v25 = vmul.f32 2.0, %v3866_v58  ;;  %7625 = vst [vmem:[#allocation48_spill] sm:$0xff] %v7034_v16  ;;  %v7052_v58 = vmul.f32 %v6994_v14, %v6908_v54  ;;  %v7063_v31 = vmul.f32 729.0, %v4055_v20  ;;  %v7078_v43 = vmul.f32 0.0013717421, %v6996_v12 }
 0x2a3   : > { %7624 = vst [vmem:[#allocation47_spill] sm:$0xff] %v7022_v35  ;;  %7626 = vst [vmem:[#allocation49_spill] sm:$0xff] %v7042_v11  ;;  %v7044_v34 = vpop.f32.mrb[30].mxu1  ;;  %v7048_v35 = vmul.f32 %v6994_v14, %v6783_v26  ;;  %v4320_v14 = vld [vmem:[%s5418_s14 + $0x18] sm:$0xff]  ;;  %v7087_v55 = vmul.f32 0.0013717421, %v7011_v18 }
 0x2a4   : > { %7627 = vst [vmem:[#allocation50_spill] sm:$0xff] %v7044_v34  ;;  %7629 = vst [vmem:[#allocation52_spill] sm:$0xff] %v7052_v58  ;;  %v7059_v37 = vmul.f32 %v7044_v34, %v7031_v29  ;;  %v7061_v16 = vpop.f32.mrb[31].mxu1  ;;  %v4009_v58 = vmul.f32 2.0, %v6908_v54  ;;  %v7081_v20 = vmul.f32 %v6781_v15, %v4010_v25  ;;  %v7090_v54 = vmul.f32 0.0013717421, %v7044_v34 }
 0x2a5   : > { %7628 = vst [vmem:[#allocation51_spill] sm:$0xff] %v7048_v35  ;;  %7631 = vst [vmem:[#allocation54_spill] sm:$0xff] %v7061_v16  ;;  %v7068_v35 = vmul.f32 %v7039_v19, %v7061_v16  ;;  %v7098_v15 = vmul.f32 %v7042_v11, %v6942_v57  ;;  %v4351_v34 = vmul.f32 %v4334_v9, %v4334_v9  ;;  %v7107_v12 = vmul.f32 0.0013717421, %v7061_v16 }
 0x2a6   : > { %7630 = vst [vmem:[#allocation53_spill] sm:$0xff] %v7059_v37  ;;  %v4335_v37 = vsub.f32 %v5270_v50, %v4319_v21  ;;  %v7094_v50 = vmul.f32 %v6785_v10, %v7042_v11  ;;  %v5271_v21 = vld [vmem:[%s5408_s19 + $0x58] sm:$0xff]  ;;  %v4337_v11 = vsub.f32 %v5272_v51, %v4321_v46  ;;  %v7124_v9 = vmul.f32 %v7078_v43, %v6979_v42 }
 0x2a7   : > { %7632 = vst [vmem:[#allocation55_spill] sm:$0xff] %v7068_v35  ;;  %v4350_v35 = vmul.f32 %v4333_v45, %v4333_v45  ;;  %v5063_v8 = vpop.f32.mrb[32].mxu1  ;;  %7634 = vst [vmem:[#allocation57_spill] sm:$0xff] %v7098_v15  ;;  %v7103_v45 = vmul.f32 %v7055_v53, %v6787_v5  ;;  %v4336_v18 = vsub.f32 %v5271_v21, %v4320_v14 }
 0x2a8   : > { %7633 = vst [vmem:[#allocation56_spill] sm:$0xff] %v7094_v50  ;;  %v4034_v25 = vsub.f32 %v5063_v8, %v6896_v49  ;;  %v3618_v1 = vpop.f32.mrb[33].mxu1  ;;  %v4352_v15 = vmul.f32 %v4335_v37, %v4335_v37  ;;  %v7116_v49 = vmul.f32 %v7055_v53, %v6948_v4  ;;  %v7120_v14 = vmul.f32 %v6789_v28, %v7078_v43 }
 0x2a9   : > { %7635 = vst [vmem:[#allocation58_spill] sm:$0xff] %v7103_v45  ;;  %v4033_v50 = vsub.f32 %v3618_v1, %v6902_v0  ;;  %7638 = vst [vmem:[#allocation61_spill] sm:$0xff] %v7124_v9  ;;  %v7135_v37 = vmul.f32 %v7087_v55, %v6991_v47  ;;  %v7139_v46 = vmul.f32 %v6793_v6, %v7090_v54  ;;  %v4366_v9 = vsel %vm1164_vm0, %v4350_v35, 0.0 }
 0x2aa   : > { %v7112_v8 = vadd.f32 %v6899_v60, %v4034_v25  ;;  %7636 = vst [vmem:[#allocation59_spill] sm:$0xff] %v7116_v49  ;;  %7637 = vst [vmem:[#allocation60_spill] sm:$0xff] %v7120_v14  ;;  %v7131_v60 = vmul.f32 %v7087_v55, %v6791_v33  ;;  %v4322_v25 = vld [vmem:[%s5418_s14 + $0x28] sm:$0xff]  ;;  %v4012_v14 = vmul.f32 2.0, %v6942_v57  ;;  %v4060_v35 = vmul.f32 %v6942_v57, %v6942_v57  ;;  %v4324_v49 = vld [vmem:[%s5418_s14 + $0x38] sm:$0xff] }
 0x2ab   : > { %v7127_v0 = vadd.f32 %v6927_v52, %v4033_v50  ;;  %v5066_v51 = vpop.f32.mrb[34].mxu1  ;;  %7640 = vst [vmem:[#allocation63_spill] sm:$0xff] %v7135_v37  ;;  %7641 = vst [vmem:[#allocation64_spill] sm:$0xff] %v7139_v46  ;;  %v7145_v52 = vmul.f32 %v7090_v54, %v7031_v29  ;;  %v4323_v50 = vld [vmem:[%s5418_s14 + $0x30] sm:$0xff]  ;;  %v4367_v37 = vsel %vm1164_vm0, %v4351_v34, 0.0  ;;  %v7154_v46 = vmul.f32 %v7107_v12, %v6795_v32 }
 0x2ac   : > { %7639 = vst [vmem:[#allocation62_spill] sm:$0xff] %v7131_v60  ;;  %v4036_v1 = vsub.f32 %v5066_v51, %v6930_v40  ;;  %v3628_v21 = vpop.f32.mrb[35].mxu1  ;;  %v7158_v40 = vmul.f32 %v7107_v12, %v7039_v19  ;;  %v4011_v45 = vmul.f32 2.0, %v6948_v4  ;;  %v4353_v16 = vmul.f32 %v4336_v18, %v4336_v18 }
 0x2ad   : > { %7642 = vst [vmem:[#allocation65_spill] sm:$0xff] %v7145_v52  ;;  %v4035_v60 = vsub.f32 %v3628_v21, %v6939_v13  ;;  %7643 = vst [vmem:[#allocation66_spill] sm:$0xff] %v7154_v46  ;;  %v7164_v52 = vmul.f32 %v4009_v58, %v6783_v26  ;;  %v5273_v13 = vld [vmem:[%s5408_s19 + $0x68] sm:$0xff]  ;;  %v4354_v57 = vmul.f32 %v4337_v11, %v4337_v11  ;;  %v7188_v18 = vmul.f32 729.0, %v4060_v35  ;;  %v5275_v11 = vld [vmem:[%s5408_s19 + $0x78] sm:$0xff] }
 0x2ae   : > { %7644 = vst [vmem:[#allocation67_spill] sm:$0xff] %v7158_v40  ;;  %v7161_v51 = vadd.f32 %v6936_v56, %v4036_v1  ;;  %v4338_v34 = vsub.f32 %v5273_v13, %v4322_v25  ;;  %v5274_v40 = vld [vmem:[%s5408_s19 + $0x70] sm:$0xff]  ;;  %v4368_v1 = vadd.f32 %v4367_v37, %v4366_v9  ;;  %v4369_v25 = vsel %vm1164_vm0, %v4352_v15, 0.0  ;;  %v4325_v9 = vld [vmem:[%s5418_s14 + $0x40] sm:$0xff] }
 0x2af   : > { %v7170_v21 = vadd.f32 %v6968_v38, %v4035_v60  ;;  %v5069_v46 = vpop.f32.mrb[36].mxu1  ;;  %v4339_v56 = vsub.f32 %v5274_v40, %v4323_v50  ;;  %v4073_v60 = vmul.f32 729.0, %v7073_v48  ;;  %v7180_v13 = vmul.f32 %v6785_v10, %v4012_v14  ;;  %v4326_v14 = vld [vmem:[%s5418_s14 + $0x48] sm:$0xff]  ;;  %v5276_v35 = vld [vmem:[%s5408_s19 + $0x80] sm:$0xff] }
 0x2b0   : > { %v4038_v26 = vsub.f32 %v5069_v46, %v6975_v41  ;;  %v3638_v58 = vpop.f32.mrb[37].mxu1  ;;  %v4059_v50 = vmul.f32 %v6948_v4, %v6948_v4  ;;  %v4340_v37 = vsub.f32 %v5275_v11, %v4324_v49  ;;  %v4355_v15 = vmul.f32 %v4338_v34, %v4338_v34  ;;  %v4328_v11 = vld [vmem:[%s5418_s14 + $0x58] sm:$0xff] }
 0x2b1   : > { %v4037_v38 = vsub.f32 %v3638_v58, %v6984_v44  ;;  %v7195_v10 = vmul.f32 %v4011_v45, %v6787_v5  ;;  %v4356_v4 = vmul.f32 %v4339_v56, %v4339_v56  ;;  %v4370_v46 = vadd.f32 %v4369_v25, %v4368_v1  ;;  %v4327_v45 = vld [vmem:[%s5418_s14 + $0x50] sm:$0xff] }
 0x2b2   : > { %v7186_v41 = vadd.f32 %v6981_v62, %v4038_v26  ;;  %v4341_v26 = vsub.f32 %v5276_v35, %v4325_v9  ;;  %v4371_v49 = vsel %vm1164_vm0, %v4353_v16, 0.0  ;;  %v4373_v34 = vsel %vm1164_vm0, %v4354_v57, 0.0  ;;  %v4329_v35 = vld [vmem:[%s5418_s14 + $0x60] sm:$0xff] }
 0x2b3   : > { %v7192_v44 = vadd.f32 %v7013_v23, %v4037_v38  ;;  %v5072_v48 = vpop.f32.mrb[38].mxu1  ;;  %v4075_v58 = vmul.f32 729.0, %v4059_v50  ;;  %v4014_v5 = vmul.f32 2.0, %v6979_v42  ;;  %v4372_v38 = vadd.f32 %v4371_v49, %v4370_v46 }
 0x2b4   : > { %v4040_v62 = vsub.f32 %v5072_v48, %v7016_v2  ;;  %v3648_v40 = vpop.f32.mrb[39].mxu1  ;;  %v5277_v2 = vld [vmem:[%s5408_s19 + $0x88] sm:$0xff]  ;;  %v4357_v25 = vmul.f32 %v4340_v37, %v4340_v37  ;;  %v4375_v9 = vsel %vm1164_vm0, %v4355_v15, 0.0  ;;  %v4013_v50 = vmul.f32 2.0, %v6991_v47 }
 0x2b5   : > { %v4039_v23 = vsub.f32 %v3648_v40, %v7027_v36  ;;  %v4342_v1 = vsub.f32 %v5277_v2, %v4326_v14  ;;  %v4062_v36 = vmul.f32 %v6979_v42, %v6979_v42  ;;  %v4374_v48 = vadd.f32 %v4373_v34, %v4372_v38  ;;  %v5278_v14 = vld [vmem:[%s5408_s19 + $0x90] sm:$0xff] }
 0x2b6   : > { %v7206_v56 = vadd.f32 %v7024_v30, %v4040_v62  ;;  %v4343_v37 = vsub.f32 %v5278_v14, %v4327_v45  ;;  %v4358_v62 = vmul.f32 %v4341_v26, %v4341_v26  ;;  %v4377_v15 = vsel %vm1164_vm0, %v4356_v4, 0.0 }
 0x2b7   : > { %v7211_v16 = vadd.f32 %v7063_v31, %v4039_v23  ;;  %v5075_v57 = vpop.f32.mrb[40].mxu1  ;;  %v4030_v40 = vmul.f32 %v6789_v28, %v4014_v5  ;;  %v4061_v42 = vmul.f32 %v6991_v47, %v6991_v47  ;;  %v4376_v49 = vadd.f32 %v4375_v9, %v4374_v48  ;;  %v4330_v47 = vld [vmem:[%s5418_s14 + $0x68] sm:$0xff] }
 0x2b8   : > { %v4042_v30 = vsub.f32 %v5075_v57, %v7081_v20  ;;  %v3658_v46 = vpop.f32.mrb[41].mxu1  ;;  %v5279_v20 = vld [vmem:[%s5408_s19 + $0x98] sm:$0xff]  ;;  %v4359_v45 = vmul.f32 %v4342_v1, %v4342_v1  ;;  %v4379_v26 = vsel %vm1164_vm0, %v4357_v25, 0.0  ;;  %v4078_v38 = vmul.f32 729.0, %v4062_v36  ;;  %v4331_v36 = vld [vmem:[%s5418_s14 + $0x70] sm:$0xff] }
 0x2b9   : > { %v4041_v31 = vsub.f32 %v3658_v46, %v7164_v52  ;;  %v4344_v23 = vsub.f32 %v5279_v20, %v4328_v11  ;;  %v4029_v28 = vmul.f32 %v4013_v50, %v6791_v33  ;;  %v4378_v5 = vadd.f32 %v4377_v15, %v4376_v49  ;;  %v5281_v50 = vld [vmem:[%s5408_s19 + $0xa8] sm:$0xff] }
 0x2ba   : > { %v7226_v34 = vadd.f32 %v7083_v7, %v4042_v30  ;;  %v5280_v7 = vld [vmem:[%s5408_s19 + $0xa0] sm:$0xff]  ;;  %v4360_v48 = vmul.f32 %v4343_v37, %v4343_v37  ;;  %v4381_v1 = vsel %vm1164_vm0, %v4358_v62, 0.0  ;;  %v4016_v11 = vmul.f32 2.0, %v7031_v29 }
 0x2bb   : > { %v7230_v4 = vadd.f32 %v4073_v60, %v4041_v31  ;;  %v5078_v52 = vpop.f32.mrb[42].mxu1  ;;  %v4345_v57 = vsub.f32 %v5280_v7, %v4329_v35  ;;  %v4077_v60 = vmul.f32 729.0, %v4061_v42  ;;  %v4380_v30 = vadd.f32 %v4379_v26, %v4378_v5  ;;  %v4332_v31 = vld [vmem:[%s5418_s14 + $0x78] sm:$0xff] }
 0x2bc   : > { %v4044_v2 = vsub.f32 %v5078_v52, %v7180_v13  ;;  %v3668_v9 = vpop.f32.mrb[43].mxu1  ;;  %v4346_v13 = vsub.f32 %v5281_v50, %v4330_v47  ;;  %v4361_v46 = vmul.f32 %v4344_v23, %v4344_v23  ;;  %v4383_v14 = vsel %vm1164_vm0, %v4359_v45, 0.0 }
 0x2bd   : > { %v4043_v25 = vsub.f32 %v3668_v9, %v7195_v10  ;;  %v4064_v10 = vmul.f32 %v7031_v29, %v7031_v29  ;;  %v4015_v62 = vmul.f32 2.0, %v7039_v19  ;;  %v4382_v42 = vadd.f32 %v4381_v1, %v4380_v30  ;;  %v5283_v29 = vld [vmem:[%s5408_s19 + $0xb8] sm:$0xff] }
 0x2be   : > { %v7241_v33 = vadd.f32 %v7188_v18, %v4044_v2  ;;  %v5282_v18 = vld [vmem:[%s5408_s19 + $0xb0] sm:$0xff]  ;;  %v4362_v26 = vmul.f32 %v4345_v57, %v4345_v57  ;;  %v4385_v23 = vsel %vm1164_vm0, %v4360_v48, 0.0  ;;  %v4063_v45 = vmul.f32 %v7039_v19, %v7039_v19 }
 0x2bf   : > { %v7245_v37 = vadd.f32 %v4075_v58, %v4043_v25  ;;  %v5081_v15 = vpop.f32.mrb[44].mxu1  ;;  %v4347_v20 = vsub.f32 %v5282_v18, %v4331_v36  ;;  %v4032_v58 = vmul.f32 %v6793_v6, %v4016_v11  ;;  %v4384_v47 = vadd.f32 %v4383_v14, %v4382_v42 }
 0x2c0   : > { %v4046_v35 = vsub.f32 %v5081_v15, %v4030_v40  ;;  %v3678_v49 = vpop.f32.mrb[45].mxu1  ;;  %v4348_v2 = vsub.f32 %v5283_v29, %v4332_v31  ;;  %v4363_v9 = vmul.f32 %v4346_v13, %v4346_v13  ;;  %v4387_v40 = vsel %vm1164_vm0, %v4361_v46, 0.0 }
 0x2c1   : > { %v4045_v52 = vsub.f32 %v3678_v49, %v4029_v28  ;;  %v4031_v57 = vmul.f32 %v4015_v62, %v6795_v32  ;;  %v4386_v48 = vadd.f32 %v4385_v23, %v4384_v47  ;;  %v4080_v25 = vmul.f32 729.0, %v4064_v10 }
 0x2c2   : > { %v7256_v5 = vadd.f32 %v4078_v38, %v4046_v35  ;;  %v4364_v11 = vmul.f32 %v4347_v20, %v4347_v20  ;;  %v4389_v19 = vsel %vm1164_vm0, %v4362_v26, 0.0  ;;  %v4079_v38 = vmul.f32 729.0, %v4063_v45 }
 0x2c3   : > { %v7260_v7 = vadd.f32 %v4077_v60, %v4045_v52  ;;  %v5084_v1 = vpop.f32.mrb[46].mxu1  ;;  %v4388_v30 = vadd.f32 %v4387_v40, %v4386_v48  ;;  %v4365_v13 = vmul.f32 %v4348_v2, %v4348_v2  ;;  %v4391_v46 = vsel %vm1164_vm0, %v4363_v9, 0.0 }
 0x2c4   : > { %v4048_v28 = vsub.f32 %v5084_v1, %v4032_v58  ;;  %v3688_v6 = vpop.f32.mrb[47].mxu1  ;;  %v4393_v32 = vsel %vm1164_vm0, %v4364_v11, 0.0  ;;  %v4098_v15 = vmul.f32 2.0, %v6801_v39  ;;  %v4097_v62 = vmul.f32 2.0, %v6809_v24 }
 0x2c5   : > { %v4047_v36 = vsub.f32 %v3688_v6, %v4031_v57  ;;  %v4390_v14 = vadd.f32 %v4389_v19, %v4388_v30  ;;  %v4395_v31 = vsel %vm1164_vm0, %v4365_v13, 0.0  ;;  %v4146_v42 = vmul.f32 %v6801_v39, %v6801_v39  ;;  %v7646_v13 = vld [vmem:[#allocation6_spill] sm:$0xff] }
 0x2c6   : > { %v7264_v50 = vadd.f32 %v4080_v25, %v4048_v28  ;;  %v4145_v49 = vmul.f32 %v6809_v24, %v6809_v24  ;;  %v4114_v18 = vmul.f32 %v6798_v27, %v4098_v15  ;;  %v4100_v20 = vmul.f32 2.0, %v6832_v3  ;;  %v7645_v28 = vld [vmem:[#allocation17_spill] sm:$0xff] }
 0x2c7   : > { %v7267_v60 = vadd.f32 %v4079_v38, %v4047_v36  ;;  %v4392_v10 = vadd.f32 %v4391_v46, %v4390_v14  ;;  %v4113_v52 = vmul.f32 %v4097_v62, %v6806_v22  ;;  %v4099_v58 = vmul.f32 2.0, %v6844_v17  ;;  %v7647_v14 = vld [vmem:[#allocation25_spill] sm:$0xff] }
 0x2c8   : > { %v4162_v47 = vmul.f32 729.0, %v4146_v42  ;;  %v4148_v39 = vmul.f32 %v6832_v3, %v6832_v3  ;;  %v4161_v9 = vmul.f32 729.0, %v4145_v49  ;;  %v4147_v27 = vmul.f32 %v6844_v17, %v6844_v17 }
 0x2c9   : > { %v4394_v35 = vadd.f32 %v4393_v32, %v4392_v10  ;;  %v4116_v40 = vmul.f32 %v6822_v59, %v4100_v20  ;;  %v4102_v1 = vmul.f32 2.0, %v6857_v63  ;;  %v4115_v48 = vmul.f32 %v4099_v58, %v6837_v61  ;;  %v7648_v10 = vld [vmem:[#allocation13_spill] sm:$0xff] }
 0x2ca   : > { %v4101_v25 = vmul.f32 2.0, %v7645_v28  ;;  %v4164_v11 = vmul.f32 729.0, %v4148_v39  ;;  %v4150_v17 = vmul.f32 %v6857_v63, %v6857_v63  ;;  %v4163_v38 = vmul.f32 729.0, %v4147_v27  ;;  %v7651_v39 = vld [vmem:[#allocation22_spill] sm:$0xff] }
 0x2cb   : > { %v4396_v26 = vadd.f32 %v4395_v31, %v4394_v35  ;;  %v4149_v30 = vmul.f32 %v7645_v28, %v7645_v28  ;;  %v4118_v46 = vmul.f32 %v7646_v13, %v4102_v1  ;;  %v7649_v31 = vld [vmem:[#allocation32_spill] sm:$0xff] }
 0x2cc   : > { %v4117_v62 = vmul.f32 %v4101_v25, %v7648_v10  ;;  %v4103_v42 = vmul.f32 2.0, %v7649_v31  ;;  %v4166_v35 = vmul.f32 729.0, %v4150_v17 }
 0x2cd   : > { %4397 = vadd.xlane.f32.xlu1 %v4396_v26 }
 0x2ce   : > { %v5087_v23 = vpop.f32.mrb[48].mxu1 }
 0x2cf   : > { %v4130_v45 = vsub.f32 %v5087_v23, %v4114_v18  ;;  %v3698_v29 = vpop.f32.mrb[49].mxu1  ;;  %v4152_v18 = vmul.f32 %v7647_v14, %v7647_v14  ;;  %v4165_v23 = vmul.f32 729.0, %v4149_v30 }
 0x2d0   : > { %v4129_v2 = vsub.f32 %v3698_v29, %v4113_v52  ;;  %v4151_v52 = vmul.f32 %v7649_v31, %v7649_v31 }
 0x2d1   : > { %v4178_v24 = vadd.f32 %v4162_v47, %v4130_v45  ;;  %v7650_v45 = vld [vmem:[#allocation18_spill] sm:$0xff] }
 0x2d2   : > { %v4177_v22 = vadd.f32 %v4161_v9, %v4129_v2  ;;  %v5090_v57 = vpop.f32.mrb[50].mxu1  ;;  %v4119_v2 = vmul.f32 %v4103_v42, %v7651_v39  ;;  %v7652_v9 = vld [vmem:[#allocation33_spill] sm:$0xff]  ;;  %v4167_v25 = vmul.f32 729.0, %v4151_v52 }
 0x2d3   : > { %v7290_v6 = vmul.f32 %v4178_v24, %v7112_v8  ;;  %v4132_v3 = vsub.f32 %v5090_v57, %v4116_v40  ;;  %v3708_v19 = vpop.f32.mrb[51].mxu1  ;;  %v4104_v8 = vmul.f32 2.0, %v7647_v14  ;;  %v4106_v27 = vmul.f32 2.0, %v7652_v9 }
 0x2d4   : > { %v7295_v36 = vmul.f32 %v4177_v22, %v7127_v0  ;;  %v4131_v59 = vsub.f32 %v3708_v19, %v4115_v48  ;;  %v7653_v22 = vld [vmem:[#allocation41_spill] sm:$0xff]  ;;  %v4107_v14 = vmul.f32 2.0, %v7055_v53 }
 0x2d5   : > { %v4180_v61 = vadd.f32 %v4164_v11, %v4132_v3  ;;  %v4120_v47 = vmul.f32 %v7650_v45, %v4104_v8  ;;  %v4105_v57 = vmul.f32 2.0, %v7653_v22  ;;  %v4154_v3 = vmul.f32 %v7652_v9, %v7652_v9 }
 0x2d6   : > { %v4179_v32 = vadd.f32 %v4163_v38, %v4131_v59  ;;  %v5093_v15 = vpop.f32.mrb[52].mxu1  ;;  %v4153_v19 = vmul.f32 %v7653_v22, %v7653_v22  ;;  %v7655_v38 = vld [vmem:[#allocation49_spill] sm:$0xff] }
 0x2d7   : > { %v7304_v63 = vmul.f32 %v4180_v61, %v7161_v51  ;;  %v4134_v0 = vsub.f32 %v5093_v15, %v4118_v46  ;;  %v3718_v49 = vpop.f32.mrb[53].mxu1  ;;  %v4108_v30 = vmul.f32 2.0, %v7655_v38  ;;  %v4170_v15 = vmul.f32 729.0, %v4154_v3 }
 0x2d8   : > { %v7309_v20 = vmul.f32 %v4179_v32, %v7170_v21  ;;  %v4133_v26 = vsub.f32 %v3718_v49, %v4117_v62  ;;  %v4168_v21 = vmul.f32 729.0, %v4152_v18  ;;  %v4156_v62 = vmul.f32 %v7655_v38, %v7655_v38 }
 0x2d9   : > { %v4182_v58 = vadd.f32 %v4166_v35, %v4134_v0  ;;  %v4169_v42 = vmul.f32 729.0, %v4153_v19  ;;  %v7657_v35 = vld [vmem:[#allocation34_spill] sm:$0xff]  ;;  %v4110_v18 = vmul.f32 2.0, %v7078_v43  ;;  %v4111_v3 = vmul.f32 2.0, %v7107_v12 }
 0x2da   : > { %v4181_v29 = vadd.f32 %v4165_v23, %v4133_v26  ;;  %v5096_v51 = vpop.f32.mrb[54].mxu1  ;;  %v4124_v49 = vmul.f32 %v7657_v35, %v4108_v30  ;;  %v4159_v38 = vmul.f32 %v7107_v12, %v7107_v12 }
 0x2db   : > { %v7317_v24 = vmul.f32 %v4182_v58, %v7186_v41  ;;  %v4136_v40 = vsub.f32 %v5096_v51, %v4120_v47  ;;  %v3728_v1 = vpop.f32.mrb[55].mxu1  ;;  %v7654_v41 = vld [vmem:[#allocation26_spill] sm:$0xff]  ;;  %v4109_v58 = vmul.f32 2.0, %v7087_v55 }
 0x2dc   : > { %v7321_v48 = vmul.f32 %v4181_v29, %v7192_v44  ;;  %v4135_v28 = vsub.f32 %v3728_v1, %v4119_v2  ;;  %v4122_v59 = vmul.f32 %v7654_v41, %v4106_v27  ;;  %v7656_v44 = vld [vmem:[#allocation30_spill] sm:$0xff]  ;;  %v4172_v29 = vmul.f32 729.0, %v4156_v62 }
 0x2dd   : > { %v4184_v11 = vadd.f32 %v4168_v21, %v4136_v40  ;;  %v4121_v46 = vmul.f32 %v4105_v57, %v7656_v44  ;;  %v4157_v27 = vmul.f32 %v7087_v55, %v7087_v55  ;;  %v7659_v21 = vld [vmem:[#allocation42_spill] sm:$0xff]  ;;  %v4160_v55 = vmul.f32 %v7090_v54, %v7090_v54 }
 0x2de   : > { %v4183_v17 = vadd.f32 %v4167_v25, %v4135_v28  ;;  %v4126_v1 = vmul.f32 %v7659_v21, %v4110_v18  ;;  %v7660_v28 = vld [vmem:[#allocation46_spill] sm:$0xff]  ;;  %v4228_v18 = vadd.f32 1e-05, %v7304_v63  ;;  %v4229_v63 = vadd.f32 1e-05, %v7321_v48  ;;  %v7670_v21 = vld [vmem:[#allocation9_spill] sm:$0xff] }
 0x2df   : > { %v7330_v61 = vmul.f32 %v4184_v11, %v7206_v56  ;;  %v5099_v13 = vpop.f32.mrb[56].mxu1  ;;  %v4155_v56 = vmul.f32 %v7055_v53, %v7055_v53  ;;  %v4158_v53 = vmul.f32 %v7078_v43, %v7078_v43  ;;  %v4125_v25 = vmul.f32 %v4109_v58, %v7660_v28  ;;  %v7674_v48 = vld [vmem:[#allocation43_spill] sm:$0xff] }
 0x2e0   : > { %v7335_v8 = vmul.f32 %v4183_v17, %v7211_v16  ;;  %v4138_v32 = vsub.f32 %v5099_v13, %v4122_v59  ;;  %v3738_v10 = vpop.f32.mrb[57].mxu1  ;;  %v7658_v16 = vld [vmem:[#allocation38_spill] sm:$0xff]  ;;  %v4173_v59 = vmul.f32 729.0, %v4157_v27 }
 0x2e1   : > { %v4137_v31 = vsub.f32 %v3738_v10, %v4121_v46  ;;  %v4123_v52 = vmul.f32 %v4107_v14, %v7658_v16  ;;  %v4171_v9 = vmul.f32 729.0, %v4155_v56  ;;  %v4174_v11 = vmul.f32 729.0, %v4158_v53  ;;  %v7661_v13 = vld [vmem:[#allocation50_spill] sm:$0xff] }
 0x2e2   : > { %v4186_v0 = vadd.f32 %v4170_v15, %v4138_v32  ;;  %v7662_v14 = vld [vmem:[#allocation54_spill] sm:$0xff] }
 0x2e3   : > { %v4185_v26 = vadd.f32 %v4169_v42, %v4137_v31  ;;  %v5102_v23 = vpop.f32.mrb[58].mxu1  ;;  %v4127_v32 = vmul.f32 %v4111_v3, %v7662_v14  ;;  %v4175_v42 = vmul.f32 729.0, %v4159_v38  ;;  %v7673_v3 = vld [vmem:[#allocation36_spill] sm:$0xff] }
 0x2e4   : > { %v7346_v45 = vmul.f32 %v4186_v0, %v7226_v34  ;;  %v4140_v47 = vsub.f32 %v5102_v23, %v4124_v49  ;;  %v3748_v51 = vpop.f32.mrb[59].mxu1  ;;  %v4112_v34 = vmul.f32 2.0, %v7090_v54  ;;  %v4176_v54 = vmul.f32 729.0, %v4160_v55  ;;  %v7663_v23 = vld [vmem:[#allocation5_spill] sm:$0xff]  ;;  %v7675_v55 = vld [vmem:[#allocation8_spill] sm:$0xff] }
 0x2e5   : > { %v7351_v39 = vmul.f32 %v4185_v26, %v7230_v4  ;;  %v4139_v2 = vsub.f32 %v3748_v51, %v4123_v52  ;;  %v4226_v0 = vadd.f32 1e-05, %v7290_v6  ;;  %v4225_v49 = vadd.f32 1e-05, %v7295_v36  ;;  %v7664_v52 = vld [vmem:[#allocation10_spill] sm:$0xff]  ;;  %v7666_v36 = vld [vmem:[#allocation11_spill] sm:$0xff] }
 0x2e6   : > { %v4188_v40 = vadd.f32 %v4172_v29, %v4140_v47  ;;  %v4128_v44 = vmul.f32 %v7661_v13, %v4112_v34  ;;  %v3970_v16 = vmul.f32 729.0, %v7663_v23  ;;  %v3969_v58 = vmul.f32 729.0, %v7664_v52  ;;  %v7677_v13 = vld [vmem:[#allocation16_spill] sm:$0xff] }
 0x2e7   : > { %v4187_v22 = vadd.f32 %v4171_v9, %v4139_v2  ;;  %v5105_v57 = vpop.f32.mrb[60].mxu1  ;;  %5187 = vrcp.f32 %v4226_v0  ;;  %v4230_v6 = vadd.f32 1e-05, %v7317_v24  ;;  %v3972_v51 = vmul.f32 729.0, %v7666_v36  ;;  %v7668_v2 = vld [vmem:[#allocation7_spill] sm:$0xff]  ;;  %v7671_v24 = vld [vmem:[#allocation28_spill] sm:$0xff] }
 0x2e8   : > { %v7360_v43 = vmul.f32 %v4188_v40, %v7241_v33  ;;  %v4142_v4 = vsub.f32 %v5105_v57, %v4126_v1  ;;  %v3758_v19 = vpop.f32.mrb[61].mxu1  ;;  %5189 = vrcp.f32 %v4225_v49  ;;  %v4232_v40 = vadd.f32 1e-05, %v7330_v61  ;;  %v7672_v57 = vld [vmem:[#allocation14_spill] sm:$0xff] }
 0x2e9   : > { %v7365_v17 = vmul.f32 %v4187_v22, %v7245_v37  ;;  %v4141_v41 = vsub.f32 %v3758_v19, %v4125_v25  ;;  %5191 = vrcp.f32 %v4228_v18  ;;  %v3973_v34 = vmul.f32 729.0, %v7671_v24 }
 0x2ea   : > { %v4190_v30 = vadd.f32 %v4174_v11, %v4142_v4  ;;  %v4231_v22 = vadd.f32 1e-05, %v7335_v8  ;;  %v7402_v4 = vmul.f32 729.0, %v7673_v3  ;;  %v7405_v11 = vmul.f32 729.0, %v7674_v48  ;;  %v7687_v48 = vld [vmem:[#allocation40_spill] sm:$0xff] }
 0x2eb   : > { %v4189_v46 = vadd.f32 %v4173_v59, %v4141_v41  ;;  %v5108_v33 = vpop.f32.mrb[62].mxu1  ;;  %v7676_v59 = vld [vmem:[#allocation48_spill] sm:$0xff]  ;;  %v4234_v8 = vadd.f32 1e-05, %v7346_v45  ;;  %v4233_v49 = vadd.f32 1e-05, %v7351_v39 }
 0x2ec   : > { %v7372_v15 = vmul.f32 %v4190_v30, %v7256_v5  ;;  %v4144_v10 = vsub.f32 %v5108_v33, %v4128_v44  ;;  %v3768_v62 = vpop.f32.mrb[63].mxu1  ;;  %v7409_v38 = vmul.f32 729.0, %v7676_v59  ;;  %v7678_v33 = vld [vmem:[#allocation3_spill] sm:$0xff]  ;;  %v4235_v39 = vadd.f32 1e-05, %v7365_v17 }
 0x2ed   : > { %v7375_v37 = vmul.f32 %v4189_v46, %v7260_v7  ;;  %v4143_v31 = vsub.f32 %v3768_v62, %v4127_v32  ;;  %v4227_v7 = vadd.f32 1e-05, %v7309_v20  ;;  %v7669_v20 = vld [vmem:[#allocation24_spill] sm:$0xff]  ;;  %v7689_v59 = vld [vmem:[#allocation59_spill] sm:$0xff] }
 0x2ee   : > { %v4192_v56 = vadd.f32 %v4176_v54, %v4144_v10  ;;  %v3974_v27 = vmul.f32 729.0, %v7669_v20  ;;  %v7679_v32 = vld [vmem:[#allocation52_spill] sm:$0xff]  ;;  %v7685_v20 = vld [vmem:[#allocation15_spill] sm:$0xff] }
 0x2ef   : > { %v4191_v12 = vadd.f32 %v4175_v42, %v4143_v31  ;;  %5193 = vrcp.f32 %v4227_v7  ;;  %v7415_v10 = vmul.f32 729.0, %v7679_v32  ;;  %v7680_v31 = vld [vmem:[#allocation4_spill] sm:$0xff] }
 0x2f0   : > { %v7379_v35 = vmul.f32 %v4192_v56, %v7264_v50  ;;  %v7665_v50 = vld [vmem:[#allocation2_spill] sm:$0xff]  ;;  %5195 = vrcp.f32 %v4230_v6  ;;  %v7683_v6 = vld [vmem:[#allocation27_spill] sm:$0xff] }
 0x2f1   : > { %v7383_v5 = vmul.f32 %v4191_v12, %v7267_v60  ;;  %v7667_v60 = vld [vmem:[#allocation19_spill] sm:$0xff]  ;;  %5197 = vrcp.f32 %v4229_v63  ;;  %v5188_v54 = vpop.eup %5187  ;;  %v7681_v12 = vld [vmem:[#allocation57_spill] sm:$0xff] }
 0x2f2   : > { %v3971_v53 = vmul.f32 729.0, %v7667_v60  ;;  %5199 = vrcp.f32 %v4232_v40  ;;  %v7419_v0 = vmul.f32 729.0, %v7681_v12  ;;  %v5190_v45 = vpop.eup %5189  ;;  %v7684_v60 = vld [vmem:[#allocation12_spill] sm:$0xff] }
 0x2f3   : > { %5201 = vrcp.f32 %v4231_v22 }
 0x2f4   : > { %5203 = vrcp.f32 %v4234_v8  ;;  %v3979_v8 = vmul.f32 729.0, %v7689_v59 }
 0x2f5   : > { %5205 = vrcp.f32 %v4233_v49 }
 0x2f6   : > { %v5111_v26 = vpop.f32.mrb[64].mxu1 }
 0x2f7   : > { %v3906_v47 = vsub.f32 %v5111_v26, %v7665_v50  ;;  %v3778_v29 = vpop.f32.mrb[65].mxu1  ;;  %v7682_v26 = vld [vmem:[#allocation20_spill] sm:$0xff] }
 0x2f8   : > { %v3905_v9 = vsub.f32 %v3778_v29, %v7668_v2  ;;  %v5192_v2 = vpop.eup %5191 }
 0x2f9   : > { %v3938_v1 = vsub.f32 %v3906_v47, %v7670_v21  ;;  %v4236_v47 = vadd.f32 1e-05, %v7360_v43 }
 0x2fa   : > { %v3937_v28 = vsub.f32 %v3905_v9, %v7672_v57  ;;  %v5114_v25 = vpop.f32.mrb[66].mxu1  ;;  %v7686_v57 = vld [vmem:[#allocation35_spill] sm:$0xff] }
 0x2fb   : > { %v3986_v19 = vadd.f32 %v3970_v16, %v3938_v1  ;;  %v3908_v41 = vsub.f32 %v5114_v25, %v7675_v55  ;;  %v3788_v61 = vpop.f32.mrb[67].mxu1  ;;  %v5194_v1 = vpop.eup %5193  ;;  %5207 = vrcp.f32 %v4236_v47  ;;  %v4240_v47 = vadd.f32 1e-05, %v7379_v35 }
 0x2fc   : > { %v3985_v30 = vadd.f32 %v3969_v58, %v3937_v28  ;;  %v3907_v44 = vsub.f32 %v3788_v61, %v7677_v13  ;;  %v5196_v55 = vpop.eup %5195  ;;  %v4238_v13 = vadd.f32 1e-05, %v7372_v15  ;;  %5209 = vrcp.f32 %v4235_v39 }
 0x2fd   : > { %v4194_v46 = vmul.f32 %v3986_v19, %v3986_v19  ;;  %v3940_v14 = vsub.f32 %v3908_v41, %v7678_v33  ;;  %v7688_v41 = vld [vmem:[#allocation21_spill] sm:$0xff] }
 0x2fe   : > { %v4193_v62 = vmul.f32 %v3985_v30, %v3985_v30  ;;  %v3939_v42 = vsub.f32 %v3907_v44, %v7680_v31  ;;  %v5117_v56 = vpop.f32.mrb[68].mxu1  ;;  %v5198_v30 = vpop.eup %5197  ;;  %5211 = vrcp.f32 %v4238_v13 }
 0x2ff   : > { %v4244_v18 = vmul.f32 %v5188_v54, %v4194_v46  ;;  %v3988_v7 = vadd.f32 %v3972_v51, %v3940_v14  ;;  %v3910_v23 = vsub.f32 %v5117_v56, %v7682_v26  ;;  %v3798_v16 = vpop.f32.mrb[69].mxu1  ;;  %v7690_v46 = vld [vmem:[#allocation23_spill] sm:$0xff]  ;;  %v5200_v14 = vpop.eup %5199 }
 0x300   : > { %v4242_v52 = vmul.f32 %v5190_v45, %v4193_v62  ;;  %v3987_v58 = vadd.f32 %v3971_v53, %v3939_v42  ;;  %v3909_v50 = vsub.f32 %v3798_v16, %v7683_v6  ;;  %v5202_v31 = vpop.eup %5201  ;;  %v7691_v45 = vld [vmem:[#allocation44_spill] sm:$0xff]  ;;  %v7693_v6 = vld [vmem:[#allocation29_spill] sm:$0xff] }
 0x301   : > { %v4275_v29 = vsel %vm1164_vm0, %v4244_v18, 0.0  ;;  %v4196_v36 = vmul.f32 %v3988_v7, %v3988_v7  ;;  %v3942_v63 = vsub.f32 %v3910_v23, %v7684_v60  ;;  %v4237_v18 = vadd.f32 1e-05, %v7375_v37  ;;  %v7692_v23 = vld [vmem:[#allocation51_spill] sm:$0xff] }
 0x302   : > { %v4274_v51 = vsel %vm1164_vm0, %v4242_v52, 0.0  ;;  %v4195_v9 = vmul.f32 %v3987_v58, %v3987_v58  ;;  %v3941_v40 = vsub.f32 %v3909_v50, %v7685_v20  ;;  %v5120_v21 = vpop.f32.mrb[70].mxu1  ;;  %v5204_v52 = vpop.eup %5203 }
 0x303   : > { %v4276_v53 = vadd.f32 %v4275_v29, %v4274_v51  ;;  %v4248_v24 = vmul.f32 %v5192_v2, %v4196_v36  ;;  %v3990_v22 = vadd.f32 %v3974_v27, %v3942_v63  ;;  %v3912_v43 = vsub.f32 %v5120_v21, %v7686_v57  ;;  %v3808_v28 = vpop.f32.mrb[71].mxu1  ;;  %v7694_v36 = vld [vmem:[#allocation31_spill] sm:$0xff]  ;;  %v7695_v51 = vld [vmem:[#allocation56_spill] sm:$0xff]  ;;  %v5206_v35 = vpop.eup %5205 }
 0x304   : > { %v4246_v25 = vmul.f32 %v5194_v1, %v4195_v9  ;;  %v3989_v3 = vadd.f32 %v3973_v34, %v3941_v40  ;;  %v3911_v19 = vsub.f32 %v3808_v28, %v7687_v48  ;;  %5213 = vrcp.f32 %v4237_v18  ;;  %v7696_v1 = vld [vmem:[#allocation58_spill] sm:$0xff]  ;;  %v7698_v48 = vld [vmem:[#allocation39_spill] sm:$0xff] }
 0x305   : > { %v4198_v17 = vmul.f32 %v3990_v22, %v3990_v22  ;;  %v3944_v61 = vsub.f32 %v3912_v43, %v7688_v41  ;;  %v4279_v42 = vsel %vm1164_vm0, %v4248_v24, 0.0  ;;  %v4239_v24 = vadd.f32 1e-05, %v7383_v5  ;;  %v7697_v43 = vld [vmem:[#allocation37_spill] sm:$0xff] }
 0x306   : > { %v4277_v27 = vsel %vm1164_vm0, %v4246_v25, 0.0  ;;  %v4197_v44 = vmul.f32 %v3989_v3, %v3989_v3  ;;  %v3943_v33 = vsub.f32 %v3911_v19, %v7690_v46  ;;  %v5208_v25 = vpop.eup %5207  ;;  %5215 = vrcp.f32 %v4240_v47  ;;  %v7700_v46 = vld [vmem:[#allocation62_spill] sm:$0xff] }
 0x307   : > { %v4278_v34 = vadd.f32 %v4277_v27, %v4276_v53  ;;  %v4252_v32 = vmul.f32 %v5196_v55, %v4198_v17  ;;  %v3992_v54 = vadd.f32 %v7402_v4, %v3944_v61  ;;  %v5123_v62 = vpop.f32.mrb[72].mxu1  ;;  %v7699_v61 = vld [vmem:[#allocation60_spill] sm:$0xff]  ;;  %5217 = vrcp.f32 %v4239_v24 }
 0x308   : > { %v4250_v56 = vmul.f32 %v5198_v30, %v4197_v44  ;;  %v3991_v12 = vadd.f32 %v7405_v11, %v3943_v33  ;;  %v3914_v15 = vsub.f32 %v5123_v62, %v7691_v45  ;;  %v3818_v49 = vpop.f32.mrb[73].mxu1  ;;  %v5210_v30 = vpop.eup %5209 }
 0x309   : > { %v4280_v7 = vadd.f32 %v4279_v42, %v4278_v34  ;;  %v4200_v26 = vmul.f32 %v3992_v54, %v3992_v54  ;;  %v3913_v16 = vsub.f32 %v3818_v49, %v7692_v23  ;;  %v4283_v37 = vsel %vm1164_vm0, %v4252_v32, 0.0  ;;  %v7701_v34 = vld [vmem:[#allocation45_spill] sm:$0xff]  ;;  %v5212_v49 = vpop.eup %5211 }
 0x30a   : > { %v4281_v4 = vsel %vm1164_vm0, %v4250_v56, 0.0  ;;  %v4199_v58 = vmul.f32 %v3991_v12, %v3991_v12  ;;  %v3946_v50 = vsub.f32 %v3914_v15, %v7693_v6  ;;  %v7702_v54 = vld [vmem:[#allocation61_spill] sm:$0xff]  ;;  %v7703_v56 = vld [vmem:[#allocation47_spill] sm:$0xff]  ;;  %v7706_v6 = vld [vmem:[#allocation66_spill] sm:$0xff] }
 0x30b   : > { %v4282_v29 = vadd.f32 %v4281_v4, %v4280_v7  ;;  %v4256_v11 = vmul.f32 %v5200_v14, %v4200_v26  ;;  %v3945_v60 = vsub.f32 %v3913_v16, %v7694_v36  ;;  %v5126_v63 = vpop.f32.mrb[74].mxu1  ;;  %v3982_v62 = vmul.f32 729.0, %v7702_v54  ;;  %v7704_v12 = vld [vmem:[#allocation63_spill] sm:$0xff]  ;;  %v7705_v26 = vld [vmem:[#allocation64_spill] sm:$0xff] }
 0x30c   : > { %v4254_v2 = vmul.f32 %v5202_v31, %v4199_v58  ;;  %v3994_v39 = vadd.f32 %v7409_v38, %v3946_v50  ;;  %v3916_v9 = vsub.f32 %v5126_v63, %v7695_v51  ;;  %v3828_v20 = vpop.f32.mrb[75].mxu1  ;;  %v3981_v45 = vmul.f32 729.0, %v7704_v12  ;;  %v7709_v51 = vld [vmem:[#allocation55_spill] sm:$0xff]  ;;  %v4349_v12 = vld [vmem:[%s5403_s16] sm:$0x1] }
 0x30d   : > { %v4284_v40 = vadd.f32 %v4283_v37, %v4282_v29  ;;  %v3993_v21 = vadd.f32 %v7415_v10, %v3945_v60  ;;  %v3915_v53 = vsub.f32 %v3828_v20, %v7696_v1  ;;  %v4287_v17 = vsel %vm1164_vm0, %v4256_v11, 0.0  ;;  %v7707_v11 = vld [vmem:[#allocation53_spill] sm:$0xff]  ;;  %v7710_v20 = vld [vmem:[#allocation67_spill] sm:$0xff] }
 0x30e   : > { %v4285_v22 = vsel %vm1164_vm0, %v4254_v2, 0.0  ;;  %v4202_v57 = vmul.f32 %v3994_v39, %v3994_v39  ;;  %v3948_v28 = vsub.f32 %v3916_v9, %v7697_v43  ;;  %v7708_v60 = vld [vmem:[#allocation65_spill] sm:$0xff]  ;;  %v5214_v37 = vpop.eup %5213 }
 0x30f   : > { %v4286_v38 = vadd.f32 %v4285_v22, %v4284_v40  ;;  %v4201_v3 = vmul.f32 %v3993_v21, %v3993_v21  ;;  %v3947_v19 = vsub.f32 %v3915_v53, %v7698_v48  ;;  %v5129_v55 = vpop.f32.mrb[76].mxu1  ;;  %v3984_v63 = vmul.f32 729.0, %v7708_v60 }
 0x310   : > { %v4260_v10 = vmul.f32 %v5204_v52, %v4202_v57  ;;  %v3996_v41 = vadd.f32 %v7419_v0, %v3948_v28  ;;  %v3918_v59 = vsub.f32 %v5129_v55, %v7699_v61  ;;  %v3838_v5 = vpop.f32.mrb[77].mxu1  ;;  %v3983_v40 = vmul.f32 729.0, %v7710_v20 }
 0x311   : > { %v4258_v13 = vmul.f32 %v5206_v35, %v4201_v3  ;;  %v4288_v27 = vadd.f32 %v4287_v17, %v4286_v38  ;;  %v3995_v44 = vadd.f32 %v3979_v8, %v3947_v19  ;;  %v3917_v33 = vsub.f32 %v3838_v5, %v7700_v46  ;;  %v5216_v35 = vpop.eup %5215 }
 0x312   : > { %v4204_v14 = vmul.f32 %v3996_v41, %v3996_v41  ;;  %v3950_v32 = vsub.f32 %v3918_v59, %v7701_v34  ;;  %v4291_v52 = vsel %vm1164_vm0, %v4260_v10, 0.0  ;;  %v5218_v3 = vpop.eup %5217 }
 0x313   : > { %v4289_v31 = vsel %vm1164_vm0, %v4258_v13, 0.0  ;;  %v4203_v42 = vmul.f32 %v3995_v44, %v3995_v44  ;;  %v3949_v0 = vsub.f32 %v3917_v33, %v7703_v56  ;;  %v5132_v15 = vpop.f32.mrb[78].mxu1 }
 0x314   : > { %v4290_v18 = vadd.f32 %v4289_v31, %v4288_v27  ;;  %v4264_v7 = vmul.f32 %v5208_v25, %v4204_v14  ;;  %v3998_v8 = vadd.f32 %v3982_v62, %v3950_v32  ;;  %v3920_v23 = vsub.f32 %v5132_v15, %v7705_v26  ;;  %v3848_v16 = vpop.f32.mrb[79].mxu1 }
 0x315   : > { %v4262_v4 = vmul.f32 %v5210_v30, %v4203_v42  ;;  %v3997_v58 = vadd.f32 %v3981_v45, %v3949_v0  ;;  %v3919_v50 = vsub.f32 %v3848_v16, %v7706_v6  ;;  %v4273_v0 = vld [vmem:[%s5398_s12] sm:$0x1] }
 0x316   : > { %v4292_v47 = vadd.f32 %v4291_v52, %v4290_v18  ;;  %v4206_v29 = vmul.f32 %v3998_v8, %v3998_v8  ;;  %v3952_v36 = vsub.f32 %v3920_v23, %v7707_v11  ;;  %v4295_v24 = vsel %vm1164_vm0, %v4264_v7, 0.0 }
 0x317   : > { %v4293_v2 = vsel %vm1164_vm0, %v4262_v4, 0.0  ;;  %v4205_v39 = vmul.f32 %v3997_v58, %v3997_v58  ;;  %v3951_v9 = vsub.f32 %v3919_v50, %v7709_v51 }
 0x318   : > { %v4294_v21 = vadd.f32 %v4293_v2, %v4292_v47  ;;  %v4268_v1 = vmul.f32 %v5212_v49, %v4206_v29  ;;  %v4000_v53 = vadd.f32 %v3984_v63, %v3952_v36 }
 0x319   : > { %v4266_v22 = vmul.f32 %v5214_v37, %v4205_v39  ;;  %v3999_v57 = vadd.f32 %v3983_v40, %v3951_v9 }
 0x31a   : > { %v4208_v43 = vmul.f32 %v4000_v53, %v4000_v53  ;;  %v4296_v28 = vadd.f32 %v4295_v24, %v4294_v21  ;;  %v4299_v17 = vsel %vm1164_vm0, %v4268_v1, 0.0 }
 0x31b   : > { %v4207_v25 = vmul.f32 %v3999_v57, %v3999_v57  ;;  %v4297_v38 = vsel %vm1164_vm0, %v4266_v22, 0.0 }
 0x31c   : > { %v4272_v48 = vmul.f32 %v5216_v35, %v4208_v43  ;;  %v4298_v19 = vadd.f32 %v4297_v38, %v4296_v28 }
 0x31d   : > { %v4270_v55 = vmul.f32 %v5218_v3, %v4207_v25 }
 0x31e   : > { %v4300_v10 = vadd.f32 %v4299_v17, %v4298_v19  ;;  %v4303_v59 = vsel %vm1164_vm0, %v4272_v48, 0.0 }
 0x31f   : > { %v4301_v41 = vsel %vm1164_vm0, %v4270_v55, 0.0 }
 0x320   : > { %v4302_v61 = vadd.f32 %v4301_v41, %v4300_v10 }
 0x322   : > { %v4304_v5 = vadd.f32 %v4303_v59, %v4302_v61 }
 0x324   : > { %4305 = vadd.xlane.f32.xlu0 %v4304_v5 }
 0x35a   : > { %v4398_v30 = vpop.xlane.xlu1 %4397 }
 0x35b   : > { %v4399_v13 = vrot.slane %v4398_v30, 4 }
 0x35d   : > { %v4400_v27 = vadd.f32 %v4399_v13, %v4398_v30 }
 0x35f   : > { %v4401_v44 = vrot.slane %v4400_v27, 2 }
 0x361   : > { %v4402_v34 = vadd.f32 %v4401_v44, %v4400_v27 }
 0x363   : > { %v4403_v62 = vrot.slane %v4402_v34, 1 }
 0x365   : > { %v4404_v56 = vadd.f32 %v4403_v62, %v4402_v34 }
 0x3b1   : > { %v4306_v46 = vpop.xlane.xlu0 %4305 }
 0x3b2   : > { %v4307_v33 = vrot.slane %v4306_v46, 4 }
 0x3b4   : > { %v4308_v14 = vadd.f32 %v4307_v33, %v4306_v46 }
 0x3b6   : > { %v4309_v32 = vrot.slane %v4308_v14, 2 }
 0x3b8   : > { %v4310_v54 = vadd.f32 %v4309_v32, %v4308_v14 }
 0x3ba   : > { %v4311_v31 = vrot.slane %v4310_v54, 1 }
 0x3bc   : > { %v4312_v42 = vadd.f32 %v4311_v31, %v4310_v54 }
 0x3be   : > { %5141 = vpush %v4312_v42 }
 0x3bf   : > { %5143 = vpush %v4404_v56 }
 0x3ef   : > { %s5142_s18 = spop %5141 }
 0x3f0   : > { %v4314_v45 = vstv %s5142_s18  ;;  %s5144_s19 = spop %5143 }
 0x3f1   : > { %v4315_v15 = vadd.f32 %v4314_v45, %v4273_v0  ;;  %v4406_v49 = vstv %s5144_s19 }
 0x3f2   : > { %v4407_v18 = vadd.f32 %v4406_v49, %v4349_v12 }
 0x3f3   : > { %4316 = vst [vmem:[%s5398_s12] sm:$0x1] %v4315_v15 }
 0x3f4   : > { %4408 = vst [vmem:[%s5403_s16] sm:$0x1] %v4407_v18 }
 0x3f5 PF: > { %s17_s25 = sadd.s32 1, %s5322_s25   ;;  %s7711_s21 = smov %s5314_s23 }
 0x3f6   : > { %p14_p9 = scmp.ge.s32.totalorder %s17_s25, 6   ;;  %s7712_s22 = smov %s5318_s24 }
 0x3f7   : > { %s7713_s23 = smov %s7716_s26  ;;  %s7714_s24 = smov %s7720_s27 }
 0x3f8   :  { %16 = sbr.rel (!%p14_p9) target bundleno = 3 (0x3), region = 92 }

</bundles_post_ra>
